<compile_context>
chip_gen: v7x
topology: tpu7x:2x2x1
jax: 0.10.0
libtpu: 0.0.40
codegen_flags: <defaults>
</compile_context>

<pallas_src>
import functools

import jax
import jax.numpy as jnp
from jax import lax
from jax.experimental import pallas as pl
from jax.experimental.pallas import tpu as pltpu


_LANE = 128                        # final logits padded to a full lane width (unmasked stores)
_VMEM_LIMIT = 48 * 1024 * 1024     # above default scoped limit on v5e/v6e/v7x, below v7x physical


def _vmem_specs(k):
    return [pl.BlockSpec(memory_space=pltpu.MemorySpace.VMEM) for _ in range(k)]


# --------------------- softmax-factor helper (shared by both factor kernels) ---------------------
# a = exp(q + c - rowmax(q + c)),  b = exp(-q - rowmax(-q))   (exact factorization, both <= 1)
# z[j, h*Cout+k] = b[j,h] * y[j, h*Cout+k]  -> aggregation becomes one [tm,N] @ [N,H*Cout] matmul.
def _write_softmax_factors(q, c_row, y, e, a_ref, b_ref, z_ref):
    qc = q + c_row
    a = jnp.exp(qc - jnp.max(qc, axis=1, keepdims=True))
    nq = -q
    b = jnp.exp(nq - jnp.max(nq, axis=1, keepdims=True))
    a_ref[...] = a.astype(jnp.bfloat16)
    b_ref[...] = b.astype(jnp.bfloat16)
    z_ref[...] = (jnp.dot(b.astype(jnp.bfloat16), e,
                          preferred_element_type=jnp.float32) * y).astype(jnp.bfloat16)


# --------------- kernel 1: input encoder + conv1 source-side factors (ungridded) -----------------
def _enc_factors_kernel(x_ref, we_ref, be_ref, u_ref, w_ref, c_ref, e_ref,
                        a_ref, b_ref, z_ref):
    h = jnp.dot(x_ref[...], we_ref[...], preferred_element_type=jnp.float32) + be_ref[...]
    hb = h.astype(jnp.bfloat16)
    q = jnp.dot(hb, u_ref[...], preferred_element_type=jnp.float32)     # [N, H]
    y = jnp.dot(hb, w_ref[...], preferred_element_type=jnp.float32)     # [N, H*C1]
    _write_softmax_factors(q, c_ref[...], y, e_ref[...], a_ref, b_ref, z_ref)


# -------- kernel 3: ReLU'd conv1 output -> BatchNorm1d + conv2 source-side factors ---------------
# TODO(synk): for N where [N, H*Cout] no longer fits VMEM, row-tile these factor kernels
# (two-pass batch statistics for the BatchNorm).
def _bn_factors_kernel(h_ref, g_ref, beta_ref, u_ref, w_ref, c_ref, e_ref,
                       a_ref, b_ref, z_ref):
    h = h_ref[...]                                                      # [N, C1], already ReLU'd
    mean = jnp.mean(h, axis=0, keepdims=True)
    var = jnp.mean(jnp.square(h - mean), axis=0, keepdims=True)         # training-mode, biased var
    hn = (h - mean) * lax.rsqrt(var + 1e-5) * g_ref[...] + beta_ref[...]
    hb = hn.astype(jnp.bfloat16)
    q = jnp.dot(hb, u_ref[...], preferred_element_type=jnp.float32)
    y = jnp.dot(hb, w_ref[...], preferred_element_type=jnp.float32)
    _write_softmax_factors(q, c_ref[...], y, e_ref[...], a_ref, b_ref, z_ref)


# -------------- kernels 2 & 4: row-tiled FeaStConv aggregation (the O(N^2) work) -----------------
#   out[i] = inv_deg[i] * sum_j adj[i,j]/(a_i.b_j) * sum_h a[i,h] b[j,h] y[j,h,:]  (+ epilogue)
# conv1 epilogue: *inv_deg + bias, ReLU.   conv2 epilogue: *inv_deg + (b2@P + pb), with R2@P folded
# into r_ref so the final Linear is fused away; output is a 128-lane padded logits slab.
def _feast_agg_kernel(apply_relu,
                      a_ref, adj_ref, invdeg_ref,              # row tiles: [tm,H], [tm,N], [tm,1]
                      b_ref, z_ref, e_ref, r_ref, bias_ref,    # resident:  [N,H], [N,H*C], [H,H*C], [H*C,W], [1,W]
                      o_ref):                                  # [tm, W]
    a_t = a_ref[...]                                                     # bf16
    denom = lax.dot_general(a_t, b_ref[...], (((1,), (1,)), ((), ())),
                            preferred_element_type=jnp.float32)          # [tm, N]
    m = adj_ref[...] * pl.reciprocal(denom, approx=True).astype(jnp.bfloat16)  # bf16; no 1/deg here
    s = jnp.dot(m, z_ref[...], preferred_element_type=jnp.float32)       # [tm, H*C]
    s2 = (jnp.dot(a_t, e_ref[...], preferred_element_type=jnp.float32) * s).astype(jnp.bfloat16)
    out = jnp.dot(s2, r_ref[...], preferred_element_type=jnp.float32)    # [tm, W] head recombination
    out = out * invdeg_ref[...] + bias_ref[...]
    if apply_relu:
        out = jnp.maximum(out, 0.0)
    o_ref[...] = out


def _feast_agg_call(apply_relu, a, adj, inv_deg, b, z, e, r, bias, out_w, tm):
    n, num_heads = a.shape
    hc = z.shape[1]
    kernel = functools.partial(_feast_agg_kernel, apply_relu)
    return pl.pallas_call(
        kernel,
        grid=(n // tm,),
        out_shape=jax.ShapeDtypeStruct((n, out_w), jnp.float32),
        in_specs=[
            pl.BlockSpec((tm, num_heads), lambda t: (t, 0)),   # a (target rows)
            pl.BlockSpec((tm, n), lambda t: (t, 0)),           # adj rows, bf16, streamed (dbl-buffered)
            pl.BlockSpec((tm, 1), lambda t: (t, 0)),           # 1/deg
            pl.BlockSpec((n, num_heads), lambda t: (0, 0)),    # b (resident, fetched once)
            pl.BlockSpec((n, hc), lambda t: (0, 0)),           # z (resident, fetched once)
            pl.BlockSpec((num_heads, hc), lambda t: (0, 0)),   # head expander E
            pl.BlockSpec((hc, out_w), lambda t: (0, 0)),       # head-sum R (conv2: R @ proj_W, padded)
            pl.BlockSpec((1, out_w), lambda t: (0, 0)),        # bias
        ],
        out_specs=pl.BlockSpec((tm, out_w), lambda t: (t, 0)),
        compiler_params=pltpu.CompilerParams(
            dimension_semantics=("parallel",),                 # v7x: row tiles across both TCs
            vmem_limit_bytes=_VMEM_LIMIT),
    )(a, adj, inv_deg, b, z, e, r, bias)


# --------------------------------------- forward wrapper -----------------------------------------
def mesh_seg_forward(params, x, adj_bf16, inv_deg, num_heads, row_tile=None):
    n = x.shape[0]
    h_heads = num_heads
    c1 = params["b1"].shape[1]
    c2 = params["b2"].shape[1]
    ncls = params["proj_b"].shape[1]
    cp = _LANE

    if row_tile is None:
        row_tile = min(n, 512)
    assert n % row_tile == 0 and row_tile % 8 == 0

    bf, f32 = jnp.bfloat16, jnp.float32

    # Host-side constant folding (tiny, done once under jit).
    e1 = jnp.repeat(jnp.eye(h_heads, dtype=f32), c1, axis=1).astype(bf)     # [H, H*C1]
    e2 = jnp.repeat(jnp.eye(h_heads, dtype=f32), c2, axis=1).astype(bf)     # [H, H*C2]
    r1 = jnp.tile(jnp.eye(c1, dtype=f32), (h_heads, 1)).astype(bf)          # [H*C1, C1]
    r2 = jnp.tile(jnp.eye(c2, dtype=f32), (h_heads, 1))                     # [H*C2, C2]
    rp = r2 @ params["proj_w_t"]                                            # fold final Linear
    rp_pad = jnp.zeros((h_heads * c2, cp), f32).at[:, :ncls].set(rp).astype(bf)
    bias2 = params["b2"] @ params["proj_w_t"] + params["proj_b"]
    bias2_pad = jnp.zeros((1, cp), f32).at[:, :ncls].set(bias2)

    # 1) input encoder + conv1 source-side softmax factors (lightweight, ungridded).
    a1, b1, z1 = pl.pallas_call(
        _enc_factors_kernel,
        out_shape=(jax.ShapeDtypeStruct((n, h_heads), bf),
                   jax.ShapeDtypeStruct((n, h_heads), bf),
                   jax.ShapeDtypeStruct((n, h_heads * c1), bf)),
        in_specs=_vmem_specs(7),
        out_specs=tuple(_vmem_specs(3)),
        compiler_params=pltpu.CompilerParams(vmem_limit_bytes=_VMEM_LIMIT),
    )(x.astype(bf), params["enc_w_t"].astype(bf), params["enc_b"],
      params["u1_t"].astype(bf), params["w1_t"].astype(bf), params["c1"], e1)

    # 2) conv1 aggregation, row-tiled over targets, adj streamed; epilogue: +bias, ReLU.
    h1 = _feast_agg_call(True, a1, adj_bf16, inv_deg, b1, z1, e1, r1,
                         params["b1"], c1, row_tile)

    # 3) BatchNorm1d (training-mode batch stats) + conv2 source-side factors.
    # TODO(synk): eval-mode running statistics are not modeled (matches nn.BatchNorm1d.train()).
    a2, b2, z2 = pl.pallas_call(
        _bn_factors_kernel,
        out_shape=(jax.ShapeDtypeStruct((n, h_heads), bf),
                   jax.ShapeDtypeStruct((n, h_heads), bf),
                   jax.ShapeDtypeStruct((n, h_heads * c2), bf)),
        in_specs=_vmem_specs(7),
        out_specs=tuple(_vmem_specs(3)),
        compiler_params=pltpu.CompilerParams(vmem_limit_bytes=_VMEM_LIMIT),
    )(h1, params["bn1_gamma"], params["bn1_beta"],
      params["u2_t"].astype(bf), params["w2_t"].astype(bf), params["c2"], e2)

    # 4) conv2 aggregation with the final Linear folded in; lane-dense padded logits.
    logits_pad = _feast_agg_call(False, a2, adj_bf16, inv_deg, b2, z2, e2, rp_pad,
                                 bias2_pad, cp, row_tile)
    return logits_pad[:, :ncls]


# --------------------------------- pure-JAX reference model --------------------------------------
def _feast_conv_ref(x, adj, u_t, w_t, c_row, b_row, num_heads, out_channels):
    n = x.shape[0]
    q = x @ u_t
    y = (x @ w_t).reshape(n, num_heads, out_channels)
    logits = q[:, None, :] - q[None, :, :] + c_row.reshape(1, 1, num_heads)
    att = jax.nn.softmax(logits, axis=-1)
    deg = adj.sum(axis=1)
    p = adj[:, :, None] * att / deg[:, None, None]
    return jnp.einsum("ijh,jhc->ic", p, y) + b_row


def mesh_seg_ref(params, x, adj, num_heads):
    h = x @ params["enc_w_t"] + params["enc_b"]
    h = _feast_conv_ref(h, adj, params["u1_t"], params["w1_t"], params["c1"],
                        params["b1"], num_heads, params["b1"].shape[1])
    h = jnp.maximum(h, 0.0)
    mean = h.mean(axis=0, keepdims=True)
    var = ((h - mean) ** 2).mean(axis=0, keepdims=True)
    h = (h - mean) / jnp.sqrt(var + 1e-5) * params["bn1_gamma"] + params["bn1_beta"]
    h = _feast_conv_ref(h, adj, params["u2_t"], params["w2_t"], params["c2"],
                        params["b2"], num_heads, params["b2"].shape[1])
    return h @ params["proj_w_t"] + params["proj_b"]


# ------------------------------------------- main ------------------------------------------------
if __name__ == "__main__":
    N = 512                      # mesh vertices; small but enough to exercise the row-tiled grid
    in_features = 8
    encoder_features = 16
    conv_channels = [32, 32]     # MeshSeg expects exactly two conv channels
    num_heads = 4
    num_classes = 6
    row_tile = 128               # -> grid (4,) per aggregation pass

    key = jax.random.PRNGKey(0)
    ks = list(jax.random.split(key, 16))

    def rnd(k, shape, scale=0.2):
        return scale * jax.random.normal(k, shape, dtype=jnp.float32)

    ch1, ch2 = conv_channels
    params = {
        "enc_w_t": rnd(ks[0], (in_features, encoder_features)),
        "enc_b": rnd(ks[1], (1, encoder_features)),
        "u1_t": rnd(ks[2], (encoder_features, num_heads)),
        "w1_t": rnd(ks[3], (encoder_features, num_heads * ch1)),
        "c1": rnd(ks[4], (1, num_heads)),
        "b1": rnd(ks[5], (1, ch1)),
        "bn1_gamma": 1.0 + rnd(ks[6], (1, ch1), 0.05),
        "bn1_beta": rnd(ks[7], (1, ch1), 0.05),
        "u2_t": rnd(ks[8], (ch1, num_heads)),
        "w2_t": rnd(ks[9], (ch1, num_heads * ch2)),
        "c2": rnd(ks[10], (1, num_heads)),
        "b2": rnd(ks[11], (1, ch2)),
        "proj_w_t": rnd(ks[12], (ch2, num_classes)),
        "proj_b": rnd(ks[13], (1, num_classes)),
    }

    # data.x and data.edge_index: ring graph + chords, undirected, no self loops.
    x = jax.random.normal(ks[14], (N, in_features), dtype=jnp.float32)
    idx = jnp.arange(N)
    src = jnp.concatenate([idx, (idx + 1) % N, idx, (idx + 7) % N])
    dst = jnp.concatenate([(idx + 1) % N, idx, (idx + 7) % N, idx])
    edge_index = jnp.stack([src, dst])

    # Dense adjacency glue: adj[target, source] = 1, plus self loops (add_self_loops).
    adj = jnp.zeros((N, N), jnp.float32).at[edge_index[1], edge_index[0]].set(1.0)
    adj = jnp.maximum(adj, jnp.eye(N, dtype=jnp.float32))

    # Host-side per perf guidance: ship adj as bf16 (0/1) and precompute 1/deg.
    adj_bf16 = adj.astype(jnp.bfloat16)
    inv_deg = (1.0 / adj.sum(axis=1, keepdims=True)).astype(jnp.float32)

    fwd = jax.jit(functools.partial(mesh_seg_forward, num_heads=num_heads, row_tile=row_tile))
    out = fwd(params, x, adj_bf16, inv_deg)
    out = jax.block_until_ready(out)

    ref = mesh_seg_ref(params, x, adj, num_heads)
    assert out.shape == (N, num_classes)
    assert jnp.all(jnp.isfinite(out))
    # Tolerance covers bf16 MXU operands (adj, factors, weights) and approx reciprocals.
    assert jnp.allclose(out, ref, atol=5e-2, rtol=5e-2)

    print("KERNEL_OK")
</pallas_src>

<mosaic_0001>
module attributes {stable_mosaic.version = 11 : i64} {
  func.func @_enc_factors_kernel(%arg0: memref<512x8xbf16, #tpu.memory_space<vmem>>, %arg1: memref<8x16xbf16, #tpu.memory_space<vmem>>, %arg2: memref<1x16xf32, #tpu.memory_space<vmem>>, %arg3: memref<16x4xbf16, #tpu.memory_space<vmem>>, %arg4: memref<16x128xbf16, #tpu.memory_space<vmem>>, %arg5: memref<1x4xf32, #tpu.memory_space<vmem>>, %arg6: memref<4x128xbf16, #tpu.memory_space<vmem>>, %arg7: memref<512x4xbf16, #tpu.memory_space<vmem>>, %arg8: memref<512x4xbf16, #tpu.memory_space<vmem>>, %arg9: memref<512x128xbf16, #tpu.memory_space<vmem>>) attributes {dimension_semantics = [], scalar_prefetch = 0 : i64, scratch_operands = 0 : i64, tpu.core_type = #tpu.core_type<tc>} {
    %c0 = arith.constant 0 : index
    %c0_0 = arith.constant 0 : index
    %0 = vector.load %arg0[%c0, %c0_0] : memref<512x8xbf16, #tpu.memory_space<vmem>>, vector<512x8xbf16>
    %c0_1 = arith.constant 0 : index
    %c0_2 = arith.constant 0 : index
    %1 = vector.load %arg1[%c0_1, %c0_2] : memref<8x16xbf16, #tpu.memory_space<vmem>>, vector<8x16xbf16>
    %cst = arith.constant dense<0.000000e+00> : vector<512x16xf32>
    %2 = tpu.matmul %0, %1, %cst {dimension_numbers = #tpu.dot_dimension_numbers<[1], [0], [0], [1], [0, 0, 1, 1], [], []>} : vector<512x8xbf16>, vector<8x16xbf16>, vector<512x16xf32> -> vector<512x16xf32>
    %c0_3 = arith.constant 0 : index
    %c0_4 = arith.constant 0 : index
    %3 = vector.load %arg2[%c0_3, %c0_4] : memref<1x16xf32, #tpu.memory_space<vmem>>, vector<1x16xf32>
    %4 = vector.broadcast %3 : vector<1x16xf32> to vector<512x16xf32>
    %5 = arith.addf %2, %4 : vector<512x16xf32>
    %6 = arith.truncf %5 : vector<512x16xf32> to vector<512x16xbf16>
    %c0_5 = arith.constant 0 : index
    %c0_6 = arith.constant 0 : index
    %7 = vector.load %arg3[%c0_5, %c0_6] : memref<16x4xbf16, #tpu.memory_space<vmem>>, vector<16x4xbf16>
    %cst_7 = arith.constant dense<0.000000e+00> : vector<512x4xf32>
    %8 = tpu.matmul %6, %7, %cst_7 {dimension_numbers = #tpu.dot_dimension_numbers<[1], [0], [0], [1], [0, 0, 1, 1], [], []>} : vector<512x16xbf16>, vector<16x4xbf16>, vector<512x4xf32> -> vector<512x4xf32>
    %c0_8 = arith.constant 0 : index
    %c0_9 = arith.constant 0 : index
    %9 = vector.load %arg4[%c0_8, %c0_9] : memref<16x128xbf16, #tpu.memory_space<vmem>>, vector<16x128xbf16>
    %cst_10 = arith.constant dense<0.000000e+00> : vector<512x128xf32>
    %10 = tpu.matmul %6, %9, %cst_10 {dimension_numbers = #tpu.dot_dimension_numbers<[1], [0], [0], [1], [0, 0, 1, 1], [], []>} : vector<512x16xbf16>, vector<16x128xbf16>, vector<512x128xf32> -> vector<512x128xf32>
    %c0_11 = arith.constant 0 : index
    %c0_12 = arith.constant 0 : index
    %11 = vector.load %arg5[%c0_11, %c0_12] : memref<1x4xf32, #tpu.memory_space<vmem>>, vector<1x4xf32>
    %c0_13 = arith.constant 0 : index
    %c0_14 = arith.constant 0 : index
    %12 = vector.load %arg6[%c0_13, %c0_14] : memref<4x128xbf16, #tpu.memory_space<vmem>>, vector<4x128xbf16>
    %13 = vector.broadcast %11 : vector<1x4xf32> to vector<512x4xf32>
    %14 = arith.addf %8, %13 : vector<512x4xf32>
    %cst_15 = arith.constant dense<0xFF800000> : vector<512xf32>
    %15 = vector.multi_reduction <maximumf>, %14, %cst_15 [1] : vector<512x4xf32> to vector<512xf32>
    %16 = vector.shape_cast %15 : vector<512xf32> to vector<512x1xf32>
    %17 = vector.broadcast %16 : vector<512x1xf32> to vector<512x4xf32>
    %18 = arith.subf %14, %17 : vector<512x4xf32>
    %19 = math.exp %18 : vector<512x4xf32>
    %cst_16 = arith.constant 0.000000e+00 : f32
    %20 = vector.broadcast %cst_16 : f32 to vector<512x4xf32>
    %21 = arith.subf %20, %8 : vector<512x4xf32>
    %cst_17 = arith.constant dense<0xFF800000> : vector<512xf32>
    %22 = vector.multi_reduction <maximumf>, %21, %cst_17 [1] : vector<512x4xf32> to vector<512xf32>
    %23 = vector.shape_cast %22 : vector<512xf32> to vector<512x1xf32>
    %24 = vector.broadcast %23 : vector<512x1xf32> to vector<512x4xf32>
    %25 = arith.subf %21, %24 : vector<512x4xf32>
    %26 = math.exp %25 : vector<512x4xf32>
    %27 = arith.truncf %19 : vector<512x4xf32> to vector<512x4xbf16>
    %c0_18 = arith.constant 0 : index
    %c0_19 = arith.constant 0 : index
    %28 = vector.load %arg7[%c0_18, %c0_19] : memref<512x4xbf16, #tpu.memory_space<vmem>>, vector<512x4xbf16>
    tpu.vector_store %arg7[%c0_18, %c0_19], %27 {strides = array<i32>} : memref<512x4xbf16, #tpu.memory_space<vmem>>, vector<512x4xbf16>,
    %29 = arith.truncf %26 : vector<512x4xf32> to vector<512x4xbf16>
    %c0_20 = arith.constant 0 : index
    %c0_21 = arith.constant 0 : index
    %30 = vector.load %arg8[%c0_20, %c0_21] : memref<512x4xbf16, #tpu.memory_space<vmem>>, vector<512x4xbf16>
    tpu.vector_store %arg8[%c0_20, %c0_21], %29 {strides = array<i32>} : memref<512x4xbf16, #tpu.memory_space<vmem>>, vector<512x4xbf16>,
    %31 = arith.truncf %26 : vector<512x4xf32> to vector<512x4xbf16>
    %cst_22 = arith.constant dense<0.000000e+00> : vector<512x128xf32>
    %32 = tpu.matmul %31, %12, %cst_22 {dimension_numbers = #tpu.dot_dimension_numbers<[1], [0], [0], [1], [0, 0, 1, 1], [], []>} : vector<512x4xbf16>, vector<4x128xbf16>, vector<512x128xf32> -> vector<512x128xf32>
    %33 = arith.mulf %32, %10 : vector<512x128xf32>
    %34 = arith.truncf %33 : vector<512x128xf32> to vector<512x128xbf16>
    %c0_23 = arith.constant 0 : index
    %c0_24 = arith.constant 0 : index
    %35 = vector.load %arg9[%c0_23, %c0_24] : memref<512x128xbf16, #tpu.memory_space<vmem>>, vector<512x128xbf16>
    tpu.vector_store %arg9[%c0_23, %c0_24], %34 {strides = array<i32>} : memref<512x128xbf16, #tpu.memory_space<vmem>>, vector<512x128xbf16>,
    return
  }
}

module attributes {stable_mosaic.version = 11 : i64} {
  func.func @_feast_agg_kernel(%arg0: i32, %arg1: memref<128x4xbf16, #tpu.memory_space<vmem>>, %arg2: memref<128x512xbf16, #tpu.memory_space<vmem>>, %arg3: memref<128x1xf32, #tpu.memory_space<vmem>>, %arg4: memref<512x4xbf16, #tpu.memory_space<vmem>>, %arg5: memref<512x128xbf16, #tpu.memory_space<vmem>>, %arg6: memref<4x128xbf16, #tpu.memory_space<vmem>>, %arg7: memref<128x32xbf16, #tpu.memory_space<vmem>>, %arg8: memref<1x32xf32, #tpu.memory_space<vmem>>, %arg9: memref<128x32xf32, #tpu.memory_space<vmem>>) attributes {dimension_semantics = [#tpu.dimension_semantics<parallel>], iteration_bounds = array<i64: 4>, scalar_prefetch = 0 : i64, scratch_operands = 0 : i64, tpu.core_type = #tpu.core_type<tc>, window_params = [{transform_indices = @transform_0, window_bounds = array<i64: 128, 4>}, {transform_indices = @transform_1, window_bounds = array<i64: 128, 512>}, {transform_indices = @transform_2, window_bounds = array<i64: 128, 1>}, {pipeline_mode = #tpu.pipeline_mode<synchronous>, transform_indices = @transform_3, window_bounds = array<i64: 512, 4>}, {pipeline_mode = #tpu.pipeline_mode<synchronous>, transform_indices = @transform_4, window_bounds = array<i64: 512, 128>}, {pipeline_mode = #tpu.pipeline_mode<synchronous>, transform_indices = @transform_5, window_bounds = array<i64: 4, 128>}, {pipeline_mode = #tpu.pipeline_mode<synchronous>, transform_indices = @transform_6, window_bounds = array<i64: 128, 32>}, {pipeline_mode = #tpu.pipeline_mode<synchronous>, transform_indices = @transform_7, window_bounds = array<i64: 1, 32>}, {transform_indices = @transform_8, window_bounds = array<i64: 128, 32>}]} {
    %c0 = arith.constant 0 : index
    %c0_0 = arith.constant 0 : index
    %0 = vector.load %arg1[%c0, %c0_0] : memref<128x4xbf16, #tpu.memory_space<vmem>>, vector<128x4xbf16>
    %c0_1 = arith.constant 0 : index
    %c0_2 = arith.constant 0 : index
    %1 = vector.load %arg4[%c0_1, %c0_2] : memref<512x4xbf16, #tpu.memory_space<vmem>>, vector<512x4xbf16>
    %cst = arith.constant dense<0.000000e+00> : vector<128x512xf32>
    %2 = tpu.matmul %0, %1, %cst {dimension_numbers = #tpu.dot_dimension_numbers<[1], [1], [0], [0], [0, 0, 1, 0], [], []>} : vector<128x4xbf16>, vector<512x4xbf16>, vector<128x512xf32> -> vector<128x512xf32>
    %c0_3 = arith.constant 0 : index
    %c0_4 = arith.constant 0 : index
    %3 = vector.load %arg2[%c0_3, %c0_4] : memref<128x512xbf16, #tpu.memory_space<vmem>>, vector<128x512xbf16>
    %4 = tpu.reciprocal %2 {approx = true} : vector<128x512xf32> -> vector<128x512xf32>
    %5 = arith.truncf %4 : vector<128x512xf32> to vector<128x512xbf16>
    %6 = arith.mulf %3, %5 : vector<128x512xbf16>
    %c0_5 = arith.constant 0 : index
    %c0_6 = arith.constant 0 : index
    %7 = vector.load %arg5[%c0_5, %c0_6] : memref<512x128xbf16, #tpu.memory_space<vmem>>, vector<512x128xbf16>
    %cst_7 = arith.constant dense<0.000000e+00> : vector<128x128xf32>
    %8 = tpu.matmul %6, %7, %cst_7 {dimension_numbers = #tpu.dot_dimension_numbers<[1], [0], [0], [1], [0, 0, 1, 1], [], []>} : vector<128x512xbf16>, vector<512x128xbf16>, vector<128x128xf32> -> vector<128x128xf32>
    %c0_8 = arith.constant 0 : index
    %c0_9 = arith.constant 0 : index
    %9 = vector.load %arg6[%c0_8, %c0_9] : memref<4x128xbf16, #tpu.memory_space<vmem>>, vector<4x128xbf16>
    %cst_10 = arith.constant dense<0.000000e+00> : vector<128x128xf32>
    %10 = tpu.matmul %0, %9, %cst_10 {dimension_numbers = #tpu.dot_dimension_numbers<[1], [0], [0], [1], [0, 0, 1, 1], [], []>} : vector<128x4xbf16>, vector<4x128xbf16>, vector<128x128xf32> -> vector<128x128xf32>
    %11 = arith.mulf %10, %8 : vector<128x128xf32>
    %12 = arith.truncf %11 : vector<128x128xf32> to vector<128x128xbf16>
    %c0_11 = arith.constant 0 : index
    %c0_12 = arith.constant 0 : index
    %13 = vector.load %arg7[%c0_11, %c0_12] : memref<128x32xbf16, #tpu.memory_space<vmem>>, vector<128x32xbf16>
    %cst_13 = arith.constant dense<0.000000e+00> : vector<128x32xf32>
    %14 = tpu.matmul %12, %13, %cst_13 {dimension_numbers = #tpu.dot_dimension_numbers<[1], [0], [0], [1], [0, 0, 1, 1], [], []>} : vector<128x128xbf16>, vector<128x32xbf16>, vector<128x32xf32> -> vector<128x32xf32>
    %c0_14 = arith.constant 0 : index
    %c0_15 = arith.constant 0 : index
    %15 = vector.load %arg3[%c0_14, %c0_15] : memref<128x1xf32, #tpu.memory_space<vmem>>, vector<128x1xf32>
    %16 = vector.broadcast %15 : vector<128x1xf32> to vector<128x32xf32>
    %17 = arith.mulf %14, %16 : vector<128x32xf32>
    %c0_16 = arith.constant 0 : index
    %c0_17 = arith.constant 0 : index
    %18 = vector.load %arg8[%c0_16, %c0_17] : memref<1x32xf32, #tpu.memory_space<vmem>>, vector<1x32xf32>
    %19 = vector.broadcast %18 : vector<1x32xf32> to vector<128x32xf32>
    %20 = arith.addf %17, %19 : vector<128x32xf32>
    %cst_18 = arith.constant 0.000000e+00 : f32
    %21 = vector.broadcast %cst_18 : f32 to vector<128x32xf32>
    %22 = arith.maximumf %20, %21 : vector<128x32xf32>
    %c0_19 = arith.constant 0 : index
    %c0_20 = arith.constant 0 : index
    %23 = vector.load %arg9[%c0_19, %c0_20] : memref<128x32xf32, #tpu.memory_space<vmem>>, vector<128x32xf32>
    tpu.vector_store %arg9[%c0_19, %c0_20], %22 {strides = array<i32>} : memref<128x32xf32, #tpu.memory_space<vmem>>, vector<128x32xf32>,
    return
  }
  func.func @transform_0(%arg0: i32) -> (i32, i32) {
    %c0_i32 = arith.constant 0 : i32
    %c0_i32_0 = arith.constant 0 : i32
    return %arg0, %c0_i32 : i32, i32
  }
  func.func @transform_1(%arg0: i32) -> (i32, i32) {
    %c0_i32 = arith.constant 0 : i32
    %c0_i32_0 = arith.constant 0 : i32
    return %arg0, %c0_i32 : i32, i32
  }
  func.func @transform_2(%arg0: i32) -> (i32, i32) {
    %c0_i32 = arith.constant 0 : i32
    %c0_i32_0 = arith.constant 0 : i32
    return %arg0, %c0_i32 : i32, i32
  }
  func.func @transform_3(%arg0: i32) -> (i32, i32) {
    %c0_i32 = arith.constant 0 : i32
    %c0_i32_0 = arith.constant 0 : i32
    %c0_i32_1 = arith.constant 0 : i32
    return %c0_i32, %c0_i32_0 : i32, i32
  }
  func.func @transform_4(%arg0: i32) -> (i32, i32) {
    %c0_i32 = arith.constant 0 : i32
    %c0_i32_0 = arith.constant 0 : i32
    %c0_i32_1 = arith.constant 0 : i32
    return %c0_i32, %c0_i32_0 : i32, i32
  }
  func.func @transform_5(%arg0: i32) -> (i32, i32) {
    %c0_i32 = arith.constant 0 : i32
    %c0_i32_0 = arith.constant 0 : i32
    %c0_i32_1 = arith.constant 0 : i32
    return %c0_i32, %c0_i32_0 : i32, i32
  }
  func.func @transform_6(%arg0: i32) -> (i32, i32) {
    %c0_i32 = arith.constant 0 : i32
    %c0_i32_0 = arith.constant 0 : i32
    %c0_i32_1 = arith.constant 0 : i32
    return %c0_i32, %c0_i32_0 : i32, i32
  }
  func.func @transform_7(%arg0: i32) -> (i32, i32) {
    %c0_i32 = arith.constant 0 : i32
    %c0_i32_0 = arith.constant 0 : i32
    %c0_i32_1 = arith.constant 0 : i32
    return %c0_i32, %c0_i32_0 : i32, i32
  }
  func.func @transform_8(%arg0: i32) -> (i32, i32) {
    %c0_i32 = arith.constant 0 : i32
    %c0_i32_0 = arith.constant 0 : i32
    return %arg0, %c0_i32 : i32, i32
  }
}

module attributes {stable_mosaic.version = 11 : i64} {
  func.func @_bn_factors_kernel(%arg0: memref<512x32xf32, #tpu.memory_space<vmem>>, %arg1: memref<1x32xf32, #tpu.memory_space<vmem>>, %arg2: memref<1x32xf32, #tpu.memory_space<vmem>>, %arg3: memref<32x4xbf16, #tpu.memory_space<vmem>>, %arg4: memref<32x128xbf16, #tpu.memory_space<vmem>>, %arg5: memref<1x4xf32, #tpu.memory_space<vmem>>, %arg6: memref<4x128xbf16, #tpu.memory_space<vmem>>, %arg7: memref<512x4xbf16, #tpu.memory_space<vmem>>, %arg8: memref<512x4xbf16, #tpu.memory_space<vmem>>, %arg9: memref<512x128xbf16, #tpu.memory_space<vmem>>) attributes {dimension_semantics = [], scalar_prefetch = 0 : i64, scratch_operands = 0 : i64, tpu.core_type = #tpu.core_type<tc>} {
    %c0 = arith.constant 0 : index
    %c0_0 = arith.constant 0 : index
    %0 = vector.load %arg0[%c0, %c0_0] : memref<512x32xf32, #tpu.memory_space<vmem>>, vector<512x32xf32>
    %cst = arith.constant dense<0.000000e+00> : vector<32xf32>
    %1 = vector.multi_reduction <add>, %0, %cst [0] : vector<512x32xf32> to vector<32xf32>
    %2 = vector.shape_cast %1 : vector<32xf32> to vector<1x32xf32>
    %cst_1 = arith.constant 5.120000e+02 : f32
    %3 = vector.broadcast %cst_1 : f32 to vector<1x32xf32>
    %4 = arith.divf %2, %3 : vector<1x32xf32>
    %5 = vector.broadcast %4 : vector<1x32xf32> to vector<512x32xf32>
    %6 = arith.subf %0, %5 : vector<512x32xf32>
    %7 = arith.mulf %6, %6 : vector<512x32xf32>
    %cst_2 = arith.constant dense<0.000000e+00> : vector<32xf32>
    %8 = vector.multi_reduction <add>, %7, %cst_2 [0] : vector<512x32xf32> to vector<32xf32>
    %9 = vector.shape_cast %8 : vector<32xf32> to vector<1x32xf32>
    %cst_3 = arith.constant 5.120000e+02 : f32
    %10 = vector.broadcast %cst_3 : f32 to vector<1x32xf32>
    %11 = arith.divf %9, %10 : vector<1x32xf32>
    %12 = vector.broadcast %4 : vector<1x32xf32> to vector<512x32xf32>
    %13 = arith.subf %0, %12 : vector<512x32xf32>
    %cst_4 = arith.constant 9.99999974E-6 : f32
    %14 = vector.broadcast %cst_4 : f32 to vector<1x32xf32>
    %15 = arith.addf %11, %14 : vector<1x32xf32>
    %16 = math.rsqrt %15 : vector<1x32xf32>
    %17 = vector.broadcast %16 : vector<1x32xf32> to vector<512x32xf32>
    %18 = arith.mulf %13, %17 : vector<512x32xf32>
    %c0_5 = arith.constant 0 : index
    %c0_6 = arith.constant 0 : index
    %19 = vector.load %arg1[%c0_5, %c0_6] : memref<1x32xf32, #tpu.memory_space<vmem>>, vector<1x32xf32>
    %20 = vector.broadcast %19 : vector<1x32xf32> to vector<512x32xf32>
    %21 = arith.mulf %18, %20 : vector<512x32xf32>
    %c0_7 = arith.constant 0 : index
    %c0_8 = arith.constant 0 : index
    %22 = vector.load %arg2[%c0_7, %c0_8] : memref<1x32xf32, #tpu.memory_space<vmem>>, vector<1x32xf32>
    %23 = vector.broadcast %22 : vector<1x32xf32> to vector<512x32xf32>
    %24 = arith.addf %21, %23 : vector<512x32xf32>
    %25 = arith.truncf %24 : vector<512x32xf32> to vector<512x32xbf16>
    %c0_9 = arith.constant 0 : index
    %c0_10 = arith.constant 0 : index
    %26 = vector.load %arg3[%c0_9, %c0_10] : memref<32x4xbf16, #tpu.memory_space<vmem>>, vector<32x4xbf16>
    %cst_11 = arith.constant dense<0.000000e+00> : vector<512x4xf32>
    %27 = tpu.matmul %25, %26, %cst_11 {dimension_numbers = #tpu.dot_dimension_numbers<[1], [0], [0], [1], [0, 0, 1, 1], [], []>} : vector<512x32xbf16>, vector<32x4xbf16>, vector<512x4xf32> -> vector<512x4xf32>
    %c0_12 = arith.constant 0 : index
    %c0_13 = arith.constant 0 : index
    %28 = vector.load %arg4[%c0_12, %c0_13] : memref<32x128xbf16, #tpu.memory_space<vmem>>, vector<32x128xbf16>
    %cst_14 = arith.constant dense<0.000000e+00> : vector<512x128xf32>
    %29 = tpu.matmul %25, %28, %cst_14 {dimension_numbers = #tpu.dot_dimension_numbers<[1], [0], [0], [1], [0, 0, 1, 1], [], []>} : vector<512x32xbf16>, vector<32x128xbf16>, vector<512x128xf32> -> vector<512x128xf32>
    %c0_15 = arith.constant 0 : index
    %c0_16 = arith.constant 0 : index
    %30 = vector.load %arg5[%c0_15, %c0_16] : memref<1x4xf32, #tpu.memory_space<vmem>>, vector<1x4xf32>
    %c0_17 = arith.constant 0 : index
    %c0_18 = arith.constant 0 : index
    %31 = vector.load %arg6[%c0_17, %c0_18] : memref<4x128xbf16, #tpu.memory_space<vmem>>, vector<4x128xbf16>
    %32 = vector.broadcast %30 : vector<1x4xf32> to vector<512x4xf32>
    %33 = arith.addf %27, %32 : vector<512x4xf32>
    %cst_19 = arith.constant dense<0xFF800000> : vector<512xf32>
    %34 = vector.multi_reduction <maximumf>, %33, %cst_19 [1] : vector<512x4xf32> to vector<512xf32>
    %35 = vector.shape_cast %34 : vector<512xf32> to vector<512x1xf32>
    %36 = vector.broadcast %35 : vector<512x1xf32> to vector<512x4xf32>
    %37 = arith.subf %33, %36 : vector<512x4xf32>
    %38 = math.exp %37 : vector<512x4xf32>
    %cst_20 = arith.constant 0.000000e+00 : f32
    %39 = vector.broadcast %cst_20 : f32 to vector<512x4xf32>
    %40 = arith.subf %39, %27 : vector<512x4xf32>
    %cst_21 = arith.constant dense<0xFF800000> : vector<512xf32>
    %41 = vector.multi_reduction <maximumf>, %40, %cst_21 [1] : vector<512x4xf32> to vector<512xf32>
    %42 = vector.shape_cast %41 : vector<512xf32> to vector<512x1xf32>
    %43 = vector.broadcast %42 : vector<512x1xf32> to vector<512x4xf32>
    %44 = arith.subf %40, %43 : vector<512x4xf32>
    %45 = math.exp %44 : vector<512x4xf32>
    %46 = arith.truncf %38 : vector<512x4xf32> to vector<512x4xbf16>
    %c0_22 = arith.constant 0 : index
    %c0_23 = arith.constant 0 : index
    %47 = vector.load %arg7[%c0_22, %c0_23] : memref<512x4xbf16, #tpu.memory_space<vmem>>, vector<512x4xbf16>
    tpu.vector_store %arg7[%c0_22, %c0_23], %46 {strides = array<i32>} : memref<512x4xbf16, #tpu.memory_space<vmem>>, vector<512x4xbf16>,
    %48 = arith.truncf %45 : vector<512x4xf32> to vector<512x4xbf16>
    %c0_24 = arith.constant 0 : index
    %c0_25 = arith.constant 0 : index
    %49 = vector.load %arg8[%c0_24, %c0_25] : memref<512x4xbf16, #tpu.memory_space<vmem>>, vector<512x4xbf16>
    tpu.vector_store %arg8[%c0_24, %c0_25], %48 {strides = array<i32>} : memref<512x4xbf16, #tpu.memory_space<vmem>>, vector<512x4xbf16>,
    %50 = arith.truncf %45 : vector<512x4xf32> to vector<512x4xbf16>
    %cst_26 = arith.constant dense<0.000000e+00> : vector<512x128xf32>
    %51 = tpu.matmul %50, %31, %cst_26 {dimension_numbers = #tpu.dot_dimension_numbers<[1], [0], [0], [1], [0, 0, 1, 1], [], []>} : vector<512x4xbf16>, vector<4x128xbf16>, vector<512x128xf32> -> vector<512x128xf32>
    %52 = arith.mulf %51, %29 : vector<512x128xf32>
    %53 = arith.truncf %52 : vector<512x128xf32> to vector<512x128xbf16>
    %c0_27 = arith.constant 0 : index
    %c0_28 = arith.constant 0 : index
    %54 = vector.load %arg9[%c0_27, %c0_28] : memref<512x128xbf16, #tpu.memory_space<vmem>>, vector<512x128xbf16>
    tpu.vector_store %arg9[%c0_27, %c0_28], %53 {strides = array<i32>} : memref<512x128xbf16, #tpu.memory_space<vmem>>, vector<512x128xbf16>,
    return
  }
}

module attributes {stable_mosaic.version = 11 : i64} {
  func.func @_feast_agg_kernel(%arg0: i32, %arg1: memref<128x4xbf16, #tpu.memory_space<vmem>>, %arg2: memref<128x512xbf16, #tpu.memory_space<vmem>>, %arg3: memref<128x1xf32, #tpu.memory_space<vmem>>, %arg4: memref<512x4xbf16, #tpu.memory_space<vmem>>, %arg5: memref<512x128xbf16, #tpu.memory_space<vmem>>, %arg6: memref<4x128xbf16, #tpu.memory_space<vmem>>, %arg7: memref<128x128xbf16, #tpu.memory_space<vmem>>, %arg8: memref<1x128xf32, #tpu.memory_space<vmem>>, %arg9: memref<128x128xf32, #tpu.memory_space<vmem>>) attributes {dimension_semantics = [#tpu.dimension_semantics<parallel>], iteration_bounds = array<i64: 4>, scalar_prefetch = 0 : i64, scratch_operands = 0 : i64, tpu.core_type = #tpu.core_type<tc>, window_params = [{transform_indices = @transform_0, window_bounds = array<i64: 128, 4>}, {transform_indices = @transform_1, window_bounds = array<i64: 128, 512>}, {transform_indices = @transform_2, window_bounds = array<i64: 128, 1>}, {pipeline_mode = #tpu.pipeline_mode<synchronous>, transform_indices = @transform_3, window_bounds = array<i64: 512, 4>}, {pipeline_mode = #tpu.pipeline_mode<synchronous>, transform_indices = @transform_4, window_bounds = array<i64: 512, 128>}, {pipeline_mode = #tpu.pipeline_mode<synchronous>, transform_indices = @transform_5, window_bounds = array<i64: 4, 128>}, {pipeline_mode = #tpu.pipeline_mode<synchronous>, transform_indices = @transform_6, window_bounds = array<i64: 128, 128>}, {pipeline_mode = #tpu.pipeline_mode<synchronous>, transform_indices = @transform_7, window_bounds = array<i64: 1, 128>}, {transform_indices = @transform_8, window_bounds = array<i64: 128, 128>}]} {
    %c0 = arith.constant 0 : index
    %c0_0 = arith.constant 0 : index
    %0 = vector.load %arg1[%c0, %c0_0] : memref<128x4xbf16, #tpu.memory_space<vmem>>, vector<128x4xbf16>
    %c0_1 = arith.constant 0 : index
    %c0_2 = arith.constant 0 : index
    %1 = vector.load %arg4[%c0_1, %c0_2] : memref<512x4xbf16, #tpu.memory_space<vmem>>, vector<512x4xbf16>
    %cst = arith.constant dense<0.000000e+00> : vector<128x512xf32>
    %2 = tpu.matmul %0, %1, %cst {dimension_numbers = #tpu.dot_dimension_numbers<[1], [1], [0], [0], [0, 0, 1, 0], [], []>} : vector<128x4xbf16>, vector<512x4xbf16>, vector<128x512xf32> -> vector<128x512xf32>
    %c0_3 = arith.constant 0 : index
    %c0_4 = arith.constant 0 : index
    %3 = vector.load %arg2[%c0_3, %c0_4] : memref<128x512xbf16, #tpu.memory_space<vmem>>, vector<128x512xbf16>
    %4 = tpu.reciprocal %2 {approx = true} : vector<128x512xf32> -> vector<128x512xf32>
    %5 = arith.truncf %4 : vector<128x512xf32> to vector<128x512xbf16>
    %6 = arith.mulf %3, %5 : vector<128x512xbf16>
    %c0_5 = arith.constant 0 : index
    %c0_6 = arith.constant 0 : index
    %7 = vector.load %arg5[%c0_5, %c0_6] : memref<512x128xbf16, #tpu.memory_space<vmem>>, vector<512x128xbf16>
    %cst_7 = arith.constant dense<0.000000e+00> : vector<128x128xf32>
    %8 = tpu.matmul %6, %7, %cst_7 {dimension_numbers = #tpu.dot_dimension_numbers<[1], [0], [0], [1], [0, 0, 1, 1], [], []>} : vector<128x512xbf16>, vector<512x128xbf16>, vector<128x128xf32> -> vector<128x128xf32>
    %c0_8 = arith.constant 0 : index
    %c0_9 = arith.constant 0 : index
    %9 = vector.load %arg6[%c0_8, %c0_9] : memref<4x128xbf16, #tpu.memory_space<vmem>>, vector<4x128xbf16>
    %cst_10 = arith.constant dense<0.000000e+00> : vector<128x128xf32>
    %10 = tpu.matmul %0, %9, %cst_10 {dimension_numbers = #tpu.dot_dimension_numbers<[1], [0], [0], [1], [0, 0, 1, 1], [], []>} : vector<128x4xbf16>, vector<4x128xbf16>, vector<128x128xf32> -> vector<128x128xf32>
    %11 = arith.mulf %10, %8 : vector<128x128xf32>
    %12 = arith.truncf %11 : vector<128x128xf32> to vector<128x128xbf16>
    %c0_11 = arith.constant 0 : index
    %c0_12 = arith.constant 0 : index
    %13 = vector.load %arg7[%c0_11, %c0_12] : memref<128x128xbf16, #tpu.memory_space<vmem>>, vector<128x128xbf16>
    %cst_13 = arith.constant dense<0.000000e+00> : vector<128x128xf32>
    %14 = tpu.matmul %12, %13, %cst_13 {dimension_numbers = #tpu.dot_dimension_numbers<[1], [0], [0], [1], [0, 0, 1, 1], [], []>} : vector<128x128xbf16>, vector<128x128xbf16>, vector<128x128xf32> -> vector<128x128xf32>
    %c0_14 = arith.constant 0 : index
    %c0_15 = arith.constant 0 : index
    %15 = vector.load %arg3[%c0_14, %c0_15] : memref<128x1xf32, #tpu.memory_space<vmem>>, vector<128x1xf32>
    %16 = vector.broadcast %15 : vector<128x1xf32> to vector<128x128xf32>
    %17 = arith.mulf %14, %16 : vector<128x128xf32>
    %c0_16 = arith.constant 0 : index
    %c0_17 = arith.constant 0 : index
    %18 = vector.load %arg8[%c0_16, %c0_17] : memref<1x128xf32, #tpu.memory_space<vmem>>, vector<1x128xf32>
    %19 = vector.broadcast %18 : vector<1x128xf32> to vector<128x128xf32>
    %20 = arith.addf %17, %19 : vector<128x128xf32>
    %c0_18 = arith.constant 0 : index
    %c0_19 = arith.constant 0 : index
    %21 = vector.load %arg9[%c0_18, %c0_19] : memref<128x128xf32, #tpu.memory_space<vmem>>, vector<128x128xf32>
    tpu.vector_store %arg9[%c0_18, %c0_19], %20 {strides = array<i32>} : memref<128x128xf32, #tpu.memory_space<vmem>>, vector<128x128xf32>,
    return
  }
  func.func @transform_0(%arg0: i32) -> (i32, i32) {
    %c0_i32 = arith.constant 0 : i32
    %c0_i32_0 = arith.constant 0 : i32
    return %arg0, %c0_i32 : i32, i32
  }
  func.func @transform_1(%arg0: i32) -> (i32, i32) {
    %c0_i32 = arith.constant 0 : i32
    %c0_i32_0 = arith.constant 0 : i32
    return %arg0, %c0_i32 : i32, i32
  }
  func.func @transform_2(%arg0: i32) -> (i32, i32) {
    %c0_i32 = arith.constant 0 : i32
    %c0_i32_0 = arith.constant 0 : i32
    return %arg0, %c0_i32 : i32, i32
  }
  func.func @transform_3(%arg0: i32) -> (i32, i32) {
    %c0_i32 = arith.constant 0 : i32
    %c0_i32_0 = arith.constant 0 : i32
    %c0_i32_1 = arith.constant 0 : i32
    return %c0_i32, %c0_i32_0 : i32, i32
  }
  func.func @transform_4(%arg0: i32) -> (i32, i32) {
    %c0_i32 = arith.constant 0 : i32
    %c0_i32_0 = arith.constant 0 : i32
    %c0_i32_1 = arith.constant 0 : i32
    return %c0_i32, %c0_i32_0 : i32, i32
  }
  func.func @transform_5(%arg0: i32) -> (i32, i32) {
    %c0_i32 = arith.constant 0 : i32
    %c0_i32_0 = arith.constant 0 : i32
    %c0_i32_1 = arith.constant 0 : i32
    return %c0_i32, %c0_i32_0 : i32, i32
  }
  func.func @transform_6(%arg0: i32) -> (i32, i32) {
    %c0_i32 = arith.constant 0 : i32
    %c0_i32_0 = arith.constant 0 : i32
    %c0_i32_1 = arith.constant 0 : i32
    return %c0_i32, %c0_i32_0 : i32, i32
  }
  func.func @transform_7(%arg0: i32) -> (i32, i32) {
    %c0_i32 = arith.constant 0 : i32
    %c0_i32_0 = arith.constant 0 : i32
    %c0_i32_1 = arith.constant 0 : i32
    return %c0_i32, %c0_i32_0 : i32, i32
  }
  func.func @transform_8(%arg0: i32) -> (i32, i32) {
    %c0_i32 = arith.constant 0 : i32
    %c0_i32_0 = arith.constant 0 : i32
    return %arg0, %c0_i32 : i32, i32
  }
}

</mosaic_0001>

<bundles_post_ra>
// kernel: mesh_seg_forward.5
= control target key start
LH: loop header
LB: loop body
LE: loop exit
PB: predicated region body
PF: predicated region fallthrough
CT: control target
= control target key end

     0   :  { %s3225_s27 = smov 0   ;;  %s3732_s0 = inlined_call_operand.vmem [shape: bf16[512,4], index: 0, kind: input, shape index: {}]   ;;  %s3733_s1 = inlined_call_operand.vmem [shape: bf16[512,512], index: 1, kind: input, shape index: {}]   ;;  %s3734_s2 = inlined_call_operand.vmem [shape: f32[512,1], index: 2, kind: input, shape index: {}]   ;;  %s3735_s3 = inlined_call_operand.vmem [shape: bf16[512,4], index: 3, kind: input, shape index: {}]   ;;  %s3736_s4 = inlined_call_operand.vmem [shape: bf16[512,128], index: 4, kind: input, shape index: {}]   ;;  %s3737_s5 = inlined_call_operand.vmem [shape: bf16[4,128], index: 5, kind: input, shape index: {}]   ;;  %s3738_s6 = inlined_call_operand.vmem [shape: bf16[128,32], index: 6, kind: input, shape index: {}]   ;;  %s3739_s7 = inlined_call_operand.vmem [shape: f32[1,32], index: 7, kind: input, shape index: {}]   ;;  %s3740_s8 = inlined_call_operand.vmem [shape: f32[512,32], index: 8, kind: output, shape index: {}]  }
   0x1 LB: > { %s2449_s28 = sadd.s32 4294967295, %s3177_s27   ;;  %p2453_p0 = scmp.ge.s32.totalorder %s3177_s27, 1  ;;  %s3177_s27 = sphi %s3225_s27, %s18_s27  }
   0x2   : > { %p286_p1 = scmp.lt.s32.totalorder %s3177_s27, 5 }
   0x4   : > { %p287_p2 = pnand %p2453_p0, %p286_p1 }
   0x5   : > { %v2962_v0 = vld [vmem:[%s3735_s3 + $0x40] sm:$0xff] (!%p287_p2)   ;;  %vm637_vm0 = vcmask (!%p287_p2), 31744   ;;  %v2966_v5 = vld [vmem:[%s3735_s3 + $0x48] sm:$0xff] (!%p287_p2)   ;;  %v2970_v11 = vld [vmem:[%s3735_s3 + $0x50] sm:$0xff] (!%p287_p2)   ;;  %s2454_s9 = sshll.u32 (!%p287_p2), %s2449_s28, 4  ;;  %vm1915_vm1 = vcmask (!%p287_p2), 1041408  }
   0x6   : > { %290 = sbr.rel (%p287_p2) target bundleno = 840 (0x348), region = 52  ;;  %v2963_v1 = vld [vmem:[%s3735_s3 + $0xc0] sm:$0xff] (!%p287_p2)   ;;  %2934 = vmatprep.subr.msk.bf16.mxu0 (!%p287_p2), %vm637_vm0, %v2962_v0  ;;  %v2967_v7 = vld [vmem:[%s3735_s3 + $0xc8] sm:$0xff] (!%p287_p2)   ;;  %v2971_v13 = vld [vmem:[%s3735_s3 + $0xd0] sm:$0xff] (!%p287_p2)   ;;  %p332_p3 = scmp.lt.s32.totalorder (!%p287_p2), %s2454_s9, 63  ;;  %vm2352_vm2 = vcmask (!%p287_p2), 261120  }
   0x7   : > { %v2964_v2 = vld [vmem:[%s3735_s3] sm:$0xff] (!%p287_p2)   ;;  %2942 = vmatprep.subr.msk.bf16.mxu1 (!%p287_p2), %vm637_vm0, %v2963_v1  ;;  %v2968_v8 = vld [vmem:[%s3735_s3 + $0x8] sm:$0xff] (!%p287_p2)   ;;  %v2972_v14 = vld [vmem:[%s3735_s3 + $0x10] sm:$0xff] (!%p287_p2)  }
   0x8   : > { %v2965_v3 = vld [vmem:[%s3735_s3 + $0x80] sm:$0xff] (!%p287_p2)   ;;  %v663_v4 = vsel (!%p287_p2), %vm637_vm0, %v2964_v2, 0  ;;  %v2969_v9 = vld [vmem:[%s3735_s3 + $0x88] sm:$0xff] (!%p287_p2)   ;;  %v666_v10 = vsel (!%p287_p2), %vm637_vm0, %v2968_v8, 0  ;;  %v2973_v15 = vld [vmem:[%s3735_s3 + $0x90] sm:$0xff] (!%p287_p2)   ;;  %v669_v16 = vsel (!%p287_p2), %vm637_vm0, %v2972_v14, 0 }
   0x9   : > { %2668 = vmatpush3.bf16.xpose.msra.mxu0 (!%p287_p2), %v663_v4  ;;  %v711_v6 = vsel (!%p287_p2), %vm637_vm0, %v2965_v3, 0  ;;  %v714_v12 = vsel (!%p287_p2), %vm637_vm0, %v2969_v9, 0  ;;  %v2974_v17 = vld [vmem:[%s3735_s3 + $0x58] sm:$0xff] (!%p287_p2)   ;;  %v717_v18 = vsel (!%p287_p2), %vm637_vm0, %v2973_v15, 0  ;;  %v2978_v23 = vld [vmem:[%s3735_s3 + $0x60] sm:$0xff] (!%p287_p2)   ;;  %v2982_v30 = vld [vmem:[%s3735_s3 + $0x68] sm:$0xff] (!%p287_p2)  }
   0xa   : > { %2700 = vmatpush3.bf16.xpose.msra.mxu1 (!%p287_p2), %v711_v6  ;;  %2935 = vmatprep.subr.msk.bf16.mxu0 (!%p287_p2), %vm637_vm0, %v2966_v5  ;;  %v2975_v19 = vld [vmem:[%s3735_s3 + $0xd8] sm:$0xff] (!%p287_p2)   ;;  %v2979_v25 = vld [vmem:[%s3735_s3 + $0xe0] sm:$0xff] (!%p287_p2)   ;;  %v2983_v32 = vld [vmem:[%s3735_s3 + $0xe8] sm:$0xff] (!%p287_p2)  }
   0xb   : > { %2943 = vmatprep.subr.msk.bf16.mxu1 (!%p287_p2), %vm637_vm0, %v2967_v7  ;;  %v2976_v20 = vld [vmem:[%s3735_s3 + $0x18] sm:$0xff] (!%p287_p2)   ;;  %v2980_v26 = vld [vmem:[%s3735_s3 + $0x20] sm:$0xff] (!%p287_p2)   ;;  %v2984_v33 = vld [vmem:[%s3735_s3 + $0x28] sm:$0xff] (!%p287_p2)  }
   0xc   : > { %v2977_v21 = vld [vmem:[%s3735_s3 + $0x98] sm:$0xff] (!%p287_p2)   ;;  %v672_v22 = vsel (!%p287_p2), %vm637_vm0, %v2976_v20, 0  ;;  %v2981_v27 = vld [vmem:[%s3735_s3 + $0xa0] sm:$0xff] (!%p287_p2)   ;;  %v675_v29 = vsel (!%p287_p2), %vm637_vm0, %v2980_v26, 0  ;;  %v2985_v34 = vld [vmem:[%s3735_s3 + $0xa8] sm:$0xff] (!%p287_p2)   ;;  %v678_v35 = vsel (!%p287_p2), %vm637_vm0, %v2984_v33, 0 }
   0xd   : > { %s3742_s9 = smov (!%p332_p3, %s2454_s9), 63  ;;  %v720_v24 = vsel %vm637_vm0, %v2977_v21, 0  ;;  %v723_v31 = vsel %vm637_vm0, %v2981_v27, 0  ;;  %v2986_v36 = vld [vmem:[%s3735_s3 + $0x70] sm:$0xff]   ;;  %v726_v37 = vsel %vm637_vm0, %v2985_v34, 0  ;;  %v2990_v42 = vld [vmem:[%s3735_s3 + $0x78] sm:$0xff]  }
   0xe   : > { %s2455_s19 = sshll.u32 %s3742_s9, 2  ;;  %v2987_v38 = vld [vmem:[%s3735_s3 + $0xf0] sm:$0xff]   ;;  %v2991_v44 = vld [vmem:[%s3735_s3 + $0xf8] sm:$0xff]   ;;  %v3002_v48 = vld [vmem:[%s3736_s4 + $0x40] sm:$0xff]   ;;  %s2634_s25 = sshll.u32 %s3742_s9, 4 }
   0xf   : > { %s3311_s26 = scalar_lea.vmem %s3732_s0, %s2455_s19  ;;  %v2988_v39 = vld [vmem:[%s3735_s3 + $0x30] sm:$0xff]   ;;  %v2992_v45 = vld [vmem:[%s3735_s3 + $0x38] sm:$0xff]   ;;  %v3010_v50 = vld [vmem:[%s3736_s4 + $0xc0] sm:$0xff]   ;;  %s3558_s10 = scalar_lea.vmem %s3733_s1, %s2634_s25 }
  0x10   : > { %v2994_v28 = vld [vmem:[%s3311_s26] sm:$0xff]   ;;  %v2989_v40 = vld [vmem:[%s3735_s3 + $0xb0] sm:$0xff]   ;;  %v681_v41 = vsel %vm637_vm0, %v2988_v39, 0  ;;  %v2993_v46 = vld [vmem:[%s3735_s3 + $0xb8] sm:$0xff]   ;;  %v684_v47 = vsel %vm637_vm0, %v2992_v45, 0  ;;  %s2460_s25 = sshll.u32 %s3742_s9, 3 }
  0x11   : > { %2670 = vmatpush3.bf16.xpose.msra.mxu0 %v666_v10  ;;  %2683 = vmatprep.mubr.msk.bf16.mxu0 %vm637_vm0, %v2994_v28  ;;  %v729_v43 = vsel %vm637_vm0, %v2989_v40, 0  ;;  %v732_v49 = vsel %vm637_vm0, %v2993_v46, 0  ;;  %v3381_v51 = vld [vmem:[%s3311_s26 + $0x8] sm:$0xff]   ;;  %v3003_v52 = vld [vmem:[%s3736_s4] sm:$0xff]   ;;  %v3006_v57 = vld [vmem:[%s3736_s4 + $0x50] sm:$0xff]   ;;  %s3680_s14 = scalar_lea.vmem %s3740_s8, %s2460_s25 }
  0x12   : > { %2702 = vmatpush3.bf16.xpose.msra.mxu1 %v714_v12  ;;  %2936 = vmatprep.subr.msk.bf16.mxu0 %vm637_vm0, %v2970_v11  ;;  %v3004_v53 = vld [vmem:[%s3736_s4 + $0x48] sm:$0xff]   ;;  %v3011_v54 = vld [vmem:[%s3736_s4 + $0x80] sm:$0xff]   ;;  %v3018_v59 = vld [vmem:[%s3736_s4 + $0xd0] sm:$0xff]  }
  0x13   : > { %2944 = vmatprep.subr.msk.bf16.mxu1 %vm637_vm0, %v2971_v13  ;;  %2715 = vmatprep.mubr.msk.bf16.mxu1 %vm637_vm0, %v2994_v28  ;;  %v3014_v55 = vld [vmem:[%s3736_s4 + $0xc8] sm:$0xff]   ;;  %v3414_v60 = vld [vmem:[%s3311_s26 + $0x10] sm:$0xff]   ;;  %v3008_v62 = vld [vmem:[%s3736_s4 + $0x58] sm:$0xff]  }
  0x14   : > { %v3005_v56 = vld [vmem:[%s3736_s4 + $0x8] sm:$0xff]   ;;  %v3007_v61 = vld [vmem:[%s3736_s4 + $0x10] sm:$0xff]   ;;  %v3009_v0 = vld [vmem:[%s3736_s4 + $0x18] sm:$0xff]  }
  0x15   : > { %v3015_v58 = vld [vmem:[%s3736_s4 + $0x88] sm:$0xff]   ;;  %v3019_v63 = vld [vmem:[%s3736_s4 + $0x90] sm:$0xff]   ;;  %v3012_v1 = vld [vmem:[%s3736_s4 + $0x60] sm:$0xff]  }
  0x16   : > { %v3440_v2 = vld [vmem:[%s3311_s26 + $0x18] sm:$0xff]   ;;  %v3013_v3 = vld [vmem:[%s3736_s4 + $0x20] sm:$0xff]   ;;  %v3016_v4 = vld [vmem:[%s3736_s4 + $0x68] sm:$0xff]  }
  0x17   : > { %v3017_v5 = vld [vmem:[%s3736_s4 + $0x28] sm:$0xff]   ;;  %v3460_v6 = vld [vmem:[%s3311_s26 + $0x20] sm:$0xff]   ;;  %v3482_v8 = vld [vmem:[%s3311_s26 + $0x30] sm:$0xff]  }
  0x18   : > { %v3471_v7 = vld [vmem:[%s3311_s26 + $0x28] sm:$0xff]   ;;  %v3493_v9 = vld [vmem:[%s3311_s26 + $0x38] sm:$0xff]   ;;  %v3022_v12 = vld [vmem:[%s3736_s4 + $0x70] sm:$0xff]  }
  0x19   : > { %2672 = vmatpush3.bf16.xpose.msra.mxu0 %v669_v16  ;;  %v3020_v10 = vld [vmem:[%s3736_s4 + $0xd8] sm:$0xff]   ;;  %v3023_v13 = vld [vmem:[%s3736_s4 + $0x30] sm:$0xff]   ;;  %v3024_v14 = vld [vmem:[%s3736_s4 + $0xe0] sm:$0xff]  }
  0x1a   : > { %2704 = vmatpush3.bf16.xpose.msra.mxu1 %v717_v18  ;;  %2937 = vmatprep.subr.msk.bf16.mxu0 %vm637_vm0, %v2974_v17  ;;  %v3021_v11 = vld [vmem:[%s3736_s4 + $0x98] sm:$0xff]   ;;  %v3025_v15 = vld [vmem:[%s3736_s4 + $0xa0] sm:$0xff]   ;;  %v3026_v16 = vld [vmem:[%s3736_s4 + $0xe8] sm:$0xff]  }
  0x1b   : > { %2945 = vmatprep.subr.msk.bf16.mxu1 %vm637_vm0, %v2975_v19  ;;  %v3027_v17 = vld [vmem:[%s3736_s4 + $0xa8] sm:$0xff]   ;;  %v3028_v18 = vld [vmem:[%s3736_s4 + $0x78] sm:$0xff]   ;;  %v3030_v20 = vld [vmem:[%s3736_s4 + $0xf0] sm:$0xff]  }
  0x1c   : > { %v3029_v19 = vld [vmem:[%s3736_s4 + $0x38] sm:$0xff]   ;;  %v3031_v21 = vld [vmem:[%s3736_s4 + $0xb0] sm:$0xff]  }
  0x21   : > { %2674 = vmatpush3.bf16.xpose.msra.mxu0 %v672_v22  ;;  %v3032_v22 = vld [vmem:[%s3736_s4 + $0xf8] sm:$0xff]  }
  0x22   : > { %2706 = vmatpush3.bf16.xpose.msra.mxu1 %v720_v24  ;;  %2938 = vmatprep.subr.msk.bf16.mxu0 %vm637_vm0, %v2978_v23  ;;  %v3033_v23 = vld [vmem:[%s3736_s4 + $0xb8] sm:$0xff]   ;;  %v1914_v24 = vld [vmem:[%s3737_s5] sm:$0x3] }
  0x23   : > { %2946 = vmatprep.subr.msk.bf16.mxu1 %vm637_vm0, %v2979_v25  ;;  %v3552_v25 = vsel %vm1915_vm1, %v1914_v24, 0 }
  0x29   : > { %2676 = vmatpush3.bf16.xpose.msra.mxu0 %v675_v29 }
  0x2a   : > { %2708 = vmatpush3.bf16.xpose.msra.mxu1 %v723_v31  ;;  %2939 = vmatprep.subr.msk.bf16.mxu0 %vm637_vm0, %v2982_v30 }
  0x2b   : > { %2947 = vmatprep.subr.msk.bf16.mxu1 %vm637_vm0, %v2983_v32 }
  0x31   : > { %2678 = vmatpush3.bf16.xpose.msra.mxu0 %v678_v35 }
  0x32   : > { %2710 = vmatpush3.bf16.xpose.msra.mxu1 %v726_v37  ;;  %2940 = vmatprep.subr.msk.bf16.mxu0 %vm637_vm0, %v2986_v36 }
  0x33   : > { %2948 = vmatprep.subr.msk.bf16.mxu1 %vm637_vm0, %v2987_v38 }
  0x39   : > { %2680 = vmatpush3.bf16.xpose.msra.mxu0 %v681_v41 }
  0x3a   : > { %2712 = vmatpush3.bf16.xpose.msra.mxu1 %v729_v43  ;;  %2941 = vmatprep.subr.msk.bf16.mxu0 %vm637_vm0, %v2990_v42 }
  0x3b   : > { %2949 = vmatprep.subr.msk.bf16.mxu1 %vm637_vm0, %v2991_v44 }
  0x41   : > { %2682 = vmatpush3.bf16.xpose.msra.mxu0 %v684_v47 }
  0x42   : > { %2714 = vmatpush3.bf16.xpose.msra.mxu1 %v732_v49  ;;  %2731 = vmatprep.subr.bf16.mxu0 %v3002_v48 }
  0x43   : > { %2795 = vmatprep.subr.bf16.mxu1 %v3010_v50 }
  0x48   : > { %2684 = vmatmul.mubr.msk.bf16.vlgmr.msra.gmra.mrb[0].mxu0 %vm637_vm0, %v2994_v28 }
  0x49   : > { %2716 = vmatmul.mubr.msk.bf16.vlgmr.msra.gmra.mrb[0].mxu1 %vm637_vm0, %v2994_v28  ;;  %2685 = vmatprep.mubr.msk.bf16.mxu0 %vm637_vm0, %v3381_v51 }
  0x4a   : > { %2717 = vmatprep.mubr.msk.bf16.mxu1 %vm637_vm0, %v3381_v51  ;;  %2732 = vmatpush3.bf16.msra.mxu0 %v3003_v52  ;;  %v985_v52 = vld [vmem:[%s3558_s10 + $0x8] sm:$0xff] }
  0x4b   : > { %2733 = vmatprep.subr.bf16.mxu0 %v3004_v53  ;;  %2796 = vmatpush3.bf16.msra.mxu1 %v3011_v54 }
  0x4c   : > { %2797 = vmatprep.subr.bf16.mxu1 %v3014_v55 }
  0x4e   : > { %2734 = vmatpush3.bf16.msra.mxu0 %v3005_v56  ;;  %v984_v56 = vld [vmem:[%s3558_s10] sm:$0xff] }
  0x4f   : > { %2735 = vmatprep.subr.bf16.mxu0 %v3006_v57  ;;  %2798 = vmatpush3.bf16.msra.mxu1 %v3015_v58  ;;  %v986_v57 = vld [vmem:[%s3558_s10 + $0x10] sm:$0xff] }
  0x50   : > { %2686 = vmatmul.mubr.msk.bf16.gmra.mrb[4].mxu0 %vm637_vm0, %v3381_v51  ;;  %2799 = vmatprep.subr.bf16.mxu1 %v3018_v59 }
  0x51   : > { %2718 = vmatmul.mubr.msk.bf16.gmra.mrb[4].mxu1 %vm637_vm0, %v3381_v51  ;;  %2687 = vmatprep.mubr.msk.bf16.mxu0 %vm637_vm0, %v3414_v60 }
  0x52   : > { %2719 = vmatprep.mubr.msk.bf16.mxu1 %vm637_vm0, %v3414_v60  ;;  %2736 = vmatpush3.bf16.msra.mxu0 %v3007_v61 }
  0x53   : > { %2737 = vmatprep.subr.bf16.mxu0 %v3008_v62  ;;  %2800 = vmatpush3.bf16.msra.mxu1 %v3019_v63  ;;  %v987_v63 = vld [vmem:[%s3558_s10 + $0x18] sm:$0xff] }
  0x54   : > { %2801 = vmatprep.subr.bf16.mxu1 %v3020_v10 }
  0x56   : > { %2738 = vmatpush3.bf16.msra.mxu0 %v3009_v0 }
  0x57   : > { %2739 = vmatprep.subr.bf16.mxu0 %v3012_v1  ;;  %2802 = vmatpush3.bf16.msra.mxu1 %v3021_v11 }
  0x58   : > { %2688 = vmatmul.mubr.msk.bf16.gmra.mrb[8].mxu0 %vm637_vm0, %v3414_v60  ;;  %2803 = vmatprep.subr.bf16.mxu1 %v3024_v14 }
  0x59   : > { %2720 = vmatmul.mubr.msk.bf16.gmra.mrb[8].mxu1 %vm637_vm0, %v3414_v60  ;;  %2689 = vmatprep.mubr.msk.bf16.mxu0 %vm637_vm0, %v3440_v2 }
  0x5a   : > { %2721 = vmatprep.mubr.msk.bf16.mxu1 %vm637_vm0, %v3440_v2  ;;  %2740 = vmatpush3.bf16.msra.mxu0 %v3013_v3 }
  0x5b   : > { %2741 = vmatprep.subr.bf16.mxu0 %v3016_v4  ;;  %2804 = vmatpush3.bf16.msra.mxu1 %v3025_v15 }
  0x5c   : > { %2805 = vmatprep.subr.bf16.mxu1 %v3026_v16 }
  0x5e   : > { %2742 = vmatpush3.bf16.msra.mxu0 %v3017_v5 }
  0x5f   : > { %2743 = vmatprep.subr.bf16.mxu0 %v3022_v12  ;;  %2806 = vmatpush3.bf16.msra.mxu1 %v3027_v17 }
  0x60   : > { %2690 = vmatmul.mubr.msk.bf16.gmra.mrb[12].mxu0 %vm637_vm0, %v3440_v2  ;;  %2807 = vmatprep.subr.bf16.mxu1 %v3030_v20 }
  0x61   : > { %2722 = vmatmul.mubr.msk.bf16.gmra.mrb[12].mxu1 %vm637_vm0, %v3440_v2  ;;  %2691 = vmatprep.mubr.msk.bf16.mxu0 %vm637_vm0, %v3460_v6 }
  0x62   : > { %2723 = vmatprep.mubr.msk.bf16.mxu1 %vm637_vm0, %v3460_v6  ;;  %2744 = vmatpush3.bf16.msra.mxu0 %v3023_v13 }
  0x63   : > { %2745 = vmatprep.subr.bf16.mxu0 %v3028_v18  ;;  %2808 = vmatpush3.bf16.msra.mxu1 %v3031_v21 }
  0x64   : > { %2809 = vmatprep.subr.bf16.mxu1 %v3032_v22 }
  0x66   : > { %2746 = vmatpush3.bf16.msra.mxu0 %v3029_v19 }
  0x67   : > { %2810 = vmatpush3.bf16.msra.mxu1 %v3033_v23  ;;  %2950 = vmatprep.subr.msk.bf16.mxu0 %vm1915_vm1, %v1914_v24 }
  0x68   : > { %2692 = vmatmul.mubr.msk.bf16.gmra.mrb[16].mxu0 %vm637_vm0, %v3460_v6 }
  0x69   : > { %2724 = vmatmul.mubr.msk.bf16.gmra.mrb[16].mxu1 %vm637_vm0, %v3460_v6  ;;  %2693 = vmatprep.mubr.msk.bf16.mxu0 %vm637_vm0, %v3471_v7 }
  0x6a   : > { %2725 = vmatprep.mubr.msk.bf16.mxu1 %vm637_vm0, %v3471_v7 }
  0x70   : > { %2694 = vmatmul.mubr.msk.bf16.gmra.mrb[20].mxu0 %vm637_vm0, %v3471_v7 }
  0x71   : > { %2726 = vmatmul.mubr.msk.bf16.gmra.mrb[20].mxu1 %vm637_vm0, %v3471_v7  ;;  %2695 = vmatprep.mubr.msk.bf16.mxu0 %vm637_vm0, %v3482_v8 }
  0x72   : > { %2727 = vmatprep.mubr.msk.bf16.mxu1 %vm637_vm0, %v3482_v8 }
  0x78   : > { %2696 = vmatmul.mubr.msk.bf16.gmra.mrb[24].mxu0 %vm637_vm0, %v3482_v8 }
  0x79   : > { %2728 = vmatmul.mubr.msk.bf16.gmra.mrb[24].mxu1 %vm637_vm0, %v3482_v8  ;;  %2697 = vmatprep.mubr.msk.bf16.mxu0 %vm637_vm0, %v3493_v9 }
  0x7a   : > { %2729 = vmatprep.mubr.msk.bf16.mxu1 %vm637_vm0, %v3493_v9 }
  0x80   : > { %2698 = vmatmul.mubr.msk.bf16.gmra.mrb[28].mxu0 %vm637_vm0, %v3493_v9 }
  0x81   : > { %2730 = vmatmul.mubr.msk.bf16.gmra.mrb[28].mxu1 %vm637_vm0, %v3493_v9 }
 0x11b   : > { %v792_v26 = vpop.f32.mrb[0].mxu0 }
 0x11c   : > { %3042 = vrcp.f32 %v792_v26  ;;  %v905_v27 = vpop.f32.mrb[0].mxu1  ;;  %v794_v28 = vpop.f32.mrb[1].mxu0 }
 0x11d   : > { %3044 = vrcp.f32 %v905_v27  ;;  %v907_v29 = vpop.f32.mrb[1].mxu1  ;;  %v796_v30 = vpop.f32.mrb[2].mxu0  ;;  %v989_v27 = vld [vmem:[%s3558_s10 + $0x28] sm:$0xff] }
 0x11e   : > { %3046 = vrcp.f32 %v794_v28  ;;  %v909_v31 = vpop.f32.mrb[2].mxu1  ;;  %v798_v32 = vpop.f32.mrb[3].mxu0 }
 0x11f   : > { %3048 = vrcp.f32 %v907_v29  ;;  %v911_v33 = vpop.f32.mrb[3].mxu1 }
 0x120   : > { %3050 = vrcp.f32 %v796_v30 }
 0x121   : > { %3052 = vrcp.f32 %v909_v31  ;;  %v988_v31 = vld [vmem:[%s3558_s10 + $0x20] sm:$0xff] }
 0x122   : > { %3054 = vrcp.f32 %v798_v32  ;;  %v990_v32 = vld [vmem:[%s3558_s10 + $0x30] sm:$0xff] }
 0x123   : > { %3056 = vrcp.f32 %v911_v33  ;;  %v802_v34 = vpop.f32.mrb[4].mxu0 }
 0x124   : > { %3058 = vrcp.f32 %v802_v34  ;;  %v915_v35 = vpop.f32.mrb[4].mxu1  ;;  %v804_v36 = vpop.f32.mrb[5].mxu0 }
 0x125   : > { %3060 = vrcp.f32 %v915_v35  ;;  %v917_v37 = vpop.f32.mrb[5].mxu1  ;;  %v806_v38 = vpop.f32.mrb[6].mxu0 }
 0x126   : > { %v3043_v39 = vpop.eup %3042  ;;  %3062 = vrcp.f32 %v804_v36  ;;  %v919_v40 = vpop.f32.mrb[6].mxu1 }
 0x127   : > { %v808_v41 = vpop.f32.mrb[7].mxu0  ;;  %v3045_v42 = vpop.eup %3044  ;;  %3064 = vrcp.f32 %v917_v37  ;;  %v991_v37 = vld [vmem:[%s3558_s10 + $0x38] sm:$0xff] }
 0x128   : > { %v921_v43 = vpop.f32.mrb[7].mxu1  ;;  %v3047_v44 = vpop.eup %3046  ;;  %3066 = vrcp.f32 %v806_v38 }
 0x129   : > { %v3049_v45 = vpop.eup %3048  ;;  %3068 = vrcp.f32 %v919_v40  ;;  %v2635_v46 = vpack.c.bf16 %v3047_v44, %v3043_v39 }
 0x12a   : > { %v3051_v47 = vpop.eup %3050  ;;  %3070 = vrcp.f32 %v808_v41  ;;  %v2636_v48 = vpack.c.bf16 %v3049_v45, %v3045_v42 }
 0x12b   : > { %v3053_v49 = vpop.eup %3052  ;;  %3072 = vrcp.f32 %v921_v43  ;;  %v812_v50 = vpop.f32.mrb[8].mxu0  ;;  %v1272_v12 = vmul.bf16 %v2635_v46, %v984_v56 }
 0x12c   : > { %v3055_v53 = vpop.eup %3054  ;;  %3074 = vrcp.f32 %v812_v50  ;;  %v925_v54 = vpop.f32.mrb[8].mxu1  ;;  %v1273_v5 = vmul.bf16 %v2636_v48, %v985_v52 }
 0x12d   : > { %v814_v55 = vpop.f32.mrb[9].mxu0  ;;  %v3057_v58 = vpop.eup %3056  ;;  %3076 = vrcp.f32 %v925_v54  ;;  %v2637_v62 = vpack.c.bf16 %v3055_v53, %v3051_v47 }
 0x12e   : > { %v927_v59 = vpop.f32.mrb[9].mxu1  ;;  %v816_v61 = vpop.f32.mrb[10].mxu0  ;;  %3078 = vrcp.f32 %v814_v55  ;;  %v2638_v4 = vpack.c.bf16 %v3057_v58, %v3053_v49 }
 0x12f   : > { %v3059_v0 = vpop.eup %3058  ;;  %v929_v1 = vpop.f32.mrb[10].mxu1  ;;  %3080 = vrcp.f32 %v927_v59  ;;  %v1274_v13 = vmul.bf16 %v2637_v62, %v986_v57  ;;  %v993_v59 = vld [vmem:[%s3558_s10 + $0x48] sm:$0xff] }
 0x130   : > { %v818_v3 = vpop.f32.mrb[11].mxu0  ;;  %v3061_v10 = vpop.eup %3060  ;;  %3082 = vrcp.f32 %v816_v61  ;;  %v1275_v15 = vmul.bf16 %v2638_v4, %v987_v63 }
 0x131   : > { %v931_v11 = vpop.f32.mrb[11].mxu1  ;;  %v3063_v14 = vpop.eup %3062  ;;  %3084 = vrcp.f32 %v929_v1  ;;  %v2551_v17 = vcombine.low %v1272_v12, %v1274_v13  ;;  %v2552_v18 = vcombine.high %v1272_v12, %v1274_v13  ;;  %v994_v1 = vld [vmem:[%s3558_s10 + $0x50] sm:$0xff] }
 0x132   : > { %v3065_v16 = vpop.eup %3064  ;;  %v2639_v19 = vpack.c.bf16 %v3063_v14, %v3059_v0  ;;  %3086 = vrcp.f32 %v818_v3  ;;  %v2553_v21 = vcombine.low %v1273_v5, %v1275_v15  ;;  %v2554_v22 = vcombine.high %v1273_v5, %v1275_v15  ;;  %v992_v0 = vld [vmem:[%s3558_s10 + $0x40] sm:$0xff] }
 0x133   : > { %v3067_v20 = vpop.eup %3066  ;;  %v2640_v23 = vpack.c.bf16 %v3065_v16, %v3061_v10  ;;  %3088 = vrcp.f32 %v931_v11  ;;  %1752 = vmatprep.mubr.bf16.mxu0 %v2552_v18  ;;  %v822_v26 = vpop.f32.mrb[12].mxu0  ;;  %v995_v11 = vld [vmem:[%s3558_s10 + $0x58] sm:$0xff] }
 0x134   : > { %v3069_v24 = vpop.eup %3068  ;;  %1849 = vmatprep.mubr.bf16.mxu1 %v2554_v22  ;;  %1753 = vmatmul.mubr.bf16.vlgmr.msra.gmra.mrb[32].mxu0 %v2551_v17  ;;  %3090 = vrcp.f32 %v822_v26  ;;  %v935_v29 = vpop.f32.mrb[12].mxu1  ;;  %v1276_v45 = vmul.bf16 %v2639_v19, %v988_v31 }
 0x135   : > { %v3071_v28 = vpop.eup %3070  ;;  %v824_v30 = vpop.f32.mrb[13].mxu0  ;;  %1850 = vmatmul.mubr.bf16.vlgmr.msra.gmra.mrb[32].mxu1 %v2553_v21  ;;  %2885 = vmatpush3.bf16.msra.mxu0 %v3552_v25  ;;  %3092 = vrcp.f32 %v935_v29  ;;  %v1277_v42 = vmul.bf16 %v2640_v23, %v989_v27 }
 0x136   : > { %v3073_v33 = vpop.eup %3072  ;;  %v937_v34 = vpop.f32.mrb[13].mxu1  ;;  %v2641_v36 = vpack.c.bf16 %v3071_v28, %v3067_v20  ;;  %3094 = vrcp.f32 %v824_v30 }
 0x137   : > { %v826_v35 = vpop.f32.mrb[14].mxu0  ;;  %v3075_v38 = vpop.eup %3074  ;;  %v2642_v41 = vpack.c.bf16 %v3073_v33, %v3069_v24  ;;  %3096 = vrcp.f32 %v937_v34  ;;  %v997_v34 = vld [vmem:[%s3558_s10 + $0x68] sm:$0xff] }
 0x138   : > { %v939_v39 = vpop.f32.mrb[14].mxu1  ;;  %v828_v40 = vpop.f32.mrb[15].mxu0  ;;  %v1278_v46 = vmul.bf16 %v2641_v36, %v990_v32  ;;  %3098 = vrcp.f32 %v826_v35 }
 0x139   : > { %v3077_v43 = vpop.eup %3076  ;;  %v941_v44 = vpop.f32.mrb[15].mxu1  ;;  %v1279_v25 = vmul.bf16 %v2642_v41, %v991_v37  ;;  %3100 = vrcp.f32 %v939_v39  ;;  %v998_v39 = vld [vmem:[%s3558_s10 + $0x70] sm:$0xff] }
 0x13a   : > { %v3079_v47 = vpop.eup %3078  ;;  %v2556_v49 = vcombine.high %v1276_v45, %v1278_v46  ;;  %v2555_v50 = vcombine.low %v1276_v45, %v1278_v46  ;;  %3102 = vrcp.f32 %v828_v40 }
 0x13b   : > { %v3081_v48 = vpop.eup %3080  ;;  %v2643_v52 = vpack.c.bf16 %v3079_v47, %v3075_v38  ;;  %v2558_v54 = vcombine.high %v1277_v42, %v1279_v25  ;;  %v2557_v55 = vcombine.low %v1277_v42, %v1279_v25  ;;  %3104 = vrcp.f32 %v941_v44  ;;  %v832_v58 = vpop.f32.mrb[16].mxu0  ;;  %v996_v38 = vld [vmem:[%s3558_s10 + $0x60] sm:$0xff]  ;;  %v999_v44 = vld [vmem:[%s3558_s10 + $0x78] sm:$0xff] }
 0x13c   : > { %v3083_v53 = vpop.eup %3082  ;;  %v2644_v56 = vpack.c.bf16 %v3081_v48, %v3077_v43  ;;  %1760 = vmatprep.mubr.bf16.mxu0 %v2556_v49  ;;  %3106 = vrcp.f32 %v832_v58  ;;  %v945_v62 = vpop.f32.mrb[16].mxu1 }
 0x13d   : > { %v3085_v57 = vpop.eup %3084  ;;  %1857 = vmatprep.mubr.bf16.mxu1 %v2558_v54  ;;  %1761 = vmatmul.mubr.bf16.gmra.mrb[36].mxu0 %v2555_v50  ;;  %v834_v63 = vpop.f32.mrb[17].mxu0  ;;  %3108 = vrcp.f32 %v945_v62  ;;  %v1280_v19 = vmul.bf16 %v2643_v52, %v992_v0 }
 0x13e   : > { %v3087_v61 = vpop.eup %3086  ;;  %1858 = vmatmul.mubr.bf16.gmra.mrb[36].mxu1 %v2557_v55  ;;  %v947_v4 = vpop.f32.mrb[17].mxu1  ;;  %3110 = vrcp.f32 %v834_v63  ;;  %v1281_v16 = vmul.bf16 %v2644_v56, %v993_v59 }
 0x13f   : > { %v3089_v3 = vpop.eup %3088  ;;  %v836_v5 = vpop.f32.mrb[18].mxu0  ;;  %v2645_v10 = vpack.c.bf16 %v3087_v61, %v3083_v53  ;;  %3112 = vrcp.f32 %v947_v4  ;;  %v1001_v4 = vld [vmem:[%s3558_s10 + $0x88] sm:$0xff] }
 0x140   : > { %v3091_v12 = vpop.eup %3090  ;;  %v949_v13 = vpop.f32.mrb[18].mxu1  ;;  %v2646_v15 = vpack.c.bf16 %v3089_v3, %v3085_v57  ;;  %3114 = vrcp.f32 %v836_v5 }
 0x141   : > { %v838_v14 = vpop.f32.mrb[19].mxu0  ;;  %v3093_v17 = vpop.eup %3092  ;;  %v1282_v20 = vmul.bf16 %v2645_v10, %v994_v1  ;;  %3116 = vrcp.f32 %v949_v13  ;;  %v1002_v13 = vld [vmem:[%s3558_s10 + $0x90] sm:$0xff] }
 0x142   : > { %v951_v18 = vpop.f32.mrb[19].mxu1  ;;  %v3095_v21 = vpop.eup %3094  ;;  %v1283_v22 = vmul.bf16 %v2646_v15, %v995_v11  ;;  %3118 = vrcp.f32 %v838_v14 }
 0x143   : > { %v3097_v23 = vpop.eup %3096  ;;  %v2560_v24 = vcombine.high %v1280_v19, %v1282_v20  ;;  %v2559_v26 = vcombine.low %v1280_v19, %v1282_v20  ;;  %v2647_v27 = vpack.c.bf16 %v3095_v21, %v3091_v12  ;;  %3120 = vrcp.f32 %v951_v18  ;;  %v842_v33 = vpop.f32.mrb[20].mxu0  ;;  %v1000_v12 = vld [vmem:[%s3558_s10 + $0x80] sm:$0xff]  ;;  %v1003_v18 = vld [vmem:[%s3558_s10 + $0x98] sm:$0xff] }
 0x144   : > { %v3099_v28 = vpop.eup %3098  ;;  %v2562_v29 = vcombine.high %v1281_v16, %v1283_v22  ;;  %v2561_v30 = vcombine.low %v1281_v16, %v1283_v22  ;;  %v2648_v31 = vpack.c.bf16 %v3097_v23, %v3093_v17  ;;  %3122 = vrcp.f32 %v842_v33  ;;  %v955_v36 = vpop.f32.mrb[20].mxu1 }
 0x145   : > { %v3101_v32 = vpop.eup %3100  ;;  %1768 = vmatprep.mubr.bf16.mxu0 %v2560_v24  ;;  %v844_v37 = vpop.f32.mrb[21].mxu0  ;;  %3124 = vrcp.f32 %v955_v36  ;;  %v1284_v52 = vmul.bf16 %v2647_v27, %v996_v38 }
 0x146   : > { %v3103_v35 = vpop.eup %3102  ;;  %1865 = vmatprep.mubr.bf16.mxu1 %v2562_v29  ;;  %1769 = vmatmul.mubr.bf16.gmra.mrb[40].mxu0 %v2559_v26  ;;  %v957_v41 = vpop.f32.mrb[21].mxu1  ;;  %3126 = vrcp.f32 %v844_v37  ;;  %v1285_v48 = vmul.bf16 %v2648_v31, %v997_v34 }
 0x147   : > { %v3105_v40 = vpop.eup %3104  ;;  %1866 = vmatmul.mubr.bf16.gmra.mrb[40].mxu1 %v2561_v30  ;;  %v846_v42 = vpop.f32.mrb[22].mxu0  ;;  %v2649_v43 = vpack.c.bf16 %v3103_v35, %v3099_v28  ;;  %3128 = vrcp.f32 %v957_v41  ;;  %v1005_v41 = vld [vmem:[%s3558_s10 + $0xa8] sm:$0xff] }
 0x148   : > { %v3107_v45 = vpop.eup %3106  ;;  %v959_v46 = vpop.f32.mrb[22].mxu1  ;;  %v2650_v25 = vpack.c.bf16 %v3105_v40, %v3101_v32  ;;  %3130 = vrcp.f32 %v846_v42 }
 0x149   : > { %v848_v47 = vpop.f32.mrb[23].mxu0  ;;  %v3109_v49 = vpop.eup %3108  ;;  %v1286_v53 = vmul.bf16 %v2649_v43, %v998_v39  ;;  %3132 = vrcp.f32 %v959_v46  ;;  %v1006_v46 = vld [vmem:[%s3558_s10 + $0xb0] sm:$0xff] }
 0x14a   : > { %v961_v50 = vpop.f32.mrb[23].mxu1  ;;  %v3111_v54 = vpop.eup %3110  ;;  %v1287_v55 = vmul.bf16 %v2650_v25, %v999_v44  ;;  %3134 = vrcp.f32 %v848_v47 }
 0x14b   : > { %v3113_v56 = vpop.eup %3112  ;;  %v2564_v57 = vcombine.high %v1284_v52, %v1286_v53  ;;  %v2563_v58 = vcombine.low %v1284_v52, %v1286_v53  ;;  %v2651_v59 = vpack.c.bf16 %v3111_v54, %v3107_v45  ;;  %3136 = vrcp.f32 %v961_v50  ;;  %v852_v3 = vpop.f32.mrb[24].mxu0  ;;  %v1004_v45 = vld [vmem:[%s3558_s10 + $0xa0] sm:$0xff]  ;;  %v1007_v50 = vld [vmem:[%s3558_s10 + $0xb8] sm:$0xff] }
 0x14c   : > { %v3115_v61 = vpop.eup %3114  ;;  %v2566_v62 = vcombine.high %v1285_v48, %v1287_v55  ;;  %v2565_v63 = vcombine.low %v1285_v48, %v1287_v55  ;;  %v2652_v0 = vpack.c.bf16 %v3113_v56, %v3109_v49  ;;  %3138 = vrcp.f32 %v852_v3  ;;  %v965_v10 = vpop.f32.mrb[24].mxu1 }
 0x14d   : > { %v3117_v1 = vpop.eup %3116  ;;  %1776 = vmatprep.mubr.bf16.mxu0 %v2564_v57  ;;  %v854_v11 = vpop.f32.mrb[25].mxu0  ;;  %3140 = vrcp.f32 %v965_v10  ;;  %v1288_v27 = vmul.bf16 %v2651_v59, %v1000_v12 }
 0x14e   : > { %v3119_v5 = vpop.eup %3118  ;;  %1873 = vmatprep.mubr.bf16.mxu1 %v2566_v62  ;;  %1777 = vmatmul.mubr.bf16.gmra.mrb[44].mxu0 %v2563_v58  ;;  %v967_v15 = vpop.f32.mrb[25].mxu1  ;;  %3142 = vrcp.f32 %v854_v11  ;;  %v1289_v23 = vmul.bf16 %v2652_v0, %v1001_v4 }
 0x14f   : > { %v3121_v14 = vpop.eup %3120  ;;  %1874 = vmatmul.mubr.bf16.gmra.mrb[44].mxu1 %v2565_v63  ;;  %v856_v16 = vpop.f32.mrb[26].mxu0  ;;  %v2653_v17 = vpack.c.bf16 %v3119_v5, %v3115_v61  ;;  %3144 = vrcp.f32 %v967_v15 }
 0x150   : > { %v3123_v19 = vpop.eup %3122  ;;  %v969_v20 = vpop.f32.mrb[26].mxu1  ;;  %v2654_v22 = vpack.c.bf16 %v3121_v14, %v3117_v1  ;;  %3146 = vrcp.f32 %v856_v16  ;;  %v1009_v14 = vld [vmem:[%s3558_s10 + $0xc8] sm:$0xff]  ;;  %v1008_v16 = vld [vmem:[%s3558_s10 + $0xc0] sm:$0xff] }
 0x151   : > { %v858_v21 = vpop.f32.mrb[27].mxu0  ;;  %v3125_v24 = vpop.eup %3124  ;;  %v1290_v28 = vmul.bf16 %v2653_v17, %v1002_v13  ;;  %3148 = vrcp.f32 %v969_v20  ;;  %v1010_v17 = vld [vmem:[%s3558_s10 + $0xd0] sm:$0xff]  ;;  %v1011_v20 = vld [vmem:[%s3558_s10 + $0xd8] sm:$0xff] }
 0x152   : > { %v971_v26 = vpop.f32.mrb[27].mxu1  ;;  %v3127_v29 = vpop.eup %3126  ;;  %v1291_v30 = vmul.bf16 %v2654_v22, %v1003_v18  ;;  %3150 = vrcp.f32 %v858_v21 }
 0x153   : > { %v3129_v31 = vpop.eup %3128  ;;  %v2568_v32 = vcombine.high %v1288_v27, %v1290_v28  ;;  %v2567_v33 = vcombine.low %v1288_v27, %v1290_v28  ;;  %v2655_v34 = vpack.c.bf16 %v3127_v29, %v3123_v19  ;;  %3152 = vrcp.f32 %v971_v26  ;;  %v862_v40 = vpop.f32.mrb[28].mxu0 }
 0x154   : > { %v3131_v35 = vpop.eup %3130  ;;  %v2570_v36 = vcombine.high %v1289_v23, %v1291_v30  ;;  %v2569_v37 = vcombine.low %v1289_v23, %v1291_v30  ;;  %v2656_v38 = vpack.c.bf16 %v3129_v31, %v3125_v24  ;;  %3154 = vrcp.f32 %v862_v40  ;;  %v975_v43 = vpop.f32.mrb[28].mxu1 }
 0x155   : > { %v3133_v39 = vpop.eup %3132  ;;  %1784 = vmatprep.mubr.bf16.mxu0 %v2568_v32  ;;  %v864_v44 = vpop.f32.mrb[29].mxu0  ;;  %3156 = vrcp.f32 %v975_v43  ;;  %v1292_v59 = vmul.bf16 %v2655_v34, %v1004_v45  ;;  %v1015_v45 = vld [vmem:[%s3558_s10 + $0xf8] sm:$0xff] }
 0x156   : > { %v3135_v42 = vpop.eup %3134  ;;  %1881 = vmatprep.mubr.bf16.mxu1 %v2570_v36  ;;  %1785 = vmatmul.mubr.bf16.gmra.mrb[48].mxu0 %v2567_v33  ;;  %v977_v25 = vpop.f32.mrb[29].mxu1  ;;  %3158 = vrcp.f32 %v864_v44  ;;  %v1293_v56 = vmul.bf16 %v2656_v38, %v1005_v41  ;;  %v1012_v41 = vld [vmem:[%s3558_s10 + $0xe0] sm:$0xff] }
 0x157   : > { %v3137_v47 = vpop.eup %3136  ;;  %1882 = vmatmul.mubr.bf16.gmra.mrb[48].mxu1 %v2569_v37  ;;  %v866_v48 = vpop.f32.mrb[30].mxu0  ;;  %v2657_v49 = vpack.c.bf16 %v3135_v42, %v3131_v35  ;;  %3160 = vrcp.f32 %v977_v25  ;;  %v1014_v42 = vld [vmem:[%s3558_s10 + $0xf0] sm:$0xff] }
 0x158   : > { %v3139_v52 = vpop.eup %3138  ;;  %v979_v53 = vpop.f32.mrb[30].mxu1  ;;  %v2658_v55 = vpack.c.bf16 %v3137_v47, %v3133_v39  ;;  %3162 = vrcp.f32 %v866_v48  ;;  %v1013_v39 = vld [vmem:[%s3558_s10 + $0xe8] sm:$0xff]  ;;  %s348_s10 = scalar_lea.vmem %s3734_s2, %s2460_s25 }
 0x159   : > { %v868_v54 = vpop.f32.mrb[31].mxu0  ;;  %v3141_v57 = vpop.eup %3140  ;;  %v1294_v61 = vmul.bf16 %v2657_v49, %v1006_v46  ;;  %3164 = vrcp.f32 %v979_v53 }
 0x15a   : > { %v981_v58 = vpop.f32.mrb[31].mxu1  ;;  %v3143_v62 = vpop.eup %3142  ;;  %v1295_v63 = vmul.bf16 %v2658_v55, %v1007_v50  ;;  %3166 = vrcp.f32 %v868_v54  ;;  %v3170_v55 = vld [vmem:[%s3311_s26] sm:$0xff]  }
 0x15b   : > { %v3145_v0 = vpop.eup %3144  ;;  %v2572_v1 = vcombine.high %v1292_v59, %v1294_v61  ;;  %v2571_v3 = vcombine.low %v1292_v59, %v1294_v61  ;;  %v2659_v4 = vpack.c.bf16 %v3143_v62, %v3139_v52  ;;  %3168 = vrcp.f32 %v981_v58  ;;  %v2203_v58 = vld [vmem:[%s348_s10 + $0x10] sm:$0xff]  ;;  %v2201_v59 = vld [vmem:[%s348_s10] sm:$0xff]  ;;  %v2204_v61 = vld [vmem:[%s348_s10 + $0x18] sm:$0xff] }
 0x15c   : > { %v3147_v5 = vpop.eup %3146  ;;  %v2574_v10 = vcombine.high %v1293_v56, %v1295_v63  ;;  %v2573_v11 = vcombine.low %v1293_v56, %v1295_v63  ;;  %v2660_v12 = vpack.c.bf16 %v3145_v0, %v3141_v57  ;;  %v3041_v56 = vld [vmem:[%s3738_s6 + $0x38] sm:$0xff]   ;;  %v3179_v57 = vmov 0   ;;  %v2202_v62 = vld [vmem:[%s348_s10 + $0x8] sm:$0xff]  ;;  %v2205_v0 = vld [vmem:[%s348_s10 + $0x20] sm:$0xff] }
 0x15d   : > { %v3149_v13 = vpop.eup %3148  ;;  %1792 = vmatprep.mubr.bf16.mxu0 %v2572_v1  ;;  %v1296_v26 = vmul.bf16 %v2659_v4, %v1008_v16  ;;  %2961 = vset.pattern.permute.xlu1 %v3179_v57  ;;  %v2206_v63 = vld [vmem:[%s348_s10 + $0x28] sm:$0xff]  ;;  %v2208_v1 = vld [vmem:[%s348_s10 + $0x38] sm:$0xff] }
 0x15e   : > { %v3151_v15 = vpop.eup %3150  ;;  %1889 = vmatprep.mubr.bf16.mxu1 %v2574_v10  ;;  %1793 = vmatmul.mubr.bf16.gmra.mrb[52].mxu0 %v2571_v3  ;;  %v1297_v23 = vmul.bf16 %v2660_v12, %v1009_v14  ;;  %v2207_v3 = vld [vmem:[%s348_s10 + $0x30] sm:$0xff]  ;;  %v2210_v4 = vld [vmem:[%s348_s10 + $0x48] sm:$0xff]  ;;  %v2212_v10 = vld [vmem:[%s348_s10 + $0x58] sm:$0xff] }
 0x15f   : > { %v3153_v18 = vpop.eup %3152  ;;  %1890 = vmatmul.mubr.bf16.gmra.mrb[52].mxu1 %v2573_v11  ;;  %v2661_v19 = vpack.c.bf16 %v3151_v15, %v3147_v5  ;;  %2960 = vset.pattern.permute.xlu0 %v3179_v57  ;;  %v2209_v5 = vld [vmem:[%s348_s10 + $0x40] sm:$0xff]  ;;  %v2211_v11 = vld [vmem:[%s348_s10 + $0x50] sm:$0xff]  ;;  %v2214_v12 = vld [vmem:[%s348_s10 + $0x68] sm:$0xff] }
 0x160   : > { %v3155_v21 = vpop.eup %3154  ;;  %v2662_v22 = vpack.c.bf16 %v3153_v18, %v3149_v13  ;;  %2229 = vperm.xlu1 %2961, %v2203_v58   ;;  %2219 = vperm.xlu0 %2960, %v2201_v59   ;;  %v2213_v13 = vld [vmem:[%s348_s10 + $0x60] sm:$0xff]  ;;  %v2216_v14 = vld [vmem:[%s348_s10 + $0x78] sm:$0xff]  ;;  %v2215_v15 = vld [vmem:[%s348_s10 + $0x70] sm:$0xff] }
 0x161   : > { %v3157_v24 = vpop.eup %3156  ;;  %v1298_v27 = vmul.bf16 %v2661_v19, %v1010_v17 }
 0x162   : > { %v3159_v28 = vpop.eup %3158  ;;  %v1299_v29 = vmul.bf16 %v2662_v22, %v1011_v20 }
 0x163   : > { %v3161_v30 = vpop.eup %3160  ;;  %v2576_v31 = vcombine.high %v1296_v26, %v1298_v27  ;;  %v2575_v32 = vcombine.low %v1296_v26, %v1298_v27  ;;  %v2663_v33 = vpack.c.bf16 %v3159_v28, %v3155_v21 }
 0x164   : > { %v3163_v34 = vpop.eup %3162  ;;  %v2578_v35 = vcombine.high %v1297_v23, %v1299_v29  ;;  %v2577_v36 = vcombine.low %v1297_v23, %v1299_v29  ;;  %v2664_v37 = vpack.c.bf16 %v3161_v30, %v3157_v24  ;;  %2234 = vperm.xlu1 %2961, %v2204_v61   ;;  %2224 = vperm.xlu0 %2960, %v2202_v62  }
 0x165   : > { %v3165_v38 = vpop.eup %3164  ;;  %1800 = vmatprep.mubr.bf16.mxu0 %v2576_v31  ;;  %v1300_v25 = vmul.bf16 %v2663_v33, %v1012_v41 }
 0x166   : > { %v3167_v40 = vpop.eup %3166  ;;  %1897 = vmatprep.mubr.bf16.mxu1 %v2578_v35  ;;  %1801 = vmatmul.mubr.bf16.gmra.mrb[56].mxu0 %v2575_v32  ;;  %v1301_v47 = vmul.bf16 %v2664_v37, %v1013_v39 }
 0x167   : > { %v3169_v43 = vpop.eup %3168  ;;  %1898 = vmatmul.mubr.bf16.gmra.mrb[56].mxu1 %v2577_v36  ;;  %v2665_v44 = vpack.c.bf16 %v3167_v40, %v3163_v34 }
 0x168   : > { %v2666_v46 = vpack.c.bf16 %v3169_v43, %v3165_v38  ;;  %2244 = vperm.xlu1 %2961, %v2206_v63   ;;  %2239 = vperm.xlu0 %2960, %v2205_v0  }
 0x169   : > { %v1302_v48 = vmul.bf16 %v2665_v44, %v1014_v42 }
 0x16a   : > { %v1303_v49 = vmul.bf16 %v2666_v46, %v1015_v45 }
 0x16b   : > { %v2580_v50 = vcombine.high %v1300_v25, %v1302_v48  ;;  %v2579_v52 = vcombine.low %v1300_v25, %v1302_v48 }
 0x16c   : > { %v2582_v53 = vcombine.high %v1301_v47, %v1303_v49  ;;  %v2581_v54 = vcombine.low %v1301_v47, %v1303_v49  ;;  %2254 = vperm.xlu1 %2961, %v2208_v1   ;;  %2249 = vperm.xlu0 %2960, %v2207_v3  }
 0x16d   : > { %1808 = vmatprep.mubr.bf16.mxu0 %v2580_v50 }
 0x16e   : > { %1905 = vmatprep.mubr.bf16.mxu1 %v2582_v53  ;;  %1809 = vmatmul.mubr.bf16.gmra.mrb[60].mxu0 %v2579_v52 }
 0x16f   : > { %1906 = vmatmul.mubr.bf16.gmra.mrb[60].mxu1 %v2581_v54  ;;  %2886 = vmatprep.mubr.msk.bf16.mxu0 %vm637_vm0, %v3170_v55 }
 0x170   : > { %2264 = vperm.xlu1 %2961, %v2210_v4   ;;  %2259 = vperm.xlu0 %2960, %v2209_v5  }
 0x174   : > { %2274 = vperm.xlu1 %2961, %v2212_v10   ;;  %2269 = vperm.xlu0 %2960, %v2211_v11  }
 0x176   : > { %2887 = vmatmul.mubr.msk.bf16.vlgmr.msra.gmra.mrb[64].mxu0 %vm637_vm0, %v3381_v51  ;;  %v3034_v51 = vld [vmem:[%s3738_s6] sm:$0xff]  }
 0x177   : > { %2890 = vmatprep.mubr.msk.bf16.mxu0 %vm637_vm0, %v3414_v60  ;;  %2902 = vmatprep.subr.bf16.mxu1 %v3034_v51  ;;  %v3035_v60 = vld [vmem:[%s3738_s6 + $0x8] sm:$0xff]  }
 0x178   : > { %2903 = vmatpush3.bf16.msra.mxu1 %v3034_v51  ;;  %2284 = vperm.xlu1 %2961, %v2214_v12  }
 0x179   : > { %2904 = vmatprep.subr.bf16.mxu1 %v3035_v60  ;;  %2279 = vperm.xlu0 %2960, %v2213_v13  }
 0x17c   : > { %2905 = vmatpush3.bf16.msra.mxu1 %v3035_v60  ;;  %2294 = vperm.xlu1 %2961, %v2216_v14  }
 0x17d   : > { %2289 = vperm.xlu0 %2960, %v2215_v15  }
 0x17e   : > { %2891 = vmatmul.mubr.msk.bf16.gmra.mrb[68].mxu0 %vm637_vm0, %v3440_v2  ;;  %v3036_v2 = vld [vmem:[%s3738_s6 + $0x10] sm:$0xff]  }
 0x17f   : > { %2894 = vmatprep.mubr.msk.bf16.mxu0 %vm637_vm0, %v3460_v6  ;;  %2906 = vmatprep.subr.bf16.mxu1 %v3036_v2  ;;  %v3037_v6 = vld [vmem:[%s3738_s6 + $0x18] sm:$0xff]  }
 0x180   : > { %2907 = vmatpush3.bf16.msra.mxu1 %v3036_v2 }
 0x181   : > { %2908 = vmatprep.subr.bf16.mxu1 %v3037_v6 }
 0x184   : > { %2909 = vmatpush3.bf16.msra.mxu1 %v3037_v6 }
 0x186   : > { %2895 = vmatmul.mubr.msk.bf16.gmra.mrb[72].mxu0 %vm637_vm0, %v3471_v7  ;;  %v3038_v7 = vld [vmem:[%s3738_s6 + $0x20] sm:$0xff]  }
 0x187   : > { %2898 = vmatprep.mubr.msk.bf16.mxu0 %vm637_vm0, %v3482_v8  ;;  %2910 = vmatprep.subr.bf16.mxu1 %v3038_v7  ;;  %v3039_v8 = vld [vmem:[%s3738_s6 + $0x28] sm:$0xff]  }
 0x188   : > { %2911 = vmatpush3.bf16.msra.mxu1 %v3038_v7 }
 0x189   : > { %2912 = vmatprep.subr.bf16.mxu1 %v3039_v8 }
 0x18c   : > { %2913 = vmatpush3.bf16.msra.mxu1 %v3039_v8 }
 0x18e   : > { %2899 = vmatmul.mubr.msk.bf16.gmra.mrb[76].mxu0 %vm637_vm0, %v3493_v9  ;;  %v3040_v9 = vld [vmem:[%s3738_s6 + $0x30] sm:$0xff]  }
 0x18f   : > { %2914 = vmatprep.subr.bf16.mxu1 %v3040_v9 }
 0x190   : > { %2915 = vmatpush3.bf16.msra.mxu1 %v3040_v9 }
 0x191   : > { %2916 = vmatprep.subr.bf16.mxu1 %v3041_v56 }
 0x194   : > { %2917 = vmatpush3.bf16.msra.mxu1 %v3041_v56 }
 0x207   : > { %v2747_v16 = vpop.f32.mrb[32].mxu0 }
 0x208   : > { %v2811_v17 = vpop.f32.mrb[32].mxu1  ;;  %v2748_v18 = vpop.f32.mrb[33].mxu0 }
 0x209   : > { %v2749_v19 = vadd.f32 %v2748_v18, %v2747_v16  ;;  %v2812_v20 = vpop.f32.mrb[33].mxu1  ;;  %v2750_v21 = vpop.f32.mrb[34].mxu0 }
 0x20a   : > { %v2813_v22 = vadd.f32 %v2812_v20, %v2811_v17  ;;  %v2814_v23 = vpop.f32.mrb[34].mxu1  ;;  %v2751_v24 = vpop.f32.mrb[35].mxu0 }
 0x20b   : > { %v2752_v26 = vadd.f32 %v2751_v24, %v2750_v21  ;;  %v2815_v27 = vpop.f32.mrb[35].mxu1 }
 0x20c   : > { %v2816_v28 = vadd.f32 %v2815_v27, %v2814_v23  ;;  %v3639_v29 = vadd.f32 %v2813_v22, %v2749_v19 }
 0x20e   : > { %v3641_v30 = vadd.f32 %v2816_v28, %v2752_v26 }
 0x210   : > { %v2753_v31 = vpop.f32.mrb[36].mxu0 }
 0x211   : > { %v2817_v32 = vpop.f32.mrb[36].mxu1  ;;  %v2754_v33 = vpop.f32.mrb[37].mxu0 }
 0x212   : > { %v2755_v34 = vadd.f32 %v2754_v33, %v2753_v31  ;;  %v2818_v35 = vpop.f32.mrb[37].mxu1  ;;  %v2756_v36 = vpop.f32.mrb[38].mxu0 }
 0x213   : > { %v2819_v37 = vadd.f32 %v2818_v35, %v2817_v32  ;;  %v2820_v38 = vpop.f32.mrb[38].mxu1  ;;  %v2757_v39 = vpop.f32.mrb[39].mxu0 }
 0x214   : > { %v2758_v40 = vadd.f32 %v2757_v39, %v2756_v36  ;;  %v2821_v41 = vpop.f32.mrb[39].mxu1 }
 0x215   : > { %v2822_v42 = vadd.f32 %v2821_v41, %v2820_v38  ;;  %v3643_v43 = vadd.f32 %v2819_v37, %v2755_v34 }
 0x217   : > { %v3645_v44 = vadd.f32 %v2822_v42, %v2758_v40 }
 0x219   : > { %v2759_v45 = vpop.f32.mrb[40].mxu0 }
 0x21a   : > { %v2823_v46 = vpop.f32.mrb[40].mxu1  ;;  %v2760_v47 = vpop.f32.mrb[41].mxu0 }
 0x21b   : > { %v2761_v25 = vadd.f32 %v2760_v47, %v2759_v45  ;;  %v2824_v48 = vpop.f32.mrb[41].mxu1  ;;  %v2762_v49 = vpop.f32.mrb[42].mxu0 }
 0x21c   : > { %v2825_v50 = vadd.f32 %v2824_v48, %v2823_v46  ;;  %v2826_v52 = vpop.f32.mrb[42].mxu1  ;;  %v2763_v53 = vpop.f32.mrb[43].mxu0 }
 0x21d   : > { %v2764_v54 = vadd.f32 %v2763_v53, %v2762_v49  ;;  %v2827_v55 = vpop.f32.mrb[43].mxu1 }
 0x21e   : > { %v2828_v51 = vadd.f32 %v2827_v55, %v2826_v52  ;;  %v3647_v60 = vadd.f32 %v2825_v50, %v2761_v25 }
 0x220   : > { %v3649_v2 = vadd.f32 %v2828_v51, %v2764_v54 }
 0x221   : > { %v2765_v6 = vpop.f32.mrb[44].mxu0 }
 0x222   : > { %v2829_v7 = vpop.f32.mrb[44].mxu1  ;;  %v2766_v8 = vpop.f32.mrb[45].mxu0 }
 0x223   : > { %v2767_v9 = vadd.f32 %v2766_v8, %v2765_v6  ;;  %v2830_v56 = vpop.f32.mrb[45].mxu1  ;;  %v2768_v57 = vpop.f32.mrb[46].mxu0 }
 0x224   : > { %v2831_v58 = vadd.f32 %v2830_v56, %v2829_v7  ;;  %v2832_v59 = vpop.f32.mrb[46].mxu1  ;;  %v2769_v61 = vpop.f32.mrb[47].mxu0 }
 0x225   : > { %v2770_v62 = vadd.f32 %v2769_v61, %v2768_v57  ;;  %v2833_v63 = vpop.f32.mrb[47].mxu1 }
 0x226   : > { %v2834_v0 = vadd.f32 %v2833_v63, %v2832_v59  ;;  %v3651_v1 = vadd.f32 %v2831_v58, %v2767_v9 }
 0x228   : > { %v3653_v3 = vadd.f32 %v2834_v0, %v2770_v62 }
 0x229   : > { %v2771_v4 = vpop.f32.mrb[48].mxu0 }
 0x22a   : > { %v2835_v5 = vpop.f32.mrb[48].mxu1  ;;  %v2772_v10 = vpop.f32.mrb[49].mxu0 }
 0x22b   : > { %v2773_v11 = vadd.f32 %v2772_v10, %v2771_v4  ;;  %v2836_v12 = vpop.f32.mrb[49].mxu1  ;;  %v2774_v13 = vpop.f32.mrb[50].mxu0 }
 0x22c   : > { %v2837_v14 = vadd.f32 %v2836_v12, %v2835_v5  ;;  %v2838_v15 = vpop.f32.mrb[50].mxu1  ;;  %v2775_v16 = vpop.f32.mrb[51].mxu0 }
 0x22d   : > { %v2776_v17 = vadd.f32 %v2775_v16, %v2774_v13  ;;  %v2839_v18 = vpop.f32.mrb[51].mxu1 }
 0x22e   : > { %v2840_v19 = vadd.f32 %v2839_v18, %v2838_v15  ;;  %v3655_v20 = vadd.f32 %v2837_v14, %v2773_v11 }
 0x230   : > { %v3657_v21 = vadd.f32 %v2840_v19, %v2776_v17 }
 0x231   : > { %v2777_v22 = vpop.f32.mrb[52].mxu0 }
 0x232   : > { %v2841_v23 = vpop.f32.mrb[52].mxu1  ;;  %v2778_v24 = vpop.f32.mrb[53].mxu0 }
 0x233   : > { %v2779_v26 = vadd.f32 %v2778_v24, %v2777_v22  ;;  %v2842_v27 = vpop.f32.mrb[53].mxu1  ;;  %v2780_v28 = vpop.f32.mrb[54].mxu0 }
 0x234   : > { %v2843_v31 = vadd.f32 %v2842_v27, %v2841_v23  ;;  %v2844_v32 = vpop.f32.mrb[54].mxu1  ;;  %v2781_v33 = vpop.f32.mrb[55].mxu0 }
 0x235   : > { %v2782_v34 = vadd.f32 %v2781_v33, %v2780_v28  ;;  %v2845_v35 = vpop.f32.mrb[55].mxu1 }
 0x236   : > { %v2846_v36 = vadd.f32 %v2845_v35, %v2844_v32  ;;  %v1892_v37 = vadd.f32 %v2843_v31, %v2779_v26 }
 0x238   : > { %v1895_v38 = vadd.f32 %v2846_v36, %v2782_v34 }
 0x239   : > { %v2783_v39 = vpop.f32.mrb[56].mxu0 }
 0x23a   : > { %v2847_v40 = vpop.f32.mrb[56].mxu1  ;;  %v2784_v41 = vpop.f32.mrb[57].mxu0 }
 0x23b   : > { %v2785_v42 = vadd.f32 %v2784_v41, %v2783_v39  ;;  %v2848_v45 = vpop.f32.mrb[57].mxu1  ;;  %v2786_v46 = vpop.f32.mrb[58].mxu0 }
 0x23c   : > { %v2849_v47 = vadd.f32 %v2848_v45, %v2847_v40  ;;  %v2850_v25 = vpop.f32.mrb[58].mxu1  ;;  %v2787_v48 = vpop.f32.mrb[59].mxu0 }
 0x23d   : > { %v2788_v49 = vadd.f32 %v2787_v48, %v2786_v46  ;;  %v2851_v50 = vpop.f32.mrb[59].mxu1 }
 0x23e   : > { %v2852_v52 = vadd.f32 %v2851_v50, %v2850_v25  ;;  %v1900_v53 = vadd.f32 %v2849_v47, %v2785_v42 }
 0x240   : > { %v1903_v54 = vadd.f32 %v2852_v52, %v2788_v49 }
 0x241   : > { %v2789_v55 = vpop.f32.mrb[60].mxu0 }
 0x242   : > { %v2853_v51 = vpop.f32.mrb[60].mxu1  ;;  %v2790_v6 = vpop.f32.mrb[61].mxu0 }
 0x243   : > { %v2791_v7 = vadd.f32 %v2790_v6, %v2789_v55  ;;  %v2854_v8 = vpop.f32.mrb[61].mxu1  ;;  %v2792_v9 = vpop.f32.mrb[62].mxu0 }
 0x244   : > { %v2855_v56 = vadd.f32 %v2854_v8, %v2853_v51  ;;  %v2856_v57 = vpop.f32.mrb[62].mxu1  ;;  %v2793_v58 = vpop.f32.mrb[63].mxu0 }
 0x245   : > { %v2794_v59 = vadd.f32 %v2793_v58, %v2792_v9  ;;  %v2857_v61 = vpop.f32.mrb[63].mxu1 }
 0x246   : > { %v2858_v62 = vadd.f32 %v2857_v61, %v2856_v57  ;;  %v1908_v63 = vadd.f32 %v2855_v56, %v2791_v7 }
 0x248   : > { %v1911_v0 = vadd.f32 %v2858_v62, %v2794_v59 }
 0x249   : > { %v2888_v4 = vpop.f32.mrb[64].mxu0 }
 0x24a   : > { %v2018_v5 = vmul.f32 %v2888_v4, %v3643_v43  ;;  %v1953_v10 = vpop.f32.mrb[65].mxu0 }
 0x24b   : > { %v2016_v11 = vmul.f32 %v1953_v10, %v3639_v29  ;;  %v2889_v12 = vpop.f32.mrb[66].mxu0 }
 0x24c   : > { %v2019_v13 = vmul.f32 %v2889_v12, %v3645_v44  ;;  %v1956_v14 = vpop.f32.mrb[67].mxu0 }
 0x24d   : > { %v2017_v15 = vmul.f32 %v1956_v14, %v3641_v30 }
 0x24e   : > { %v2033_v16 = vpack.c.bf16 %v2019_v13, %v2018_v5 }
 0x24f   : > { %v2032_v17 = vpack.c.bf16 %v2017_v15, %v2016_v11 }
 0x251   : > { %v2892_v18 = vpop.f32.mrb[68].mxu0  ;;  %2918 = vmatprep.mubr.bf16.mxu1 %v2032_v17 }
 0x252   : > { %v2022_v19 = vmul.f32 %v2892_v18, %v3651_v1  ;;  %v1969_v22 = vpop.f32.mrb[69].mxu0  ;;  %2919 = vmatmul.mubr.bf16.vlgmr.msra.gmra.mrb[64].mxu1 %v2033_v16 }
 0x253   : > { %v2020_v23 = vmul.f32 %v1969_v22, %v3647_v60  ;;  %v2893_v43 = vpop.f32.mrb[70].mxu0 }
 0x254   : > { %v2023_v24 = vmul.f32 %v2893_v43, %v3653_v3  ;;  %v1972_v29 = vpop.f32.mrb[71].mxu0 }
 0x255   : > { %v2021_v26 = vmul.f32 %v1972_v29, %v3649_v2 }
 0x256   : > { %v2035_v44 = vpack.c.bf16 %v2023_v24, %v2022_v19 }
 0x257   : > { %v2034_v27 = vpack.c.bf16 %v2021_v26, %v2020_v23 }
 0x259   : > { %v2896_v28 = vpop.f32.mrb[72].mxu0  ;;  %2922 = vmatprep.mubr.bf16.mxu1 %v2034_v27 }
 0x25a   : > { %v2026_v30 = vmul.f32 %v2896_v28, %v1892_v37  ;;  %v1985_v31 = vpop.f32.mrb[73].mxu0  ;;  %2923 = vmatmul.mubr.bf16.gmra.mrb[68].mxu1 %v2035_v44 }
 0x25b   : > { %v2024_v32 = vmul.f32 %v1985_v31, %v3655_v20  ;;  %v2897_v1 = vpop.f32.mrb[74].mxu0  ;;  %v2220_v20 = vpop.permute.xlu0 %2219 }
 0x25c   : > { %v2027_v33 = vmul.f32 %v2897_v1, %v1895_v38  ;;  %v1988_v34 = vpop.f32.mrb[75].mxu0  ;;  %v2230_v38 = vpop.permute.xlu1 %2229 }
 0x25d   : > { %v2025_v60 = vmul.f32 %v1988_v34, %v3657_v21 }
 0x25e   : > { %v2037_v35 = vpack.c.bf16 %v2027_v33, %v2026_v30 }
 0x25f   : > { %v2036_v36 = vpack.c.bf16 %v2025_v60, %v2024_v32  ;;  %v2225_v21 = vpop.permute.xlu0 %2224 }
 0x260   : > { %v2235_v25 = vpop.permute.xlu1 %2234 }
 0x261   : > { %v2900_v3 = vpop.f32.mrb[76].mxu0  ;;  %2926 = vmatprep.mubr.bf16.mxu1 %v2036_v36 }
 0x262   : > { %v2030_v39 = vmul.f32 %v2900_v3, %v1908_v63  ;;  %v2001_v2 = vpop.f32.mrb[77].mxu0  ;;  %2927 = vmatmul.mubr.bf16.gmra.mrb[72].mxu1 %v2037_v35 }
 0x263   : > { %v2028_v40 = vmul.f32 %v2001_v2, %v1900_v53  ;;  %v2901_v41 = vpop.f32.mrb[78].mxu0  ;;  %v2240_v48 = vpop.permute.xlu0 %2239  ;;  %v3672_v53 = vld [vmem:[%s3739_s7] ss:$0 sm:$0xff] }
 0x264   : > { %v2031_v42 = vmul.f32 %v2901_v41, %v1911_v0  ;;  %v2004_v37 = vpop.f32.mrb[79].mxu0  ;;  %v2245_v49 = vpop.permute.xlu1 %2244 }
 0x265   : > { %v2029_v45 = vmul.f32 %v2004_v37, %v1903_v54 }
 0x266   : > { %v2039_v46 = vpack.c.bf16 %v2031_v42, %v2030_v39 }
 0x267   : > { %v2038_v47 = vpack.c.bf16 %v2029_v45, %v2028_v40  ;;  %v2250_v50 = vpop.permute.xlu0 %2249 }
 0x268   : > { %v2255_v51 = vpop.permute.xlu1 %2254 }
 0x269   : > { %2930 = vmatprep.mubr.bf16.mxu1 %v2038_v47 }
 0x26a   : > { %2931 = vmatmul.mubr.bf16.gmra.mrb[76].mxu1 %v2039_v46 }
 0x26b   : > { %v2260_v62 = vpop.permute.xlu0 %2259 }
 0x26c   : > { %v2265_v5 = vpop.permute.xlu1 %2264 }
 0x26f   : > { %v2270_v19 = vpop.permute.xlu0 %2269 }
 0x270   : > { %v2275_v29 = vpop.permute.xlu1 %2274 }
 0x273   : > { %v2280_v1 = vpop.permute.xlu0 %2279 }
 0x274   : > { %v2285_v3 = vpop.permute.xlu1 %2284 }
 0x277   : > { %v2290_v46 = vpop.permute.xlu0 %2289 }
 0x325   : > { %v2920_v52 = vpop.f32.mrb[64].mxu1 }
 0x326   : > { %v2299_v55 = vmul.f32 %v2920_v52, %v2230_v38  ;;  %v2138_v54 = vpop.f32.mrb[65].mxu1 }
 0x327   : > { %v2297_v6 = vmul.f32 %v2220_v20, %v2138_v54  ;;  %v2921_v7 = vpop.f32.mrb[66].mxu1 }
 0x328   : > { %v2322_v8 = vadd.f32 %v3672_v53, %v2299_v55  ;;  %v2300_v9 = vmul.f32 %v2921_v7, %v2235_v25  ;;  %v2141_v56 = vpop.f32.mrb[67].mxu1  ;;  %v2295_v25 = vpop.permute.xlu1 %2294 }
 0x329   : > { %v2320_v57 = vadd.f32 %v3672_v53, %v2297_v6  ;;  %v2298_v58 = vmul.f32 %v2225_v21, %v2141_v56 }
 0x32a   : > { %v2338_v59 = vmax.f32 %v2322_v8, 0.0  ;;  %v2323_v61 = vadd.f32 %v3672_v53, %v2300_v9 }
 0x32b   : > { %v2336_v63 = vmax.f32 %v2320_v57, 0.0  ;;  %v2321_v0 = vadd.f32 %v3672_v53, %v2298_v58 }
 0x32c   : > { %2355 = vst.msk [vmem:[%s3680_s14 + $0x10] sm:$0xff] %vm2352_vm2, %v2338_v59  ;;  %v2339_v4 = vmax.f32 %v2323_v61, 0.0 }
 0x32d   : > { %2353 = vst.msk [vmem:[%s3680_s14] sm:$0xff] %vm2352_vm2, %v2336_v63  ;;  %v2337_v10 = vmax.f32 %v2321_v0, 0.0  ;;  %v2924_v11 = vpop.f32.mrb[68].mxu1 }
 0x32e   : > { %2356 = vst.msk [vmem:[%s3680_s14 + $0x18] sm:$0xff] %vm2352_vm2, %v2339_v4  ;;  %v2303_v12 = vmul.f32 %v2924_v11, %v2250_v50  ;;  %v2154_v13 = vpop.f32.mrb[69].mxu1 }
 0x32f   : > { %2354 = vst.msk [vmem:[%s3680_s14 + $0x8] sm:$0xff] %vm2352_vm2, %v2337_v10  ;;  %v2301_v14 = vmul.f32 %v2240_v48, %v2154_v13  ;;  %v2925_v15 = vpop.f32.mrb[70].mxu1 }
 0x330   : > { %v2326_v16 = vadd.f32 %v3672_v53, %v2303_v12  ;;  %v2304_v17 = vmul.f32 %v2925_v15, %v2255_v51  ;;  %v2157_v18 = vpop.f32.mrb[71].mxu1 }
 0x331   : > { %v2324_v22 = vadd.f32 %v3672_v53, %v2301_v14  ;;  %v2302_v23 = vmul.f32 %v2245_v49, %v2157_v18 }
 0x332   : > { %v2342_v43 = vmax.f32 %v2326_v16, 0.0  ;;  %v2327_v24 = vadd.f32 %v3672_v53, %v2304_v17 }
 0x333   : > { %v2340_v26 = vmax.f32 %v2324_v22, 0.0  ;;  %v2325_v44 = vadd.f32 %v3672_v53, %v2302_v23 }
 0x334   : > { %2359 = vst.msk [vmem:[%s3680_s14 + $0x30] sm:$0xff] %vm2352_vm2, %v2342_v43  ;;  %v2343_v27 = vmax.f32 %v2327_v24, 0.0 }
 0x335   : > { %2357 = vst.msk [vmem:[%s3680_s14 + $0x20] sm:$0xff] %vm2352_vm2, %v2340_v26  ;;  %v2341_v28 = vmax.f32 %v2325_v44, 0.0  ;;  %v2928_v30 = vpop.f32.mrb[72].mxu1 }
 0x336   : > { %2360 = vst.msk [vmem:[%s3680_s14 + $0x38] sm:$0xff] %vm2352_vm2, %v2343_v27  ;;  %v2307_v31 = vmul.f32 %v2928_v30, %v2270_v19  ;;  %v2170_v32 = vpop.f32.mrb[73].mxu1 }
 0x337   : > { %2358 = vst.msk [vmem:[%s3680_s14 + $0x28] sm:$0xff] %vm2352_vm2, %v2341_v28  ;;  %v2305_v33 = vmul.f32 %v2260_v62, %v2170_v32  ;;  %v2929_v34 = vpop.f32.mrb[74].mxu1 }
 0x338   : > { %v2330_v60 = vadd.f32 %v3672_v53, %v2307_v31  ;;  %v2308_v35 = vmul.f32 %v2929_v34, %v2275_v29  ;;  %v2173_v36 = vpop.f32.mrb[75].mxu1 }
 0x339   : > { %v2328_v39 = vadd.f32 %v3672_v53, %v2305_v33  ;;  %v2306_v2 = vmul.f32 %v2265_v5, %v2173_v36 }
 0x33a   : > { %v2346_v40 = vmax.f32 %v2330_v60, 0.0  ;;  %v2331_v41 = vadd.f32 %v3672_v53, %v2308_v35 }
 0x33b   : > { %v2344_v42 = vmax.f32 %v2328_v39, 0.0  ;;  %v2329_v37 = vadd.f32 %v3672_v53, %v2306_v2 }
 0x33c   : > { %2363 = vst.msk [vmem:[%s3680_s14 + $0x50] sm:$0xff] %vm2352_vm2, %v2346_v40  ;;  %v2347_v45 = vmax.f32 %v2331_v41, 0.0 }
 0x33d   : > { %2361 = vst.msk [vmem:[%s3680_s14 + $0x40] sm:$0xff] %vm2352_vm2, %v2344_v42  ;;  %v2345_v47 = vmax.f32 %v2329_v37, 0.0  ;;  %v2932_v20 = vpop.f32.mrb[76].mxu1 }
 0x33e   : > { %2364 = vst.msk [vmem:[%s3680_s14 + $0x58] sm:$0xff] %vm2352_vm2, %v2347_v45  ;;  %v2311_v38 = vmul.f32 %v2932_v20, %v2290_v46  ;;  %v2186_v21 = vpop.f32.mrb[77].mxu1 }
 0x33f   : > { %2362 = vst.msk [vmem:[%s3680_s14 + $0x48] sm:$0xff] %vm2352_vm2, %v2345_v47  ;;  %v2309_v48 = vmul.f32 %v2280_v1, %v2186_v21  ;;  %v2933_v49 = vpop.f32.mrb[78].mxu1 }
 0x340   : > { %v2334_v50 = vadd.f32 %v3672_v53, %v2311_v38  ;;  %v2312_v52 = vmul.f32 %v2933_v49, %v2295_v25  ;;  %v2189_v55 = vpop.f32.mrb[79].mxu1 }
 0x341   : > { %v2332_v54 = vadd.f32 %v3672_v53, %v2309_v48  ;;  %v2310_v51 = vmul.f32 %v2285_v3, %v2189_v55 }
 0x342   : > { %v2350_v6 = vmax.f32 %v2334_v50, 0.0  ;;  %v2335_v7 = vadd.f32 %v3672_v53, %v2312_v52 }
 0x343   : > { %v2348_v8 = vmax.f32 %v2332_v54, 0.0  ;;  %v2333_v9 = vadd.f32 %v3672_v53, %v2310_v51 }
 0x344   : > { %2367 = vst.msk [vmem:[%s3680_s14 + $0x70] sm:$0xff] %vm2352_vm2, %v2350_v6  ;;  %v2351_v56 = vmax.f32 %v2335_v7, 0.0 }
 0x345   : > { %2365 = vst.msk [vmem:[%s3680_s14 + $0x60] sm:$0xff] %vm2352_vm2, %v2348_v8  ;;  %v2349_v57 = vmax.f32 %v2333_v9, 0.0 }
 0x346   : > { %2368 = vst.msk [vmem:[%s3680_s14 + $0x78] sm:$0xff] %vm2352_vm2, %v2351_v56 }
 0x347   : > { %2366 = vst.msk [vmem:[%s3680_s14 + $0x68] sm:$0xff] %vm2352_vm2, %v2349_v57 }
 0x348 PF: > { %s18_s27 = sadd.s32 1, %s3177_s27  }
 0x349   : > { %p15_p4 = scmp.ge.s32.totalorder %s18_s27, 6  }
 0x34b   :  { %17 = sbr.rel (!%p15_p4) target bundleno = 1 (0x1), region = 88 }

// kernel: mesh_seg_forward.4
= control target key start
LH: loop header
LB: loop body
LE: loop exit
PB: predicated region body
PF: predicated region fallthrough
CT: control target
= control target key end

     0   :  { %vm359_vm0 = vcmask 1043456   ;;  %vm262_vm1 = vcmask 64512   ;;  %vm692_vm2 = vcmask 130048   ;;  %vm3017_vm3 = vcmask 1041408   ;;  %s7259_s1 = inlined_call_operand.vmem [shape: bf16[8,16], index: 1, kind: input, shape index: {}]   ;;  %s7260_s0 = inlined_call_operand.vmem [shape: bf16[512,8], index: 0, kind: input, shape index: {}]   ;;  %s7261_s3 = inlined_call_operand.vmem [shape: bf16[16,4], index: 3, kind: input, shape index: {}]   ;;  %s7262_s4 = inlined_call_operand.vmem [shape: bf16[16,128], index: 4, kind: input, shape index: {}]   ;;  %s7263_s2 = inlined_call_operand.vmem [shape: f32[1,16], index: 2, kind: input, shape index: {}]   ;;  %s7264_s6 = inlined_call_operand.vmem [shape: bf16[4,128], index: 6, kind: input, shape index: {}]   ;;  %s7265_s5 = inlined_call_operand.vmem [shape: f32[1,4], index: 5, kind: input, shape index: {}]   ;;  %s7266_s8 = inlined_call_operand.vmem [shape: bf16[512,4], index: 8, kind: output, shape index: {1}]   ;;  %s7267_s7 = inlined_call_operand.vmem [shape: bf16[512,4], index: 7, kind: output, shape index: {0}]   ;;  %s7268_s9 = inlined_call_operand.vmem [shape: bf16[512,128], index: 9, kind: output, shape index: {2}]  }
   0x1   :  { %v94_v0 = vld [vmem:[%s7259_s1] sm:$0xf]  ;;  %v4844_v3 = vld [vmem:[%s7260_s0 + $0x8] sm:$0xff]   ;;  %v4845_v4 = vld [vmem:[%s7260_s0 + $0x10] sm:$0xff]   ;;  %vm1447_vm4 = vcmask 31744   ;;  %vm2536_vm5 = vcmask 27648  }
   0x2   :  { %4841 = vmatprep.subr.msk.bf16.mxu0 %vm359_vm0, %v94_v0  ;;  %v361_v1 = vsel %vm359_vm0, %v94_v0, 0  ;;  %v4843_v2 = vld [vmem:[%s7260_s0] sm:$0xff]   ;;  %v4846_v5 = vld [vmem:[%s7260_s0 + $0x18] sm:$0xff]   ;;  %v4848_v7 = vld [vmem:[%s7260_s0 + $0x28] sm:$0xff]  }
   0x3   :  { %4578 = vmatpush3.bf16.msra.mxu0 %v361_v1  ;;  %4579 = vmatprep.mubr.msk.bf16.mxu0 %vm262_vm1, %v4843_v2  ;;  %v4847_v6 = vld [vmem:[%s7260_s0 + $0x20] sm:$0xff]   ;;  %v4849_v8 = vld [vmem:[%s7260_s0 + $0x30] sm:$0xff]   ;;  %v4850_v9 = vld [vmem:[%s7260_s0 + $0x38] sm:$0xff]  }
   0x4   :  { %v4851_v10 = vld [vmem:[%s7260_s0 + $0x40] sm:$0xff]   ;;  %v4852_v11 = vld [vmem:[%s7260_s0 + $0x48] sm:$0xff]   ;;  %v4853_v12 = vld [vmem:[%s7260_s0 + $0x50] sm:$0xff]  }
   0x5   :  { %v4854_v13 = vld [vmem:[%s7260_s0 + $0x58] sm:$0xff]   ;;  %v4855_v14 = vld [vmem:[%s7260_s0 + $0x60] sm:$0xff]   ;;  %v4856_v15 = vld [vmem:[%s7260_s0 + $0x68] sm:$0xff]  }
   0x6   :  { %4580 = vmatmul.mubr.msk.bf16.vlgmr.msra.gmra.mrb[0].mxu0 %vm262_vm1, %v4844_v3  ;;  %v4857_v16 = vld [vmem:[%s7260_s0 + $0x70] sm:$0xff]   ;;  %v4858_v17 = vld [vmem:[%s7260_s0 + $0x78] sm:$0xff]   ;;  %v4859_v18 = vld [vmem:[%s7260_s0 + $0x80] sm:$0xff]  }
   0x7   :  { %4583 = vmatprep.mubr.msk.bf16.mxu0 %vm262_vm1, %v4845_v4  ;;  %v4860_v19 = vld [vmem:[%s7260_s0 + $0x88] sm:$0xff]   ;;  %v4861_v20 = vld [vmem:[%s7260_s0 + $0x90] sm:$0xff]   ;;  %v4862_v21 = vld [vmem:[%s7260_s0 + $0x98] sm:$0xff]  }
   0x8   :  { %v4863_v22 = vld [vmem:[%s7260_s0 + $0xa0] sm:$0xff]   ;;  %v4864_v23 = vld [vmem:[%s7260_s0 + $0xa8] sm:$0xff]   ;;  %v4865_v24 = vld [vmem:[%s7260_s0 + $0xb0] sm:$0xff]  }
   0x9   :  { %v4866_v25 = vld [vmem:[%s7260_s0 + $0xb8] sm:$0xff]   ;;  %v4867_v26 = vld [vmem:[%s7260_s0 + $0xc0] sm:$0xff]   ;;  %v4868_v29 = vld [vmem:[%s7260_s0 + $0xc8] sm:$0xff]  }
   0xa   :  { %v4875_v27 = vld [vmem:[%s7261_s3] sm:$0xff]   ;;  %v4869_v30 = vld [vmem:[%s7260_s0 + $0xd0] sm:$0xff]   ;;  %v4870_v31 = vld [vmem:[%s7260_s0 + $0xd8] sm:$0xff]  }
   0xb   :  { %v4876_v28 = vld [vmem:[%s7262_s4] sm:$0xff]   ;;  %4643 = vmatprep.subr.bf16.mxu1 %v4875_v27  ;;  %v4872_v33 = vld [vmem:[%s7260_s0 + $0xe8] sm:$0xff]   ;;  %v4873_v34 = vld [vmem:[%s7260_s0 + $0xf0] sm:$0xff]  }
   0xc   :  { %4709 = vmatprep.subr.bf16.mxu0 %v4876_v28  ;;  %4644 = vmatpush3.bf16.msra.mxu1 %v4875_v27  ;;  %v4871_v32 = vld [vmem:[%s7260_s0 + $0xe0] sm:$0xff]   ;;  %v4874_v35 = vld [vmem:[%s7260_s0 + $0xf8] sm:$0xff]  }
   0xd   :  { %4710 = vmatpush3.bf16.msra.mxu0 %v4876_v28  ;;  %v5324_v37 = vld [vmem:[%s7263_s2] ss:$0 sm:$0xff] }
   0xe   :  { %4584 = vmatmul.mubr.msk.bf16.gmra.mrb[4].mxu0 %vm262_vm1, %v4846_v5 }
   0xf   :  { %4587 = vmatprep.mubr.msk.bf16.mxu0 %vm262_vm1, %v4847_v6 }
  0x16   :  { %4588 = vmatmul.mubr.msk.bf16.gmra.mrb[8].mxu0 %vm262_vm1, %v4848_v7 }
  0x17   :  { %4591 = vmatprep.mubr.msk.bf16.mxu0 %vm262_vm1, %v4849_v8 }
  0x1e   :  { %4592 = vmatmul.mubr.msk.bf16.gmra.mrb[12].mxu0 %vm262_vm1, %v4850_v9 }
  0x1f   :  { %4595 = vmatprep.mubr.msk.bf16.mxu0 %vm262_vm1, %v4851_v10 }
  0x26   :  { %4596 = vmatmul.mubr.msk.bf16.gmra.mrb[16].mxu0 %vm262_vm1, %v4852_v11 }
  0x27   :  { %4599 = vmatprep.mubr.msk.bf16.mxu0 %vm262_vm1, %v4853_v12 }
  0x2e   :  { %4600 = vmatmul.mubr.msk.bf16.gmra.mrb[20].mxu0 %vm262_vm1, %v4854_v13 }
  0x2f   :  { %4603 = vmatprep.mubr.msk.bf16.mxu0 %vm262_vm1, %v4855_v14 }
  0x36   :  { %4604 = vmatmul.mubr.msk.bf16.gmra.mrb[24].mxu0 %vm262_vm1, %v4856_v15 }
  0x37   :  { %4607 = vmatprep.mubr.msk.bf16.mxu0 %vm262_vm1, %v4857_v16 }
  0x3e   :  { %4608 = vmatmul.mubr.msk.bf16.gmra.mrb[28].mxu0 %vm262_vm1, %v4858_v17 }
  0x3f   :  { %4611 = vmatprep.mubr.msk.bf16.mxu0 %vm262_vm1, %v4859_v18 }
  0x46   :  { %4612 = vmatmul.mubr.msk.bf16.gmra.mrb[32].mxu0 %vm262_vm1, %v4860_v19 }
  0x47   :  { %4615 = vmatprep.mubr.msk.bf16.mxu0 %vm262_vm1, %v4861_v20 }
  0x4e   :  { %4616 = vmatmul.mubr.msk.bf16.gmra.mrb[36].mxu0 %vm262_vm1, %v4862_v21 }
  0x4f   :  { %4619 = vmatprep.mubr.msk.bf16.mxu0 %vm262_vm1, %v4863_v22 }
  0x56   :  { %4620 = vmatmul.mubr.msk.bf16.gmra.mrb[40].mxu0 %vm262_vm1, %v4864_v23 }
  0x57   :  { %4623 = vmatprep.mubr.msk.bf16.mxu0 %vm262_vm1, %v4865_v24 }
  0x5e   :  { %4624 = vmatmul.mubr.msk.bf16.gmra.mrb[44].mxu0 %vm262_vm1, %v4866_v25 }
  0x5f   :  { %4627 = vmatprep.mubr.msk.bf16.mxu0 %vm262_vm1, %v4867_v26 }
  0x66   :  { %4628 = vmatmul.mubr.msk.bf16.gmra.mrb[48].mxu0 %vm262_vm1, %v4868_v29 }
  0x67   :  { %4631 = vmatprep.mubr.msk.bf16.mxu0 %vm262_vm1, %v4869_v30 }
  0x6e   :  { %4632 = vmatmul.mubr.msk.bf16.gmra.mrb[52].mxu0 %vm262_vm1, %v4870_v31 }
  0x6f   :  { %4635 = vmatprep.mubr.msk.bf16.mxu0 %vm262_vm1, %v4871_v32 }
  0x76   :  { %4636 = vmatmul.mubr.msk.bf16.gmra.mrb[56].mxu0 %vm262_vm1, %v4872_v33 }
  0x77   :  { %4639 = vmatprep.mubr.msk.bf16.mxu0 %vm262_vm1, %v4873_v34 }
  0x7e   :  { %4640 = vmatmul.mubr.msk.bf16.gmra.mrb[60].mxu0 %vm262_vm1, %v4874_v35 }
  0xd9   :  { %v4581_v36 = vpop.f32.mrb[0].mxu0 }
  0xda   :  { %v397_v38 = vpop.f32.mrb[1].mxu0  ;;  %v406_v40 = vadd.f32 %v4581_v36, %v5324_v37 }
  0xdb   :  { %v4582_v39 = vpop.f32.mrb[2].mxu0  ;;  %v398_v43 = vadd.f32 %v5324_v37, %v397_v38 }
  0xdc   :  { %v409_v41 = vadd.f32 %v4582_v39, %v5324_v37  ;;  %v400_v42 = vpop.f32.mrb[3].mxu0 }
  0xdd   :  { %v401_v44 = vadd.f32 %v5324_v37, %v400_v42 }
  0xde   :  { %v653_v45 = vpack.c.bf16 %v409_v41, %v406_v40 }
  0xdf   :  { %v652_v46 = vpack.c.bf16 %v401_v44, %v398_v43 }
  0xe1   :  { %v4585_v47 = vpop.f32.mrb[4].mxu0  ;;  %4645 = vmatprep.mubr.msk.bf16.mxu1 %vm692_vm2, %v652_v46  ;;  %4711 = vmatprep.mubr.msk.bf16.mxu0 %vm692_vm2, %v652_v46 }
  0xe2   :  { %v413_v48 = vpop.f32.mrb[5].mxu0  ;;  %4646 = vmatmul.mubr.msk.bf16.vlgmr.msra.gmra.mrb[0].mxu1 %vm692_vm2, %v653_v45  ;;  %4712 = vmatmul.mubr.msk.bf16.vlgmr.msra.gmra.mrb[64].mxu0 %vm692_vm2, %v653_v45  ;;  %v422_v50 = vadd.f32 %v4585_v47, %v5324_v37 }
  0xe3   :  { %v4586_v49 = vpop.f32.mrb[6].mxu0  ;;  %v414_v53 = vadd.f32 %v5324_v37, %v413_v48 }
  0xe4   :  { %v425_v51 = vadd.f32 %v4586_v49, %v5324_v37  ;;  %v416_v52 = vpop.f32.mrb[7].mxu0 }
  0xe5   :  { %v417_v54 = vadd.f32 %v5324_v37, %v416_v52 }
  0xe6   :  { %v655_v55 = vpack.c.bf16 %v425_v51, %v422_v50 }
  0xe7   :  { %v654_v56 = vpack.c.bf16 %v417_v54, %v414_v53 }
  0xe9   :  { %v4589_v57 = vpop.f32.mrb[8].mxu0  ;;  %4649 = vmatprep.mubr.msk.bf16.mxu1 %vm692_vm2, %v654_v56  ;;  %4715 = vmatprep.mubr.msk.bf16.mxu0 %vm692_vm2, %v654_v56 }
  0xea   :  { %v429_v58 = vpop.f32.mrb[9].mxu0  ;;  %4650 = vmatmul.mubr.msk.bf16.gmra.mrb[4].mxu1 %vm692_vm2, %v655_v55  ;;  %4716 = vmatmul.mubr.msk.bf16.gmra.mrb[68].mxu0 %vm692_vm2, %v655_v55  ;;  %v438_v60 = vadd.f32 %v4589_v57, %v5324_v37 }
  0xeb   :  { %v4590_v59 = vpop.f32.mrb[10].mxu0  ;;  %v430_v63 = vadd.f32 %v5324_v37, %v429_v58 }
  0xec   :  { %v441_v61 = vadd.f32 %v4590_v59, %v5324_v37  ;;  %v432_v62 = vpop.f32.mrb[11].mxu0 }
  0xed   :  { %v433_v0 = vadd.f32 %v5324_v37, %v432_v62 }
  0xee   :  { %v657_v1 = vpack.c.bf16 %v441_v61, %v438_v60 }
  0xef   :  { %v656_v2 = vpack.c.bf16 %v433_v0, %v430_v63 }
  0xf1   :  { %v4593_v3 = vpop.f32.mrb[12].mxu0  ;;  %4653 = vmatprep.mubr.msk.bf16.mxu1 %vm692_vm2, %v656_v2  ;;  %4719 = vmatprep.mubr.msk.bf16.mxu0 %vm692_vm2, %v656_v2 }
  0xf2   :  { %v445_v4 = vpop.f32.mrb[13].mxu0  ;;  %4654 = vmatmul.mubr.msk.bf16.gmra.mrb[8].mxu1 %vm692_vm2, %v657_v1  ;;  %4720 = vmatmul.mubr.msk.bf16.gmra.mrb[72].mxu0 %vm692_vm2, %v657_v1  ;;  %v454_v6 = vadd.f32 %v4593_v3, %v5324_v37 }
  0xf3   :  { %v4594_v5 = vpop.f32.mrb[14].mxu0  ;;  %v446_v9 = vadd.f32 %v5324_v37, %v445_v4 }
  0xf4   :  { %v457_v7 = vadd.f32 %v4594_v5, %v5324_v37  ;;  %v448_v8 = vpop.f32.mrb[15].mxu0 }
  0xf5   :  { %v449_v10 = vadd.f32 %v5324_v37, %v448_v8 }
  0xf6   :  { %v659_v11 = vpack.c.bf16 %v457_v7, %v454_v6 }
  0xf7   :  { %v658_v12 = vpack.c.bf16 %v449_v10, %v446_v9 }
  0xf9   :  { %v4597_v13 = vpop.f32.mrb[16].mxu0  ;;  %4657 = vmatprep.mubr.msk.bf16.mxu1 %vm692_vm2, %v658_v12  ;;  %4723 = vmatprep.mubr.msk.bf16.mxu0 %vm692_vm2, %v658_v12 }
  0xfa   :  { %v461_v14 = vpop.f32.mrb[17].mxu0  ;;  %4658 = vmatmul.mubr.msk.bf16.gmra.mrb[12].mxu1 %vm692_vm2, %v659_v11  ;;  %4724 = vmatmul.mubr.msk.bf16.gmra.mrb[76].mxu0 %vm692_vm2, %v659_v11  ;;  %v470_v16 = vadd.f32 %v4597_v13, %v5324_v37 }
  0xfb   :  { %v4598_v15 = vpop.f32.mrb[18].mxu0  ;;  %v462_v19 = vadd.f32 %v5324_v37, %v461_v14 }
  0xfc   :  { %v473_v17 = vadd.f32 %v4598_v15, %v5324_v37  ;;  %v464_v18 = vpop.f32.mrb[19].mxu0 }
  0xfd   :  { %v465_v20 = vadd.f32 %v5324_v37, %v464_v18 }
  0xfe   :  { %v661_v21 = vpack.c.bf16 %v473_v17, %v470_v16 }
  0xff   :  { %v660_v22 = vpack.c.bf16 %v465_v20, %v462_v19 }
 0x101   :  { %v4601_v23 = vpop.f32.mrb[20].mxu0  ;;  %4661 = vmatprep.mubr.msk.bf16.mxu1 %vm692_vm2, %v660_v22  ;;  %4727 = vmatprep.mubr.msk.bf16.mxu0 %vm692_vm2, %v660_v22 }
 0x102   :  { %v477_v24 = vpop.f32.mrb[21].mxu0  ;;  %4662 = vmatmul.mubr.msk.bf16.gmra.mrb[16].mxu1 %vm692_vm2, %v661_v21  ;;  %4728 = vmatmul.mubr.msk.bf16.gmra.mrb[80].mxu0 %vm692_vm2, %v661_v21  ;;  %v486_v26 = vadd.f32 %v4601_v23, %v5324_v37 }
 0x103   :  { %v4602_v25 = vpop.f32.mrb[22].mxu0  ;;  %v478_v29 = vadd.f32 %v5324_v37, %v477_v24 }
 0x104   :  { %v489_v27 = vadd.f32 %v4602_v25, %v5324_v37  ;;  %v480_v28 = vpop.f32.mrb[23].mxu0 }
 0x105   :  { %v481_v30 = vadd.f32 %v5324_v37, %v480_v28 }
 0x106   :  { %v663_v31 = vpack.c.bf16 %v489_v27, %v486_v26 }
 0x107   :  { %v662_v32 = vpack.c.bf16 %v481_v30, %v478_v29 }
 0x109   :  { %v4605_v33 = vpop.f32.mrb[24].mxu0  ;;  %4665 = vmatprep.mubr.msk.bf16.mxu1 %vm692_vm2, %v662_v32  ;;  %4731 = vmatprep.mubr.msk.bf16.mxu0 %vm692_vm2, %v662_v32 }
 0x10a   :  { %v493_v34 = vpop.f32.mrb[25].mxu0  ;;  %4666 = vmatmul.mubr.msk.bf16.gmra.mrb[20].mxu1 %vm692_vm2, %v663_v31  ;;  %4732 = vmatmul.mubr.msk.bf16.gmra.mrb[84].mxu0 %vm692_vm2, %v663_v31  ;;  %v502_v36 = vadd.f32 %v4605_v33, %v5324_v37 }
 0x10b   :  { %v4606_v35 = vpop.f32.mrb[26].mxu0  ;;  %v494_v40 = vadd.f32 %v5324_v37, %v493_v34 }
 0x10c   :  { %v505_v38 = vadd.f32 %v4606_v35, %v5324_v37  ;;  %v496_v39 = vpop.f32.mrb[27].mxu0 }
 0x10d   :  { %v497_v41 = vadd.f32 %v5324_v37, %v496_v39 }
 0x10e   :  { %v665_v42 = vpack.c.bf16 %v505_v38, %v502_v36 }
 0x10f   :  { %v664_v43 = vpack.c.bf16 %v497_v41, %v494_v40 }
 0x111   :  { %v4609_v44 = vpop.f32.mrb[28].mxu0  ;;  %4669 = vmatprep.mubr.msk.bf16.mxu1 %vm692_vm2, %v664_v43  ;;  %4735 = vmatprep.mubr.msk.bf16.mxu0 %vm692_vm2, %v664_v43 }
 0x112   :  { %v509_v45 = vpop.f32.mrb[29].mxu0  ;;  %4670 = vmatmul.mubr.msk.bf16.gmra.mrb[24].mxu1 %vm692_vm2, %v665_v42  ;;  %4736 = vmatmul.mubr.msk.bf16.gmra.mrb[88].mxu0 %vm692_vm2, %v665_v42  ;;  %v518_v47 = vadd.f32 %v4609_v44, %v5324_v37 }
 0x113   :  { %v4610_v46 = vpop.f32.mrb[30].mxu0  ;;  %v510_v50 = vadd.f32 %v5324_v37, %v509_v45 }
 0x114   :  { %v521_v48 = vadd.f32 %v4610_v46, %v5324_v37  ;;  %v512_v49 = vpop.f32.mrb[31].mxu0 }
 0x115   :  { %v513_v51 = vadd.f32 %v5324_v37, %v512_v49 }
 0x116   :  { %v667_v52 = vpack.c.bf16 %v521_v48, %v518_v47 }
 0x117   :  { %v666_v53 = vpack.c.bf16 %v513_v51, %v510_v50 }
 0x119   :  { %v4613_v54 = vpop.f32.mrb[32].mxu0  ;;  %4673 = vmatprep.mubr.msk.bf16.mxu1 %vm692_vm2, %v666_v53  ;;  %4739 = vmatprep.mubr.msk.bf16.mxu0 %vm692_vm2, %v666_v53 }
 0x11a   :  { %v525_v55 = vpop.f32.mrb[33].mxu0  ;;  %4674 = vmatmul.mubr.msk.bf16.gmra.mrb[28].mxu1 %vm692_vm2, %v667_v52  ;;  %4740 = vmatmul.mubr.msk.bf16.gmra.mrb[92].mxu0 %vm692_vm2, %v667_v52  ;;  %v534_v57 = vadd.f32 %v4613_v54, %v5324_v37 }
 0x11b   :  { %v4614_v56 = vpop.f32.mrb[34].mxu0  ;;  %v526_v60 = vadd.f32 %v5324_v37, %v525_v55 }
 0x11c   :  { %v537_v58 = vadd.f32 %v4614_v56, %v5324_v37  ;;  %v528_v59 = vpop.f32.mrb[35].mxu0 }
 0x11d   :  { %v529_v61 = vadd.f32 %v5324_v37, %v528_v59 }
 0x11e   :  { %v669_v62 = vpack.c.bf16 %v537_v58, %v534_v57 }
 0x11f   :  { %v668_v63 = vpack.c.bf16 %v529_v61, %v526_v60 }
 0x121   :  { %v4617_v0 = vpop.f32.mrb[36].mxu0  ;;  %4677 = vmatprep.mubr.msk.bf16.mxu1 %vm692_vm2, %v668_v63  ;;  %4743 = vmatprep.mubr.msk.bf16.mxu0 %vm692_vm2, %v668_v63 }
 0x122   :  { %v541_v1 = vpop.f32.mrb[37].mxu0  ;;  %4678 = vmatmul.mubr.msk.bf16.gmra.mrb[32].mxu1 %vm692_vm2, %v669_v62  ;;  %4744 = vmatmul.mubr.msk.bf16.gmra.mrb[96].mxu0 %vm692_vm2, %v669_v62  ;;  %v550_v3 = vadd.f32 %v4617_v0, %v5324_v37 }
 0x123   :  { %v4618_v2 = vpop.f32.mrb[38].mxu0  ;;  %v542_v6 = vadd.f32 %v5324_v37, %v541_v1 }
 0x124   :  { %v553_v4 = vadd.f32 %v4618_v2, %v5324_v37  ;;  %v544_v5 = vpop.f32.mrb[39].mxu0 }
 0x125   :  { %v545_v7 = vadd.f32 %v5324_v37, %v544_v5 }
 0x126   :  { %v671_v8 = vpack.c.bf16 %v553_v4, %v550_v3 }
 0x127   :  { %v670_v9 = vpack.c.bf16 %v545_v7, %v542_v6  ;;  %v1376_v7 = vld [vmem:[%s7264_s6] sm:$0x3] }
 0x128   :  { %4842 = vmatprep.subr.msk.bf16.mxu1 %vm3017_vm3, %v1376_v7 }
 0x129   :  { %v4621_v10 = vpop.f32.mrb[40].mxu0  ;;  %4681 = vmatprep.mubr.msk.bf16.mxu1 %vm692_vm2, %v670_v9  ;;  %4747 = vmatprep.mubr.msk.bf16.mxu0 %vm692_vm2, %v670_v9 }
 0x12a   :  { %v557_v11 = vpop.f32.mrb[41].mxu0  ;;  %4682 = vmatmul.mubr.msk.bf16.gmra.mrb[36].mxu1 %vm692_vm2, %v671_v8  ;;  %4748 = vmatmul.mubr.msk.bf16.gmra.mrb[100].mxu0 %vm692_vm2, %v671_v8  ;;  %v566_v13 = vadd.f32 %v4621_v10, %v5324_v37  ;;  %v3019_v8 = vsel %vm3017_vm3, %v1376_v7, 0 }
 0x12b   :  { %v4622_v12 = vpop.f32.mrb[42].mxu0  ;;  %v558_v16 = vadd.f32 %v5324_v37, %v557_v11  ;;  %4776 = vmatpush3.bf16.msra.mxu1 %v3019_v8 }
 0x12c   :  { %v569_v14 = vadd.f32 %v4622_v12, %v5324_v37  ;;  %v560_v15 = vpop.f32.mrb[43].mxu0 }
 0x12d   :  { %v561_v17 = vadd.f32 %v5324_v37, %v560_v15 }
 0x12e   :  { %v673_v18 = vpack.c.bf16 %v569_v14, %v566_v13 }
 0x12f   :  { %v672_v19 = vpack.c.bf16 %v561_v17, %v558_v16 }
 0x131   :  { %v4625_v20 = vpop.f32.mrb[44].mxu0  ;;  %4685 = vmatprep.mubr.msk.bf16.mxu1 %vm692_vm2, %v672_v19  ;;  %4751 = vmatprep.mubr.msk.bf16.mxu0 %vm692_vm2, %v672_v19 }
 0x132   :  { %v573_v21 = vpop.f32.mrb[45].mxu0  ;;  %4686 = vmatmul.mubr.msk.bf16.gmra.mrb[40].mxu1 %vm692_vm2, %v673_v18  ;;  %4752 = vmatmul.mubr.msk.bf16.gmra.mrb[104].mxu0 %vm692_vm2, %v673_v18  ;;  %v582_v23 = vadd.f32 %v4625_v20, %v5324_v37 }
 0x133   :  { %v4626_v22 = vpop.f32.mrb[46].mxu0  ;;  %v574_v26 = vadd.f32 %v5324_v37, %v573_v21 }
 0x134   :  { %v585_v24 = vadd.f32 %v4626_v22, %v5324_v37  ;;  %v576_v25 = vpop.f32.mrb[47].mxu0 }
 0x135   :  { %v577_v27 = vadd.f32 %v5324_v37, %v576_v25 }
 0x136   :  { %v675_v28 = vpack.c.bf16 %v585_v24, %v582_v23 }
 0x137   :  { %v674_v29 = vpack.c.bf16 %v577_v27, %v574_v26 }
 0x139   :  { %v4629_v30 = vpop.f32.mrb[48].mxu0  ;;  %4689 = vmatprep.mubr.msk.bf16.mxu1 %vm692_vm2, %v674_v29  ;;  %4755 = vmatprep.mubr.msk.bf16.mxu0 %vm692_vm2, %v674_v29 }
 0x13a   :  { %v589_v31 = vpop.f32.mrb[49].mxu0  ;;  %4690 = vmatmul.mubr.msk.bf16.gmra.mrb[44].mxu1 %vm692_vm2, %v675_v28  ;;  %4756 = vmatmul.mubr.msk.bf16.gmra.mrb[108].mxu0 %vm692_vm2, %v675_v28  ;;  %v598_v33 = vadd.f32 %v4629_v30, %v5324_v37 }
 0x13b   :  { %v4630_v32 = vpop.f32.mrb[50].mxu0  ;;  %v590_v36 = vadd.f32 %v5324_v37, %v589_v31 }
 0x13c   :  { %v601_v34 = vadd.f32 %v4630_v32, %v5324_v37  ;;  %v592_v35 = vpop.f32.mrb[51].mxu0 }
 0x13d   :  { %v593_v38 = vadd.f32 %v5324_v37, %v592_v35 }
 0x13e   :  { %v677_v39 = vpack.c.bf16 %v601_v34, %v598_v33 }
 0x13f   :  { %v676_v40 = vpack.c.bf16 %v593_v38, %v590_v36 }
 0x141   :  { %v4633_v41 = vpop.f32.mrb[52].mxu0  ;;  %4693 = vmatprep.mubr.msk.bf16.mxu1 %vm692_vm2, %v676_v40  ;;  %4759 = vmatprep.mubr.msk.bf16.mxu0 %vm692_vm2, %v676_v40 }
 0x142   :  { %v605_v42 = vpop.f32.mrb[53].mxu0  ;;  %4694 = vmatmul.mubr.msk.bf16.gmra.mrb[48].mxu1 %vm692_vm2, %v677_v39  ;;  %4760 = vmatmul.mubr.msk.bf16.gmra.mrb[112].mxu0 %vm692_vm2, %v677_v39  ;;  %v614_v44 = vadd.f32 %v4633_v41, %v5324_v37 }
 0x143   :  { %v4634_v43 = vpop.f32.mrb[54].mxu0  ;;  %v606_v47 = vadd.f32 %v5324_v37, %v605_v42 }
 0x144   :  { %v617_v45 = vadd.f32 %v4634_v43, %v5324_v37  ;;  %v608_v46 = vpop.f32.mrb[55].mxu0 }
 0x145   :  { %v609_v48 = vadd.f32 %v5324_v37, %v608_v46 }
 0x146   :  { %v679_v49 = vpack.c.bf16 %v617_v45, %v614_v44 }
 0x147   :  { %v678_v50 = vpack.c.bf16 %v609_v48, %v606_v47 }
 0x149   :  { %v4637_v51 = vpop.f32.mrb[56].mxu0  ;;  %4697 = vmatprep.mubr.msk.bf16.mxu1 %vm692_vm2, %v678_v50  ;;  %4763 = vmatprep.mubr.msk.bf16.mxu0 %vm692_vm2, %v678_v50 }
 0x14a   :  { %v621_v52 = vpop.f32.mrb[57].mxu0  ;;  %4698 = vmatmul.mubr.msk.bf16.gmra.mrb[52].mxu1 %vm692_vm2, %v679_v49  ;;  %4764 = vmatmul.mubr.msk.bf16.gmra.mrb[116].mxu0 %vm692_vm2, %v679_v49  ;;  %v630_v54 = vadd.f32 %v4637_v51, %v5324_v37 }
 0x14b   :  { %v4638_v53 = vpop.f32.mrb[58].mxu0  ;;  %v622_v57 = vadd.f32 %v5324_v37, %v621_v52 }
 0x14c   :  { %v633_v55 = vadd.f32 %v4638_v53, %v5324_v37  ;;  %v624_v56 = vpop.f32.mrb[59].mxu0 }
 0x14d   :  { %v625_v58 = vadd.f32 %v5324_v37, %v624_v56 }
 0x14e   :  { %v681_v59 = vpack.c.bf16 %v633_v55, %v630_v54 }
 0x14f   :  { %v680_v60 = vpack.c.bf16 %v625_v58, %v622_v57 }
 0x151   :  { %v4641_v61 = vpop.f32.mrb[60].mxu0  ;;  %4701 = vmatprep.mubr.msk.bf16.mxu1 %vm692_vm2, %v680_v60  ;;  %4767 = vmatprep.mubr.msk.bf16.mxu0 %vm692_vm2, %v680_v60 }
 0x152   :  { %v637_v62 = vpop.f32.mrb[61].mxu0  ;;  %4702 = vmatmul.mubr.msk.bf16.gmra.mrb[56].mxu1 %vm692_vm2, %v681_v59  ;;  %4768 = vmatmul.mubr.msk.bf16.gmra.mrb[120].mxu0 %vm692_vm2, %v681_v59  ;;  %v646_v0 = vadd.f32 %v4641_v61, %v5324_v37 }
 0x153   :  { %v4642_v63 = vpop.f32.mrb[62].mxu0  ;;  %v638_v3 = vadd.f32 %v5324_v37, %v637_v62 }
 0x154   :  { %v649_v1 = vadd.f32 %v4642_v63, %v5324_v37  ;;  %v640_v2 = vpop.f32.mrb[63].mxu0 }
 0x155   :  { %v641_v4 = vadd.f32 %v5324_v37, %v640_v2 }
 0x156   :  { %v683_v5 = vpack.c.bf16 %v649_v1, %v646_v0 }
 0x157   :  { %v682_v6 = vpack.c.bf16 %v641_v4, %v638_v3 }
 0x159   :  { %4705 = vmatprep.mubr.msk.bf16.mxu1 %vm692_vm2, %v682_v6  ;;  %4771 = vmatprep.mubr.msk.bf16.mxu0 %vm692_vm2, %v682_v6 }
 0x15a   :  { %4706 = vmatmul.mubr.msk.bf16.gmra.mrb[60].mxu1 %vm692_vm2, %v683_v5  ;;  %4772 = vmatmul.mubr.msk.bf16.gmra.mrb[124].mxu0 %vm692_vm2, %v683_v5 }
 0x1b5   :  { %v5457_v9 = vpop.f32.mrb[0].mxu1  ;;  %v5459_v37 = vpop.f32.mrb[64].mxu0 }
 0x1b6   :  { %7381 = vst [vmem:[#allocation2_spill] sm:$0xff] %v5459_v37  ;;  %v5461_v10 = vpop.f32.mrb[1].mxu1  ;;  %v5463_v11 = vpop.f32.mrb[65].mxu0  ;;  %v7292_v12 = vsub.f32 0.0, %v5457_v9 }
 0x1b7   :  { %7382 = vst [vmem:[#allocation3_spill] sm:$0xff] %v5463_v11  ;;  %v5466_v13 = vpop.f32.mrb[2].mxu1  ;;  %v5468_v14 = vpop.f32.mrb[66].mxu0  ;;  %v7290_v15 = vsub.f32 0.0, %v5461_v10 }
 0x1b8   :  { %7383 = vst [vmem:[#allocation4_spill] sm:$0xff] %v5468_v14  ;;  %v7289_v16 = vsub.f32 0.0, %v5466_v13  ;;  %v5472_v17 = vpop.f32.mrb[3].mxu1  ;;  %v5474_v18 = vpop.f32.mrb[67].mxu0  ;;  %v1902_v19 = vsel %vm1447_vm4, %v7292_v12, -inf }
 0x1b9   :  { %7384 = vst [vmem:[#allocation5_spill] sm:$0xff] %v5474_v18  ;;  %v7287_v20 = vsub.f32 0.0, %v5472_v17  ;;  %1903 = vmax.xlane.f32.xlu1 %v1902_v19  ;;  %v1896_v21 = vsel %vm1447_vm4, %v7290_v15, -inf }
 0x1ba   :  { %1897 = vmax.xlane.f32.xlu0 %v1896_v21  ;;  %v1905_v22 = vsel %vm1447_vm4, %v7289_v16, -inf }
 0x1bb   :  { %v1899_v25 = vsel %vm1447_vm4, %v7287_v20, -inf }
 0x1bd   :  { %v5486_v23 = vpop.f32.mrb[68].mxu0  ;;  %1906 = vmax.xlane.f32.xlu1 %v1905_v22  ;;  %v5488_v24 = vpop.f32.mrb[4].mxu1 }
 0x1be   :  { %7385 = vst [vmem:[#allocation6_spill] sm:$0xff] %v5486_v23  ;;  %v5493_v26 = vpop.f32.mrb[69].mxu0  ;;  %1900 = vmax.xlane.f32.xlu0 %v1899_v25  ;;  %v5495_v27 = vpop.f32.mrb[5].mxu1  ;;  %v7282_v33 = vsub.f32 0.0, %v5488_v24 }
 0x1bf   :  { %7386 = vst [vmem:[#allocation7_spill] sm:$0xff] %v5493_v26  ;;  %v7285_v28 = vsub.f32 0.0, %v5495_v27  ;;  %v5498_v29 = vpop.f32.mrb[6].mxu1  ;;  %v5500_v30 = vpop.f32.mrb[70].mxu0 }
 0x1c0   :  { %7387 = vst [vmem:[#allocation8_spill] sm:$0xff] %v5500_v30  ;;  %v5502_v31 = vpop.f32.mrb[7].mxu1  ;;  %v5504_v32 = vpop.f32.mrb[71].mxu0  ;;  %v7281_v36 = vsub.f32 0.0, %v5498_v29  ;;  %v1914_v41 = vsel %vm1447_vm4, %v7282_v33, -inf }
 0x1c1   :  { %7388 = vst [vmem:[#allocation9_spill] sm:$0xff] %v5504_v32  ;;  %v7284_v34 = vsub.f32 0.0, %v5502_v31  ;;  %v1908_v35 = vsel %vm1447_vm4, %v7285_v28, -inf }
 0x1c2   :  { %1909 = vmax.xlane.f32.xlu0 %v1908_v35  ;;  %v1917_v47 = vsel %vm1447_vm4, %v7281_v36, -inf }
 0x1c3   :  { %v1911_v38 = vsel %vm1447_vm4, %v7284_v34, -inf }
 0x1c4   :  { %1912 = vmax.xlane.f32.xlu1 %v1911_v38 }
 0x1c5   :  { %v5515_v39 = vpop.f32.mrb[8].mxu1  ;;  %v5517_v40 = vpop.f32.mrb[72].mxu0 }
 0x1c6   :  { %7389 = vst [vmem:[#allocation10_spill] sm:$0xff] %v5517_v40  ;;  %v5522_v42 = vpop.f32.mrb[73].mxu0  ;;  %1915 = vmax.xlane.f32.xlu0 %v1914_v41  ;;  %v5524_v43 = vpop.f32.mrb[9].mxu1  ;;  %v7277_v50 = vsub.f32 0.0, %v5515_v39 }
 0x1c7   :  { %7390 = vst [vmem:[#allocation11_spill] sm:$0xff] %v5522_v42  ;;  %v7280_v44 = vsub.f32 0.0, %v5524_v43  ;;  %v5527_v45 = vpop.f32.mrb[10].mxu1  ;;  %v5529_v46 = vpop.f32.mrb[74].mxu0 }
 0x1c8   :  { %7391 = vst [vmem:[#allocation12_spill] sm:$0xff] %v5529_v46  ;;  %v5534_v48 = vpop.f32.mrb[75].mxu0  ;;  %1918 = vmax.xlane.f32.xlu1 %v1917_v47  ;;  %v5536_v49 = vpop.f32.mrb[11].mxu1  ;;  %v7275_v53 = vsub.f32 0.0, %v5527_v45  ;;  %v1926_v57 = vsel %vm1447_vm4, %v7277_v50, -inf }
 0x1c9   :  { %7392 = vst [vmem:[#allocation13_spill] sm:$0xff] %v5534_v48  ;;  %v7278_v51 = vsub.f32 0.0, %v5536_v49  ;;  %v1920_v52 = vsel %vm1447_vm4, %v7280_v44, -inf }
 0x1ca   :  { %1921 = vmax.xlane.f32.xlu0 %v1920_v52  ;;  %v1929_v63 = vsel %vm1447_vm4, %v7275_v53, -inf }
 0x1cb   :  { %v1923_v54 = vsel %vm1447_vm4, %v7278_v51, -inf }
 0x1cc   :  { %1924 = vmax.xlane.f32.xlu1 %v1923_v54 }
 0x1cd   :  { %v5547_v55 = vpop.f32.mrb[12].mxu1  ;;  %v5549_v56 = vpop.f32.mrb[76].mxu0 }
 0x1ce   :  { %7393 = vst [vmem:[#allocation14_spill] sm:$0xff] %v5549_v56  ;;  %v5554_v58 = vpop.f32.mrb[77].mxu0  ;;  %1927 = vmax.xlane.f32.xlu0 %v1926_v57  ;;  %v5556_v59 = vpop.f32.mrb[13].mxu1  ;;  %v7270_v2 = vsub.f32 0.0, %v5547_v55 }
 0x1cf   :  { %7394 = vst [vmem:[#allocation15_spill] sm:$0xff] %v5554_v58  ;;  %v7273_v60 = vsub.f32 0.0, %v5556_v59  ;;  %v5559_v61 = vpop.f32.mrb[14].mxu1  ;;  %v5561_v62 = vpop.f32.mrb[78].mxu0 }
 0x1d0   :  { %7395 = vst [vmem:[#allocation16_spill] sm:$0xff] %v5561_v62  ;;  %v5566_v0 = vpop.f32.mrb[79].mxu0  ;;  %1930 = vmax.xlane.f32.xlu1 %v1929_v63  ;;  %v5568_v1 = vpop.f32.mrb[15].mxu1  ;;  %v7269_v5 = vsub.f32 0.0, %v5559_v61  ;;  %v1938_v19 = vsel %vm1447_vm4, %v7270_v2, -inf }
 0x1d1   :  { %7396 = vst [vmem:[#allocation17_spill] sm:$0xff] %v5566_v0  ;;  %v7272_v3 = vsub.f32 0.0, %v5568_v1  ;;  %v1932_v4 = vsel %vm1447_vm4, %v7273_v60, -inf }
 0x1d2   :  { %1933 = vmax.xlane.f32.xlu0 %v1932_v4  ;;  %v1941_v41 = vsel %vm1447_vm4, %v7269_v5, -inf }
 0x1d3   :  { %v1935_v6 = vsel %vm1447_vm4, %v7272_v3, -inf }
 0x1d4   :  { %1936 = vmax.xlane.f32.xlu1 %v1935_v6 }
 0x1d5   :  { %v5579_v7 = vpop.f32.mrb[16].mxu1  ;;  %v5581_v8 = vpop.f32.mrb[80].mxu0 }
 0x1d6   :  { %7397 = vst [vmem:[#allocation18_spill] sm:$0xff] %v5581_v8  ;;  %v5586_v21 = vpop.f32.mrb[81].mxu0  ;;  %1939 = vmax.xlane.f32.xlu0 %v1938_v19  ;;  %v5588_v22 = vpop.f32.mrb[17].mxu1  ;;  %v7276_v54 = vsub.f32 0.0, %v5579_v7 }
 0x1d7   :  { %7398 = vst [vmem:[#allocation19_spill] sm:$0xff] %v5586_v21  ;;  %v7271_v25 = vsub.f32 0.0, %v5588_v22  ;;  %v5591_v35 = vpop.f32.mrb[18].mxu1  ;;  %v5593_v38 = vpop.f32.mrb[82].mxu0 }
 0x1d8   :  { %7399 = vst [vmem:[#allocation20_spill] sm:$0xff] %v5593_v38  ;;  %v5598_v47 = vpop.f32.mrb[83].mxu0  ;;  %1942 = vmax.xlane.f32.xlu1 %v1941_v41  ;;  %v5600_v52 = vpop.f32.mrb[19].mxu1  ;;  %v7279_v4 = vsub.f32 0.0, %v5591_v35  ;;  %v1950_v5 = vsel %vm1447_vm4, %v7276_v54, -inf }
 0x1d9   :  { %7400 = vst [vmem:[#allocation21_spill] sm:$0xff] %v5598_v47  ;;  %v7274_v57 = vsub.f32 0.0, %v5600_v52  ;;  %v1944_v63 = vsel %vm1447_vm4, %v7271_v25, -inf }
 0x1da   :  { %1945 = vmax.xlane.f32.xlu0 %v1944_v63 }
 0x1db   :  { %v1947_v6 = vsel %vm1447_vm4, %v7274_v57, -inf }
 0x1dc   :  { %1948 = vmax.xlane.f32.xlu1 %v1947_v6  ;;  %v1953_v6 = vsel %vm1447_vm4, %v7279_v4, -inf }
 0x1dd   :  { %v5611_v19 = vpop.f32.mrb[20].mxu1  ;;  %v5613_v41 = vpop.f32.mrb[84].mxu0 }
 0x1de   :  { %7401 = vst [vmem:[#allocation22_spill] sm:$0xff] %v5613_v41  ;;  %v5618_v2 = vpop.f32.mrb[85].mxu0  ;;  %1951 = vmax.xlane.f32.xlu0 %v1950_v5  ;;  %v5620_v25 = vpop.f32.mrb[21].mxu1  ;;  %v7288_v54 = vsub.f32 0.0, %v5611_v19 }
 0x1df   :  { %7402 = vst [vmem:[#allocation23_spill] sm:$0xff] %v5618_v2  ;;  %v7283_v63 = vsub.f32 0.0, %v5620_v25  ;;  %v5623_v3 = vpop.f32.mrb[22].mxu1  ;;  %v5625_v60 = vpop.f32.mrb[86].mxu0 }
 0x1e0   :  { %7403 = vst [vmem:[#allocation24_spill] sm:$0xff] %v5625_v60  ;;  %v5630_v57 = vpop.f32.mrb[87].mxu0  ;;  %1954 = vmax.xlane.f32.xlu1 %v1953_v6  ;;  %v5632_v53 = vpop.f32.mrb[23].mxu1  ;;  %v7291_v51 = vsub.f32 0.0, %v5623_v3  ;;  %v1962_v36 = vsel %vm1447_vm4, %v7288_v54, -inf }
 0x1e1   :  { %7404 = vst [vmem:[#allocation25_spill] sm:$0xff] %v5630_v57  ;;  %v7286_v5 = vsub.f32 0.0, %v5632_v53  ;;  %v1956_v50 = vsel %vm1447_vm4, %v7283_v63, -inf }
 0x1e2   :  { %1957 = vmax.xlane.f32.xlu0 %v1956_v50 }
 0x1e3   :  { %v1959_v4 = vsel %vm1447_vm4, %v7286_v5, -inf }
 0x1e4   :  { %1960 = vmax.xlane.f32.xlu1 %v1959_v4  ;;  %v1965_v4 = vsel %vm1447_vm4, %v7291_v51, -inf }
 0x1e5   :  { %v5643_v44 = vpop.f32.mrb[24].mxu1  ;;  %v5645_v6 = vpop.f32.mrb[88].mxu0 }
 0x1e6   :  { %7405 = vst [vmem:[#allocation26_spill] sm:$0xff] %v5645_v6  ;;  %v5650_v33 = vpop.f32.mrb[89].mxu0  ;;  %1963 = vmax.xlane.f32.xlu0 %v1962_v36  ;;  %v5652_v63 = vpop.f32.mrb[25].mxu1  ;;  %v7295_v54 = vsub.f32 0.0, %v5643_v44 }
 0x1e7   :  { %7406 = vst [vmem:[#allocation27_spill] sm:$0xff] %v5650_v33  ;;  %v7293_v50 = vsub.f32 0.0, %v5652_v63  ;;  %v5655_v34 = vpop.f32.mrb[26].mxu1  ;;  %v5657_v28 = vpop.f32.mrb[90].mxu0 }
 0x1e8   :  { %7407 = vst [vmem:[#allocation28_spill] sm:$0xff] %v5657_v28  ;;  %v5662_v5 = vpop.f32.mrb[91].mxu0  ;;  %1966 = vmax.xlane.f32.xlu1 %v1965_v4  ;;  %v5664_v20 = vpop.f32.mrb[27].mxu1 }
 0x1e9   :  { %7408 = vst [vmem:[#allocation29_spill] sm:$0xff] %v5662_v5  ;;  %v7294_v36 = vsub.f32 0.0, %v5664_v20  ;;  %v1968_v16 = vsel %vm1447_vm4, %v7293_v50, -inf  ;;  %v1974_v5 = vsel %vm1447_vm4, %v7295_v54, -inf }
 0x1ea   :  { %1969 = vmax.xlane.f32.xlu0 %v1968_v16 }
 0x1eb   :  { %v1971_v51 = vsel %vm1447_vm4, %v7294_v36, -inf }
 0x1ec   :  { %1972 = vmax.xlane.f32.xlu1 %v1971_v51  ;;  %v7412_v51 = vsub.f32 0.0, %v5655_v34 }
 0x1ed   :  { %v5675_v12 = vpop.f32.mrb[28].mxu1  ;;  %v5677_v4 = vpop.f32.mrb[92].mxu0 }
 0x1ee   :  { %7409 = vst [vmem:[#allocation30_spill] sm:$0xff] %v5677_v4  ;;  %v5682_v28 = vpop.f32.mrb[93].mxu0  ;;  %1975 = vmax.xlane.f32.xlu0 %v1974_v5  ;;  %v5684_v50 = vpop.f32.mrb[29].mxu1  ;;  %v1977_v36 = vsel %vm1447_vm4, %v7412_v51, -inf  ;;  %v7298_v54 = vsub.f32 0.0, %v5675_v12 }
 0x1ef   :  { %7410 = vst [vmem:[#allocation31_spill] sm:$0xff] %v5682_v28  ;;  %v7296_v16 = vsub.f32 0.0, %v5684_v50  ;;  %v5687_v15 = vpop.f32.mrb[30].mxu1  ;;  %v5689_v33 = vpop.f32.mrb[94].mxu0 }
 0x1f0   :  { %7411 = vst [vmem:[#allocation32_spill] sm:$0xff] %v5689_v33  ;;  %v5694_v4 = vpop.f32.mrb[95].mxu0  ;;  %1978 = vmax.xlane.f32.xlu1 %v1977_v36  ;;  %v5696_v6 = vpop.f32.mrb[31].mxu1  ;;  %v1986_v57 = vsel %vm1447_vm4, %v7298_v54, -inf }
 0x1f1   :  { %7413 = vst [vmem:[#allocation33_spill] sm:$0xff] %v5694_v4  ;;  %v7297_v5 = vsub.f32 0.0, %v5696_v6  ;;  %v1980_v28 = vsel %vm1447_vm4, %v7296_v16, -inf }
 0x1f2   :  { %1981 = vmax.xlane.f32.xlu0 %v1980_v28 }
 0x1f3   :  { %v1983_v51 = vsel %vm1447_vm4, %v7297_v5, -inf }
 0x1f4   :  { %1984 = vmax.xlane.f32.xlu1 %v1983_v51  ;;  %v7417_v51 = vsub.f32 0.0, %v5687_v15 }
 0x1f5   :  { %v5707_v4 = vpop.f32.mrb[32].mxu1  ;;  %v5709_v36 = vpop.f32.mrb[96].mxu0 }
 0x1f6   :  { %7414 = vst [vmem:[#allocation34_spill] sm:$0xff] %v5709_v36  ;;  %v5714_v60 = vpop.f32.mrb[97].mxu0  ;;  %1987 = vmax.xlane.f32.xlu0 %v1986_v57  ;;  %v5716_v16 = vpop.f32.mrb[33].mxu1  ;;  %v1989_v5 = vsel %vm1447_vm4, %v7417_v51, -inf  ;;  %v7301_v54 = vsub.f32 0.0, %v5707_v4 }
 0x1f7   :  { %7415 = vst [vmem:[#allocation35_spill] sm:$0xff] %v5714_v60  ;;  %v7299_v28 = vsub.f32 0.0, %v5716_v16  ;;  %v5719_v33 = vpop.f32.mrb[34].mxu1  ;;  %v5721_v2 = vpop.f32.mrb[98].mxu0 }
 0x1f8   :  { %7416 = vst [vmem:[#allocation36_spill] sm:$0xff] %v5721_v2  ;;  %v5726_v36 = vpop.f32.mrb[99].mxu0  ;;  %1990 = vmax.xlane.f32.xlu1 %v1989_v5  ;;  %v5728_v41 = vpop.f32.mrb[35].mxu1  ;;  %v1998_v47 = vsel %vm1447_vm4, %v7301_v54, -inf }
 0x1f9   :  { %7418 = vst [vmem:[#allocation37_spill] sm:$0xff] %v5726_v36  ;;  %v7300_v57 = vsub.f32 0.0, %v5728_v41  ;;  %v1992_v60 = vsel %vm1447_vm4, %v7299_v28, -inf }
 0x1fa   :  { %1993 = vmax.xlane.f32.xlu0 %v1992_v60 }
 0x1fb   :  { %v1995_v51 = vsel %vm1447_vm4, %v7300_v57, -inf }
 0x1fc   :  { %1996 = vmax.xlane.f32.xlu1 %v1995_v51  ;;  %v7422_v51 = vsub.f32 0.0, %v5719_v33 }
 0x1fd   :  { %v5739_v36 = vpop.f32.mrb[36].mxu1  ;;  %v5741_v5 = vpop.f32.mrb[100].mxu0 }
 0x1fe   :  { %7419 = vst [vmem:[#allocation38_spill] sm:$0xff] %v5741_v5  ;;  %v5746_v38 = vpop.f32.mrb[101].mxu0  ;;  %1999 = vmax.xlane.f32.xlu0 %v1998_v47  ;;  %v5748_v28 = vpop.f32.mrb[37].mxu1  ;;  %v2001_v57 = vsel %vm1447_vm4, %v7422_v51, -inf  ;;  %v7304_v54 = vsub.f32 0.0, %v5739_v36 }
 0x1ff   :  { %7420 = vst [vmem:[#allocation39_spill] sm:$0xff] %v5746_v38  ;;  %v7302_v60 = vsub.f32 0.0, %v5748_v28  ;;  %v5751_v2 = vpop.f32.mrb[38].mxu1  ;;  %v5753_v21 = vpop.f32.mrb[102].mxu0 }
 0x200   :  { %7421 = vst [vmem:[#allocation40_spill] sm:$0xff] %v5753_v21  ;;  %v5758_v5 = vpop.f32.mrb[103].mxu0  ;;  %2002 = vmax.xlane.f32.xlu1 %v2001_v57  ;;  %v5760_v8 = vpop.f32.mrb[39].mxu1  ;;  %v2010_v0 = vsel %vm1447_vm4, %v7304_v54, -inf }
 0x201   :  { %7423 = vst [vmem:[#allocation41_spill] sm:$0xff] %v5758_v5  ;;  %v7303_v47 = vsub.f32 0.0, %v5760_v8  ;;  %v2004_v38 = vsel %vm1447_vm4, %v7302_v60, -inf }
 0x202   :  { %2005 = vmax.xlane.f32.xlu0 %v2004_v38 }
 0x203   :  { %v2007_v51 = vsel %vm1447_vm4, %v7303_v47, -inf }
 0x204   :  { %2008 = vmax.xlane.f32.xlu1 %v2007_v51  ;;  %v7427_v51 = vsub.f32 0.0, %v5751_v2 }
 0x205   :  { %v5771_v5 = vpop.f32.mrb[40].mxu1  ;;  %v5773_v57 = vpop.f32.mrb[104].mxu0 }
 0x206   :  { %7424 = vst [vmem:[#allocation42_spill] sm:$0xff] %v5773_v57  ;;  %v5778_v62 = vpop.f32.mrb[105].mxu0  ;;  %2011 = vmax.xlane.f32.xlu0 %v2010_v0  ;;  %v5780_v60 = vpop.f32.mrb[41].mxu1  ;;  %v2013_v47 = vsel %vm1447_vm4, %v7427_v51, -inf  ;;  %v7307_v54 = vsub.f32 0.0, %v5771_v5 }
 0x207   :  { %7425 = vst [vmem:[#allocation43_spill] sm:$0xff] %v5778_v62  ;;  %v7305_v38 = vsub.f32 0.0, %v5780_v60  ;;  %v5783_v21 = vpop.f32.mrb[42].mxu1  ;;  %v5785_v58 = vpop.f32.mrb[106].mxu0 }
 0x208   :  { %7426 = vst [vmem:[#allocation44_spill] sm:$0xff] %v5785_v58  ;;  %v5790_v57 = vpop.f32.mrb[107].mxu0  ;;  %2014 = vmax.xlane.f32.xlu1 %v2013_v47  ;;  %v5792_v56 = vpop.f32.mrb[43].mxu1  ;;  %v2022_v48 = vsel %vm1447_vm4, %v7307_v54, -inf }
 0x209   :  { %7428 = vst [vmem:[#allocation45_spill] sm:$0xff] %v5790_v57  ;;  %v7306_v0 = vsub.f32 0.0, %v5792_v56  ;;  %v2016_v62 = vsel %vm1447_vm4, %v7305_v38, -inf }
 0x20a   :  { %2017 = vmax.xlane.f32.xlu0 %v2016_v62 }
 0x20b   :  { %v2019_v51 = vsel %vm1447_vm4, %v7306_v0, -inf }
 0x20c   :  { %2020 = vmax.xlane.f32.xlu1 %v2019_v51  ;;  %v7432_v51 = vsub.f32 0.0, %v5783_v21 }
 0x20d   :  { %v5803_v57 = vpop.f32.mrb[44].mxu1  ;;  %v5805_v47 = vpop.f32.mrb[108].mxu0 }
 0x20e   :  { %7429 = vst [vmem:[#allocation46_spill] sm:$0xff] %v5805_v47  ;;  %v5810_v46 = vpop.f32.mrb[109].mxu0  ;;  %2023 = vmax.xlane.f32.xlu0 %v2022_v48  ;;  %v5812_v38 = vpop.f32.mrb[45].mxu1  ;;  %v2025_v0 = vsel %vm1447_vm4, %v7432_v51, -inf  ;;  %v7310_v54 = vsub.f32 0.0, %v5803_v57 }
 0x20f   :  { %7430 = vst [vmem:[#allocation47_spill] sm:$0xff] %v5810_v46  ;;  %v7308_v62 = vsub.f32 0.0, %v5812_v38  ;;  %v5815_v58 = vpop.f32.mrb[46].mxu1  ;;  %v5817_v42 = vpop.f32.mrb[110].mxu0 }
 0x210   :  { %7431 = vst [vmem:[#allocation48_spill] sm:$0xff] %v5817_v42  ;;  %v5822_v47 = vpop.f32.mrb[111].mxu0  ;;  %2026 = vmax.xlane.f32.xlu1 %v2025_v0  ;;  %v5824_v40 = vpop.f32.mrb[47].mxu1  ;;  %v2034_v32 = vsel %vm1447_vm4, %v7310_v54, -inf }
 0x211   :  { %7433 = vst [vmem:[#allocation49_spill] sm:$0xff] %v5822_v47  ;;  %v7309_v48 = vsub.f32 0.0, %v5824_v40  ;;  %v2028_v46 = vsel %vm1447_vm4, %v7308_v62, -inf }
 0x212   :  { %2029 = vmax.xlane.f32.xlu0 %v2028_v46 }
 0x213   :  { %v2031_v51 = vsel %vm1447_vm4, %v7309_v48, -inf }
 0x214   :  { %2032 = vmax.xlane.f32.xlu1 %v2031_v51  ;;  %v7440_v51 = vsub.f32 0.0, %v5815_v58 }
 0x215   :  { %v5835_v47 = vpop.f32.mrb[48].mxu1  ;;  %v5837_v0 = vpop.f32.mrb[112].mxu0 }
 0x216   :  { %7434 = vst [vmem:[#allocation50_spill] sm:$0xff] %v5835_v47  ;;  %7435 = vst [vmem:[#allocation51_spill] sm:$0xff] %v5837_v0  ;;  %v5842_v30 = vpop.f32.mrb[113].mxu0  ;;  %2035 = vmax.xlane.f32.xlu0 %v2034_v32  ;;  %v5844_v62 = vpop.f32.mrb[49].mxu1  ;;  %v2037_v48 = vsel %vm1447_vm4, %v7440_v51, -inf  ;;  %v7313_v54 = vsub.f32 0.0, %v5835_v47 }
 0x217   :  { %7436 = vst [vmem:[#allocation52_spill] sm:$0xff] %v5842_v30  ;;  %7437 = vst [vmem:[#allocation53_spill] sm:$0xff] %v5844_v62  ;;  %v7311_v46 = vsub.f32 0.0, %v5844_v62  ;;  %v5847_v42 = vpop.f32.mrb[50].mxu1  ;;  %v5849_v26 = vpop.f32.mrb[114].mxu0 }
 0x218   :  { %7438 = vst [vmem:[#allocation54_spill] sm:$0xff] %v5847_v42  ;;  %7439 = vst [vmem:[#allocation55_spill] sm:$0xff] %v5849_v26  ;;  %v5854_v0 = vpop.f32.mrb[115].mxu0  ;;  %2038 = vmax.xlane.f32.xlu1 %v2037_v48  ;;  %v5856_v23 = vpop.f32.mrb[51].mxu1  ;;  %v2046_v18 = vsel %vm1447_vm4, %v7313_v54, -inf }
 0x219   :  { %7441 = vst [vmem:[#allocation56_spill] sm:$0xff] %v5854_v0  ;;  %7442 = vst [vmem:[#allocation57_spill] sm:$0xff] %v5856_v23  ;;  %v7312_v32 = vsub.f32 0.0, %v5856_v23  ;;  %v2040_v30 = vsel %vm1447_vm4, %v7311_v46, -inf }
 0x21a   :  { %2041 = vmax.xlane.f32.xlu0 %v2040_v30 }
 0x21b   :  { %v2043_v51 = vsel %vm1447_vm4, %v7312_v32, -inf }
 0x21c   :  { %2044 = vmax.xlane.f32.xlu1 %v2043_v51  ;;  %v7449_v51 = vsub.f32 0.0, %v5847_v42 }
 0x21d   :  { %v5867_v0 = vpop.f32.mrb[52].mxu1  ;;  %v5869_v48 = vpop.f32.mrb[116].mxu0 }
 0x21e   :  { %7443 = vst [vmem:[#allocation58_spill] sm:$0xff] %v5867_v0  ;;  %7444 = vst [vmem:[#allocation59_spill] sm:$0xff] %v5869_v48  ;;  %v5874_v14 = vpop.f32.mrb[117].mxu0  ;;  %2047 = vmax.xlane.f32.xlu0 %v2046_v18  ;;  %v5876_v46 = vpop.f32.mrb[53].mxu1  ;;  %v2049_v32 = vsel %vm1447_vm4, %v7449_v51, -inf  ;;  %v7324_v54 = vsub.f32 0.0, %v5867_v0 }
 0x21f   :  { %7445 = vst [vmem:[#allocation60_spill] sm:$0xff] %v5874_v14  ;;  %7446 = vst [vmem:[#allocation61_spill] sm:$0xff] %v5876_v46  ;;  %v7318_v30 = vsub.f32 0.0, %v5876_v46  ;;  %v5879_v26 = vpop.f32.mrb[54].mxu1  ;;  %v5881_v11 = vpop.f32.mrb[118].mxu0 }
 0x220   :  { %7447 = vst [vmem:[#allocation62_spill] sm:$0xff] %v5879_v26  ;;  %7448 = vst [vmem:[#allocation63_spill] sm:$0xff] %v5881_v11  ;;  %v5886_v48 = vpop.f32.mrb[119].mxu0  ;;  %2050 = vmax.xlane.f32.xlu1 %v2049_v32  ;;  %v5888_v37 = vpop.f32.mrb[55].mxu1  ;;  %v2058_v42 = vsel %vm1447_vm4, %v7324_v54, -inf }
 0x221   :  { %7450 = vst [vmem:[#allocation64_spill] sm:$0xff] %v5886_v48  ;;  %7451 = vst [vmem:[#allocation65_spill] sm:$0xff] %v5888_v37  ;;  %v7321_v18 = vsub.f32 0.0, %v5888_v37  ;;  %v2052_v14 = vsel %vm1447_vm4, %v7318_v30, -inf }
 0x222   :  { %2053 = vmax.xlane.f32.xlu0 %v2052_v14 }
 0x223   :  { %v2055_v51 = vsel %vm1447_vm4, %v7321_v18, -inf }
 0x224   :  { %2056 = vmax.xlane.f32.xlu1 %v2055_v51  ;;  %v7458_v51 = vsub.f32 0.0, %v5879_v26 }
 0x225   :  { %v5899_v48 = vpop.f32.mrb[56].mxu1  ;;  %v5901_v32 = vpop.f32.mrb[120].mxu0 }
 0x226   :  { %7452 = vst [vmem:[#allocation66_spill] sm:$0xff] %v5899_v48  ;;  %7453 = vst [vmem:[#allocation67_spill] sm:$0xff] %v5901_v32  ;;  %v5906_v47 = vpop.f32.mrb[121].mxu0  ;;  %2059 = vmax.xlane.f32.xlu0 %v2058_v42  ;;  %v5908_v30 = vpop.f32.mrb[57].mxu1  ;;  %v2061_v18 = vsel %vm1447_vm4, %v7458_v51, -inf  ;;  %v7335_v54 = vsub.f32 0.0, %v5899_v48 }
 0x227   :  { %7454 = vst [vmem:[#allocation68_spill] sm:$0xff] %v5906_v47  ;;  %7455 = vst [vmem:[#allocation69_spill] sm:$0xff] %v5908_v30  ;;  %v7329_v14 = vsub.f32 0.0, %v5908_v30  ;;  %v5911_v11 = vpop.f32.mrb[58].mxu1  ;;  %v5913_v37 = vpop.f32.mrb[122].mxu0 }
 0x228   :  { %7456 = vst [vmem:[#allocation70_spill] sm:$0xff] %v5911_v11  ;;  %7457 = vst [vmem:[#allocation71_spill] sm:$0xff] %v5913_v37  ;;  %v5918_v32 = vpop.f32.mrb[123].mxu0  ;;  %2062 = vmax.xlane.f32.xlu1 %v2061_v18  ;;  %v5920_v0 = vpop.f32.mrb[59].mxu1  ;;  %v2070_v26 = vsel %vm1447_vm4, %v7335_v54, -inf }
 0x229   :  { %7459 = vst [vmem:[#allocation72_spill] sm:$0xff] %v5918_v32  ;;  %7460 = vst [vmem:[#allocation73_spill] sm:$0xff] %v5920_v0  ;;  %v7332_v42 = vsub.f32 0.0, %v5920_v0  ;;  %v2064_v47 = vsel %vm1447_vm4, %v7329_v14, -inf }
 0x22a   :  { %2065 = vmax.xlane.f32.xlu0 %v2064_v47 }
 0x22b   :  { %v2067_v51 = vsel %vm1447_vm4, %v7332_v42, -inf }
 0x22c   :  { %2068 = vmax.xlane.f32.xlu1 %v2067_v51  ;;  %v7467_v51 = vsub.f32 0.0, %v5911_v11 }
 0x22d   :  { %v5931_v32 = vpop.f32.mrb[60].mxu1  ;;  %v5933_v18 = vpop.f32.mrb[124].mxu0 }
 0x22e   :  { %7461 = vst [vmem:[#allocation74_spill] sm:$0xff] %v5931_v32  ;;  %7462 = vst [vmem:[#allocation75_spill] sm:$0xff] %v5933_v18  ;;  %v5938_v46 = vpop.f32.mrb[125].mxu0  ;;  %2071 = vmax.xlane.f32.xlu0 %v2070_v26  ;;  %v5940_v14 = vpop.f32.mrb[61].mxu1  ;;  %v2073_v42 = vsel %vm1447_vm4, %v7467_v51, -inf }
 0x22f   :  { %7463 = vst [vmem:[#allocation76_spill] sm:$0xff] %v5938_v46  ;;  %7464 = vst [vmem:[#allocation77_spill] sm:$0xff] %v5940_v14  ;;  %v7336_v47 = vsub.f32 0.0, %v5940_v14  ;;  %v5943_v37 = vpop.f32.mrb[62].mxu1  ;;  %v5945_v0 = vpop.f32.mrb[126].mxu0 }
 0x230   :  { %7465 = vst [vmem:[#allocation78_spill] sm:$0xff] %v5943_v37  ;;  %7466 = vst [vmem:[#allocation79_spill] sm:$0xff] %v5945_v0  ;;  %v5950_v18 = vpop.f32.mrb[127].mxu0  ;;  %2074 = vmax.xlane.f32.xlu1 %v2073_v42  ;;  %v5952_v48 = vpop.f32.mrb[63].mxu1  ;;  %v5962_v0 = vld [vmem:[%s7265_s5] ss:$0 sm:$0xff] }
 0x231   :  { %7468 = vst [vmem:[#allocation80_spill] sm:$0xff] %v5950_v18  ;;  %7469 = vst [vmem:[#allocation81_spill] sm:$0xff] %v5952_v48  ;;  %v7339_v26 = vsub.f32 0.0, %v5952_v48  ;;  %v2076_v46 = vsel %vm1447_vm4, %v7336_v47, -inf  ;;  %v7340_v51 = vsub.f32 0.0, %v5943_v37  ;;  %v5970_v54 = vadd.f32 %v5962_v0, %v5461_v10 }
 0x232   :  { %2077 = vmax.xlane.f32.xlu0 %v2076_v46  ;;  %v7471_v18 = vsub.f32 0.0, %v5931_v32  ;;  %v5977_v14 = vadd.f32 %v5962_v0, %v5472_v17 }
 0x233   :  { %v2079_v42 = vsel %vm1447_vm4, %v7339_v26, -inf  ;;  %7470 = vst [vmem:[#allocation82_spill] sm:$0xff] %v5970_v54  ;;  %v2085_v46 = vsel %vm1447_vm4, %v7340_v51, -inf  ;;  %v1448_v26 = vsel %vm1447_vm4, %v5970_v54, -inf  ;;  %v5996_v51 = vadd.f32 %v5962_v0, %v5495_v27 }
 0x234   :  { %2080 = vmax.xlane.f32.xlu1 %v2079_v42  ;;  %v2082_v47 = vsel %vm1447_vm4, %v7471_v18, -inf  ;;  %7472 = vst [vmem:[#allocation83_spill] sm:$0xff] %v5977_v14  ;;  %v5984_v42 = vadd.f32 %v5457_v9, %v5962_v0  ;;  %v5990_v18 = vadd.f32 %v5466_v13, %v5962_v0  ;;  %v6002_v54 = vadd.f32 %v5962_v0, %v5502_v31 }
 0x235   :  { %7475 = vst [vmem:[#allocation86_spill] sm:$0xff] %v5996_v51 }
 0x236   :  { %2083 = vmax.xlane.f32.xlu0 %v2082_v47  ;;  %7473 = vst [vmem:[#allocation84_spill] sm:$0xff] %v5984_v42  ;;  %7474 = vst [vmem:[#allocation85_spill] sm:$0xff] %v5990_v18  ;;  %v1451_v47 = vsel %vm1447_vm4, %v5977_v14, -inf  ;;  %v6008_v14 = vadd.f32 %v5488_v24, %v5962_v0 }
 0x237   :  { %7476 = vst [vmem:[#allocation87_spill] sm:$0xff] %v6002_v54 }
 0x238   :  { %2086 = vmax.xlane.f32.xlu1 %v2085_v46  ;;  %v1454_v46 = vsel %vm1447_vm4, %v5984_v42, -inf  ;;  %7477 = vst [vmem:[#allocation88_spill] sm:$0xff] %v6008_v14  ;;  %v6014_v42 = vadd.f32 %v5498_v29, %v5962_v0 }
 0x23a   :  { %1449 = vmax.xlane.f32.xlu0 %v1448_v26  ;;  %v1457_v26 = vsel %vm1447_vm4, %v5990_v18, -inf  ;;  %v6020_v18 = vadd.f32 %v5962_v0, %v5524_v43 }
 0x23c   :  { %1452 = vmax.xlane.f32.xlu1 %v1451_v47  ;;  %v1460_v47 = vsel %vm1447_vm4, %v5996_v51, -inf  ;;  %v7478_v51 = vsub.f32 0.0, %v5457_v9  ;;  %v1472_v30 = vsel %vm1447_vm4, %v6020_v18, -inf  ;;  %v6042_v9 = vadd.f32 %v5527_v45, %v5962_v0 }
 0x23e   :  { %1455 = vmax.xlane.f32.xlu0 %v1454_v46  ;;  %v1463_v46 = vsel %vm1447_vm4, %v6002_v54, -inf  ;;  %v7479_v54 = vsub.f32 0.0, %v5461_v10  ;;  %7481 = vst [vmem:[#allocation90_spill] sm:$0xff] %v6042_v9 }
 0x240   :  { %1458 = vmax.xlane.f32.xlu1 %v1457_v26  ;;  %v1466_v26 = vsel %vm1447_vm4, %v6008_v14, -inf  ;;  %v6036_v14 = vadd.f32 %v5515_v39, %v5962_v0 }
 0x242   :  { %1461 = vmax.xlane.f32.xlu0 %v1460_v47  ;;  %v6026_v47 = vadd.f32 %v5962_v0, %v5536_v49  ;;  %7480 = vst [vmem:[#allocation89_spill] sm:$0xff] %v6036_v14 }
 0x244   :  { %1464 = vmax.xlane.f32.xlu1 %v1463_v46  ;;  %v1469_v46 = vsel %vm1447_vm4, %v6014_v42, -inf }
 0x246   :  { %v1904_v37 = vpop.xlane.xlu1 %1903  ;;  %1467 = vmax.xlane.f32.xlu0 %v1466_v26 }
 0x247   :  { %v2090_v32 = vsub.f32 %v7478_v51, %v1904_v37  ;;  %v1898_v48 = vpop.xlane.xlu0 %1897  ;;  %v7482_v37 = vsub.f32 0.0, %v5466_v13  ;;  %v6058_v13 = vadd.f32 %v5962_v0, %v5568_v1 }
 0x248   :  { %v2088_v11 = vsub.f32 %v7479_v54, %v1898_v48  ;;  %1470 = vmax.xlane.f32.xlu1 %v1469_v46  ;;  %v1475_v48 = vsel %vm1447_vm4, %v6026_v47, -inf  ;;  %v1478_v46 = vsel %vm1447_vm4, %v6036_v14, -inf }
 0x249   :  { %v2156_v26 = vmul.f32 1.442695, %v2090_v32  ;;  %v7483_v32 = vsub.f32 0.0, %v5472_v17  ;;  %7485 = vst [vmem:[#allocation92_spill] sm:$0xff] %v6058_v13  ;;  %v1481_v17 = vsel %vm1447_vm4, %v6042_v9, -inf }
 0x24a   :  { %v2152_v23 = vmul.f32 1.442695, %v2088_v11  ;;  %v1907_v62 = vpop.xlane.xlu1 %1906  ;;  %1473 = vmax.xlane.f32.xlu0 %v1472_v30  ;;  %v6052_v11 = vadd.f32 %v5962_v0, %v5556_v59 }
 0x24b   :  { %4877 = vpow2.f32 %v2156_v26  ;;  %v2091_v10 = vsub.f32 %v7482_v37, %v1907_v62  ;;  %v1901_v54 = vpop.xlane.xlu0 %1900  ;;  %v7486_v62 = vsub.f32 0.0, %v5495_v27 }
 0x24c   :  { %4879 = vpow2.f32 %v2152_v23  ;;  %v2089_v51 = vsub.f32 %v7483_v32, %v1901_v54  ;;  %1476 = vmax.xlane.f32.xlu1 %v1475_v48  ;;  %7484 = vst [vmem:[#allocation91_spill] sm:$0xff] %v6052_v11  ;;  %v1484_v48 = vsel %vm1447_vm4, %v6052_v11, -inf }
 0x24d   :  { %v2158_v30 = vmul.f32 1.442695, %v2091_v10  ;;  %v6066_v10 = vadd.f32 %v5547_v55, %v5962_v0 }
 0x24e   :  { %v2154_v26 = vmul.f32 1.442695, %v2089_v51  ;;  %1479 = vmax.xlane.f32.xlu0 %v1478_v46  ;;  %v7488_v51 = vsub.f32 0.0, %v5502_v31  ;;  %v6074_v46 = vadd.f32 %v5559_v61, %v5962_v0  ;;  %v6082_v31 = vadd.f32 %v5962_v0, %v5588_v22 }
 0x24f   :  { %4881 = vpow2.f32 %v2158_v30  ;;  %v1910_v23 = vpop.xlane.xlu0 %1909  ;;  %7487 = vst [vmem:[#allocation93_spill] sm:$0xff] %v6066_v10 }
 0x250   :  { %4883 = vpow2.f32 %v2154_v26  ;;  %v2092_v37 = vsub.f32 %v7486_v62, %v1910_v23  ;;  %1482 = vmax.xlane.f32.xlu1 %v1481_v17  ;;  %7489 = vst [vmem:[#allocation94_spill] sm:$0xff] %v6074_v46  ;;  %v1487_v26 = vsel %vm1447_vm4, %v6058_v13, -inf  ;;  %v7490_v17 = vsub.f32 0.0, %v5488_v24 }
 0x251   :  { %v1913_v54 = vpop.xlane.xlu1 %1912  ;;  %v6090_v24 = vadd.f32 %v5962_v0, %v5600_v52 }
 0x252   :  { %v2160_v32 = vmul.f32 1.442695, %v2092_v37  ;;  %v2093_v30 = vsub.f32 %v7488_v51, %v1913_v54  ;;  %1485 = vmax.xlane.f32.xlu0 %v1484_v48  ;;  %v1490_v54 = vsel %vm1447_vm4, %v6066_v10, -inf }
 0x253   :  { %v1916_v27 = vpop.xlane.xlu0 %1915 }
 0x254   :  { %4885 = vpow2.f32 %v2160_v32  ;;  %v2162_v23 = vmul.f32 1.442695, %v2093_v30  ;;  %v2094_v62 = vsub.f32 %v7490_v17, %v1916_v27  ;;  %1488 = vmax.xlane.f32.xlu1 %v1487_v26  ;;  %v7491_v32 = vsub.f32 0.0, %v5498_v29 }
 0x255   :  { %v4878_v11 = vpop.eup %4877  ;;  %v1919_v37 = vpop.xlane.xlu1 %1918  ;;  %v1493_v17 = vsel %vm1447_vm4, %v6074_v46, -inf  ;;  %v7492_v29 = vsub.f32 0.0, %v5524_v43  ;;  %v6112_v43 = vadd.f32 %v5591_v35, %v5962_v0 }
 0x256   :  { %v4880_v48 = vpop.eup %4879  ;;  %v4128_v51 = vpack.c.bf16 %v4878_v11, %v4878_v11  ;;  %4887 = vpow2.f32 %v2162_v23  ;;  %v2164_v13 = vmul.f32 1.442695, %v2094_v62  ;;  %v2095_v30 = vsub.f32 %v7491_v32, %v1919_v37  ;;  %1491 = vmax.xlane.f32.xlu0 %v1490_v54 }
 0x257   :  { %v4126_v27 = vpack.c.bf16 %v4880_v48, %v4880_v48  ;;  %v1922_v26 = vpop.xlane.xlu0 %1921  ;;  %v6102_v54 = vadd.f32 %v5579_v7, %v5962_v0 }
 0x258   :  { %2859 = vst.msk [vmem:[%s7266_s8 + $0x8] sm:$0xf] %vm2536_vm5, %v4128_v51  ;;  %4889 = vpow2.f32 %v2164_v13  ;;  %v2166_v23 = vmul.f32 1.442695, %v2095_v30  ;;  %v2096_v62 = vsub.f32 %v7492_v29, %v1922_v26  ;;  %1494 = vmax.xlane.f32.xlu1 %v1493_v17  ;;  %v1496_v51 = vsel %vm1447_vm4, %v6082_v31, -inf }
 0x259   :  { %v4882_v37 = vpop.eup %4881  ;;  %2857 = vst.msk [vmem:[%s7266_s8] sm:$0xf] %vm2536_vm5, %v4126_v27  ;;  %v1925_v32 = vpop.xlane.xlu1 %1924  ;;  %v7493_v29 = vsub.f32 0.0, %v5536_v49  ;;  %v1499_v27 = vsel %vm1447_vm4, %v6090_v24, -inf  ;;  %v6126_v49 = vadd.f32 %v5962_v0, %v5620_v25 }
 0x25a   :  { %v4884_v13 = vpop.eup %4883  ;;  %v4129_v30 = vpack.c.bf16 %v4882_v37, %v4882_v37  ;;  %4891 = vpow2.f32 %v2166_v23  ;;  %v2168_v26 = vmul.f32 1.442695, %v2096_v62  ;;  %1497 = vmax.xlane.f32.xlu0 %v1496_v51  ;;  %v2602_v14 = vpack.c.bf16 %v4882_v37, %v4878_v11 }
 0x25b   :  { %v4127_v17 = vpack.c.bf16 %v4884_v13, %v4884_v13  ;;  %v2097_v46 = vsub.f32 %v7493_v29, %v1925_v32  ;;  %v1928_v10 = vpop.xlane.xlu0 %1927  ;;  %v2601_v9 = vpack.c.bf16 %v4884_v13, %v4880_v48  ;;  %v7494_v23 = vsub.f32 0.0, %v5515_v39 }
 0x25c   :  { %2860 = vst.msk [vmem:[%s7266_s8 + $0xc] sm:$0xf] %vm2536_vm5, %v4129_v30  ;;  %4893 = vpow2.f32 %v2168_v26  ;;  %1500 = vmax.xlane.f32.xlu1 %v1499_v27  ;;  %v1502_v37 = vsel %vm1447_vm4, %v6102_v54, -inf  ;;  %v6140_v13 = vadd.f32 %v5962_v0, %v5632_v53  ;;  %v7496_v29 = vsub.f32 0.0, %v5556_v59 }
 0x25d   :  { %v2098_v62 = vsub.f32 %v7494_v23, %v1928_v10  ;;  %2858 = vst.msk [vmem:[%s7266_s8 + $0x4] sm:$0xf] %vm2536_vm5, %v4127_v17  ;;  %v2170_v11 = vmul.f32 1.442695, %v2097_v46  ;;  %4777 = vmatprep.mubr.msk.bf16.mxu1 %vm1447_vm4, %v2601_v9  ;;  %v1931_v48 = vpop.xlane.xlu1 %1930  ;;  %v7495_v10 = vsub.f32 0.0, %v5527_v45  ;;  %v1505_v9 = vsel %vm1447_vm4, %v6112_v43, -inf }
 0x25e   :  { %v4886_v32 = vpop.eup %4885  ;;  %4778 = vmatmul.mubr.msk.bf16.vlgmr.msra.gmra.mrb[64].mxu1 %vm1447_vm4, %v2602_v14  ;;  %1503 = vmax.xlane.f32.xlu0 %v1502_v37  ;;  %v6148_v14 = vadd.f32 %v5611_v19, %v5962_v0  ;;  %v7497_v37 = vsub.f32 0.0, %v5568_v1 }
 0x25f   :  { %v2172_v39 = vmul.f32 1.442695, %v2098_v62  ;;  %v2099_v51 = vsub.f32 %v7495_v10, %v1931_v48  ;;  %v4130_v30 = vpack.c.bf16 %v4886_v32, %v4886_v32  ;;  %4895 = vpow2.f32 %v2170_v11  ;;  %v1934_v46 = vpop.xlane.xlu0 %1933 }
 0x260   :  { %v4888_v26 = vpop.eup %4887  ;;  %v2100_v45 = vsub.f32 %v7496_v29, %v1934_v46  ;;  %1506 = vmax.xlane.f32.xlu1 %v1505_v9  ;;  %v1508_v62 = vsel %vm1447_vm4, %v6126_v49, -inf  ;;  %v6160_v10 = vadd.f32 %v5623_v3, %v5962_v0  ;;  %v7498_v9 = vsub.f32 0.0, %v5547_v55 }
 0x261   :  { %4897 = vpow2.f32 %v2172_v39  ;;  %v2174_v17 = vmul.f32 1.442695, %v2099_v51  ;;  %2861 = vst.msk [vmem:[%s7266_s8 + $0x10] sm:$0xf] %vm2536_vm5, %v4130_v30  ;;  %v4131_v27 = vpack.c.bf16 %v4888_v26, %v4888_v26  ;;  %v1937_v23 = vpop.xlane.xlu1 %1936  ;;  %v2603_v11 = vpack.c.bf16 %v4888_v26, %v4886_v32 }
 0x262   :  { %v4890_v48 = vpop.eup %4889  ;;  %v2176_v59 = vmul.f32 1.442695, %v2100_v45  ;;  %v2101_v39 = vsub.f32 %v7497_v37, %v1937_v23  ;;  %1509 = vmax.xlane.f32.xlu0 %v1508_v62  ;;  %v1511_v30 = vsel %vm1447_vm4, %v6140_v13, -inf  ;;  %v6185_v37 = vadd.f32 %v5962_v0, %v5664_v20 }
 0x263   :  { %4899 = vpow2.f32 %v2174_v17  ;;  %2862 = vst.msk [vmem:[%s7266_s8 + $0x14] sm:$0xf] %vm2536_vm5, %v4131_v27  ;;  %v4132_v51 = vpack.c.bf16 %v4890_v48, %v4890_v48  ;;  %4781 = vmatprep.mubr.msk.bf16.mxu1 %vm1447_vm4, %v2603_v11  ;;  %v1940_v32 = vpop.xlane.xlu0 %1939  ;;  %v6173_v17 = vadd.f32 %v5962_v0, %v5652_v63  ;;  %v1514_v27 = vsel %vm1447_vm4, %v6148_v14, -inf }
 0x264   :  { %v4892_v46 = vpop.eup %4891  ;;  %4901 = vpow2.f32 %v2176_v59  ;;  %v2178_v1 = vmul.f32 1.442695, %v2101_v39  ;;  %v2102_v26 = vsub.f32 %v7498_v9, %v1940_v32  ;;  %1512 = vmax.xlane.f32.xlu1 %v1511_v30  ;;  %v7499_v11 = vsub.f32 0.0, %v5559_v61 }
 0x265   :  { %2863 = vst.msk [vmem:[%s7266_s8 + $0x18] sm:$0xf] %vm2536_vm5, %v4132_v51  ;;  %v4133_v29 = vpack.c.bf16 %v4892_v46, %v4892_v46  ;;  %v1943_v45 = vpop.xlane.xlu1 %1942  ;;  %v2604_v23 = vpack.c.bf16 %v4892_v46, %v4890_v48  ;;  %v1517_v51 = vsel %vm1447_vm4, %v6160_v10, -inf  ;;  %v7500_v32 = vsub.f32 0.0, %v5588_v22 }
 0x266   :  { %v4894_v62 = vpop.eup %4893  ;;  %4903 = vpow2.f32 %v2178_v1  ;;  %v2180_v55 = vmul.f32 1.442695, %v2102_v26  ;;  %v2103_v59 = vsub.f32 %v7499_v11, %v1943_v45  ;;  %1515 = vmax.xlane.f32.xlu0 %v1514_v27  ;;  %v6198_v1 = vadd.f32 %v5643_v44, %v5962_v0 }
 0x267   :  { %2864 = vst.msk [vmem:[%s7266_s8 + $0x1c] sm:$0xf] %vm2536_vm5, %v4133_v29  ;;  %v4134_v39 = vpack.c.bf16 %v4894_v62, %v4894_v62  ;;  %4782 = vmatmul.mubr.msk.bf16.gmra.mrb[68].mxu1 %vm1447_vm4, %v2604_v23  ;;  %v1946_v48 = vpop.xlane.xlu0 %1945  ;;  %v1520_v26 = vsel %vm1447_vm4, %v6173_v17, -inf  ;;  %v7501_v27 = vsub.f32 0.0, %v5600_v52 }
 0x268   :  { %4905 = vpow2.f32 %v2180_v55  ;;  %v2182_v61 = vmul.f32 1.442695, %v2103_v59  ;;  %v2104_v30 = vsub.f32 %v7500_v32, %v1946_v48  ;;  %1518 = vmax.xlane.f32.xlu1 %v1517_v51  ;;  %v6210_v55 = vadd.f32 %v5655_v34, %v5962_v0 }
 0x269   :  { %v4896_v46 = vpop.eup %4895  ;;  %2865 = vst.msk [vmem:[%s7266_s8 + $0x20] sm:$0xf] %vm2536_vm5, %v4134_v39  ;;  %v1949_v9 = vpop.xlane.xlu1 %1948  ;;  %v1523_v39 = vsel %vm1447_vm4, %v6185_v37, -inf }
 0x26a   :  { %v4135_v45 = vpack.c.bf16 %v4896_v46, %v4896_v46  ;;  %4907 = vpow2.f32 %v2182_v61  ;;  %v2184_v22 = vmul.f32 1.442695, %v2104_v30  ;;  %v2105_v23 = vsub.f32 %v7501_v27, %v1949_v9  ;;  %1521 = vmax.xlane.f32.xlu0 %v1520_v26 }
 0x26b   :  { %v4898_v29 = vpop.eup %4897  ;;  %v2605_v59 = vpack.c.bf16 %v4896_v46, %v4894_v62  ;;  %v1952_v48 = vpop.xlane.xlu0 %1951  ;;  %v7502_v61 = vsub.f32 0.0, %v5579_v7  ;;  %v6222_v30 = vadd.f32 %v5962_v0, %v5684_v50  ;;  %v1526_v9 = vsel %vm1447_vm4, %v6198_v1, -inf }
 0x26c   :  { %v4136_v11 = vpack.c.bf16 %v4898_v29, %v4898_v29  ;;  %2866 = vst.msk [vmem:[%s7266_s8 + $0x24] sm:$0xf] %vm2536_vm5, %v4135_v45  ;;  %4909 = vpow2.f32 %v2184_v22  ;;  %v2186_v52 = vmul.f32 1.442695, %v2105_v23  ;;  %1524 = vmax.xlane.f32.xlu1 %v1523_v39  ;;  %v7503_v22 = vsub.f32 0.0, %v5591_v35 }
 0x26d   :  { %v4900_v51 = vpop.eup %4899  ;;  %v2106_v32 = vsub.f32 %v7502_v61, %v1952_v48  ;;  %4785 = vmatprep.mubr.msk.bf16.mxu1 %vm1447_vm4, %v2605_v59  ;;  %v1955_v46 = vpop.xlane.xlu1 %1954  ;;  %v6235_v23 = vadd.f32 %v5962_v0, %v5696_v6  ;;  %v1529_v59 = vsel %vm1447_vm4, %v6210_v55, -inf  ;;  %v7504_v39 = vsub.f32 0.0, %v5620_v25 }
 0x26e   :  { %2867 = vst.msk [vmem:[%s7266_s8 + $0x28] sm:$0xf] %vm2536_vm5, %v4136_v11  ;;  %v4137_v62 = vpack.c.bf16 %v4900_v51, %v4900_v51  ;;  %v2606_v26 = vpack.c.bf16 %v4900_v51, %v4898_v29  ;;  %v4902_v7 = vpop.eup %4901  ;;  %4911 = vpow2.f32 %v2186_v52  ;;  %v2107_v27 = vsub.f32 %v7503_v22, %v1955_v46  ;;  %1527 = vmax.xlane.f32.xlu0 %v1526_v9 }
 0x26f   :  { %v2188_v45 = vmul.f32 1.442695, %v2106_v32  ;;  %v4138_v11 = vpack.c.bf16 %v4902_v7, %v4902_v7  ;;  %v1958_v29 = vpop.xlane.xlu0 %1957  ;;  %v6248_v52 = vadd.f32 %v5675_v12, %v5962_v0  ;;  %v6260_v22 = vadd.f32 %v5687_v15, %v5962_v0 }
 0x270   :  { %2868 = vst.msk [vmem:[%s7266_s8 + $0x2c] sm:$0xf] %vm2536_vm5, %v4137_v62  ;;  %4786 = vmatmul.mubr.msk.bf16.gmra.mrb[72].mxu1 %vm1447_vm4, %v2606_v26  ;;  %v4904_v48 = vpop.eup %4903  ;;  %v2190_v35 = vmul.f32 1.442695, %v2107_v27  ;;  %v2108_v51 = vsub.f32 %v7504_v39, %v1958_v29  ;;  %1530 = vmax.xlane.f32.xlu1 %v1529_v59  ;;  %v1532_v62 = vsel %vm1447_vm4, %v6222_v30, -inf  ;;  %v7505_v26 = vsub.f32 0.0, %v5632_v53 }
 0x271   :  { %4913 = vpow2.f32 %v2188_v45  ;;  %2869 = vst.msk [vmem:[%s7266_s8 + $0x30] sm:$0xf] %vm2536_vm5, %v4138_v11  ;;  %v4139_v61 = vpack.c.bf16 %v4904_v48, %v4904_v48  ;;  %v1961_v32 = vpop.xlane.xlu1 %1960  ;;  %v2607_v46 = vpack.c.bf16 %v4904_v48, %v4902_v7  ;;  %v1535_v11 = vsel %vm1447_vm4, %v6235_v23, -inf }
 0x272   :  { %v4906_v9 = vpop.eup %4905  ;;  %4915 = vpow2.f32 %v2190_v35  ;;  %v2192_v25 = vmul.f32 1.442695, %v2108_v51  ;;  %v2109_v45 = vsub.f32 %v7505_v26, %v1961_v32  ;;  %1533 = vmax.xlane.f32.xlu0 %v1532_v62  ;;  %v7506_v59 = vsub.f32 0.0, %v5611_v19 }
 0x273   :  { %2870 = vst.msk [vmem:[%s7266_s8 + $0x34] sm:$0xf] %vm2536_vm5, %v4139_v61  ;;  %v4140_v27 = vpack.c.bf16 %v4906_v9, %v4906_v9  ;;  %4789 = vmatprep.mubr.msk.bf16.mxu1 %vm1447_vm4, %v2607_v46  ;;  %v1964_v7 = vpop.xlane.xlu0 %1963  ;;  %v6273_v35 = vadd.f32 %v5962_v0, %v5716_v16  ;;  %v1538_v61 = vsel %vm1447_vm4, %v6248_v52, -inf  ;;  %v7507_v46 = vsub.f32 0.0, %v5623_v3 }
 0x274   :  { %v4908_v29 = vpop.eup %4907  ;;  %4917 = vpow2.f32 %v2192_v25  ;;  %v2194_v53 = vmul.f32 1.442695, %v2109_v45  ;;  %v2110_v48 = vsub.f32 %v7506_v59, %v1964_v7  ;;  %1536 = vmax.xlane.f32.xlu1 %v1535_v11  ;;  %v6285_v26 = vadd.f32 %v5962_v0, %v5728_v41 }
 0x275   :  { %2871 = vst.msk [vmem:[%s7266_s8 + $0x38] sm:$0xf] %vm2536_vm5, %v4140_v27  ;;  %v4141_v39 = vpack.c.bf16 %v4908_v29, %v4908_v29  ;;  %v1967_v51 = vpop.xlane.xlu1 %1966  ;;  %v2608_v32 = vpack.c.bf16 %v4908_v29, %v4906_v9  ;;  %v1541_v27 = vsel %vm1447_vm4, %v6260_v22, -inf  ;;  %v7508_v11 = vsub.f32 0.0, %v5652_v63 }
 0x276   :  { %v4910_v62 = vpop.eup %4909  ;;  %4919 = vpow2.f32 %v2194_v53  ;;  %v2196_v19 = vmul.f32 1.442695, %v2110_v48  ;;  %v2111_v25 = vsub.f32 %v7507_v46, %v1967_v51  ;;  %1539 = vmax.xlane.f32.xlu0 %v1538_v61  ;;  %v6298_v53 = vadd.f32 %v5707_v4, %v5962_v0 }
 0x277   :  { %2872 = vst.msk [vmem:[%s7266_s8 + $0x3c] sm:$0xf] %vm2536_vm5, %v4141_v39  ;;  %v4142_v45 = vpack.c.bf16 %v4910_v62, %v4910_v62  ;;  %v1970_v9 = vpop.xlane.xlu0 %1969  ;;  %v1544_v39 = vsel %vm1447_vm4, %v6273_v35, -inf  ;;  %v6310_v46 = vadd.f32 %v5719_v33, %v5962_v0 }
 0x278   :  { %4790 = vmatmul.mubr.msk.bf16.gmra.mrb[76].mxu1 %vm1447_vm4, %v2608_v32  ;;  %v4912_v7 = vpop.eup %4911  ;;  %4921 = vpow2.f32 %v2196_v19  ;;  %v2198_v3 = vmul.f32 1.442695, %v2111_v25  ;;  %v2112_v29 = vsub.f32 %v7508_v11, %v1970_v9  ;;  %1542 = vmax.xlane.f32.xlu1 %v1541_v27  ;;  %v7509_v32 = vsub.f32 0.0, %v5664_v20 }
 0x279   :  { %2873 = vst.msk [vmem:[%s7266_s8 + $0x40] sm:$0xf] %vm2536_vm5, %v4142_v45  ;;  %v4143_v59 = vpack.c.bf16 %v4912_v7, %v4912_v7  ;;  %v1973_v48 = vpop.xlane.xlu1 %1972  ;;  %v2609_v51 = vpack.c.bf16 %v4912_v7, %v4910_v62  ;;  %v1547_v45 = vsel %vm1447_vm4, %v6285_v26, -inf  ;;  %v7510_v27 = vsub.f32 0.0, %v5643_v44 }
 0x27a   :  { %4923 = vpow2.f32 %v2198_v3  ;;  %v2200_v63 = vmul.f32 1.442695, %v2112_v29  ;;  %v2113_v19 = vsub.f32 %v7509_v32, %v1973_v48  ;;  %1545 = vmax.xlane.f32.xlu0 %v1544_v39  ;;  %v6323_v3 = vadd.f32 %v5962_v0, %v5748_v28 }
 0x27b   :  { %v4914_v61 = vpop.eup %4913  ;;  %2874 = vst.msk [vmem:[%s7266_s8 + $0x44] sm:$0xf] %vm2536_vm5, %v4143_v59  ;;  %4793 = vmatprep.mubr.msk.bf16.mxu1 %vm1447_vm4, %v2609_v51  ;;  %v1976_v62 = vpop.xlane.xlu0 %1975  ;;  %v1550_v59 = vsel %vm1447_vm4, %v6298_v53, -inf  ;;  %v7511_v51 = vsub.f32 0.0, %v5655_v34  ;;  %v6335_v32 = vadd.f32 %v5962_v0, %v5760_v8 }
 0x27c   :  { %v4144_v25 = vpack.c.bf16 %v4914_v61, %v4914_v61  ;;  %v4916_v9 = vpop.eup %4915  ;;  %4925 = vpow2.f32 %v2200_v63  ;;  %v2202_v20 = vmul.f32 1.442695, %v2113_v19  ;;  %v2114_v7 = vsub.f32 %v7510_v27, %v1976_v62  ;;  %1548 = vmax.xlane.f32.xlu1 %v1547_v45 }
 0x27d   :  { %v4145_v11 = vpack.c.bf16 %v4916_v9, %v4916_v9  ;;  %v1979_v29 = vpop.xlane.xlu1 %1978  ;;  %v2610_v48 = vpack.c.bf16 %v4916_v9, %v4914_v61  ;;  %v7512_v45 = vsub.f32 0.0, %v5684_v50 }
 0x27e   :  { %2875 = vst.msk [vmem:[%s7266_s8 + $0x48] sm:$0xf] %vm2536_vm5, %v4144_v25  ;;  %v4918_v39 = vpop.eup %4917  ;;  %4927 = vpow2.f32 %v2202_v20  ;;  %v2204_v44 = vmul.f32 1.442695, %v2114_v7  ;;  %v2115_v63 = vsub.f32 %v7511_v51, %v1979_v29  ;;  %1551 = vmax.xlane.f32.xlu0 %v1550_v59  ;;  %v1553_v25 = vsel %vm1447_vm4, %v6310_v46, -inf }
 0x27f   :  { %2876 = vst.msk [vmem:[%s7266_s8 + $0x4c] sm:$0xf] %vm2536_vm5, %v4145_v11  ;;  %v4146_v19 = vpack.c.bf16 %v4918_v39, %v4918_v39  ;;  %v1982_v61 = vpop.xlane.xlu0 %1981  ;;  %v6348_v20 = vadd.f32 %v5739_v36, %v5962_v0  ;;  %v1556_v11 = vsel %vm1447_vm4, %v6323_v3, -inf  ;;  %v6360_v51 = vadd.f32 %v5751_v2, %v5962_v0 }
 0x280   :  { %4794 = vmatmul.mubr.msk.bf16.gmra.mrb[80].mxu1 %vm1447_vm4, %v2610_v48  ;;  %v4920_v62 = vpop.eup %4919  ;;  %4929 = vpow2.f32 %v2204_v44  ;;  %v2206_v34 = vmul.f32 1.442695, %v2115_v63  ;;  %v2116_v9 = vsub.f32 %v7512_v45, %v1982_v61  ;;  %1554 = vmax.xlane.f32.xlu1 %v1553_v25  ;;  %v7513_v48 = vsub.f32 0.0, %v5696_v6 }
 0x281   :  { %2877 = vst.msk [vmem:[%s7266_s8 + $0x50] sm:$0xf] %vm2536_vm5, %v4146_v19  ;;  %v4147_v27 = vpack.c.bf16 %v4920_v62, %v4920_v62  ;;  %v1985_v7 = vpop.xlane.xlu1 %1984  ;;  %v2611_v29 = vpack.c.bf16 %v4920_v62, %v4918_v39  ;;  %v1559_v19 = vsel %vm1447_vm4, %v6335_v32, -inf  ;;  %v7514_v25 = vsub.f32 0.0, %v5675_v12 }
 0x282   :  { %v4922_v59 = vpop.eup %4921  ;;  %4931 = vpow2.f32 %v2206_v34  ;;  %v2208_v50 = vmul.f32 1.442695, %v2116_v9  ;;  %v2117_v44 = vsub.f32 %v7513_v48, %v1985_v7  ;;  %1557 = vmax.xlane.f32.xlu0 %v1556_v11  ;;  %v6373_v34 = vadd.f32 %v5962_v0, %v5780_v60 }
 0x283   :  { %2878 = vst.msk [vmem:[%s7266_s8 + $0x54] sm:$0xf] %vm2536_vm5, %v4147_v27  ;;  %v4148_v63 = vpack.c.bf16 %v4922_v59, %v4922_v59  ;;  %4797 = vmatprep.mubr.msk.bf16.mxu1 %vm1447_vm4, %v2611_v29  ;;  %v1988_v39 = vpop.xlane.xlu0 %1987  ;;  %v1562_v27 = vsel %vm1447_vm4, %v6348_v20, -inf  ;;  %v7515_v29 = vsub.f32 0.0, %v5687_v15  ;;  %v6385_v48 = vadd.f32 %v5962_v0, %v5792_v56 }
 0x284   :  { %v4924_v61 = vpop.eup %4923  ;;  %4933 = vpow2.f32 %v2208_v50  ;;  %v2210_v6 = vmul.f32 1.442695, %v2117_v44  ;;  %v2118_v62 = vsub.f32 %v7514_v25, %v1988_v39  ;;  %1560 = vmax.xlane.f32.xlu1 %v1559_v19  ;;  %v7516_v19 = vsub.f32 0.0, %v5716_v16 }
 0x285   :  { %2879 = vst.msk [vmem:[%s7266_s8 + $0x58] sm:$0xf] %vm2536_vm5, %v4148_v63  ;;  %v4149_v45 = vpack.c.bf16 %v4924_v61, %v4924_v61  ;;  %v1991_v9 = vpop.xlane.xlu1 %1990  ;;  %v2612_v7 = vpack.c.bf16 %v4924_v61, %v4922_v59  ;;  %v1565_v63 = vsel %vm1447_vm4, %v6360_v51, -inf }
 0x286   :  { %v4926_v11 = vpop.eup %4925  ;;  %4935 = vpow2.f32 %v2210_v6  ;;  %v2212_v12 = vmul.f32 1.442695, %v2118_v62  ;;  %v2119_v50 = vsub.f32 %v7515_v29, %v1991_v9  ;;  %1563 = vmax.xlane.f32.xlu0 %v1562_v27  ;;  %v6398_v6 = vadd.f32 %v5771_v5, %v5962_v0 }
 0x287   :  { %2880 = vst.msk [vmem:[%s7266_s8 + $0x5c] sm:$0xf] %vm2536_vm5, %v4149_v45  ;;  %v4150_v44 = vpack.c.bf16 %v4926_v11, %v4926_v11  ;;  %v1994_v59 = vpop.xlane.xlu0 %1993  ;;  %v1568_v45 = vsel %vm1447_vm4, %v6373_v34, -inf  ;;  %v6410_v29 = vadd.f32 %v5783_v21, %v5962_v0 }
 0x288   :  { %4798 = vmatmul.mubr.msk.bf16.gmra.mrb[84].mxu1 %vm1447_vm4, %v2612_v7  ;;  %v4928_v39 = vpop.eup %4927  ;;  %4937 = vpow2.f32 %v2212_v12  ;;  %v2214_v15 = vmul.f32 1.442695, %v2119_v50  ;;  %v2120_v61 = vsub.f32 %v7516_v19, %v1994_v59  ;;  %1566 = vmax.xlane.f32.xlu1 %v1565_v63  ;;  %v7517_v7 = vsub.f32 0.0, %v5728_v41 }
 0x289   :  { %2881 = vst.msk [vmem:[%s7266_s8 + $0x60] sm:$0xf] %vm2536_vm5, %v4150_v44  ;;  %v4151_v25 = vpack.c.bf16 %v4928_v39, %v4928_v39  ;;  %v1997_v62 = vpop.xlane.xlu1 %1996  ;;  %v2613_v9 = vpack.c.bf16 %v4928_v39, %v4926_v11  ;;  %v1571_v44 = vsel %vm1447_vm4, %v6385_v48, -inf  ;;  %v7518_v63 = vsub.f32 0.0, %v5707_v4 }
 0x28a   :  { %v4930_v27 = vpop.eup %4929  ;;  %4939 = vpow2.f32 %v2214_v15  ;;  %v2216_v16 = vmul.f32 1.442695, %v2120_v61  ;;  %v2121_v12 = vsub.f32 %v7517_v7, %v1997_v62  ;;  %1569 = vmax.xlane.f32.xlu0 %v1568_v45  ;;  %v6423_v15 = vadd.f32 %v5962_v0, %v5812_v38 }
 0x28b   :  { %2882 = vst.msk [vmem:[%s7266_s8 + $0x64] sm:$0xf] %vm2536_vm5, %v4151_v25  ;;  %v4152_v50 = vpack.c.bf16 %v4930_v27, %v4930_v27  ;;  %4801 = vmatprep.mubr.msk.bf16.mxu1 %vm1447_vm4, %v2613_v9  ;;  %v2000_v11 = vpop.xlane.xlu0 %1999  ;;  %v1574_v25 = vsel %vm1447_vm4, %v6398_v6, -inf  ;;  %v7519_v9 = vsub.f32 0.0, %v5719_v33  ;;  %v6435_v7 = vadd.f32 %v5962_v0, %v5824_v40 }
 0x28c   :  { %v4932_v59 = vpop.eup %4931  ;;  %4941 = vpow2.f32 %v2216_v16  ;;  %v2218_v41 = vmul.f32 1.442695, %v2121_v12  ;;  %v2122_v39 = vsub.f32 %v7518_v63, %v2000_v11  ;;  %1572 = vmax.xlane.f32.xlu1 %v1571_v44  ;;  %v7520_v44 = vsub.f32 0.0, %v5748_v28 }
 0x28d   :  { %2883 = vst.msk [vmem:[%s7266_s8 + $0x68] sm:$0xf] %vm2536_vm5, %v4152_v50  ;;  %v4153_v19 = vpack.c.bf16 %v4932_v59, %v4932_v59  ;;  %v2003_v61 = vpop.xlane.xlu1 %2002  ;;  %v2614_v62 = vpack.c.bf16 %v4932_v59, %v4930_v27  ;;  %v1577_v50 = vsel %vm1447_vm4, %v6410_v29, -inf }
 0x28e   :  { %v4934_v45 = vpop.eup %4933  ;;  %4943 = vpow2.f32 %v2218_v41  ;;  %v2220_v4 = vmul.f32 1.442695, %v2122_v39  ;;  %v2123_v16 = vsub.f32 %v7519_v9, %v2003_v61  ;;  %1575 = vmax.xlane.f32.xlu0 %v1574_v25  ;;  %v6448_v41 = vadd.f32 %v5803_v57, %v5962_v0 }
 0x28f   :  { %2884 = vst.msk [vmem:[%s7266_s8 + $0x6c] sm:$0xf] %vm2536_vm5, %v4153_v19  ;;  %v4154_v12 = vpack.c.bf16 %v4934_v45, %v4934_v45  ;;  %v2006_v27 = vpop.xlane.xlu0 %2005  ;;  %v1580_v19 = vsel %vm1447_vm4, %v6423_v15, -inf  ;;  %v6460_v9 = vadd.f32 %v5815_v58, %v5962_v0 }
 0x290   :  { %4802 = vmatmul.mubr.msk.bf16.gmra.mrb[88].mxu1 %vm1447_vm4, %v2614_v62  ;;  %v4936_v11 = vpop.eup %4935  ;;  %4945 = vpow2.f32 %v2220_v4  ;;  %v2222_v33 = vmul.f32 1.442695, %v2123_v16  ;;  %v2124_v59 = vsub.f32 %v7520_v44, %v2006_v27  ;;  %1578 = vmax.xlane.f32.xlu1 %v1577_v50  ;;  %v7521_v62 = vsub.f32 0.0, %v5760_v8 }
 0x291   :  { %2885 = vst.msk [vmem:[%s7266_s8 + $0x70] sm:$0xf] %vm2536_vm5, %v4154_v12  ;;  %v4155_v63 = vpack.c.bf16 %v4936_v11, %v4936_v11  ;;  %v2009_v39 = vpop.xlane.xlu1 %2008  ;;  %v2615_v61 = vpack.c.bf16 %v4936_v11, %v4934_v45  ;;  %v1583_v12 = vsel %vm1447_vm4, %v6435_v7, -inf  ;;  %v7522_v50 = vsub.f32 0.0, %v5739_v36 }
 0x292   :  { %v4938_v25 = vpop.eup %4937  ;;  %4947 = vpow2.f32 %v2222_v33  ;;  %v2224_v28 = vmul.f32 1.442695, %v2124_v59  ;;  %v2125_v4 = vsub.f32 %v7521_v62, %v2009_v39  ;;  %1581 = vmax.xlane.f32.xlu0 %v1580_v19  ;;  %v7523_v33 = vld [vmem:[#allocation53_spill] sm:$0xff]  ;;  %v1586_v39 = vsel %vm1447_vm4, %v6448_v41, -inf }
 0x293   :  { %2886 = vst.msk [vmem:[%s7266_s8 + $0x74] sm:$0xf] %vm2536_vm5, %v4155_v63  ;;  %v4156_v16 = vpack.c.bf16 %v4938_v25, %v4938_v25  ;;  %4805 = vmatprep.mubr.msk.bf16.mxu1 %vm1447_vm4, %v2615_v61  ;;  %v2012_v45 = vpop.xlane.xlu0 %2011  ;;  %v6473_v44 = vadd.f32 %v5962_v0, %v7523_v33 }
 0x294   :  { %v4940_v27 = vpop.eup %4939  ;;  %4949 = vpow2.f32 %v2224_v28  ;;  %v2226_v8 = vmul.f32 1.442695, %v2125_v4  ;;  %v2126_v11 = vsub.f32 %v7522_v50, %v2012_v45  ;;  %1584 = vmax.xlane.f32.xlu1 %v1583_v12  ;;  %v7525_v28 = vsub.f32 0.0, %v5751_v2  ;;  %v7526_v4 = vld [vmem:[#allocation57_spill] sm:$0xff] }
 0x295   :  { %7524 = vst [vmem:[#allocation53_spill] sm:$0xff] %v6473_v44  ;;  %2887 = vst.msk [vmem:[%s7266_s8 + $0x78] sm:$0xf] %vm2536_vm5, %v4156_v16  ;;  %v4157_v59 = vpack.c.bf16 %v4940_v27, %v4940_v27  ;;  %v2015_v63 = vpop.xlane.xlu1 %2014  ;;  %v2616_v19 = vpack.c.bf16 %v4940_v27, %v4938_v25  ;;  %v6485_v45 = vadd.f32 %v5962_v0, %v7526_v4  ;;  %v1589_v12 = vsel %vm1447_vm4, %v6460_v9, -inf }
 0x296   :  { %v4942_v61 = vpop.eup %4941  ;;  %4951 = vpow2.f32 %v2226_v8  ;;  %v2228_v36 = vmul.f32 1.442695, %v2126_v11  ;;  %v2127_v62 = vsub.f32 %v7525_v28, %v2015_v63  ;;  %1587 = vmax.xlane.f32.xlu0 %v1586_v39  ;;  %v7528_v8 = vsub.f32 0.0, %v5780_v60  ;;  %v7529_v11 = vld [vmem:[#allocation50_spill] sm:$0xff] }
 0x297   :  { %7527 = vst [vmem:[#allocation57_spill] sm:$0xff] %v6485_v45  ;;  %2888 = vst.msk [vmem:[%s7266_s8 + $0x7c] sm:$0xf] %vm2536_vm5, %v4157_v59  ;;  %v4158_v16 = vpack.c.bf16 %v4942_v61, %v4942_v61  ;;  %v2018_v25 = vpop.xlane.xlu0 %2017  ;;  %v6498_v63 = vadd.f32 %v7529_v11, %v5962_v0 }
 0x298   :  { %4806 = vmatmul.mubr.msk.bf16.gmra.mrb[92].mxu1 %vm1447_vm4, %v2616_v19  ;;  %v4944_v27 = vpop.eup %4943  ;;  %4953 = vpow2.f32 %v2228_v36  ;;  %v2230_v2 = vmul.f32 1.442695, %v2127_v62  ;;  %v2128_v50 = vsub.f32 %v7528_v8, %v2018_v25  ;;  %1590 = vmax.xlane.f32.xlu1 %v1589_v12  ;;  %v1592_v19 = vsel %vm1447_vm4, %v6473_v44, -inf  ;;  %v7532_v12 = vld [vmem:[#allocation54_spill] sm:$0xff] }
 0x299   :  { %7530 = vst [vmem:[#allocation50_spill] sm:$0xff] %v6498_v63  ;;  %2889 = vst.msk [vmem:[%s7266_s8 + $0x80] sm:$0xf] %vm2536_vm5, %v4158_v16  ;;  %v4159_v59 = vpack.c.bf16 %v4944_v27, %v4944_v27  ;;  %v2021_v39 = vpop.xlane.xlu1 %2020  ;;  %v2617_v36 = vpack.c.bf16 %v4944_v27, %v4942_v61  ;;  %v7531_v62 = vsub.f32 0.0, %v5792_v56  ;;  %v6510_v8 = vadd.f32 %v7532_v12, %v5962_v0 }
 0x29a   :  { %v4946_v28 = vpop.eup %4945  ;;  %4955 = vpow2.f32 %v2230_v2  ;;  %v2232_v60 = vmul.f32 1.442695, %v2128_v50  ;;  %1593 = vmax.xlane.f32.xlu0 %v1592_v19  ;;  %v1595_v27 = vsel %vm1447_vm4, %v6485_v45, -inf  ;;  %v7534_v50 = vsub.f32 0.0, %v5771_v5  ;;  %v7535_v19 = vld [vmem:[#allocation61_spill] sm:$0xff] }
 0x29b   :  { %v2129_v25 = vsub.f32 %v7531_v62, %v2021_v39  ;;  %7533 = vst [vmem:[#allocation54_spill] sm:$0xff] %v6510_v8  ;;  %2890 = vst.msk [vmem:[%s7266_s8 + $0x84] sm:$0xf] %vm2536_vm5, %v4159_v59  ;;  %v4160_v16 = vpack.c.bf16 %v4946_v28, %v4946_v28  ;;  %4809 = vmatprep.mubr.msk.bf16.mxu1 %vm1447_vm4, %v2617_v36  ;;  %v2024_v61 = vpop.xlane.xlu0 %2023  ;;  %v6523_v62 = vadd.f32 %v5962_v0, %v7535_v19 }
 0x29c   :  { %v4948_v2 = vpop.eup %4947  ;;  %4957 = vpow2.f32 %v2232_v60  ;;  %v2130_v39 = vsub.f32 %v7534_v50, %v2024_v61  ;;  %1596 = vmax.xlane.f32.xlu1 %v1595_v27  ;;  %v1598_v45 = vsel %vm1447_vm4, %v6498_v63, -inf  ;;  %v7537_v61 = vsub.f32 0.0, %v5783_v21  ;;  %v7538_v50 = vld [vmem:[#allocation65_spill] sm:$0xff] }
 0x29d   :  { %v2234_v56 = vmul.f32 1.442695, %v2129_v25  ;;  %7536 = vst [vmem:[#allocation61_spill] sm:$0xff] %v6523_v62  ;;  %2891 = vst.msk [vmem:[%s7266_s8 + $0x88] sm:$0xf] %vm2536_vm5, %v4160_v16  ;;  %v4161_v59 = vpack.c.bf16 %v4948_v2, %v4948_v2  ;;  %v2027_v36 = vpop.xlane.xlu1 %2026  ;;  %v2618_v60 = vpack.c.bf16 %v4948_v2, %v4946_v28  ;;  %v6535_v44 = vadd.f32 %v5962_v0, %v7538_v50 }
 0x29e   :  { %v4950_v25 = vpop.eup %4949  ;;  %v2236_v5 = vmul.f32 1.442695, %v2130_v39  ;;  %v2131_v27 = vsub.f32 %v7537_v61, %v2027_v36  ;;  %1599 = vmax.xlane.f32.xlu0 %v1598_v45  ;;  %v1601_v2 = vsel %vm1447_vm4, %v6510_v8, -inf  ;;  %v7540_v45 = vsub.f32 0.0, %v5812_v38  ;;  %v7541_v36 = vld [vmem:[#allocation58_spill] sm:$0xff] }
 0x29f   :  { %4959 = vpow2.f32 %v2234_v56  ;;  %7539 = vst [vmem:[#allocation65_spill] sm:$0xff] %v6535_v44  ;;  %2892 = vst.msk [vmem:[%s7266_s8 + $0x8c] sm:$0xf] %vm2536_vm5, %v4161_v59  ;;  %v4162_v16 = vpack.c.bf16 %v4950_v25, %v4950_v25  ;;  %v2030_v28 = vpop.xlane.xlu0 %2029  ;;  %v6548_v61 = vadd.f32 %v7541_v36, %v5962_v0  ;;  %v1604_v8 = vsel %vm1447_vm4, %v6523_v62, -inf }
 0x2a0   :  { %4810 = vmatmul.mubr.msk.bf16.gmra.mrb[96].mxu1 %vm1447_vm4, %v2618_v60  ;;  %v4952_v56 = vpop.eup %4951  ;;  %4961 = vpow2.f32 %v2236_v5  ;;  %v2238_v21 = vmul.f32 1.442695, %v2131_v27  ;;  %v2132_v39 = vsub.f32 %v7540_v45, %v2030_v28  ;;  %1602 = vmax.xlane.f32.xlu1 %v1601_v2  ;;  %v7543_v28 = vsub.f32 0.0, %v5824_v40  ;;  %v7544_v45 = vld [vmem:[#allocation62_spill] sm:$0xff] }
 0x2a1   :  { %7542 = vst [vmem:[#allocation58_spill] sm:$0xff] %v6548_v61  ;;  %2893 = vst.msk [vmem:[%s7266_s8 + $0x90] sm:$0xf] %vm2536_vm5, %v4162_v16  ;;  %v4163_v59 = vpack.c.bf16 %v4952_v56, %v4952_v56  ;;  %v2033_v60 = vpop.xlane.xlu1 %2032  ;;  %v2619_v5 = vpack.c.bf16 %v4952_v56, %v4950_v25  ;;  %v6560_v63 = vadd.f32 %v7544_v45, %v5962_v0  ;;  %v1607_v56 = vsel %vm1447_vm4, %v6535_v44, -inf  ;;  %v6574_v0 = vld [vmem:[%s7265_s5] ss:$0 sm:$0xff] }
 0x2a2   :  { %v4954_v27 = vpop.eup %4953  ;;  %4963 = vpow2.f32 %v2238_v21  ;;  %v2240_v38 = vmul.f32 1.442695, %v2132_v39  ;;  %v2133_v2 = vsub.f32 %v7543_v28, %v2033_v60  ;;  %1605 = vmax.xlane.f32.xlu0 %v1604_v8  ;;  %v7546_v8 = vsub.f32 0.0, %v5803_v57  ;;  %v7550_v44 = vld [vmem:[#allocation73_spill] sm:$0xff] }
 0x2a3   :  { %7545 = vst [vmem:[#allocation62_spill] sm:$0xff] %v6560_v63  ;;  %2894 = vst.msk [vmem:[%s7266_s8 + $0x94] sm:$0xf] %vm2536_vm5, %v4163_v59  ;;  %v4164_v16 = vpack.c.bf16 %v4954_v27, %v4954_v27  ;;  %4813 = vmatprep.mubr.msk.bf16.mxu1 %vm1447_vm4, %v2619_v5  ;;  %v2036_v25 = vpop.xlane.xlu0 %2035  ;;  %v7547_v59 = vld [vmem:[#allocation69_spill] sm:$0xff]  ;;  %v1610_v57 = vsel %vm1447_vm4, %v6548_v61, -inf  ;;  %v6590_v62 = vadd.f32 %v6574_v0, %v7550_v44 }
 0x2a4   :  { %v4956_v21 = vpop.eup %4955  ;;  %4965 = vpow2.f32 %v2240_v38  ;;  %v2242_v40 = vmul.f32 1.442695, %v2133_v2  ;;  %v2134_v39 = vsub.f32 %v7546_v8, %v2036_v25  ;;  %1608 = vmax.xlane.f32.xlu1 %v1607_v56  ;;  %v6578_v60 = vadd.f32 %v6574_v0, %v7547_v59 }
 0x2a5   :  { %2895 = vst.msk [vmem:[%s7266_s8 + $0x98] sm:$0xf] %vm2536_vm5, %v4164_v16  ;;  %v4165_v5 = vpack.c.bf16 %v4956_v21, %v4956_v21  ;;  %v2039_v38 = vpop.xlane.xlu1 %2038  ;;  %v2620_v28 = vpack.c.bf16 %v4956_v21, %v4954_v27  ;;  %v7549_v56 = vsub.f32 0.0, %v5815_v58  ;;  %7551 = vst [vmem:[#allocation73_spill] sm:$0xff] %v6590_v62  ;;  %v1613_v21 = vsel %vm1447_vm4, %v6560_v63, -inf }
 0x2a6   :  { %7548 = vst [vmem:[#allocation69_spill] sm:$0xff] %v6578_v60  ;;  %v4958_v2 = vpop.eup %4957  ;;  %4967 = vpow2.f32 %v2242_v40  ;;  %v2244_v25 = vmul.f32 1.442695, %v2134_v39  ;;  %1611 = vmax.xlane.f32.xlu0 %v1610_v57  ;;  %v7552_v39 = vsub.f32 0.0, %v7523_v33  ;;  %v7553_v57 = vld [vmem:[#allocation66_spill] sm:$0xff]  ;;  %v1616_v63 = vsel %vm1447_vm4, %v6578_v60, -inf }
 0x2a7   :  { %v2135_v8 = vsub.f32 %v7549_v56, %v2039_v38  ;;  %2896 = vst.msk [vmem:[%s7266_s8 + $0x9c] sm:$0xf] %vm2536_vm5, %v4165_v5  ;;  %v4166_v16 = vpack.c.bf16 %v4958_v2, %v4958_v2  ;;  %v2042_v27 = vpop.xlane.xlu0 %2041  ;;  %v6603_v56 = vadd.f32 %v6574_v0, %v7553_v57 }
 0x2a8   :  { %4814 = vmatmul.mubr.msk.bf16.gmra.mrb[100].mxu1 %vm1447_vm4, %v2620_v28  ;;  %4969 = vpow2.f32 %v2244_v25  ;;  %v2136_v38 = vsub.f32 %v7552_v39, %v2042_v27  ;;  %1614 = vmax.xlane.f32.xlu1 %v1613_v21  ;;  %v7555_v27 = vsub.f32 0.0, %v7526_v4  ;;  %v7556_v39 = vld [vmem:[#allocation70_spill] sm:$0xff] }
 0x2a9   :  { %v4960_v40 = vpop.eup %4959  ;;  %v2246_v58 = vmul.f32 1.442695, %v2135_v8  ;;  %7554 = vst [vmem:[#allocation66_spill] sm:$0xff] %v6603_v56  ;;  %2897 = vst.msk [vmem:[%s7266_s8 + $0xa0] sm:$0xf] %vm2536_vm5, %v4166_v16  ;;  %v2045_v28 = vpop.xlane.xlu1 %2044  ;;  %v6615_v61 = vadd.f32 %v6574_v0, %v7556_v39 }
 0x2aa   :  { %v4167_v5 = vpack.c.bf16 %v4960_v40, %v4960_v40  ;;  %v2621_v25 = vpack.c.bf16 %v4960_v40, %v4958_v2  ;;  %v4962_v8 = vpop.eup %4961  ;;  %v2248_v33 = vmul.f32 1.442695, %v2136_v38  ;;  %v2137_v21 = vsub.f32 %v7555_v27, %v2045_v28  ;;  %1617 = vmax.xlane.f32.xlu0 %v1616_v63  ;;  %v7559_v28 = vld [vmem:[#allocation77_spill] sm:$0xff] }
 0x2ab   :  { %4971 = vpow2.f32 %v2246_v58  ;;  %7557 = vst [vmem:[#allocation70_spill] sm:$0xff] %v6615_v61  ;;  %v4168_v16 = vpack.c.bf16 %v4962_v8, %v4962_v8  ;;  %v2048_v2 = vpop.xlane.xlu0 %2047  ;;  %v1619_v40 = vsel %vm1447_vm4, %v6590_v62, -inf  ;;  %v7558_v63 = vsub.f32 0.0, %v7529_v11 }
 0x2ac   :  { %2898 = vst.msk [vmem:[%s7266_s8 + $0xa4] sm:$0xf] %vm2536_vm5, %v4167_v5  ;;  %4817 = vmatprep.mubr.msk.bf16.mxu1 %vm1447_vm4, %v2621_v25  ;;  %v4964_v58 = vpop.eup %4963  ;;  %4973 = vpow2.f32 %v2248_v33  ;;  %v2250_v4 = vmul.f32 1.442695, %v2137_v21  ;;  %1620 = vmax.xlane.f32.xlu1 %v1619_v40  ;;  %v6628_v27 = vadd.f32 %v6574_v0, %v7559_v28  ;;  %v1622_v62 = vsel %vm1447_vm4, %v6603_v56, -inf }
 0x2ad   :  { %v2138_v38 = vsub.f32 %v7558_v63, %v2048_v2  ;;  %2899 = vst.msk [vmem:[%s7266_s8 + $0xa8] sm:$0xf] %vm2536_vm5, %v4168_v16  ;;  %v4169_v5 = vpack.c.bf16 %v4964_v58, %v4964_v58  ;;  %v2051_v25 = vpop.xlane.xlu1 %2050  ;;  %v2622_v33 = vpack.c.bf16 %v4964_v58, %v4962_v8  ;;  %v7560_v2 = vsub.f32 0.0, %v7532_v12  ;;  %v7561_v63 = vld [vmem:[#allocation81_spill] sm:$0xff] }
 0x2ae   :  { %v4966_v21 = vpop.eup %4965  ;;  %4975 = vpow2.f32 %v2250_v4  ;;  %1623 = vmax.xlane.f32.xlu0 %v1622_v62  ;;  %v6640_v60 = vadd.f32 %v6574_v0, %v7561_v63  ;;  %v1625_v58 = vsel %vm1447_vm4, %v6615_v61, -inf  ;;  %v7563_v62 = vsub.f32 0.0, %v7535_v19 }
 0x2af   :  { %v2252_v11 = vmul.f32 1.442695, %v2138_v38  ;;  %v2139_v40 = vsub.f32 %v7560_v2, %v2051_v25  ;;  %2900 = vst.msk [vmem:[%s7266_s8 + $0xac] sm:$0xf] %vm2536_vm5, %v4169_v5  ;;  %v4170_v16 = vpack.c.bf16 %v4966_v21, %v4966_v21  ;;  %v2054_v8 = vpop.xlane.xlu0 %2053  ;;  %v7564_v25 = vld [vmem:[#allocation74_spill] sm:$0xff]  ;;  %v1628_v61 = vsel %vm1447_vm4, %v6628_v27, -inf }
 0x2b0   :  { %7562 = vst [vmem:[#allocation77_spill] sm:$0xff] %v6640_v60  ;;  %4818 = vmatmul.mubr.msk.bf16.gmra.mrb[104].mxu1 %vm1447_vm4, %v2622_v33  ;;  %v4968_v4 = vpop.eup %4967  ;;  %v2140_v38 = vsub.f32 %v7563_v62, %v2054_v8  ;;  %1626 = vmax.xlane.f32.xlu1 %v1625_v58  ;;  %v6653_v2 = vadd.f32 %v6574_v0, %v7564_v25  ;;  %v7565_v8 = vsub.f32 0.0, %v7538_v50  ;;  %v7566_v62 = vld [vmem:[#allocation78_spill] sm:$0xff] }
 0x2b1   :  { %4977 = vpow2.f32 %v2252_v11  ;;  %v2254_v12 = vmul.f32 1.442695, %v2139_v40  ;;  %2901 = vst.msk [vmem:[%s7266_s8 + $0xb0] sm:$0xf] %vm2536_vm5, %v4170_v16  ;;  %v4171_v5 = vpack.c.bf16 %v4968_v4, %v4968_v4  ;;  %v2057_v33 = vpop.xlane.xlu1 %2056  ;;  %v2623_v11 = vpack.c.bf16 %v4968_v4, %v4966_v21 }
 0x2b2   :  { %v4970_v40 = vpop.eup %4969  ;;  %v2256_v19 = vmul.f32 1.442695, %v2140_v38  ;;  %v2141_v58 = vsub.f32 %v7565_v8, %v2057_v33  ;;  %1629 = vmax.xlane.f32.xlu0 %v1628_v61  ;;  %v6665_v56 = vadd.f32 %v6574_v0, %v7566_v62  ;;  %v1631_v4 = vsel %vm1447_vm4, %v6640_v60, -inf }
 0x2b3   :  { %4979 = vpow2.f32 %v2254_v12  ;;  %2902 = vst.msk [vmem:[%s7266_s8 + $0xb4] sm:$0xf] %vm2536_vm5, %v4171_v5  ;;  %v4172_v16 = vpack.c.bf16 %v4970_v40, %v4970_v40  ;;  %4821 = vmatprep.mubr.msk.bf16.mxu1 %vm1447_vm4, %v2623_v11  ;;  %v2060_v21 = vpop.xlane.xlu0 %2059  ;;  %v7567_v61 = vsub.f32 0.0, %v7541_v36  ;;  %v1634_v33 = vsel %vm1447_vm4, %v6653_v2, -inf }
 0x2b4   :  { %4981 = vpow2.f32 %v2256_v19  ;;  %v2258_v50 = vmul.f32 1.442695, %v2141_v58  ;;  %1632 = vmax.xlane.f32.xlu1 %v1631_v4  ;;  %v7568_v19 = vsub.f32 0.0, %v7544_v45 }
 0x2b5   :  { %v4972_v12 = vpop.eup %4971  ;;  %v2142_v38 = vsub.f32 %v7567_v61, %v2060_v21  ;;  %2903 = vst.msk [vmem:[%s7266_s8 + $0xb8] sm:$0xf] %vm2536_vm5, %v4172_v16  ;;  %v2063_v5 = vpop.xlane.xlu1 %2062  ;;  %v1637_v21 = vsel %vm1447_vm4, %v6665_v56, -inf }
 0x2b6   :  { %v4173_v0 = vpack.c.bf16 %v4972_v12, %v4972_v12  ;;  %v2624_v11 = vpack.c.bf16 %v4972_v12, %v4970_v40  ;;  %v4974_v8 = vpop.eup %4973  ;;  %4983 = vpow2.f32 %v2258_v50  ;;  %v2143_v58 = vsub.f32 %v7568_v19, %v2063_v5  ;;  %1635 = vmax.xlane.f32.xlu0 %v1634_v33 }
 0x2b7   :  { %v2260_v60 = vmul.f32 1.442695, %v2142_v38  ;;  %v4174_v36 = vpack.c.bf16 %v4974_v8, %v4974_v8  ;;  %v2066_v16 = vpop.xlane.xlu0 %2065  ;;  %v7569_v12 = vsub.f32 0.0, %v7547_v59  ;;  %v7570_v33 = vsub.f32 0.0, %v7550_v44 }
 0x2b8   :  { %2904 = vst.msk [vmem:[%s7266_s8 + $0xbc] sm:$0xf] %vm2536_vm5, %v4173_v0  ;;  %4822 = vmatmul.mubr.msk.bf16.gmra.mrb[108].mxu1 %vm1447_vm4, %v2624_v11  ;;  %v4976_v40 = vpop.eup %4975  ;;  %v2262_v4 = vmul.f32 1.442695, %v2143_v58  ;;  %1638 = vmax.xlane.f32.xlu1 %v1637_v21 }
 0x2b9   :  { %4985 = vpow2.f32 %v2260_v60  ;;  %v2144_v45 = vsub.f32 %v7569_v12, %v2066_v16  ;;  %2905 = vst.msk [vmem:[%s7266_s8 + $0xc0] sm:$0xf] %vm2536_vm5, %v4174_v36  ;;  %v4175_v50 = vpack.c.bf16 %v4976_v40, %v4976_v40  ;;  %v2069_v61 = vpop.xlane.xlu1 %2068  ;;  %v2625_v38 = vpack.c.bf16 %v4976_v40, %v4974_v8 }
 0x2ba   :  { %4987 = vpow2.f32 %v2262_v4  ;;  %v2145_v11 = vsub.f32 %v7570_v33, %v2069_v61  ;;  %v7571_v8 = vsub.f32 0.0, %v7553_v57  ;;  %v7572_v12 = vsub.f32 0.0, %v7556_v39 }
 0x2bb   :  { %v4978_v0 = vpop.eup %4977  ;;  %v2264_v5 = vmul.f32 1.442695, %v2144_v45  ;;  %2906 = vst.msk [vmem:[%s7266_s8 + $0xc4] sm:$0xf] %vm2536_vm5, %v4175_v50  ;;  %4825 = vmatprep.mubr.msk.bf16.mxu1 %vm1447_vm4, %v2625_v38  ;;  %v2072_v60 = vpop.xlane.xlu0 %2071 }
 0x2bc   :  { %v4176_v59 = vpack.c.bf16 %v4978_v0, %v4978_v0  ;;  %v2266_v58 = vmul.f32 1.442695, %v2145_v11  ;;  %v2146_v36 = vsub.f32 %v7571_v8, %v2072_v60 }
 0x2bd   :  { %v4980_v19 = vpop.eup %4979  ;;  %4989 = vpow2.f32 %v2264_v5  ;;  %v2075_v16 = vpop.xlane.xlu1 %2074 }
 0x2be   :  { %2907 = vst.msk [vmem:[%s7266_s8 + $0xc8] sm:$0xf] %vm2536_vm5, %v4176_v59  ;;  %v4177_v44 = vpack.c.bf16 %v4980_v19, %v4980_v19  ;;  %v2626_v21 = vpack.c.bf16 %v4980_v19, %v4978_v0  ;;  %v4982_v40 = vpop.eup %4981  ;;  %4991 = vpow2.f32 %v2266_v58  ;;  %v2268_v4 = vmul.f32 1.442695, %v2146_v36 }
 0x2bf   :  { %v2147_v45 = vsub.f32 %v7572_v12, %v2075_v16  ;;  %v4178_v57 = vpack.c.bf16 %v4982_v40, %v4982_v40  ;;  %v2078_v50 = vpop.xlane.xlu0 %2077  ;;  %v7573_v0 = vsub.f32 0.0, %v7559_v28  ;;  %v7574_v19 = vsub.f32 0.0, %v7561_v63 }
 0x2c0   :  { %2908 = vst.msk [vmem:[%s7266_s8 + $0xcc] sm:$0xf] %vm2536_vm5, %v4177_v44  ;;  %4826 = vmatmul.mubr.msk.bf16.gmra.mrb[112].mxu1 %vm1447_vm4, %v2626_v21  ;;  %v4984_v61 = vpop.eup %4983  ;;  %4993 = vpow2.f32 %v2268_v4  ;;  %v7575_v16 = vsub.f32 0.0, %v7564_v25 }
 0x2c1   :  { %v2270_v38 = vmul.f32 1.442695, %v2147_v45  ;;  %v2148_v5 = vsub.f32 %v7573_v0, %v2078_v50  ;;  %2909 = vst.msk [vmem:[%s7266_s8 + $0xd0] sm:$0xf] %vm2536_vm5, %v4178_v57  ;;  %v4179_v39 = vpack.c.bf16 %v4984_v61, %v4984_v61  ;;  %v2081_v33 = vpop.xlane.xlu1 %2080  ;;  %v2627_v11 = vpack.c.bf16 %v4984_v61, %v4982_v40 }
 0x2c2   :  { %v2149_v58 = vsub.f32 %v7574_v19, %v2081_v33  ;;  %v7576_v57 = vsub.f32 0.0, %v7566_v62  ;;  %v7578_v19 = vld [vmem:[#allocation83_spill] sm:$0xff] }
 0x2c3   :  { %v4986_v59 = vpop.eup %4985  ;;  %4995 = vpow2.f32 %v2270_v38  ;;  %v2272_v60 = vmul.f32 1.442695, %v2148_v5  ;;  %2910 = vst.msk [vmem:[%s7266_s8 + $0xd4] sm:$0xf] %vm2536_vm5, %v4179_v39  ;;  %4829 = vmatprep.mubr.msk.bf16.mxu1 %vm1447_vm4, %v2627_v11  ;;  %v2084_v8 = vpop.xlane.xlu0 %2083  ;;  %v7577_v5 = vld [vmem:[#allocation82_spill] sm:$0xff] }
 0x2c4   :  { %v4180_v28 = vpack.c.bf16 %v4986_v59, %v4986_v59  ;;  %v4988_v36 = vpop.eup %4987  ;;  %v2274_v44 = vmul.f32 1.442695, %v2149_v58  ;;  %v2150_v21 = vsub.f32 %v7575_v16, %v2084_v8  ;;  %v7579_v16 = vld [vmem:[#allocation84_spill] sm:$0xff] }
 0x2c5   :  { %4997 = vpow2.f32 %v2272_v60  ;;  %v4181_v63 = vpack.c.bf16 %v4988_v36, %v4988_v36  ;;  %v2087_v40 = vpop.xlane.xlu1 %2086  ;;  %v2628_v4 = vpack.c.bf16 %v4988_v36, %v4986_v59 }
 0x2c6   :  { %2911 = vst.msk [vmem:[%s7266_s8 + $0xd8] sm:$0xf] %vm2536_vm5, %v4180_v28  ;;  %4999 = vpow2.f32 %v2274_v44  ;;  %v2276_v45 = vmul.f32 1.442695, %v2150_v21  ;;  %v2151_v50 = vsub.f32 %v7576_v57, %v2087_v40  ;;  %v7580_v57 = vld [vmem:[#allocation85_spill] sm:$0xff] }
 0x2c7   :  { %v4990_v12 = vpop.eup %4989  ;;  %2912 = vst.msk [vmem:[%s7266_s8 + $0xdc] sm:$0xf] %vm2536_vm5, %v4181_v63  ;;  %v1450_v61 = vpop.xlane.xlu0 %1449 }
 0x2c8   :  { %v4182_v25 = vpack.c.bf16 %v4990_v12, %v4990_v12  ;;  %4830 = vmatmul.mubr.msk.bf16.gmra.mrb[116].mxu1 %vm1447_vm4, %v2628_v4  ;;  %v4992_v38 = vpop.eup %4991  ;;  %5001 = vpow2.f32 %v2276_v45  ;;  %v2278_v0 = vmul.f32 1.442695, %v2151_v50  ;;  %v1640_v39 = vsub.f32 %v7577_v5, %v1450_v61  ;;  %v7581_v5 = vld [vmem:[#allocation86_spill] sm:$0xff] }
 0x2c9   :  { %v4183_v62 = vpack.c.bf16 %v4992_v38, %v4992_v38  ;;  %v1453_v33 = vpop.xlane.xlu1 %1452  ;;  %v2629_v11 = vpack.c.bf16 %v4992_v38, %v4990_v12 }
 0x2ca   :  { %2913 = vst.msk [vmem:[%s7266_s8 + $0xe0] sm:$0xf] %vm2536_vm5, %v4182_v25  ;;  %v4994_v59 = vpop.eup %4993  ;;  %5003 = vpow2.f32 %v2278_v0  ;;  %v1704_v60 = vmul.f32 1.442695, %v1640_v39  ;;  %v1641_v58 = vsub.f32 %v7578_v19, %v1453_v33  ;;  %v7582_v19 = vld [vmem:[#allocation87_spill] sm:$0xff] }
 0x2cb   :  { %2914 = vst.msk [vmem:[%s7266_s8 + $0xe4] sm:$0xf] %vm2536_vm5, %v4183_v62  ;;  %v4184_v28 = vpack.c.bf16 %v4994_v59, %v4994_v59  ;;  %4833 = vmatprep.mubr.msk.bf16.mxu1 %vm1447_vm4, %v2629_v11  ;;  %v1456_v8 = vpop.xlane.xlu0 %1455 }
 0x2cc   :  { %5005 = vpow2.f32 %v1704_v60  ;;  %v1706_v44 = vmul.f32 1.442695, %v1641_v58  ;;  %v1642_v21 = vsub.f32 %v7579_v16, %v1456_v8  ;;  %v7583_v16 = vld [vmem:[#allocation88_spill] sm:$0xff] }
 0x2cd   :  { %v4996_v36 = vpop.eup %4995  ;;  %2915 = vst.msk [vmem:[%s7266_s8 + $0xe8] sm:$0xf] %vm2536_vm5, %v4184_v28  ;;  %v1459_v40 = vpop.xlane.xlu1 %1458 }
 0x2ce   :  { %v4185_v63 = vpack.c.bf16 %v4996_v36, %v4996_v36  ;;  %v2630_v4 = vpack.c.bf16 %v4996_v36, %v4994_v59  ;;  %5007 = vpow2.f32 %v1706_v44  ;;  %v1708_v45 = vmul.f32 1.442695, %v1642_v21 }
 0x2cf   :  { %v4998_v12 = vpop.eup %4997  ;;  %v1643_v50 = vsub.f32 %v7580_v57, %v1459_v40  ;;  %v1462_v61 = vpop.xlane.xlu0 %1461 }
 0x2d0   :  { %2916 = vst.msk [vmem:[%s7266_s8 + $0xec] sm:$0xf] %vm2536_vm5, %v4185_v63  ;;  %v4186_v25 = vpack.c.bf16 %v4998_v12, %v4998_v12  ;;  %4834 = vmatmul.mubr.msk.bf16.gmra.mrb[120].mxu1 %vm1447_vm4, %v2630_v4  ;;  %v5000_v38 = vpop.eup %4999  ;;  %5009 = vpow2.f32 %v1708_v45  ;;  %v1644_v39 = vsub.f32 %v7581_v5, %v1462_v61 }
 0x2d1   :  { %v1710_v0 = vmul.f32 1.442695, %v1643_v50  ;;  %v4187_v62 = vpack.c.bf16 %v5000_v38, %v5000_v38  ;;  %v1465_v33 = vpop.xlane.xlu1 %1464  ;;  %v2631_v11 = vpack.c.bf16 %v5000_v38, %v4998_v12 }
 0x2d2   :  { %2917 = vst.msk [vmem:[%s7266_s8 + $0xf0] sm:$0xf] %vm2536_vm5, %v4186_v25  ;;  %v5002_v59 = vpop.eup %5001  ;;  %v1712_v60 = vmul.f32 1.442695, %v1644_v39  ;;  %v1645_v58 = vsub.f32 %v7582_v19, %v1465_v33  ;;  %v7584_v19 = vld [vmem:[#allocation89_spill] sm:$0xff] }
 0x2d3   :  { %5011 = vpow2.f32 %v1710_v0  ;;  %2918 = vst.msk [vmem:[%s7266_s8 + $0xf4] sm:$0xf] %vm2536_vm5, %v4187_v62  ;;  %v4188_v28 = vpack.c.bf16 %v5002_v59, %v5002_v59  ;;  %v1468_v8 = vpop.xlane.xlu0 %1467  ;;  %4837 = vmatprep.mubr.msk.bf16.mxu1 %vm1447_vm4, %v2631_v11 }
 0x2d4   :  { %v5004_v36 = vpop.eup %5003  ;;  %5013 = vpow2.f32 %v1712_v60  ;;  %v1714_v44 = vmul.f32 1.442695, %v1645_v58  ;;  %v1646_v21 = vsub.f32 %v7583_v16, %v1468_v8 }
 0x2d5   :  { %2919 = vst.msk [vmem:[%s7266_s8 + $0xf8] sm:$0xf] %vm2536_vm5, %v4188_v28  ;;  %v4189_v63 = vpack.c.bf16 %v5004_v36, %v5004_v36  ;;  %v1471_v40 = vpop.xlane.xlu1 %1470  ;;  %v2632_v4 = vpack.c.bf16 %v5004_v36, %v5002_v59 }
 0x2d6   :  { %v5006_v12 = vpop.eup %5005  ;;  %5015 = vpow2.f32 %v1714_v44  ;;  %v1716_v45 = vmul.f32 1.442695, %v1646_v21  ;;  %v1647_v57 = vsub.f32 %v6014_v42, %v1471_v40  ;;  %v7585_v44 = vld [vmem:[#allocation90_spill] sm:$0xff] }
 0x2d7   :  { %2920 = vst.msk [vmem:[%s7266_s8 + $0xfc] sm:$0xf] %vm2536_vm5, %v4189_v63  ;;  %v4062_v50 = vpack.c.bf16 %v5006_v12, %v5006_v12  ;;  %v1474_v25 = vpop.xlane.xlu0 %1473  ;;  %v7586_v12 = vld [vmem:[#allocation91_spill] sm:$0xff] }
 0x2d8   :  { %4838 = vmatmul.mubr.msk.bf16.gmra.mrb[124].mxu1 %vm1447_vm4, %v2632_v4  ;;  %v5008_v61 = vpop.eup %5007  ;;  %5017 = vpow2.f32 %v1716_v45  ;;  %v1718_v38 = vmul.f32 1.442695, %v1647_v57  ;;  %v1648_v0 = vsub.f32 %v6020_v18, %v1474_v25 }
 0x2d9   :  { %2537 = vst.msk [vmem:[%s7267_s7] sm:$0xf] %vm2536_vm5, %v4062_v50  ;;  %v4063_v42 = vpack.c.bf16 %v5008_v61, %v5008_v61  ;;  %v1477_v5 = vpop.xlane.xlu1 %1476 }
 0x2da   :  { %v5010_v39 = vpop.eup %5009  ;;  %5019 = vpow2.f32 %v1718_v38  ;;  %v1720_v62 = vmul.f32 1.442695, %v1648_v0  ;;  %v1649_v33 = vsub.f32 %v6026_v47, %v1477_v5  ;;  %v7587_v38 = vld [vmem:[#allocation92_spill] sm:$0xff] }
 0x2db   :  { %2538 = vst.msk [vmem:[%s7267_s7 + $0x4] sm:$0xf] %vm2536_vm5, %v4063_v42  ;;  %v4064_v11 = vpack.c.bf16 %v5010_v39, %v5010_v39  ;;  %v1480_v59 = vpop.xlane.xlu0 %1479 }
 0x2dc   :  { %5021 = vpow2.f32 %v1720_v62  ;;  %v1722_v60 = vmul.f32 1.442695, %v1649_v33  ;;  %v1650_v58 = vsub.f32 %v7584_v19, %v1480_v59  ;;  %v7588_v33 = vld [vmem:[#allocation93_spill] sm:$0xff] }
 0x2dd   :  { %v5012_v18 = vpop.eup %5011  ;;  %2539 = vst.msk [vmem:[%s7267_s7 + $0x8] sm:$0xf] %vm2536_vm5, %v4064_v11  ;;  %v1483_v8 = vpop.xlane.xlu1 %1482 }
 0x2de   :  { %v4065_v28 = vpack.c.bf16 %v5012_v18, %v5012_v18  ;;  %v5014_v47 = vpop.eup %5013  ;;  %5023 = vpow2.f32 %v1722_v60  ;;  %v1724_v36 = vmul.f32 1.442695, %v1650_v58  ;;  %v1651_v16 = vsub.f32 %v7585_v44, %v1483_v8  ;;  %v7589_v58 = vld [vmem:[#allocation94_spill] sm:$0xff] }
 0x2df   :  { %v4066_v21 = vpack.c.bf16 %v5014_v47, %v5014_v47  ;;  %v1486_v63 = vpop.xlane.xlu0 %1485 }
 0x2e0   :  { %2540 = vst.msk [vmem:[%s7267_s7 + $0xc] sm:$0xf] %vm2536_vm5, %v4065_v28  ;;  %v5016_v40 = vpop.eup %5015  ;;  %5025 = vpow2.f32 %v1724_v36  ;;  %v1726_v4 = vmul.f32 1.442695, %v1651_v16  ;;  %v1652_v45 = vsub.f32 %v7586_v12, %v1486_v63 }
 0x2e1   :  { %2541 = vst.msk [vmem:[%s7267_s7 + $0x10] sm:$0xf] %vm2536_vm5, %v4066_v21  ;;  %v4067_v57 = vpack.c.bf16 %v5016_v40, %v5016_v40  ;;  %v1489_v50 = vpop.xlane.xlu1 %1488 }
 0x2e2   :  { %v5018_v25 = vpop.eup %5017  ;;  %5027 = vpow2.f32 %v1726_v4  ;;  %v1728_v61 = vmul.f32 1.442695, %v1652_v45  ;;  %v1653_v0 = vsub.f32 %v7587_v38, %v1489_v50 }
 0x2e3   :  { %2542 = vst.msk [vmem:[%s7267_s7 + $0x14] sm:$0xf] %vm2536_vm5, %v4067_v57  ;;  %v4068_v42 = vpack.c.bf16 %v5018_v25, %v5018_v25  ;;  %v1492_v5 = vpop.xlane.xlu0 %1491 }
 0x2e4   :  { %v5020_v39 = vpop.eup %5019  ;;  %5029 = vpow2.f32 %v1728_v61  ;;  %v1730_v62 = vmul.f32 1.442695, %v1653_v0  ;;  %v1654_v11 = vsub.f32 %v7588_v33, %v1492_v5 }
 0x2e5   :  { %2543 = vst.msk [vmem:[%s7267_s7 + $0x18] sm:$0xf] %vm2536_vm5, %v4068_v42  ;;  %v4069_v59 = vpack.c.bf16 %v5020_v39, %v5020_v39  ;;  %v1495_v18 = vpop.xlane.xlu1 %1494 }
 0x2e6   :  { %v5022_v60 = vpop.eup %5021  ;;  %5031 = vpow2.f32 %v1730_v62  ;;  %v1732_v19 = vmul.f32 1.442695, %v1654_v11  ;;  %v1655_v28 = vsub.f32 %v7589_v58, %v1495_v18 }
 0x2e7   :  { %2544 = vst.msk [vmem:[%s7267_s7 + $0x1c] sm:$0xf] %vm2536_vm5, %v4069_v59  ;;  %v4070_v8 = vpack.c.bf16 %v5022_v60, %v5022_v60  ;;  %v1498_v47 = vpop.xlane.xlu0 %1497 }
 0x2e8   :  { %v5024_v36 = vpop.eup %5023  ;;  %5033 = vpow2.f32 %v1732_v19  ;;  %v1734_v44 = vmul.f32 1.442695, %v1655_v28  ;;  %v1656_v16 = vsub.f32 %v6082_v31, %v1498_v47 }
 0x2e9   :  { %2545 = vst.msk [vmem:[%s7267_s7 + $0x20] sm:$0xf] %vm2536_vm5, %v4070_v8  ;;  %v4071_v21 = vpack.c.bf16 %v5024_v36, %v5024_v36  ;;  %v1501_v63 = vpop.xlane.xlu1 %1500 }
 0x2ea   :  { %v5026_v40 = vpop.eup %5025  ;;  %5035 = vpow2.f32 %v1734_v44  ;;  %v1736_v4 = vmul.f32 1.442695, %v1656_v16  ;;  %v1657_v12 = vsub.f32 %v6090_v24, %v1501_v63 }
 0x2eb   :  { %2546 = vst.msk [vmem:[%s7267_s7 + $0x24] sm:$0xf] %vm2536_vm5, %v4071_v21  ;;  %v4072_v45 = vpack.c.bf16 %v5026_v40, %v5026_v40  ;;  %v1504_v57 = vpop.xlane.xlu0 %1503 }
 0x2ec   :  { %v5028_v31 = vpop.eup %5027  ;;  %5037 = vpow2.f32 %v1736_v4  ;;  %v1738_v50 = vmul.f32 1.442695, %v1657_v12  ;;  %v1658_v25 = vsub.f32 %v6102_v54, %v1504_v57 }
 0x2ed   :  { %2547 = vst.msk [vmem:[%s7267_s7 + $0x28] sm:$0xf] %vm2536_vm5, %v4072_v45  ;;  %v4073_v61 = vpack.c.bf16 %v5028_v31, %v5028_v31  ;;  %v1507_v38 = vpop.xlane.xlu1 %1506 }
 0x2ee   :  { %v5030_v24 = vpop.eup %5029  ;;  %5039 = vpow2.f32 %v1738_v50  ;;  %v1740_v0 = vmul.f32 1.442695, %v1658_v25  ;;  %v1659_v42 = vsub.f32 %v6112_v43, %v1507_v38 }
 0x2ef   :  { %2548 = vst.msk [vmem:[%s7267_s7 + $0x2c] sm:$0xf] %vm2536_vm5, %v4073_v61  ;;  %v4074_v5 = vpack.c.bf16 %v5030_v24, %v5030_v24  ;;  %v1510_v39 = vpop.xlane.xlu0 %1509 }
 0x2f0   :  { %v5032_v54 = vpop.eup %5031  ;;  %5041 = vpow2.f32 %v1740_v0  ;;  %v1742_v62 = vmul.f32 1.442695, %v1659_v42  ;;  %v1660_v33 = vsub.f32 %v6126_v49, %v1510_v39 }
 0x2f1   :  { %2549 = vst.msk [vmem:[%s7267_s7 + $0x30] sm:$0xf] %vm2536_vm5, %v4074_v5  ;;  %v4075_v11 = vpack.c.bf16 %v5032_v54, %v5032_v54  ;;  %v1513_v59 = vpop.xlane.xlu1 %1512 }
 0x2f2   :  { %v5034_v43 = vpop.eup %5033  ;;  %5043 = vpow2.f32 %v1742_v62  ;;  %v1744_v18 = vmul.f32 1.442695, %v1660_v33  ;;  %v1661_v60 = vsub.f32 %v6140_v13, %v1513_v59 }
 0x2f3   :  { %2550 = vst.msk [vmem:[%s7267_s7 + $0x34] sm:$0xf] %vm2536_vm5, %v4075_v11  ;;  %v4076_v19 = vpack.c.bf16 %v5034_v43, %v5034_v43  ;;  %v1516_v58 = vpop.xlane.xlu0 %1515 }
 0x2f4   :  { %v5036_v49 = vpop.eup %5035  ;;  %5045 = vpow2.f32 %v1744_v18  ;;  %v1746_v28 = vmul.f32 1.442695, %v1661_v60  ;;  %v1662_v8 = vsub.f32 %v6148_v14, %v1516_v58 }
 0x2f5   :  { %2551 = vst.msk [vmem:[%s7267_s7 + $0x38] sm:$0xf] %vm2536_vm5, %v4076_v19  ;;  %v4077_v47 = vpack.c.bf16 %v5036_v49, %v5036_v49  ;;  %v1519_v36 = vpop.xlane.xlu1 %1518 }
 0x2f6   :  { %v5038_v13 = vpop.eup %5037  ;;  %5047 = vpow2.f32 %v1746_v28  ;;  %v1748_v44 = vmul.f32 1.442695, %v1662_v8  ;;  %v1663_v16 = vsub.f32 %v6160_v10, %v1519_v36 }
 0x2f7   :  { %2552 = vst.msk [vmem:[%s7267_s7 + $0x3c] sm:$0xf] %vm2536_vm5, %v4077_v47  ;;  %v4078_v21 = vpack.c.bf16 %v5038_v13, %v5038_v13  ;;  %v1522_v63 = vpop.xlane.xlu0 %1521 }
 0x2f8   :  { %v5040_v14 = vpop.eup %5039  ;;  %5049 = vpow2.f32 %v1748_v44  ;;  %v1750_v40 = vmul.f32 1.442695, %v1663_v16  ;;  %v1664_v4 = vsub.f32 %v6173_v17, %v1522_v63 }
 0x2f9   :  { %2553 = vst.msk [vmem:[%s7267_s7 + $0x40] sm:$0xf] %vm2536_vm5, %v4078_v21  ;;  %v4079_v12 = vpack.c.bf16 %v5040_v14, %v5040_v14  ;;  %v1525_v45 = vpop.xlane.xlu1 %1524 }
 0x2fa   :  { %v5042_v10 = vpop.eup %5041  ;;  %5051 = vpow2.f32 %v1750_v40  ;;  %v1752_v57 = vmul.f32 1.442695, %v1664_v4  ;;  %v1665_v31 = vsub.f32 %v6185_v37, %v1525_v45 }
 0x2fb   :  { %2554 = vst.msk [vmem:[%s7267_s7 + $0x44] sm:$0xf] %vm2536_vm5, %v4079_v12  ;;  %v4080_v50 = vpack.c.bf16 %v5042_v10, %v5042_v10  ;;  %v1528_v25 = vpop.xlane.xlu0 %1527 }
 0x2fc   :  { %v5044_v17 = vpop.eup %5043  ;;  %5053 = vpow2.f32 %v1752_v57  ;;  %v1754_v61 = vmul.f32 1.442695, %v1665_v31  ;;  %v1666_v38 = vsub.f32 %v6198_v1, %v1528_v25 }
 0x2fd   :  { %2555 = vst.msk [vmem:[%s7267_s7 + $0x48] sm:$0xf] %vm2536_vm5, %v4080_v50  ;;  %v4081_v24 = vpack.c.bf16 %v5044_v17, %v5044_v17  ;;  %v1531_v0 = vpop.xlane.xlu1 %1530 }
 0x2fe   :  { %v5046_v37 = vpop.eup %5045  ;;  %5055 = vpow2.f32 %v1754_v61  ;;  %v1756_v42 = vmul.f32 1.442695, %v1666_v38  ;;  %v1667_v5 = vsub.f32 %v6210_v55, %v1531_v0 }
 0x2ff   :  { %2556 = vst.msk [vmem:[%s7267_s7 + $0x4c] sm:$0xf] %vm2536_vm5, %v4081_v24  ;;  %v4082_v39 = vpack.c.bf16 %v5046_v37, %v5046_v37  ;;  %v1534_v54 = vpop.xlane.xlu0 %1533 }
 0x300   :  { %v5048_v1 = vpop.eup %5047  ;;  %5057 = vpow2.f32 %v1756_v42  ;;  %v1758_v62 = vmul.f32 1.442695, %v1667_v5  ;;  %v1668_v33 = vsub.f32 %v6222_v30, %v1534_v54 }
 0x301   :  { %2557 = vst.msk [vmem:[%s7267_s7 + $0x50] sm:$0xf] %vm2536_vm5, %v4082_v39  ;;  %v4083_v11 = vpack.c.bf16 %v5048_v1, %v5048_v1  ;;  %v1537_v59 = vpop.xlane.xlu1 %1536 }
 0x302   :  { %v5050_v55 = vpop.eup %5049  ;;  %5059 = vpow2.f32 %v1758_v62  ;;  %v1760_v43 = vmul.f32 1.442695, %v1668_v33  ;;  %v1669_v18 = vsub.f32 %v6235_v23, %v1537_v59 }
 0x303   :  { %2558 = vst.msk [vmem:[%s7267_s7 + $0x54] sm:$0xf] %vm2536_vm5, %v4083_v11  ;;  %v4084_v60 = vpack.c.bf16 %v5050_v55, %v5050_v55  ;;  %v1540_v19 = vpop.xlane.xlu0 %1539 }
 0x304   :  { %v5052_v30 = vpop.eup %5051  ;;  %5061 = vpow2.f32 %v1760_v43  ;;  %v1762_v58 = vmul.f32 1.442695, %v1669_v18  ;;  %v1670_v49 = vsub.f32 %v6248_v52, %v1540_v19 }
 0x305   :  { %2559 = vst.msk [vmem:[%s7267_s7 + $0x58] sm:$0xf] %vm2536_vm5, %v4084_v60  ;;  %v4085_v28 = vpack.c.bf16 %v5052_v30, %v5052_v30  ;;  %v1543_v8 = vpop.xlane.xlu1 %1542 }
 0x306   :  { %v5054_v23 = vpop.eup %5053  ;;  %5063 = vpow2.f32 %v1762_v58  ;;  %v1764_v47 = vmul.f32 1.442695, %v1670_v49  ;;  %v1671_v36 = vsub.f32 %v6260_v22, %v1543_v8 }
 0x307   :  { %2560 = vst.msk [vmem:[%s7267_s7 + $0x5c] sm:$0xf] %vm2536_vm5, %v4085_v28  ;;  %v4086_v13 = vpack.c.bf16 %v5054_v23, %v5054_v23  ;;  %v1546_v44 = vpop.xlane.xlu0 %1545 }
 0x308   :  { %v5056_v52 = vpop.eup %5055  ;;  %5065 = vpow2.f32 %v1764_v47  ;;  %v1766_v16 = vmul.f32 1.442695, %v1671_v36  ;;  %v1672_v21 = vsub.f32 %v6273_v35, %v1546_v44 }
 0x309   :  { %2561 = vst.msk [vmem:[%s7267_s7 + $0x60] sm:$0xf] %vm2536_vm5, %v4086_v13  ;;  %v4087_v63 = vpack.c.bf16 %v5056_v52, %v5056_v52  ;;  %v1549_v14 = vpop.xlane.xlu1 %1548 }
 0x30a   :  { %v5058_v22 = vpop.eup %5057  ;;  %5067 = vpow2.f32 %v1766_v16  ;;  %v1768_v40 = vmul.f32 1.442695, %v1672_v21  ;;  %v1673_v4 = vsub.f32 %v6285_v26, %v1549_v14 }
 0x30b   :  { %2562 = vst.msk [vmem:[%s7267_s7 + $0x64] sm:$0xf] %vm2536_vm5, %v4087_v63  ;;  %v4088_v12 = vpack.c.bf16 %v5058_v22, %v5058_v22  ;;  %v1552_v45 = vpop.xlane.xlu0 %1551 }
 0x30c   :  { %v5060_v35 = vpop.eup %5059  ;;  %5069 = vpow2.f32 %v1768_v40  ;;  %v1770_v10 = vmul.f32 1.442695, %v1673_v4  ;;  %v1674_v57 = vsub.f32 %v6298_v53, %v1552_v45 }
 0x30d   :  { %2563 = vst.msk [vmem:[%s7267_s7 + $0x68] sm:$0xf] %vm2536_vm5, %v4088_v12  ;;  %v4089_v31 = vpack.c.bf16 %v5060_v35, %v5060_v35  ;;  %v1555_v50 = vpop.xlane.xlu1 %1554 }
 0x30e   :  { %v5062_v26 = vpop.eup %5061  ;;  %5071 = vpow2.f32 %v1770_v10  ;;  %v1772_v25 = vmul.f32 1.442695, %v1674_v57  ;;  %v1675_v17 = vsub.f32 %v6310_v46, %v1555_v50 }
 0x30f   :  { %2564 = vst.msk [vmem:[%s7267_s7 + $0x6c] sm:$0xf] %vm2536_vm5, %v4089_v31  ;;  %v4090_v61 = vpack.c.bf16 %v5062_v26, %v5062_v26  ;;  %v1558_v38 = vpop.xlane.xlu0 %1557 }
 0x310   :  { %v5064_v53 = vpop.eup %5063  ;;  %5073 = vpow2.f32 %v1772_v25  ;;  %v1774_v24 = vmul.f32 1.442695, %v1675_v17  ;;  %v1676_v0 = vsub.f32 %v6323_v3, %v1558_v38 }
 0x311   :  { %2565 = vst.msk [vmem:[%s7267_s7 + $0x70] sm:$0xf] %vm2536_vm5, %v4090_v61  ;;  %v4091_v37 = vpack.c.bf16 %v5064_v53, %v5064_v53  ;;  %v1561_v42 = vpop.xlane.xlu1 %1560 }
 0x312   :  { %v5066_v46 = vpop.eup %5065  ;;  %5075 = vpow2.f32 %v1774_v24  ;;  %v1776_v5 = vmul.f32 1.442695, %v1676_v0  ;;  %v1677_v39 = vsub.f32 %v6335_v32, %v1561_v42  ;;  %v7590_v0 = vld [vmem:[#allocation53_spill] sm:$0xff] }
 0x313   :  { %2566 = vst.msk [vmem:[%s7267_s7 + $0x74] sm:$0xf] %vm2536_vm5, %v4091_v37  ;;  %v4092_v54 = vpack.c.bf16 %v5066_v46, %v5066_v46  ;;  %v1564_v1 = vpop.xlane.xlu0 %1563 }
 0x314   :  { %v5068_v3 = vpop.eup %5067  ;;  %5077 = vpow2.f32 %v1776_v5  ;;  %v1778_v62 = vmul.f32 1.442695, %v1677_v39  ;;  %v1678_v33 = vsub.f32 %v6348_v20, %v1564_v1  ;;  %v7591_v39 = vld [vmem:[#allocation57_spill] sm:$0xff] }
 0x315   :  { %2567 = vst.msk [vmem:[%s7267_s7 + $0x78] sm:$0xf] %vm2536_vm5, %v4092_v54  ;;  %v4093_v11 = vpack.c.bf16 %v5068_v3, %v5068_v3  ;;  %v1567_v59 = vpop.xlane.xlu1 %1566 }
 0x316   :  { %v5070_v32 = vpop.eup %5069  ;;  %5079 = vpow2.f32 %v1778_v62  ;;  %v1780_v55 = vmul.f32 1.442695, %v1678_v33  ;;  %v1679_v43 = vsub.f32 %v6360_v51, %v1567_v59 }
 0x317   :  { %2568 = vst.msk [vmem:[%s7267_s7 + $0x7c] sm:$0xf] %vm2536_vm5, %v4093_v11  ;;  %v4094_v18 = vpack.c.bf16 %v5070_v32, %v5070_v32  ;;  %v1570_v60 = vpop.xlane.xlu0 %1569  ;;  %v7592_v11 = vld [vmem:[#allocation50_spill] sm:$0xff] }
 0x318   :  { %v5072_v20 = vpop.eup %5071  ;;  %5081 = vpow2.f32 %v1780_v55  ;;  %v1782_v19 = vmul.f32 1.442695, %v1679_v43  ;;  %v1680_v30 = vsub.f32 %v6373_v34, %v1570_v60  ;;  %v7593_v60 = vld [vmem:[#allocation54_spill] sm:$0xff] }
 0x319   :  { %2569 = vst.msk [vmem:[%s7267_s7 + $0x80] sm:$0xf] %vm2536_vm5, %v4094_v18  ;;  %v4095_v58 = vpack.c.bf16 %v5072_v20, %v5072_v20  ;;  %v1573_v49 = vpop.xlane.xlu1 %1572 }
 0x31a   :  { %v5074_v51 = vpop.eup %5073  ;;  %5083 = vpow2.f32 %v1782_v19  ;;  %v1784_v28 = vmul.f32 1.442695, %v1680_v30  ;;  %v1681_v8 = vsub.f32 %v6385_v48, %v1573_v49 }
 0x31b   :  { %2570 = vst.msk [vmem:[%s7267_s7 + $0x84] sm:$0xf] %vm2536_vm5, %v4095_v58  ;;  %v4096_v23 = vpack.c.bf16 %v5074_v51, %v5074_v51  ;;  %v1576_v47 = vpop.xlane.xlu0 %1575  ;;  %v7594_v51 = vld [vmem:[#allocation61_spill] sm:$0xff] }
 0x31c   :  { %v5076_v34 = vpop.eup %5075  ;;  %5085 = vpow2.f32 %v1784_v28  ;;  %v1786_v36 = vmul.f32 1.442695, %v1681_v8  ;;  %v1682_v13 = vsub.f32 %v6398_v6, %v1576_v47 }
 0x31d   :  { %2571 = vst.msk [vmem:[%s7267_s7 + $0x88] sm:$0xf] %vm2536_vm5, %v4096_v23  ;;  %v4097_v44 = vpack.c.bf16 %v5076_v34, %v5076_v34  ;;  %v1579_v52 = vpop.xlane.xlu1 %1578 }
 0x31e   :  { %v5078_v48 = vpop.eup %5077  ;;  %5087 = vpow2.f32 %v1786_v36  ;;  %v1788_v16 = vmul.f32 1.442695, %v1682_v13  ;;  %v1683_v21 = vsub.f32 %v6410_v29, %v1579_v52  ;;  %v7595_v13 = vld [vmem:[#allocation2_spill] sm:$0xff]  ;;  %v7596_v52 = vld [vmem:[#allocation65_spill] sm:$0xff] }
 0x31f   :  { %2572 = vst.msk [vmem:[%s7267_s7 + $0x8c] sm:$0xf] %vm2536_vm5, %v4097_v44  ;;  %v4098_v63 = vpack.c.bf16 %v5078_v48, %v5078_v48  ;;  %v1582_v14 = vpop.xlane.xlu0 %1581 }
 0x320   :  { %v5080_v6 = vpop.eup %5079  ;;  %5089 = vpow2.f32 %v1788_v16  ;;  %v1790_v22 = vmul.f32 1.442695, %v1683_v21  ;;  %v1684_v40 = vsub.f32 %v6423_v15, %v1582_v14 }
 0x321   :  { %2573 = vst.msk [vmem:[%s7267_s7 + $0x90] sm:$0xf] %vm2536_vm5, %v4098_v63  ;;  %v4099_v4 = vpack.c.bf16 %v5080_v6, %v5080_v6  ;;  %v1585_v12 = vpop.xlane.xlu1 %1584  ;;  %v7597_v63 = vld [vmem:[#allocation3_spill] sm:$0xff] }
 0x322   :  { %v5082_v29 = vpop.eup %5081  ;;  %5091 = vpow2.f32 %v1790_v22  ;;  %v1792_v45 = vmul.f32 1.442695, %v1684_v40  ;;  %v1685_v35 = vsub.f32 %v6435_v7, %v1585_v12  ;;  %v7598_v12 = vld [vmem:[#allocation58_spill] sm:$0xff] }
 0x323   :  { %2574 = vst.msk [vmem:[%s7267_s7 + $0x94] sm:$0xf] %vm2536_vm5, %v4099_v4  ;;  %v4100_v10 = vpack.c.bf16 %v5082_v29, %v5082_v29  ;;  %v1588_v57 = vpop.xlane.xlu0 %1587 }
 0x324   :  { %v5084_v15 = vpop.eup %5083  ;;  %5093 = vpow2.f32 %v1792_v45  ;;  %v1794_v31 = vmul.f32 1.442695, %v1685_v35  ;;  %v1686_v50 = vsub.f32 %v6448_v41, %v1588_v57  ;;  %v7599_v45 = vld [vmem:[#allocation4_spill] sm:$0xff] }
 0x325   :  { %2575 = vst.msk [vmem:[%s7267_s7 + $0x98] sm:$0xf] %vm2536_vm5, %v4100_v10  ;;  %v4101_v26 = vpack.c.bf16 %v5084_v15, %v5084_v15  ;;  %v1591_v25 = vpop.xlane.xlu1 %1590  ;;  %v7600_v15 = vld [vmem:[#allocation5_spill] sm:$0xff] }
 0x326   :  { %v5086_v7 = vpop.eup %5085  ;;  %5095 = vpow2.f32 %v1794_v31  ;;  %v1796_v17 = vmul.f32 1.442695, %v1686_v50  ;;  %v1687_v61 = vsub.f32 %v6460_v9, %v1591_v25 }
 0x327   :  { %2576 = vst.msk [vmem:[%s7267_s7 + $0x9c] sm:$0xf] %vm2536_vm5, %v4101_v26  ;;  %v4102_v38 = vpack.c.bf16 %v5086_v7, %v5086_v7  ;;  %v1594_v53 = vpop.xlane.xlu0 %1593 }
 0x328   :  { %v5088_v41 = vpop.eup %5087  ;;  %5097 = vpow2.f32 %v1796_v17  ;;  %v1798_v24 = vmul.f32 1.442695, %v1687_v61  ;;  %v1688_v37 = vsub.f32 %v7590_v0, %v1594_v53  ;;  %v7601_v17 = vld [vmem:[#allocation62_spill] sm:$0xff] }
 0x329   :  { %2577 = vst.msk [vmem:[%s7267_s7 + $0xa0] sm:$0xf] %vm2536_vm5, %v4102_v38  ;;  %v4103_v42 = vpack.c.bf16 %v5088_v41, %v5088_v41  ;;  %v1597_v46 = vpop.xlane.xlu1 %1596 }
 0x32a   :  { %v5090_v9 = vpop.eup %5089  ;;  %5099 = vpow2.f32 %v1798_v24  ;;  %v1800_v5 = vmul.f32 1.442695, %v1688_v37  ;;  %v1689_v54 = vsub.f32 %v7591_v39, %v1597_v46  ;;  %v7602_v37 = vld [vmem:[#allocation69_spill] sm:$0xff] }
 0x32b   :  { %2578 = vst.msk [vmem:[%s7267_s7 + $0xa4] sm:$0xf] %vm2536_vm5, %v4103_v42  ;;  %v4104_v1 = vpack.c.bf16 %v5090_v9, %v5090_v9  ;;  %v1600_v3 = vpop.xlane.xlu0 %1599 }
 0x32c   :  { %v5092_v62 = vpop.eup %5091  ;;  %5101 = vpow2.f32 %v1800_v5  ;;  %v1802_v33 = vmul.f32 1.442695, %v1689_v54  ;;  %v1690_v59 = vsub.f32 %v7592_v11, %v1600_v3  ;;  %v7603_v54 = vld [vmem:[#allocation73_spill] sm:$0xff] }
 0x32d   :  { %2579 = vst.msk [vmem:[%s7267_s7 + $0xa8] sm:$0xf] %vm2536_vm5, %v4104_v1  ;;  %v4105_v32 = vpack.c.bf16 %v5092_v62, %v5092_v62  ;;  %v1603_v55 = vpop.xlane.xlu1 %1602 }
 0x32e   :  { %v5094_v43 = vpop.eup %5093  ;;  %5103 = vpow2.f32 %v1802_v33  ;;  %v1804_v18 = vmul.f32 1.442695, %v1690_v59  ;;  %v1691_v20 = vsub.f32 %v7593_v60, %v1603_v55  ;;  %v7604_v33 = vld [vmem:[#allocation6_spill] sm:$0xff] }
 0x32f   :  { %2580 = vst.msk [vmem:[%s7267_s7 + $0xac] sm:$0xf] %vm2536_vm5, %v4105_v32  ;;  %v4106_v19 = vpack.c.bf16 %v5094_v43, %v5094_v43  ;;  %v1606_v30 = vpop.xlane.xlu0 %1605 }
 0x330   :  { %v5096_v58 = vpop.eup %5095  ;;  %5105 = vpow2.f32 %v1804_v18  ;;  %v1806_v49 = vmul.f32 1.442695, %v1691_v20  ;;  %v1692_v28 = vsub.f32 %v7594_v51, %v1606_v30  ;;  %v7605_v18 = vld [vmem:[#allocation66_spill] sm:$0xff]  ;;  %v7606_v20 = vld [vmem:[#allocation7_spill] sm:$0xff] }
 0x331   :  { %2581 = vst.msk [vmem:[%s7267_s7 + $0xb0] sm:$0xf] %vm2536_vm5, %v4106_v19  ;;  %v4107_v8 = vpack.c.bf16 %v5096_v58, %v5096_v58  ;;  %v4779_v23 = vpop.f32.mrb[64].mxu1  ;;  %v1609_v47 = vpop.xlane.xlu1 %1608 }
 0x332   :  { %v5098_v34 = vpop.eup %5097  ;;  %5107 = vpow2.f32 %v1806_v49  ;;  %v1808_v36 = vmul.f32 1.442695, %v1692_v28  ;;  %v3312_v44 = vmul.f32 %v4779_v23, %v7595_v13  ;;  %v1693_v48 = vsub.f32 %v7596_v52, %v1609_v47  ;;  %v3055_v16 = vpop.f32.mrb[65].mxu1  ;;  %v7607_v49 = vld [vmem:[#allocation8_spill] sm:$0xff]  ;;  %v7609_v13 = vld [vmem:[#allocation70_spill] sm:$0xff] }
 0x333   :  { %2582 = vst.msk [vmem:[%s7267_s7 + $0xb4] sm:$0xf] %vm2536_vm5, %v4107_v8  ;;  %v4108_v21 = vpack.c.bf16 %v5098_v34, %v5098_v34  ;;  %v3310_v14 = vmul.f32 %v3055_v16, %v7597_v63  ;;  %v1612_v6 = vpop.xlane.xlu0 %1611  ;;  %v4780_v22 = vpop.f32.mrb[66].mxu1  ;;  %v7608_v34 = vld [vmem:[#allocation9_spill] sm:$0xff] }
 0x334   :  { %v5100_v40 = vpop.eup %5099  ;;  %5109 = vpow2.f32 %v1808_v36  ;;  %v1810_v4 = vmul.f32 1.442695, %v1693_v48  ;;  %v1694_v29 = vsub.f32 %v7598_v12, %v1612_v6  ;;  %v3313_v35 = vmul.f32 %v4780_v22, %v7599_v45  ;;  %v3058_v10 = vpop.f32.mrb[67].mxu1 }
 0x335   :  { %2583 = vst.msk [vmem:[%s7267_s7 + $0xb8] sm:$0xf] %vm2536_vm5, %v4108_v21  ;;  %v4109_v57 = vpack.c.bf16 %v5100_v40, %v5100_v40  ;;  %v3311_v31 = vmul.f32 %v3058_v10, %v7600_v15  ;;  %v1615_v50 = vpop.xlane.xlu1 %1614  ;;  %v7611_v10 = vld [vmem:[#allocation10_spill] sm:$0xff] }
 0x336   :  { %v5102_v26 = vpop.eup %5101  ;;  %5111 = vpow2.f32 %v1810_v4  ;;  %v1812_v25 = vmul.f32 1.442695, %v1694_v29  ;;  %v4262_v7 = vpack.c.bf16 %v3313_v35, %v3312_v44  ;;  %v1695_v61 = vsub.f32 %v7601_v17, %v1615_v50  ;;  %v7610_v29 = vld [vmem:[#allocation77_spill] sm:$0xff] }
 0x337   :  { %2584 = vst.msk [vmem:[%s7267_s7 + $0xbc] sm:$0xf] %vm2536_vm5, %v4109_v57  ;;  %v4110_v38 = vpack.c.bf16 %v5102_v26, %v5102_v26  ;;  %v4257_v53 = vpack.c.bf16 %v3311_v31, %v3310_v14  ;;  %v1618_v41 = vpop.xlane.xlu0 %1617 }
 0x338   :  { %v5104_v24 = vpop.eup %5103  ;;  %5113 = vpow2.f32 %v1812_v25  ;;  %4414 = vst [vmem:[%s7268_s9 + $0x8] sm:$0xff] %v4262_v7   ;;  %v1814_v0 = vmul.f32 1.442695, %v1695_v61  ;;  %v1696_v42 = vsub.f32 %v7602_v37, %v1618_v41  ;;  %v7612_v7 = vld [vmem:[#allocation11_spill] sm:$0xff] }
 0x339   :  { %2585 = vst.msk [vmem:[%s7267_s7 + $0xc0] sm:$0xf] %vm2536_vm5, %v4110_v38  ;;  %v4111_v46 = vpack.c.bf16 %v5104_v24, %v5104_v24  ;;  %4258 = vst [vmem:[%s7268_s9] sm:$0xff] %v4257_v53   ;;  %v1621_v9 = vpop.xlane.xlu1 %1620  ;;  %v7613_v53 = vld [vmem:[#allocation12_spill] sm:$0xff] }
 0x33a   :  { %v5106_v5 = vpop.eup %5105  ;;  %5115 = vpow2.f32 %v1814_v0  ;;  %v1816_v39 = vmul.f32 1.442695, %v1696_v42  ;;  %v1697_v1 = vsub.f32 %v7603_v54, %v1621_v9  ;;  %v4783_v3 = vpop.f32.mrb[68].mxu1 }
 0x33b   :  { %2586 = vst.msk [vmem:[%s7267_s7 + $0xc4] sm:$0xf] %vm2536_vm5, %v4111_v46  ;;  %v4112_v62 = vpack.c.bf16 %v5106_v5, %v5106_v5  ;;  %v3316_v11 = vmul.f32 %v4783_v3, %v7604_v33  ;;  %v1624_v59 = vpop.xlane.xlu0 %1623  ;;  %v3071_v32 = vpop.f32.mrb[69].mxu1  ;;  %v7614_v46 = vld [vmem:[#allocation13_spill] sm:$0xff] }
 0x33c   :  { %v5108_v55 = vpop.eup %5107  ;;  %5117 = vpow2.f32 %v1816_v39  ;;  %v1818_v43 = vmul.f32 1.442695, %v1697_v1  ;;  %v1698_v60 = vsub.f32 %v7605_v18, %v1624_v59  ;;  %v3314_v19 = vmul.f32 %v3071_v32, %v7606_v20  ;;  %v4784_v30 = vpop.f32.mrb[70].mxu1  ;;  %v7615_v59 = vld [vmem:[#allocation14_spill] sm:$0xff]  ;;  %v7616_v18 = vld [vmem:[#allocation15_spill] sm:$0xff] }
 0x33d   :  { %2587 = vst.msk [vmem:[%s7267_s7 + $0xc8] sm:$0xf] %vm2536_vm5, %v4112_v62  ;;  %v4113_v58 = vpack.c.bf16 %v5108_v55, %v5108_v55  ;;  %v3317_v51 = vmul.f32 %v4784_v30, %v7607_v49  ;;  %v3074_v28 = vpop.f32.mrb[71].mxu1  ;;  %v1627_v8 = vpop.xlane.xlu1 %1626  ;;  %v7617_v30 = vld [vmem:[#allocation16_spill] sm:$0xff] }
 0x33e   :  { %v5110_v23 = vpop.eup %5109  ;;  %5119 = vpow2.f32 %v1818_v43  ;;  %v1820_v47 = vmul.f32 1.442695, %v1698_v60  ;;  %v3315_v36 = vmul.f32 %v3074_v28, %v7608_v34  ;;  %v1699_v44 = vsub.f32 %v7609_v13, %v1627_v8  ;;  %v7618_v28 = vld [vmem:[#allocation17_spill] sm:$0xff] }
 0x33f   :  { %2588 = vst.msk [vmem:[%s7267_s7 + $0xcc] sm:$0xf] %vm2536_vm5, %v4113_v58  ;;  %v4114_v52 = vpack.c.bf16 %v5110_v23, %v5110_v23  ;;  %v4272_v48 = vpack.c.bf16 %v3317_v51, %v3316_v11  ;;  %v1630_v16 = vpop.xlane.xlu0 %1629 }
 0x340   :  { %v5112_v21 = vpop.eup %5111  ;;  %5121 = vpow2.f32 %v1820_v47  ;;  %v4267_v63 = vpack.c.bf16 %v3315_v36, %v3314_v19  ;;  %v1822_v14 = vmul.f32 1.442695, %v1699_v44  ;;  %v1700_v6 = vsub.f32 %v6628_v27, %v1630_v16  ;;  %v7619_v16 = vld [vmem:[#allocation18_spill] sm:$0xff] }
 0x341   :  { %2589 = vst.msk [vmem:[%s7267_s7 + $0xd0] sm:$0xf] %vm2536_vm5, %v4114_v52  ;;  %v4115_v22 = vpack.c.bf16 %v5112_v21, %v5112_v21  ;;  %4416 = vst [vmem:[%s7268_s9 + $0x18] sm:$0xff] %v4272_v48   ;;  %v1633_v40 = vpop.xlane.xlu1 %1632 }
 0x342   :  { %v5114_v4 = vpop.eup %5113  ;;  %4415 = vst [vmem:[%s7268_s9 + $0x10] sm:$0xff] %v4267_v63   ;;  %5123 = vpow2.f32 %v1822_v14  ;;  %v1824_v12 = vmul.f32 1.442695, %v1700_v6  ;;  %v1701_v27 = vsub.f32 %v7610_v29, %v1633_v40  ;;  %v7620_v6 = vld [vmem:[#allocation19_spill] sm:$0xff] }
 0x343   :  { %v4787_v45 = vpop.f32.mrb[72].mxu1  ;;  %2590 = vst.msk [vmem:[%s7267_s7 + $0xd4] sm:$0xf] %vm2536_vm5, %v4115_v22  ;;  %v4116_v35 = vpack.c.bf16 %v5114_v4, %v5114_v4  ;;  %v1636_v15 = vpop.xlane.xlu0 %1635 }
 0x344   :  { %v3320_v57 = vmul.f32 %v4787_v45, %v7611_v10  ;;  %v3087_v31 = vpop.f32.mrb[73].mxu1  ;;  %v5116_v50 = vpop.eup %5115  ;;  %5125 = vpow2.f32 %v1824_v12  ;;  %v1826_v26 = vmul.f32 1.442695, %v1701_v27  ;;  %v1702_v25 = vsub.f32 %v6653_v2, %v1636_v15  ;;  %v7621_v12 = vld [vmem:[#allocation20_spill] sm:$0xff]  ;;  %v7622_v45 = vld [vmem:[#allocation21_spill] sm:$0xff] }
 0x345   :  { %v3318_v17 = vmul.f32 %v3087_v31, %v7612_v7  ;;  %v4788_v61 = vpop.f32.mrb[74].mxu1  ;;  %2591 = vst.msk [vmem:[%s7267_s7 + $0xd8] sm:$0xf] %vm2536_vm5, %v4116_v35  ;;  %v4117_v38 = vpack.c.bf16 %v5116_v50, %v5116_v50  ;;  %v1639_v0 = vpop.xlane.xlu1 %1638  ;;  %v7623_v31 = vld [vmem:[#allocation22_spill] sm:$0xff] }
 0x346   :  { %v3321_v41 = vmul.f32 %v4788_v61, %v7613_v53  ;;  %v3090_v24 = vpop.f32.mrb[75].mxu1  ;;  %v5118_v37 = vpop.eup %5117  ;;  %5127 = vpow2.f32 %v1826_v26  ;;  %v1828_v42 = vmul.f32 1.442695, %v1702_v25  ;;  %v1703_v2 = vsub.f32 %v6665_v56, %v1639_v0  ;;  %v7624_v25 = vld [vmem:[#allocation23_spill] sm:$0xff]  ;;  %v7625_v61 = vld [vmem:[#allocation24_spill] sm:$0xff] }
 0x347   :  { %v3319_v9 = vmul.f32 %v3090_v24, %v7614_v46  ;;  %2592 = vst.msk [vmem:[%s7267_s7 + $0xdc] sm:$0xf] %vm2536_vm5, %v4117_v38  ;;  %v4118_v5 = vpack.c.bf16 %v5118_v37, %v5118_v37  ;;  %v7627_v46 = vld [vmem:[#allocation26_spill] sm:$0xff] }
 0x348   :  { %v4282_v39 = vpack.c.bf16 %v3321_v41, %v3320_v57  ;;  %v5120_v54 = vpop.eup %5119  ;;  %5129 = vpow2.f32 %v1828_v42  ;;  %v1830_v3 = vmul.f32 1.442695, %v1703_v2  ;;  %v7626_v41 = vld [vmem:[#allocation25_spill] sm:$0xff] }
 0x349   :  { %v4277_v1 = vpack.c.bf16 %v3319_v9, %v3318_v17  ;;  %2593 = vst.msk [vmem:[%s7267_s7 + $0xe0] sm:$0xf] %vm2536_vm5, %v4118_v5  ;;  %v4119_v62 = vpack.c.bf16 %v5120_v54, %v5120_v54  ;;  %v7628_v5 = vld [vmem:[#allocation27_spill] sm:$0xff] }
 0x34a   :  { %4418 = vst [vmem:[%s7268_s9 + $0x28] sm:$0xff] %v4282_v39   ;;  %v5122_v56 = vpop.eup %5121  ;;  %5131 = vpow2.f32 %v1830_v3 }
 0x34b   :  { %4417 = vst [vmem:[%s7268_s9 + $0x20] sm:$0xff] %v4277_v1   ;;  %v4791_v33 = vpop.f32.mrb[76].mxu1  ;;  %2594 = vst.msk [vmem:[%s7267_s7 + $0xe4] sm:$0xf] %vm2536_vm5, %v4119_v62  ;;  %v4120_v11 = vpack.c.bf16 %v5122_v56, %v5122_v56  ;;  %v7629_v1 = vld [vmem:[#allocation28_spill] sm:$0xff]  ;;  %v7630_v56 = vld [vmem:[#allocation29_spill] sm:$0xff] }
 0x34c   :  { %v3324_v32 = vmul.f32 %v4791_v33, %v7615_v59  ;;  %v3103_v55 = vpop.f32.mrb[77].mxu1  ;;  %v5124_v43 = vpop.eup %5123 }
 0x34d   :  { %v3322_v60 = vmul.f32 %v3103_v55, %v7616_v18  ;;  %v4792_v20 = vpop.f32.mrb[78].mxu1  ;;  %2595 = vst.msk [vmem:[%s7267_s7 + $0xe8] sm:$0xf] %vm2536_vm5, %v4120_v11  ;;  %v4121_v19 = vpack.c.bf16 %v5124_v43, %v5124_v43  ;;  %v7631_v55 = vld [vmem:[#allocation30_spill] sm:$0xff] }
 0x34e   :  { %v3325_v58 = vmul.f32 %v4792_v20, %v7617_v30  ;;  %v3106_v49 = vpop.f32.mrb[79].mxu1  ;;  %v5126_v51 = vpop.eup %5125  ;;  %v7633_v30 = vld [vmem:[#allocation32_spill] sm:$0xff] }
 0x34f   :  { %v3323_v8 = vmul.f32 %v3106_v49, %v7618_v28  ;;  %2596 = vst.msk [vmem:[%s7267_s7 + $0xec] sm:$0xf] %vm2536_vm5, %v4121_v19  ;;  %v4122_v23 = vpack.c.bf16 %v5126_v51, %v5126_v51  ;;  %v7634_v51 = vld [vmem:[#allocation33_spill] sm:$0xff] }
 0x350   :  { %v4292_v47 = vpack.c.bf16 %v3325_v58, %v3324_v32  ;;  %v5128_v34 = vpop.eup %5127 }
 0x351   :  { %v4287_v36 = vpack.c.bf16 %v3323_v8, %v3322_v60  ;;  %2597 = vst.msk [vmem:[%s7267_s7 + $0xf0] sm:$0xf] %vm2536_vm5, %v4122_v23  ;;  %v4123_v13 = vpack.c.bf16 %v5128_v34, %v5128_v34  ;;  %v7632_v60 = vld [vmem:[#allocation31_spill] sm:$0xff]  ;;  %v7635_v34 = vld [vmem:[#allocation34_spill] sm:$0xff] }
 0x352   :  { %4420 = vst [vmem:[%s7268_s9 + $0x38] sm:$0xff] %v4292_v47   ;;  %v5130_v44 = vpop.eup %5129 }
 0x353   :  { %4419 = vst [vmem:[%s7268_s9 + $0x30] sm:$0xff] %v4287_v36   ;;  %v4795_v52 = vpop.f32.mrb[80].mxu1  ;;  %2598 = vst.msk [vmem:[%s7267_s7 + $0xf4] sm:$0xf] %vm2536_vm5, %v4123_v13  ;;  %v4124_v48 = vpack.c.bf16 %v5130_v44, %v5130_v44  ;;  %v7636_v44 = vld [vmem:[#allocation35_spill] sm:$0xff] }
 0x354   :  { %v3328_v21 = vmul.f32 %v4795_v52, %v7619_v16  ;;  %v3119_v63 = vpop.f32.mrb[81].mxu1  ;;  %v5132_v14 = vpop.eup %5131  ;;  %v7637_v16 = vld [vmem:[#allocation36_spill] sm:$0xff] }
 0x355   :  { %v3326_v22 = vmul.f32 %v3119_v63, %v7620_v6  ;;  %v4796_v40 = vpop.f32.mrb[82].mxu1  ;;  %2599 = vst.msk [vmem:[%s7267_s7 + $0xf8] sm:$0xf] %vm2536_vm5, %v4124_v48  ;;  %v4125_v4 = vpack.c.bf16 %v5132_v14, %v5132_v14  ;;  %v7638_v14 = vld [vmem:[#allocation37_spill] sm:$0xff] }
 0x356   :  { %v3329_v29 = vmul.f32 %v4796_v40, %v7621_v12  ;;  %v3122_v27 = vpop.f32.mrb[83].mxu1  ;;  %v7639_v12 = vld [vmem:[#allocation38_spill] sm:$0xff] }
 0x357   :  { %v3327_v35 = vmul.f32 %v3122_v27, %v7622_v45  ;;  %2600 = vst.msk [vmem:[%s7267_s7 + $0xfc] sm:$0xf] %vm2536_vm5, %v4125_v4  ;;  %v7640_v45 = vld [vmem:[#allocation39_spill] sm:$0xff] }
 0x358   :  { %v4302_v10 = vpack.c.bf16 %v3329_v29, %v3328_v21 }
 0x359   :  { %v4297_v57 = vpack.c.bf16 %v3327_v35, %v3326_v22 }
 0x35a   :  { %4422 = vst [vmem:[%s7268_s9 + $0x48] sm:$0xff] %v4302_v10  }
 0x35b   :  { %4421 = vst [vmem:[%s7268_s9 + $0x40] sm:$0xff] %v4297_v57   ;;  %v4799_v15 = vpop.f32.mrb[84].mxu1  ;;  %v7641_v57 = vld [vmem:[#allocation40_spill] sm:$0xff] }
 0x35c   :  { %v3332_v50 = vmul.f32 %v4799_v15, %v7623_v31  ;;  %v3135_v26 = vpop.f32.mrb[85].mxu1 }
 0x35d   :  { %v3330_v7 = vmul.f32 %v3135_v26, %v7624_v25  ;;  %v4800_v17 = vpop.f32.mrb[86].mxu1 }
 0x35e   :  { %v3333_v38 = vmul.f32 %v4800_v17, %v7625_v61  ;;  %v3138_v53 = vpop.f32.mrb[87].mxu1  ;;  %v7643_v61 = vld [vmem:[#allocation42_spill] sm:$0xff] }
 0x35f   :  { %v3331_v24 = vmul.f32 %v3138_v53, %v7626_v41  ;;  %v7644_v41 = vld [vmem:[#allocation43_spill] sm:$0xff] }
 0x360   :  { %v4312_v0 = vpack.c.bf16 %v3333_v38, %v3332_v50  ;;  %v7642_v50 = vld [vmem:[#allocation41_spill] sm:$0xff] }
 0x361   :  { %v4307_v37 = vpack.c.bf16 %v3331_v24, %v3330_v7 }
 0x362   :  { %4424 = vst [vmem:[%s7268_s9 + $0x58] sm:$0xff] %v4312_v0  }
 0x363   :  { %4423 = vst [vmem:[%s7268_s9 + $0x50] sm:$0xff] %v4307_v37   ;;  %v4803_v42 = vpop.f32.mrb[88].mxu1  ;;  %v7645_v37 = vld [vmem:[#allocation44_spill] sm:$0xff] }
 0x364   :  { %v3336_v9 = vmul.f32 %v4803_v42, %v7627_v46  ;;  %v3151_v2 = vpop.f32.mrb[89].mxu1 }
 0x365   :  { %v3334_v39 = vmul.f32 %v3151_v2, %v7628_v5  ;;  %v4804_v54 = vpop.f32.mrb[90].mxu1 }
 0x366   :  { %v3337_v3 = vmul.f32 %v4804_v54, %v7629_v1  ;;  %v3154_v62 = vpop.f32.mrb[91].mxu1  ;;  %v7647_v1 = vld [vmem:[#allocation46_spill] sm:$0xff] }
 0x367   :  { %v3335_v33 = vmul.f32 %v3154_v62, %v7630_v56  ;;  %v7648_v56 = vld [vmem:[#allocation47_spill] sm:$0xff] }
 0x368   :  { %v4322_v11 = vpack.c.bf16 %v3337_v3, %v3336_v9  ;;  %v7646_v9 = vld [vmem:[#allocation45_spill] sm:$0xff] }
 0x369   :  { %v4317_v59 = vpack.c.bf16 %v3335_v33, %v3334_v39 }
 0x36a   :  { %4426 = vst [vmem:[%s7268_s9 + $0x68] sm:$0xff] %v4322_v11  }
 0x36b   :  { %4425 = vst [vmem:[%s7268_s9 + $0x60] sm:$0xff] %v4317_v59   ;;  %v4807_v32 = vpop.f32.mrb[92].mxu1  ;;  %v7649_v59 = vld [vmem:[#allocation48_spill] sm:$0xff] }
 0x36c   :  { %v3340_v43 = vmul.f32 %v4807_v32, %v7631_v55  ;;  %v3167_v18 = vpop.f32.mrb[93].mxu1 }
 0x36d   :  { %v3338_v20 = vmul.f32 %v3167_v18, %v7632_v60  ;;  %v4808_v19 = vpop.f32.mrb[94].mxu1 }
 0x36e   :  { %v3341_v58 = vmul.f32 %v4808_v19, %v7633_v30  ;;  %v3170_v49 = vpop.f32.mrb[95].mxu1  ;;  %v7651_v30 = vld [vmem:[#allocation51_spill] sm:$0xff] }
 0x36f   :  { %v3339_v28 = vmul.f32 %v3170_v49, %v7634_v51  ;;  %v7652_v51 = vld [vmem:[#allocation52_spill] sm:$0xff] }
 0x370   :  { %v4332_v8 = vpack.c.bf16 %v3341_v58, %v3340_v43  ;;  %v7650_v43 = vld [vmem:[#allocation49_spill] sm:$0xff] }
 0x371   :  { %v4327_v23 = vpack.c.bf16 %v3339_v28, %v3338_v20 }
 0x372   :  { %4428 = vst [vmem:[%s7268_s9 + $0x78] sm:$0xff] %v4332_v8  }
 0x373   :  { %4427 = vst [vmem:[%s7268_s9 + $0x70] sm:$0xff] %v4327_v23   ;;  %v4811_v47 = vpop.f32.mrb[96].mxu1  ;;  %v7653_v23 = vld [vmem:[#allocation55_spill] sm:$0xff] }
 0x374   :  { %v3344_v36 = vmul.f32 %v4811_v47, %v7635_v34  ;;  %v3183_v13 = vpop.f32.mrb[97].mxu1 }
 0x375   :  { %v3342_v52 = vmul.f32 %v3183_v13, %v7636_v44  ;;  %v4812_v48 = vpop.f32.mrb[98].mxu1 }
 0x376   :  { %v3345_v21 = vmul.f32 %v4812_v48, %v7637_v16  ;;  %v3186_v63 = vpop.f32.mrb[99].mxu1  ;;  %v7655_v16 = vld [vmem:[#allocation59_spill] sm:$0xff] }
 0x377   :  { %v3343_v6 = vmul.f32 %v3186_v63, %v7638_v14  ;;  %v7656_v14 = vld [vmem:[#allocation60_spill] sm:$0xff] }
 0x378   :  { %v4342_v22 = vpack.c.bf16 %v3345_v21, %v3344_v36  ;;  %v7654_v36 = vld [vmem:[#allocation56_spill] sm:$0xff] }
 0x379   :  { %v4337_v40 = vpack.c.bf16 %v3343_v6, %v3342_v52 }
 0x37a   :  { %4430 = vst [vmem:[%s7268_s9 + $0x88] sm:$0xff] %v4342_v22  }
 0x37b   :  { %4429 = vst [vmem:[%s7268_s9 + $0x80] sm:$0xff] %v4337_v40   ;;  %v4815_v4 = vpop.f32.mrb[100].mxu1  ;;  %v7657_v40 = vld [vmem:[#allocation63_spill] sm:$0xff] }
 0x37c   :  { %v3348_v29 = vmul.f32 %v4815_v4, %v7639_v12  ;;  %v3199_v27 = vpop.f32.mrb[101].mxu1 }
 0x37d   :  { %v3346_v35 = vmul.f32 %v3199_v27, %v7640_v45  ;;  %v4816_v10 = vpop.f32.mrb[102].mxu1 }
 0x37e   :  { %v3349_v15 = vmul.f32 %v4816_v10, %v7641_v57  ;;  %v3202_v31 = vpop.f32.mrb[103].mxu1  ;;  %v7659_v57 = vld [vmem:[#allocation67_spill] sm:$0xff] }
 0x37f   :  { %v3347_v26 = vmul.f32 %v3202_v31, %v7642_v50  ;;  %v7660_v50 = vld [vmem:[#allocation68_spill] sm:$0xff] }
 0x380   :  { %v4352_v25 = vpack.c.bf16 %v3349_v15, %v3348_v29  ;;  %v7658_v29 = vld [vmem:[#allocation64_spill] sm:$0xff] }
 0x381   :  { %v4347_v7 = vpack.c.bf16 %v3347_v26, %v3346_v35 }
 0x382   :  { %4432 = vst [vmem:[%s7268_s9 + $0x98] sm:$0xff] %v4352_v25  }
 0x383   :  { %4431 = vst [vmem:[%s7268_s9 + $0x90] sm:$0xff] %v4347_v7   ;;  %v4819_v17 = vpop.f32.mrb[104].mxu1  ;;  %v7661_v7 = vld [vmem:[#allocation71_spill] sm:$0xff] }
 0x384   :  { %v3352_v38 = vmul.f32 %v4819_v17, %v7643_v61  ;;  %v3215_v53 = vpop.f32.mrb[105].mxu1 }
 0x385   :  { %v3350_v24 = vmul.f32 %v3215_v53, %v7644_v41  ;;  %v4820_v0 = vpop.f32.mrb[106].mxu1 }
 0x386   :  { %v3353_v42 = vmul.f32 %v4820_v0, %v7645_v37  ;;  %v3218_v46 = vpop.f32.mrb[107].mxu1  ;;  %v7663_v37 = vld [vmem:[#allocation75_spill] sm:$0xff] }
 0x387   :  { %v3351_v2 = vmul.f32 %v3218_v46, %v7646_v9  ;;  %v7664_v9 = vld [vmem:[#allocation76_spill] sm:$0xff] }
 0x388   :  { %v4362_v5 = vpack.c.bf16 %v3353_v42, %v3352_v38  ;;  %v7662_v38 = vld [vmem:[#allocation72_spill] sm:$0xff] }
 0x389   :  { %v4357_v39 = vpack.c.bf16 %v3351_v2, %v3350_v24 }
 0x38a   :  { %4434 = vst [vmem:[%s7268_s9 + $0xa8] sm:$0xff] %v4362_v5  }
 0x38b   :  { %4433 = vst [vmem:[%s7268_s9 + $0xa0] sm:$0xff] %v4357_v39   ;;  %v4823_v54 = vpop.f32.mrb[108].mxu1  ;;  %v7665_v39 = vld [vmem:[#allocation79_spill] sm:$0xff] }
 0x38c   :  { %v3356_v3 = vmul.f32 %v4823_v54, %v7647_v1  ;;  %v3231_v62 = vpop.f32.mrb[109].mxu1 }
 0x38d   :  { %v3354_v33 = vmul.f32 %v3231_v62, %v7648_v56  ;;  %v4824_v11 = vpop.f32.mrb[110].mxu1 }
 0x38e   :  { %v3357_v32 = vmul.f32 %v4824_v11, %v7649_v59  ;;  %v3234_v55 = vpop.f32.mrb[111].mxu1 }
 0x38f   :  { %v3355_v18 = vmul.f32 %v3234_v55, %v7650_v43 }
 0x390   :  { %v4372_v60 = vpack.c.bf16 %v3357_v32, %v3356_v3  ;;  %v7666_v3 = vld [vmem:[#allocation80_spill] sm:$0xff] }
 0x391   :  { %v4367_v20 = vpack.c.bf16 %v3355_v18, %v3354_v33 }
 0x392   :  { %4436 = vst [vmem:[%s7268_s9 + $0xb8] sm:$0xff] %v4372_v60  }
 0x393   :  { %4435 = vst [vmem:[%s7268_s9 + $0xb0] sm:$0xff] %v4367_v20   ;;  %v4827_v19 = vpop.f32.mrb[112].mxu1 }
 0x394   :  { %v3360_v58 = vmul.f32 %v4827_v19, %v7651_v30  ;;  %v3247_v49 = vpop.f32.mrb[113].mxu1 }
 0x395   :  { %v3358_v28 = vmul.f32 %v3247_v49, %v7652_v51  ;;  %v4828_v8 = vpop.f32.mrb[114].mxu1 }
 0x396   :  { %v3361_v47 = vmul.f32 %v4828_v8, %v7653_v23  ;;  %v3250_v34 = vpop.f32.mrb[115].mxu1 }
 0x397   :  { %v3359_v13 = vmul.f32 %v3250_v34, %v7654_v36 }
 0x398   :  { %v4382_v44 = vpack.c.bf16 %v3361_v47, %v3360_v58 }
 0x399   :  { %v4377_v52 = vpack.c.bf16 %v3359_v13, %v3358_v28 }
 0x39a   :  { %4438 = vst [vmem:[%s7268_s9 + $0xc8] sm:$0xff] %v4382_v44  }
 0x39b   :  { %4437 = vst [vmem:[%s7268_s9 + $0xc0] sm:$0xff] %v4377_v52   ;;  %v4831_v48 = vpop.f32.mrb[116].mxu1 }
 0x39c   :  { %v3364_v21 = vmul.f32 %v4831_v48, %v7655_v16  ;;  %v3263_v63 = vpop.f32.mrb[117].mxu1 }
 0x39d   :  { %v3362_v6 = vmul.f32 %v3263_v63, %v7656_v14  ;;  %v4832_v22 = vpop.f32.mrb[118].mxu1 }
 0x39e   :  { %v3365_v4 = vmul.f32 %v4832_v22, %v7657_v40  ;;  %v3266_v12 = vpop.f32.mrb[119].mxu1 }
 0x39f   :  { %v3363_v27 = vmul.f32 %v3266_v12, %v7658_v29 }
 0x3a0   :  { %v4392_v45 = vpack.c.bf16 %v3365_v4, %v3364_v21 }
 0x3a1   :  { %v4387_v35 = vpack.c.bf16 %v3363_v27, %v3362_v6 }
 0x3a2   :  { %4440 = vst [vmem:[%s7268_s9 + $0xd8] sm:$0xff] %v4392_v45  }
 0x3a3   :  { %4439 = vst [vmem:[%s7268_s9 + $0xd0] sm:$0xff] %v4387_v35   ;;  %v4835_v10 = vpop.f32.mrb[120].mxu1 }
 0x3a4   :  { %v3368_v15 = vmul.f32 %v4835_v10, %v7659_v57  ;;  %v3279_v31 = vpop.f32.mrb[121].mxu1 }
 0x3a5   :  { %v3366_v26 = vmul.f32 %v3279_v31, %v7660_v50  ;;  %v4836_v25 = vpop.f32.mrb[122].mxu1 }
 0x3a6   :  { %v3369_v17 = vmul.f32 %v4836_v25, %v7661_v7  ;;  %v3282_v61 = vpop.f32.mrb[123].mxu1 }
 0x3a7   :  { %v3367_v53 = vmul.f32 %v3282_v61, %v7662_v38 }
 0x3a8   :  { %v4402_v41 = vpack.c.bf16 %v3369_v17, %v3368_v15 }
 0x3a9   :  { %v4397_v24 = vpack.c.bf16 %v3367_v53, %v3366_v26 }
 0x3aa   :  { %4442 = vst [vmem:[%s7268_s9 + $0xe8] sm:$0xff] %v4402_v41  }
 0x3ab   :  { %4441 = vst [vmem:[%s7268_s9 + $0xe0] sm:$0xff] %v4397_v24   ;;  %v4839_v0 = vpop.f32.mrb[124].mxu1 }
 0x3ac   :  { %v3372_v42 = vmul.f32 %v4839_v0, %v7663_v37  ;;  %v3295_v46 = vpop.f32.mrb[125].mxu1 }
 0x3ad   :  { %v3370_v2 = vmul.f32 %v3295_v46, %v7664_v9  ;;  %v4840_v5 = vpop.f32.mrb[126].mxu1 }
 0x3ae   :  { %v3373_v54 = vmul.f32 %v4840_v5, %v7665_v39  ;;  %v3298_v1 = vpop.f32.mrb[127].mxu1 }
 0x3af   :  { %v3371_v62 = vmul.f32 %v3298_v1, %v7666_v3 }
 0x3b0   :  { %v4412_v56 = vpack.c.bf16 %v3373_v54, %v3372_v42 }
 0x3b1   :  { %v4407_v33 = vpack.c.bf16 %v3371_v62, %v3370_v2 }
 0x3b2   :  { %4444 = vst [vmem:[%s7268_s9 + $0xf8] sm:$0xff] %v4412_v56  }
 0x3b3   :  { %4443 = vst [vmem:[%s7268_s9 + $0xf0] sm:$0xff] %v4407_v33  }

// kernel: mesh_seg_forward.7
= control target key start
LH: loop header
LB: loop body
LE: loop exit
PB: predicated region body
PF: predicated region fallthrough
CT: control target
= control target key end

     0   :  { %s3208_s27 = smov 0   ;;  %s3699_s0 = inlined_call_operand.vmem [shape: bf16[512,4], index: 0, kind: input, shape index: {}]   ;;  %s3700_s1 = inlined_call_operand.vmem [shape: bf16[512,512], index: 1, kind: input, shape index: {}]   ;;  %s3701_s2 = inlined_call_operand.vmem [shape: f32[512,1], index: 2, kind: input, shape index: {}]   ;;  %s3702_s3 = inlined_call_operand.vmem [shape: bf16[512,4], index: 3, kind: input, shape index: {}]   ;;  %s3703_s4 = inlined_call_operand.vmem [shape: bf16[512,128], index: 4, kind: input, shape index: {}]   ;;  %s3704_s5 = inlined_call_operand.vmem [shape: bf16[4,128], index: 5, kind: input, shape index: {}]   ;;  %s3705_s6 = inlined_call_operand.vmem [shape: bf16[128,128], index: 6, kind: input, shape index: {}]   ;;  %s3706_s7 = inlined_call_operand.vmem [shape: f32[1,128], index: 7, kind: input, shape index: {}]   ;;  %s3707_s8 = inlined_call_operand.vmem [shape: f32[512,128], index: 8, kind: output, shape index: {}]  }
   0x1 LB: > { %s2432_s28 = sadd.s32 4294967295, %s3160_s27   ;;  %p2436_p0 = scmp.ge.s32.totalorder %s3160_s27, 1  ;;  %s3160_s27 = sphi %s3208_s27, %s18_s27  }
   0x2   : > { %p286_p1 = scmp.lt.s32.totalorder %s3160_s27, 5 }
   0x4   : > { %p287_p2 = pnand %p2436_p0, %p286_p1 }
   0x5   : > { %v2945_v0 = vld [vmem:[%s3702_s3 + $0x40] sm:$0xff] (!%p287_p2)   ;;  %vm637_vm0 = vcmask (!%p287_p2), 31744   ;;  %v2949_v5 = vld [vmem:[%s3702_s3 + $0x48] sm:$0xff] (!%p287_p2)   ;;  %v2953_v11 = vld [vmem:[%s3702_s3 + $0x50] sm:$0xff] (!%p287_p2)   ;;  %s2437_s9 = sshll.u32 (!%p287_p2), %s2432_s28, 4  ;;  %vm1915_vm1 = vcmask (!%p287_p2), 1041408  }
   0x6   : > { %290 = sbr.rel (%p287_p2) target bundleno = 838 (0x346), region = 52  ;;  %v2946_v1 = vld [vmem:[%s3702_s3 + $0xc0] sm:$0xff] (!%p287_p2)   ;;  %2917 = vmatprep.subr.msk.bf16.mxu0 (!%p287_p2), %vm637_vm0, %v2945_v0  ;;  %v2950_v7 = vld [vmem:[%s3702_s3 + $0xc8] sm:$0xff] (!%p287_p2)   ;;  %v2954_v13 = vld [vmem:[%s3702_s3 + $0xd0] sm:$0xff] (!%p287_p2)   ;;  %p332_p3 = scmp.lt.s32.totalorder (!%p287_p2), %s2437_s9, 63 }
   0x7   : > { %v2947_v2 = vld [vmem:[%s3702_s3] sm:$0xff] (!%p287_p2)   ;;  %2925 = vmatprep.subr.msk.bf16.mxu1 (!%p287_p2), %vm637_vm0, %v2946_v1  ;;  %v2951_v8 = vld [vmem:[%s3702_s3 + $0x8] sm:$0xff] (!%p287_p2)   ;;  %v2955_v14 = vld [vmem:[%s3702_s3 + $0x10] sm:$0xff] (!%p287_p2)  }
   0x8   : > { %v2948_v3 = vld [vmem:[%s3702_s3 + $0x80] sm:$0xff] (!%p287_p2)   ;;  %v663_v4 = vsel (!%p287_p2), %vm637_vm0, %v2947_v2, 0  ;;  %v2952_v9 = vld [vmem:[%s3702_s3 + $0x88] sm:$0xff] (!%p287_p2)   ;;  %v666_v10 = vsel (!%p287_p2), %vm637_vm0, %v2951_v8, 0  ;;  %v2956_v15 = vld [vmem:[%s3702_s3 + $0x90] sm:$0xff] (!%p287_p2)   ;;  %v669_v16 = vsel (!%p287_p2), %vm637_vm0, %v2955_v14, 0 }
   0x9   : > { %2651 = vmatpush3.bf16.xpose.msra.mxu0 (!%p287_p2), %v663_v4  ;;  %v711_v6 = vsel (!%p287_p2), %vm637_vm0, %v2948_v3, 0  ;;  %v714_v12 = vsel (!%p287_p2), %vm637_vm0, %v2952_v9, 0  ;;  %v2957_v17 = vld [vmem:[%s3702_s3 + $0x58] sm:$0xff] (!%p287_p2)   ;;  %v717_v18 = vsel (!%p287_p2), %vm637_vm0, %v2956_v15, 0  ;;  %v2961_v23 = vld [vmem:[%s3702_s3 + $0x60] sm:$0xff] (!%p287_p2)   ;;  %v2965_v30 = vld [vmem:[%s3702_s3 + $0x68] sm:$0xff] (!%p287_p2)  }
   0xa   : > { %2683 = vmatpush3.bf16.xpose.msra.mxu1 (!%p287_p2), %v711_v6  ;;  %2918 = vmatprep.subr.msk.bf16.mxu0 (!%p287_p2), %vm637_vm0, %v2949_v5  ;;  %v2958_v19 = vld [vmem:[%s3702_s3 + $0xd8] sm:$0xff] (!%p287_p2)   ;;  %v2962_v25 = vld [vmem:[%s3702_s3 + $0xe0] sm:$0xff] (!%p287_p2)   ;;  %v2966_v32 = vld [vmem:[%s3702_s3 + $0xe8] sm:$0xff] (!%p287_p2)  }
   0xb   : > { %2926 = vmatprep.subr.msk.bf16.mxu1 (!%p287_p2), %vm637_vm0, %v2950_v7  ;;  %v2959_v20 = vld [vmem:[%s3702_s3 + $0x18] sm:$0xff] (!%p287_p2)   ;;  %v2963_v26 = vld [vmem:[%s3702_s3 + $0x20] sm:$0xff] (!%p287_p2)   ;;  %v2967_v33 = vld [vmem:[%s3702_s3 + $0x28] sm:$0xff] (!%p287_p2)  }
   0xc   : > { %v2960_v21 = vld [vmem:[%s3702_s3 + $0x98] sm:$0xff] (!%p287_p2)   ;;  %v672_v22 = vsel (!%p287_p2), %vm637_vm0, %v2959_v20, 0  ;;  %v2964_v27 = vld [vmem:[%s3702_s3 + $0xa0] sm:$0xff] (!%p287_p2)   ;;  %v675_v29 = vsel (!%p287_p2), %vm637_vm0, %v2963_v26, 0  ;;  %v2968_v34 = vld [vmem:[%s3702_s3 + $0xa8] sm:$0xff] (!%p287_p2)   ;;  %v678_v35 = vsel (!%p287_p2), %vm637_vm0, %v2967_v33, 0 }
   0xd   : > { %s3709_s9 = smov (!%p332_p3, %s2437_s9), 63  ;;  %v720_v24 = vsel %vm637_vm0, %v2960_v21, 0  ;;  %v723_v31 = vsel %vm637_vm0, %v2964_v27, 0  ;;  %v2969_v36 = vld [vmem:[%s3702_s3 + $0x70] sm:$0xff]   ;;  %v726_v37 = vsel %vm637_vm0, %v2968_v34, 0  ;;  %v2973_v42 = vld [vmem:[%s3702_s3 + $0x78] sm:$0xff]  }
   0xe   : > { %s2438_s19 = sshll.u32 %s3709_s9, 2  ;;  %v2970_v38 = vld [vmem:[%s3702_s3 + $0xf0] sm:$0xff]   ;;  %v2974_v44 = vld [vmem:[%s3702_s3 + $0xf8] sm:$0xff]   ;;  %v2985_v48 = vld [vmem:[%s3703_s4 + $0x40] sm:$0xff]   ;;  %s2617_s25 = sshll.u32 %s3709_s9, 4 }
   0xf   : > { %s3294_s26 = scalar_lea.vmem %s3699_s0, %s2438_s19  ;;  %v2971_v39 = vld [vmem:[%s3702_s3 + $0x30] sm:$0xff]   ;;  %v2975_v45 = vld [vmem:[%s3702_s3 + $0x38] sm:$0xff]   ;;  %v2993_v50 = vld [vmem:[%s3703_s4 + $0xc0] sm:$0xff]   ;;  %s3541_s10 = scalar_lea.vmem %s3700_s1, %s2617_s25 }
  0x10   : > { %v2977_v28 = vld [vmem:[%s3294_s26] sm:$0xff]   ;;  %v2972_v40 = vld [vmem:[%s3702_s3 + $0xb0] sm:$0xff]   ;;  %v681_v41 = vsel %vm637_vm0, %v2971_v39, 0  ;;  %v2976_v46 = vld [vmem:[%s3702_s3 + $0xb8] sm:$0xff]   ;;  %v684_v47 = vsel %vm637_vm0, %v2975_v45, 0  ;;  %s2443_s25 = sshll.u32 %s3709_s9, 3 }
  0x11   : > { %2653 = vmatpush3.bf16.xpose.msra.mxu0 %v666_v10  ;;  %2666 = vmatprep.mubr.msk.bf16.mxu0 %vm637_vm0, %v2977_v28  ;;  %v729_v43 = vsel %vm637_vm0, %v2972_v40, 0  ;;  %v732_v49 = vsel %vm637_vm0, %v2976_v46, 0  ;;  %v3364_v51 = vld [vmem:[%s3294_s26 + $0x8] sm:$0xff]   ;;  %v2986_v52 = vld [vmem:[%s3703_s4] sm:$0xff]   ;;  %v2989_v57 = vld [vmem:[%s3703_s4 + $0x50] sm:$0xff]   ;;  %s3662_s14 = scalar_lea.vmem %s3707_s8, %s2443_s25 }
  0x12   : > { %2685 = vmatpush3.bf16.xpose.msra.mxu1 %v714_v12  ;;  %2919 = vmatprep.subr.msk.bf16.mxu0 %vm637_vm0, %v2953_v11  ;;  %v2987_v53 = vld [vmem:[%s3703_s4 + $0x48] sm:$0xff]   ;;  %v2994_v54 = vld [vmem:[%s3703_s4 + $0x80] sm:$0xff]   ;;  %v3001_v59 = vld [vmem:[%s3703_s4 + $0xd0] sm:$0xff]  }
  0x13   : > { %2927 = vmatprep.subr.msk.bf16.mxu1 %vm637_vm0, %v2954_v13  ;;  %2698 = vmatprep.mubr.msk.bf16.mxu1 %vm637_vm0, %v2977_v28  ;;  %v2997_v55 = vld [vmem:[%s3703_s4 + $0xc8] sm:$0xff]   ;;  %v3397_v60 = vld [vmem:[%s3294_s26 + $0x10] sm:$0xff]   ;;  %v2991_v62 = vld [vmem:[%s3703_s4 + $0x58] sm:$0xff]  }
  0x14   : > { %v2988_v56 = vld [vmem:[%s3703_s4 + $0x8] sm:$0xff]   ;;  %v2990_v61 = vld [vmem:[%s3703_s4 + $0x10] sm:$0xff]   ;;  %v2992_v0 = vld [vmem:[%s3703_s4 + $0x18] sm:$0xff]  }
  0x15   : > { %v2998_v58 = vld [vmem:[%s3703_s4 + $0x88] sm:$0xff]   ;;  %v3002_v63 = vld [vmem:[%s3703_s4 + $0x90] sm:$0xff]   ;;  %v2995_v1 = vld [vmem:[%s3703_s4 + $0x60] sm:$0xff]  }
  0x16   : > { %v3423_v2 = vld [vmem:[%s3294_s26 + $0x18] sm:$0xff]   ;;  %v2996_v3 = vld [vmem:[%s3703_s4 + $0x20] sm:$0xff]   ;;  %v2999_v4 = vld [vmem:[%s3703_s4 + $0x68] sm:$0xff]  }
  0x17   : > { %v3000_v5 = vld [vmem:[%s3703_s4 + $0x28] sm:$0xff]   ;;  %v3443_v6 = vld [vmem:[%s3294_s26 + $0x20] sm:$0xff]   ;;  %v3465_v8 = vld [vmem:[%s3294_s26 + $0x30] sm:$0xff]  }
  0x18   : > { %v3454_v7 = vld [vmem:[%s3294_s26 + $0x28] sm:$0xff]   ;;  %v3476_v9 = vld [vmem:[%s3294_s26 + $0x38] sm:$0xff]   ;;  %v3005_v12 = vld [vmem:[%s3703_s4 + $0x70] sm:$0xff]  }
  0x19   : > { %2655 = vmatpush3.bf16.xpose.msra.mxu0 %v669_v16  ;;  %v3003_v10 = vld [vmem:[%s3703_s4 + $0xd8] sm:$0xff]   ;;  %v3006_v13 = vld [vmem:[%s3703_s4 + $0x30] sm:$0xff]   ;;  %v3007_v14 = vld [vmem:[%s3703_s4 + $0xe0] sm:$0xff]  }
  0x1a   : > { %2687 = vmatpush3.bf16.xpose.msra.mxu1 %v717_v18  ;;  %2920 = vmatprep.subr.msk.bf16.mxu0 %vm637_vm0, %v2957_v17  ;;  %v3004_v11 = vld [vmem:[%s3703_s4 + $0x98] sm:$0xff]   ;;  %v3008_v15 = vld [vmem:[%s3703_s4 + $0xa0] sm:$0xff]   ;;  %v3009_v16 = vld [vmem:[%s3703_s4 + $0xe8] sm:$0xff]  }
  0x1b   : > { %2928 = vmatprep.subr.msk.bf16.mxu1 %vm637_vm0, %v2958_v19  ;;  %v3010_v17 = vld [vmem:[%s3703_s4 + $0xa8] sm:$0xff]   ;;  %v3011_v18 = vld [vmem:[%s3703_s4 + $0x78] sm:$0xff]   ;;  %v3013_v20 = vld [vmem:[%s3703_s4 + $0xf0] sm:$0xff]  }
  0x1c   : > { %v3012_v19 = vld [vmem:[%s3703_s4 + $0x38] sm:$0xff]   ;;  %v3014_v21 = vld [vmem:[%s3703_s4 + $0xb0] sm:$0xff]  }
  0x21   : > { %2657 = vmatpush3.bf16.xpose.msra.mxu0 %v672_v22  ;;  %v3015_v22 = vld [vmem:[%s3703_s4 + $0xf8] sm:$0xff]  }
  0x22   : > { %2689 = vmatpush3.bf16.xpose.msra.mxu1 %v720_v24  ;;  %2921 = vmatprep.subr.msk.bf16.mxu0 %vm637_vm0, %v2961_v23  ;;  %v3016_v23 = vld [vmem:[%s3703_s4 + $0xb8] sm:$0xff]   ;;  %v1914_v24 = vld [vmem:[%s3704_s5] sm:$0x3] }
  0x23   : > { %2929 = vmatprep.subr.msk.bf16.mxu1 %vm637_vm0, %v2962_v25  ;;  %v3535_v25 = vsel %vm1915_vm1, %v1914_v24, 0 }
  0x29   : > { %2659 = vmatpush3.bf16.xpose.msra.mxu0 %v675_v29 }
  0x2a   : > { %2691 = vmatpush3.bf16.xpose.msra.mxu1 %v723_v31  ;;  %2922 = vmatprep.subr.msk.bf16.mxu0 %vm637_vm0, %v2965_v30 }
  0x2b   : > { %2930 = vmatprep.subr.msk.bf16.mxu1 %vm637_vm0, %v2966_v32 }
  0x31   : > { %2661 = vmatpush3.bf16.xpose.msra.mxu0 %v678_v35 }
  0x32   : > { %2693 = vmatpush3.bf16.xpose.msra.mxu1 %v726_v37  ;;  %2923 = vmatprep.subr.msk.bf16.mxu0 %vm637_vm0, %v2969_v36 }
  0x33   : > { %2931 = vmatprep.subr.msk.bf16.mxu1 %vm637_vm0, %v2970_v38 }
  0x39   : > { %2663 = vmatpush3.bf16.xpose.msra.mxu0 %v681_v41 }
  0x3a   : > { %2695 = vmatpush3.bf16.xpose.msra.mxu1 %v729_v43  ;;  %2924 = vmatprep.subr.msk.bf16.mxu0 %vm637_vm0, %v2973_v42 }
  0x3b   : > { %2932 = vmatprep.subr.msk.bf16.mxu1 %vm637_vm0, %v2974_v44 }
  0x41   : > { %2665 = vmatpush3.bf16.xpose.msra.mxu0 %v684_v47 }
  0x42   : > { %2697 = vmatpush3.bf16.xpose.msra.mxu1 %v732_v49  ;;  %2714 = vmatprep.subr.bf16.mxu0 %v2985_v48 }
  0x43   : > { %2778 = vmatprep.subr.bf16.mxu1 %v2993_v50 }
  0x48   : > { %2667 = vmatmul.mubr.msk.bf16.vlgmr.msra.gmra.mrb[0].mxu0 %vm637_vm0, %v2977_v28 }
  0x49   : > { %2699 = vmatmul.mubr.msk.bf16.vlgmr.msra.gmra.mrb[0].mxu1 %vm637_vm0, %v2977_v28  ;;  %2668 = vmatprep.mubr.msk.bf16.mxu0 %vm637_vm0, %v3364_v51 }
  0x4a   : > { %2700 = vmatprep.mubr.msk.bf16.mxu1 %vm637_vm0, %v3364_v51  ;;  %2715 = vmatpush3.bf16.msra.mxu0 %v2986_v52  ;;  %v985_v52 = vld [vmem:[%s3541_s10 + $0x8] sm:$0xff] }
  0x4b   : > { %2716 = vmatprep.subr.bf16.mxu0 %v2987_v53  ;;  %2779 = vmatpush3.bf16.msra.mxu1 %v2994_v54 }
  0x4c   : > { %2780 = vmatprep.subr.bf16.mxu1 %v2997_v55 }
  0x4e   : > { %2717 = vmatpush3.bf16.msra.mxu0 %v2988_v56  ;;  %v984_v56 = vld [vmem:[%s3541_s10] sm:$0xff] }
  0x4f   : > { %2718 = vmatprep.subr.bf16.mxu0 %v2989_v57  ;;  %2781 = vmatpush3.bf16.msra.mxu1 %v2998_v58  ;;  %v986_v57 = vld [vmem:[%s3541_s10 + $0x10] sm:$0xff] }
  0x50   : > { %2669 = vmatmul.mubr.msk.bf16.gmra.mrb[4].mxu0 %vm637_vm0, %v3364_v51  ;;  %2782 = vmatprep.subr.bf16.mxu1 %v3001_v59 }
  0x51   : > { %2701 = vmatmul.mubr.msk.bf16.gmra.mrb[4].mxu1 %vm637_vm0, %v3364_v51  ;;  %2670 = vmatprep.mubr.msk.bf16.mxu0 %vm637_vm0, %v3397_v60 }
  0x52   : > { %2702 = vmatprep.mubr.msk.bf16.mxu1 %vm637_vm0, %v3397_v60  ;;  %2719 = vmatpush3.bf16.msra.mxu0 %v2990_v61 }
  0x53   : > { %2720 = vmatprep.subr.bf16.mxu0 %v2991_v62  ;;  %2783 = vmatpush3.bf16.msra.mxu1 %v3002_v63  ;;  %v987_v63 = vld [vmem:[%s3541_s10 + $0x18] sm:$0xff] }
  0x54   : > { %2784 = vmatprep.subr.bf16.mxu1 %v3003_v10 }
  0x56   : > { %2721 = vmatpush3.bf16.msra.mxu0 %v2992_v0 }
  0x57   : > { %2722 = vmatprep.subr.bf16.mxu0 %v2995_v1  ;;  %2785 = vmatpush3.bf16.msra.mxu1 %v3004_v11 }
  0x58   : > { %2671 = vmatmul.mubr.msk.bf16.gmra.mrb[8].mxu0 %vm637_vm0, %v3397_v60  ;;  %2786 = vmatprep.subr.bf16.mxu1 %v3007_v14 }
  0x59   : > { %2703 = vmatmul.mubr.msk.bf16.gmra.mrb[8].mxu1 %vm637_vm0, %v3397_v60  ;;  %2672 = vmatprep.mubr.msk.bf16.mxu0 %vm637_vm0, %v3423_v2 }
  0x5a   : > { %2704 = vmatprep.mubr.msk.bf16.mxu1 %vm637_vm0, %v3423_v2  ;;  %2723 = vmatpush3.bf16.msra.mxu0 %v2996_v3 }
  0x5b   : > { %2724 = vmatprep.subr.bf16.mxu0 %v2999_v4  ;;  %2787 = vmatpush3.bf16.msra.mxu1 %v3008_v15 }
  0x5c   : > { %2788 = vmatprep.subr.bf16.mxu1 %v3009_v16 }
  0x5e   : > { %2725 = vmatpush3.bf16.msra.mxu0 %v3000_v5 }
  0x5f   : > { %2726 = vmatprep.subr.bf16.mxu0 %v3005_v12  ;;  %2789 = vmatpush3.bf16.msra.mxu1 %v3010_v17 }
  0x60   : > { %2673 = vmatmul.mubr.msk.bf16.gmra.mrb[12].mxu0 %vm637_vm0, %v3423_v2  ;;  %2790 = vmatprep.subr.bf16.mxu1 %v3013_v20 }
  0x61   : > { %2705 = vmatmul.mubr.msk.bf16.gmra.mrb[12].mxu1 %vm637_vm0, %v3423_v2  ;;  %2674 = vmatprep.mubr.msk.bf16.mxu0 %vm637_vm0, %v3443_v6 }
  0x62   : > { %2706 = vmatprep.mubr.msk.bf16.mxu1 %vm637_vm0, %v3443_v6  ;;  %2727 = vmatpush3.bf16.msra.mxu0 %v3006_v13 }
  0x63   : > { %2728 = vmatprep.subr.bf16.mxu0 %v3011_v18  ;;  %2791 = vmatpush3.bf16.msra.mxu1 %v3014_v21 }
  0x64   : > { %2792 = vmatprep.subr.bf16.mxu1 %v3015_v22 }
  0x66   : > { %2729 = vmatpush3.bf16.msra.mxu0 %v3012_v19 }
  0x67   : > { %2793 = vmatpush3.bf16.msra.mxu1 %v3016_v23  ;;  %2933 = vmatprep.subr.msk.bf16.mxu0 %vm1915_vm1, %v1914_v24 }
  0x68   : > { %2675 = vmatmul.mubr.msk.bf16.gmra.mrb[16].mxu0 %vm637_vm0, %v3443_v6 }
  0x69   : > { %2707 = vmatmul.mubr.msk.bf16.gmra.mrb[16].mxu1 %vm637_vm0, %v3443_v6  ;;  %2676 = vmatprep.mubr.msk.bf16.mxu0 %vm637_vm0, %v3454_v7 }
  0x6a   : > { %2708 = vmatprep.mubr.msk.bf16.mxu1 %vm637_vm0, %v3454_v7 }
  0x70   : > { %2677 = vmatmul.mubr.msk.bf16.gmra.mrb[20].mxu0 %vm637_vm0, %v3454_v7 }
  0x71   : > { %2709 = vmatmul.mubr.msk.bf16.gmra.mrb[20].mxu1 %vm637_vm0, %v3454_v7  ;;  %2678 = vmatprep.mubr.msk.bf16.mxu0 %vm637_vm0, %v3465_v8 }
  0x72   : > { %2710 = vmatprep.mubr.msk.bf16.mxu1 %vm637_vm0, %v3465_v8 }
  0x78   : > { %2679 = vmatmul.mubr.msk.bf16.gmra.mrb[24].mxu0 %vm637_vm0, %v3465_v8 }
  0x79   : > { %2711 = vmatmul.mubr.msk.bf16.gmra.mrb[24].mxu1 %vm637_vm0, %v3465_v8  ;;  %2680 = vmatprep.mubr.msk.bf16.mxu0 %vm637_vm0, %v3476_v9 }
  0x7a   : > { %2712 = vmatprep.mubr.msk.bf16.mxu1 %vm637_vm0, %v3476_v9 }
  0x80   : > { %2681 = vmatmul.mubr.msk.bf16.gmra.mrb[28].mxu0 %vm637_vm0, %v3476_v9 }
  0x81   : > { %2713 = vmatmul.mubr.msk.bf16.gmra.mrb[28].mxu1 %vm637_vm0, %v3476_v9 }
 0x11b   : > { %v792_v26 = vpop.f32.mrb[0].mxu0 }
 0x11c   : > { %3025 = vrcp.f32 %v792_v26  ;;  %v905_v27 = vpop.f32.mrb[0].mxu1  ;;  %v794_v28 = vpop.f32.mrb[1].mxu0 }
 0x11d   : > { %3027 = vrcp.f32 %v905_v27  ;;  %v907_v29 = vpop.f32.mrb[1].mxu1  ;;  %v796_v30 = vpop.f32.mrb[2].mxu0  ;;  %v989_v27 = vld [vmem:[%s3541_s10 + $0x28] sm:$0xff] }
 0x11e   : > { %3029 = vrcp.f32 %v794_v28  ;;  %v909_v31 = vpop.f32.mrb[2].mxu1  ;;  %v798_v32 = vpop.f32.mrb[3].mxu0 }
 0x11f   : > { %3031 = vrcp.f32 %v907_v29  ;;  %v911_v33 = vpop.f32.mrb[3].mxu1 }
 0x120   : > { %3033 = vrcp.f32 %v796_v30 }
 0x121   : > { %3035 = vrcp.f32 %v909_v31  ;;  %v988_v31 = vld [vmem:[%s3541_s10 + $0x20] sm:$0xff] }
 0x122   : > { %3037 = vrcp.f32 %v798_v32  ;;  %v990_v32 = vld [vmem:[%s3541_s10 + $0x30] sm:$0xff] }
 0x123   : > { %3039 = vrcp.f32 %v911_v33  ;;  %v802_v34 = vpop.f32.mrb[4].mxu0 }
 0x124   : > { %3041 = vrcp.f32 %v802_v34  ;;  %v915_v35 = vpop.f32.mrb[4].mxu1  ;;  %v804_v36 = vpop.f32.mrb[5].mxu0 }
 0x125   : > { %3043 = vrcp.f32 %v915_v35  ;;  %v917_v37 = vpop.f32.mrb[5].mxu1  ;;  %v806_v38 = vpop.f32.mrb[6].mxu0 }
 0x126   : > { %v3026_v39 = vpop.eup %3025  ;;  %3045 = vrcp.f32 %v804_v36  ;;  %v919_v40 = vpop.f32.mrb[6].mxu1 }
 0x127   : > { %v808_v41 = vpop.f32.mrb[7].mxu0  ;;  %v3028_v42 = vpop.eup %3027  ;;  %3047 = vrcp.f32 %v917_v37  ;;  %v991_v37 = vld [vmem:[%s3541_s10 + $0x38] sm:$0xff] }
 0x128   : > { %v921_v43 = vpop.f32.mrb[7].mxu1  ;;  %v3030_v44 = vpop.eup %3029  ;;  %3049 = vrcp.f32 %v806_v38 }
 0x129   : > { %v3032_v45 = vpop.eup %3031  ;;  %3051 = vrcp.f32 %v919_v40  ;;  %v2618_v46 = vpack.c.bf16 %v3030_v44, %v3026_v39 }
 0x12a   : > { %v3034_v47 = vpop.eup %3033  ;;  %3053 = vrcp.f32 %v808_v41  ;;  %v2619_v48 = vpack.c.bf16 %v3032_v45, %v3028_v42 }
 0x12b   : > { %v3036_v49 = vpop.eup %3035  ;;  %3055 = vrcp.f32 %v921_v43  ;;  %v812_v50 = vpop.f32.mrb[8].mxu0  ;;  %v1272_v12 = vmul.bf16 %v2618_v46, %v984_v56 }
 0x12c   : > { %v3038_v53 = vpop.eup %3037  ;;  %3057 = vrcp.f32 %v812_v50  ;;  %v925_v54 = vpop.f32.mrb[8].mxu1  ;;  %v1273_v5 = vmul.bf16 %v2619_v48, %v985_v52 }
 0x12d   : > { %v814_v55 = vpop.f32.mrb[9].mxu0  ;;  %v3040_v58 = vpop.eup %3039  ;;  %3059 = vrcp.f32 %v925_v54  ;;  %v2620_v62 = vpack.c.bf16 %v3038_v53, %v3034_v47 }
 0x12e   : > { %v927_v59 = vpop.f32.mrb[9].mxu1  ;;  %v816_v61 = vpop.f32.mrb[10].mxu0  ;;  %3061 = vrcp.f32 %v814_v55  ;;  %v2621_v4 = vpack.c.bf16 %v3040_v58, %v3036_v49 }
 0x12f   : > { %v3042_v0 = vpop.eup %3041  ;;  %v929_v1 = vpop.f32.mrb[10].mxu1  ;;  %3063 = vrcp.f32 %v927_v59  ;;  %v1274_v13 = vmul.bf16 %v2620_v62, %v986_v57  ;;  %v993_v59 = vld [vmem:[%s3541_s10 + $0x48] sm:$0xff] }
 0x130   : > { %v818_v3 = vpop.f32.mrb[11].mxu0  ;;  %v3044_v10 = vpop.eup %3043  ;;  %3065 = vrcp.f32 %v816_v61  ;;  %v1275_v15 = vmul.bf16 %v2621_v4, %v987_v63 }
 0x131   : > { %v931_v11 = vpop.f32.mrb[11].mxu1  ;;  %v3046_v14 = vpop.eup %3045  ;;  %3067 = vrcp.f32 %v929_v1  ;;  %v2534_v17 = vcombine.low %v1272_v12, %v1274_v13  ;;  %v2535_v18 = vcombine.high %v1272_v12, %v1274_v13  ;;  %v994_v1 = vld [vmem:[%s3541_s10 + $0x50] sm:$0xff] }
 0x132   : > { %v3048_v16 = vpop.eup %3047  ;;  %v2622_v19 = vpack.c.bf16 %v3046_v14, %v3042_v0  ;;  %3069 = vrcp.f32 %v818_v3  ;;  %v2536_v21 = vcombine.low %v1273_v5, %v1275_v15  ;;  %v2537_v22 = vcombine.high %v1273_v5, %v1275_v15  ;;  %v992_v0 = vld [vmem:[%s3541_s10 + $0x40] sm:$0xff] }
 0x133   : > { %v3050_v20 = vpop.eup %3049  ;;  %v2623_v23 = vpack.c.bf16 %v3048_v16, %v3044_v10  ;;  %3071 = vrcp.f32 %v931_v11  ;;  %1752 = vmatprep.mubr.bf16.mxu0 %v2535_v18  ;;  %v822_v26 = vpop.f32.mrb[12].mxu0  ;;  %v995_v11 = vld [vmem:[%s3541_s10 + $0x58] sm:$0xff] }
 0x134   : > { %v3052_v24 = vpop.eup %3051  ;;  %1849 = vmatprep.mubr.bf16.mxu1 %v2537_v22  ;;  %1753 = vmatmul.mubr.bf16.vlgmr.msra.gmra.mrb[32].mxu0 %v2534_v17  ;;  %3073 = vrcp.f32 %v822_v26  ;;  %v935_v29 = vpop.f32.mrb[12].mxu1  ;;  %v1276_v45 = vmul.bf16 %v2622_v19, %v988_v31 }
 0x135   : > { %v3054_v28 = vpop.eup %3053  ;;  %v824_v30 = vpop.f32.mrb[13].mxu0  ;;  %1850 = vmatmul.mubr.bf16.vlgmr.msra.gmra.mrb[32].mxu1 %v2536_v21  ;;  %2868 = vmatpush3.bf16.msra.mxu0 %v3535_v25  ;;  %3075 = vrcp.f32 %v935_v29  ;;  %v1277_v42 = vmul.bf16 %v2623_v23, %v989_v27 }
 0x136   : > { %v3056_v33 = vpop.eup %3055  ;;  %v937_v34 = vpop.f32.mrb[13].mxu1  ;;  %v2624_v36 = vpack.c.bf16 %v3054_v28, %v3050_v20  ;;  %3077 = vrcp.f32 %v824_v30 }
 0x137   : > { %v826_v35 = vpop.f32.mrb[14].mxu0  ;;  %v3058_v38 = vpop.eup %3057  ;;  %v2625_v41 = vpack.c.bf16 %v3056_v33, %v3052_v24  ;;  %3079 = vrcp.f32 %v937_v34  ;;  %v997_v34 = vld [vmem:[%s3541_s10 + $0x68] sm:$0xff] }
 0x138   : > { %v939_v39 = vpop.f32.mrb[14].mxu1  ;;  %v828_v40 = vpop.f32.mrb[15].mxu0  ;;  %v1278_v46 = vmul.bf16 %v2624_v36, %v990_v32  ;;  %3081 = vrcp.f32 %v826_v35 }
 0x139   : > { %v3060_v43 = vpop.eup %3059  ;;  %v941_v44 = vpop.f32.mrb[15].mxu1  ;;  %v1279_v25 = vmul.bf16 %v2625_v41, %v991_v37  ;;  %3083 = vrcp.f32 %v939_v39  ;;  %v998_v39 = vld [vmem:[%s3541_s10 + $0x70] sm:$0xff] }
 0x13a   : > { %v3062_v47 = vpop.eup %3061  ;;  %v2539_v49 = vcombine.high %v1276_v45, %v1278_v46  ;;  %v2538_v50 = vcombine.low %v1276_v45, %v1278_v46  ;;  %3085 = vrcp.f32 %v828_v40 }
 0x13b   : > { %v3064_v48 = vpop.eup %3063  ;;  %v2626_v52 = vpack.c.bf16 %v3062_v47, %v3058_v38  ;;  %v2541_v54 = vcombine.high %v1277_v42, %v1279_v25  ;;  %v2540_v55 = vcombine.low %v1277_v42, %v1279_v25  ;;  %3087 = vrcp.f32 %v941_v44  ;;  %v832_v58 = vpop.f32.mrb[16].mxu0  ;;  %v996_v38 = vld [vmem:[%s3541_s10 + $0x60] sm:$0xff]  ;;  %v999_v44 = vld [vmem:[%s3541_s10 + $0x78] sm:$0xff] }
 0x13c   : > { %v3066_v53 = vpop.eup %3065  ;;  %v2627_v56 = vpack.c.bf16 %v3064_v48, %v3060_v43  ;;  %1760 = vmatprep.mubr.bf16.mxu0 %v2539_v49  ;;  %3089 = vrcp.f32 %v832_v58  ;;  %v945_v62 = vpop.f32.mrb[16].mxu1 }
 0x13d   : > { %v3068_v57 = vpop.eup %3067  ;;  %1857 = vmatprep.mubr.bf16.mxu1 %v2541_v54  ;;  %1761 = vmatmul.mubr.bf16.gmra.mrb[36].mxu0 %v2538_v50  ;;  %v834_v63 = vpop.f32.mrb[17].mxu0  ;;  %3091 = vrcp.f32 %v945_v62  ;;  %v1280_v19 = vmul.bf16 %v2626_v52, %v992_v0 }
 0x13e   : > { %v3070_v61 = vpop.eup %3069  ;;  %1858 = vmatmul.mubr.bf16.gmra.mrb[36].mxu1 %v2540_v55  ;;  %v947_v4 = vpop.f32.mrb[17].mxu1  ;;  %3093 = vrcp.f32 %v834_v63  ;;  %v1281_v16 = vmul.bf16 %v2627_v56, %v993_v59 }
 0x13f   : > { %v3072_v3 = vpop.eup %3071  ;;  %v836_v5 = vpop.f32.mrb[18].mxu0  ;;  %v2628_v10 = vpack.c.bf16 %v3070_v61, %v3066_v53  ;;  %3095 = vrcp.f32 %v947_v4  ;;  %v1001_v4 = vld [vmem:[%s3541_s10 + $0x88] sm:$0xff] }
 0x140   : > { %v3074_v12 = vpop.eup %3073  ;;  %v949_v13 = vpop.f32.mrb[18].mxu1  ;;  %v2629_v15 = vpack.c.bf16 %v3072_v3, %v3068_v57  ;;  %3097 = vrcp.f32 %v836_v5 }
 0x141   : > { %v838_v14 = vpop.f32.mrb[19].mxu0  ;;  %v3076_v17 = vpop.eup %3075  ;;  %v1282_v20 = vmul.bf16 %v2628_v10, %v994_v1  ;;  %3099 = vrcp.f32 %v949_v13  ;;  %v1002_v13 = vld [vmem:[%s3541_s10 + $0x90] sm:$0xff] }
 0x142   : > { %v951_v18 = vpop.f32.mrb[19].mxu1  ;;  %v3078_v21 = vpop.eup %3077  ;;  %v1283_v22 = vmul.bf16 %v2629_v15, %v995_v11  ;;  %3101 = vrcp.f32 %v838_v14 }
 0x143   : > { %v3080_v23 = vpop.eup %3079  ;;  %v2543_v24 = vcombine.high %v1280_v19, %v1282_v20  ;;  %v2542_v26 = vcombine.low %v1280_v19, %v1282_v20  ;;  %v2630_v27 = vpack.c.bf16 %v3078_v21, %v3074_v12  ;;  %3103 = vrcp.f32 %v951_v18  ;;  %v842_v33 = vpop.f32.mrb[20].mxu0  ;;  %v1000_v12 = vld [vmem:[%s3541_s10 + $0x80] sm:$0xff]  ;;  %v1003_v18 = vld [vmem:[%s3541_s10 + $0x98] sm:$0xff] }
 0x144   : > { %v3082_v28 = vpop.eup %3081  ;;  %v2545_v29 = vcombine.high %v1281_v16, %v1283_v22  ;;  %v2544_v30 = vcombine.low %v1281_v16, %v1283_v22  ;;  %v2631_v31 = vpack.c.bf16 %v3080_v23, %v3076_v17  ;;  %3105 = vrcp.f32 %v842_v33  ;;  %v955_v36 = vpop.f32.mrb[20].mxu1 }
 0x145   : > { %v3084_v32 = vpop.eup %3083  ;;  %1768 = vmatprep.mubr.bf16.mxu0 %v2543_v24  ;;  %v844_v37 = vpop.f32.mrb[21].mxu0  ;;  %3107 = vrcp.f32 %v955_v36  ;;  %v1284_v52 = vmul.bf16 %v2630_v27, %v996_v38 }
 0x146   : > { %v3086_v35 = vpop.eup %3085  ;;  %1865 = vmatprep.mubr.bf16.mxu1 %v2545_v29  ;;  %1769 = vmatmul.mubr.bf16.gmra.mrb[40].mxu0 %v2542_v26  ;;  %v957_v41 = vpop.f32.mrb[21].mxu1  ;;  %3109 = vrcp.f32 %v844_v37  ;;  %v1285_v48 = vmul.bf16 %v2631_v31, %v997_v34 }
 0x147   : > { %v3088_v40 = vpop.eup %3087  ;;  %1866 = vmatmul.mubr.bf16.gmra.mrb[40].mxu1 %v2544_v30  ;;  %v846_v42 = vpop.f32.mrb[22].mxu0  ;;  %v2632_v43 = vpack.c.bf16 %v3086_v35, %v3082_v28  ;;  %3111 = vrcp.f32 %v957_v41  ;;  %v1005_v41 = vld [vmem:[%s3541_s10 + $0xa8] sm:$0xff] }
 0x148   : > { %v3090_v45 = vpop.eup %3089  ;;  %v959_v46 = vpop.f32.mrb[22].mxu1  ;;  %v2633_v25 = vpack.c.bf16 %v3088_v40, %v3084_v32  ;;  %3113 = vrcp.f32 %v846_v42 }
 0x149   : > { %v848_v47 = vpop.f32.mrb[23].mxu0  ;;  %v3092_v49 = vpop.eup %3091  ;;  %v1286_v53 = vmul.bf16 %v2632_v43, %v998_v39  ;;  %3115 = vrcp.f32 %v959_v46  ;;  %v1006_v46 = vld [vmem:[%s3541_s10 + $0xb0] sm:$0xff] }
 0x14a   : > { %v961_v50 = vpop.f32.mrb[23].mxu1  ;;  %v3094_v54 = vpop.eup %3093  ;;  %v1287_v55 = vmul.bf16 %v2633_v25, %v999_v44  ;;  %3117 = vrcp.f32 %v848_v47 }
 0x14b   : > { %v3096_v56 = vpop.eup %3095  ;;  %v2547_v57 = vcombine.high %v1284_v52, %v1286_v53  ;;  %v2546_v58 = vcombine.low %v1284_v52, %v1286_v53  ;;  %v2634_v59 = vpack.c.bf16 %v3094_v54, %v3090_v45  ;;  %3119 = vrcp.f32 %v961_v50  ;;  %v852_v3 = vpop.f32.mrb[24].mxu0  ;;  %v1004_v45 = vld [vmem:[%s3541_s10 + $0xa0] sm:$0xff]  ;;  %v1007_v50 = vld [vmem:[%s3541_s10 + $0xb8] sm:$0xff] }
 0x14c   : > { %v3098_v61 = vpop.eup %3097  ;;  %v2549_v62 = vcombine.high %v1285_v48, %v1287_v55  ;;  %v2548_v63 = vcombine.low %v1285_v48, %v1287_v55  ;;  %v2635_v0 = vpack.c.bf16 %v3096_v56, %v3092_v49  ;;  %3121 = vrcp.f32 %v852_v3  ;;  %v965_v10 = vpop.f32.mrb[24].mxu1 }
 0x14d   : > { %v3100_v1 = vpop.eup %3099  ;;  %1776 = vmatprep.mubr.bf16.mxu0 %v2547_v57  ;;  %v854_v11 = vpop.f32.mrb[25].mxu0  ;;  %3123 = vrcp.f32 %v965_v10  ;;  %v1288_v27 = vmul.bf16 %v2634_v59, %v1000_v12 }
 0x14e   : > { %v3102_v5 = vpop.eup %3101  ;;  %1873 = vmatprep.mubr.bf16.mxu1 %v2549_v62  ;;  %1777 = vmatmul.mubr.bf16.gmra.mrb[44].mxu0 %v2546_v58  ;;  %v967_v15 = vpop.f32.mrb[25].mxu1  ;;  %3125 = vrcp.f32 %v854_v11  ;;  %v1289_v23 = vmul.bf16 %v2635_v0, %v1001_v4 }
 0x14f   : > { %v3104_v14 = vpop.eup %3103  ;;  %1874 = vmatmul.mubr.bf16.gmra.mrb[44].mxu1 %v2548_v63  ;;  %v856_v16 = vpop.f32.mrb[26].mxu0  ;;  %v2636_v17 = vpack.c.bf16 %v3102_v5, %v3098_v61  ;;  %3127 = vrcp.f32 %v967_v15 }
 0x150   : > { %v3106_v19 = vpop.eup %3105  ;;  %v969_v20 = vpop.f32.mrb[26].mxu1  ;;  %v2637_v22 = vpack.c.bf16 %v3104_v14, %v3100_v1  ;;  %3129 = vrcp.f32 %v856_v16  ;;  %v1009_v14 = vld [vmem:[%s3541_s10 + $0xc8] sm:$0xff]  ;;  %v1008_v16 = vld [vmem:[%s3541_s10 + $0xc0] sm:$0xff] }
 0x151   : > { %v858_v21 = vpop.f32.mrb[27].mxu0  ;;  %v3108_v24 = vpop.eup %3107  ;;  %v1290_v28 = vmul.bf16 %v2636_v17, %v1002_v13  ;;  %3131 = vrcp.f32 %v969_v20  ;;  %v1010_v17 = vld [vmem:[%s3541_s10 + $0xd0] sm:$0xff]  ;;  %v1011_v20 = vld [vmem:[%s3541_s10 + $0xd8] sm:$0xff] }
 0x152   : > { %v971_v26 = vpop.f32.mrb[27].mxu1  ;;  %v3110_v29 = vpop.eup %3109  ;;  %v1291_v30 = vmul.bf16 %v2637_v22, %v1003_v18  ;;  %3133 = vrcp.f32 %v858_v21 }
 0x153   : > { %v3112_v31 = vpop.eup %3111  ;;  %v2551_v32 = vcombine.high %v1288_v27, %v1290_v28  ;;  %v2550_v33 = vcombine.low %v1288_v27, %v1290_v28  ;;  %v2638_v34 = vpack.c.bf16 %v3110_v29, %v3106_v19  ;;  %3135 = vrcp.f32 %v971_v26  ;;  %v862_v40 = vpop.f32.mrb[28].mxu0 }
 0x154   : > { %v3114_v35 = vpop.eup %3113  ;;  %v2553_v36 = vcombine.high %v1289_v23, %v1291_v30  ;;  %v2552_v37 = vcombine.low %v1289_v23, %v1291_v30  ;;  %v2639_v38 = vpack.c.bf16 %v3112_v31, %v3108_v24  ;;  %3137 = vrcp.f32 %v862_v40  ;;  %v975_v43 = vpop.f32.mrb[28].mxu1 }
 0x155   : > { %v3116_v39 = vpop.eup %3115  ;;  %1784 = vmatprep.mubr.bf16.mxu0 %v2551_v32  ;;  %v864_v44 = vpop.f32.mrb[29].mxu0  ;;  %3139 = vrcp.f32 %v975_v43  ;;  %v1292_v59 = vmul.bf16 %v2638_v34, %v1004_v45  ;;  %v1015_v45 = vld [vmem:[%s3541_s10 + $0xf8] sm:$0xff] }
 0x156   : > { %v3118_v42 = vpop.eup %3117  ;;  %1881 = vmatprep.mubr.bf16.mxu1 %v2553_v36  ;;  %1785 = vmatmul.mubr.bf16.gmra.mrb[48].mxu0 %v2550_v33  ;;  %v977_v25 = vpop.f32.mrb[29].mxu1  ;;  %3141 = vrcp.f32 %v864_v44  ;;  %v1293_v56 = vmul.bf16 %v2639_v38, %v1005_v41  ;;  %v1012_v41 = vld [vmem:[%s3541_s10 + $0xe0] sm:$0xff] }
 0x157   : > { %v3120_v47 = vpop.eup %3119  ;;  %1882 = vmatmul.mubr.bf16.gmra.mrb[48].mxu1 %v2552_v37  ;;  %v866_v48 = vpop.f32.mrb[30].mxu0  ;;  %v2640_v49 = vpack.c.bf16 %v3118_v42, %v3114_v35  ;;  %3143 = vrcp.f32 %v977_v25  ;;  %v1014_v42 = vld [vmem:[%s3541_s10 + $0xf0] sm:$0xff] }
 0x158   : > { %v3122_v52 = vpop.eup %3121  ;;  %v979_v53 = vpop.f32.mrb[30].mxu1  ;;  %v2641_v55 = vpack.c.bf16 %v3120_v47, %v3116_v39  ;;  %3145 = vrcp.f32 %v866_v48  ;;  %v1013_v39 = vld [vmem:[%s3541_s10 + $0xe8] sm:$0xff]  ;;  %s348_s10 = scalar_lea.vmem %s3701_s2, %s2443_s25 }
 0x159   : > { %v868_v54 = vpop.f32.mrb[31].mxu0  ;;  %v3124_v57 = vpop.eup %3123  ;;  %v1294_v61 = vmul.bf16 %v2640_v49, %v1006_v46  ;;  %3147 = vrcp.f32 %v979_v53 }
 0x15a   : > { %v981_v58 = vpop.f32.mrb[31].mxu1  ;;  %v3126_v62 = vpop.eup %3125  ;;  %v1295_v63 = vmul.bf16 %v2641_v55, %v1007_v50  ;;  %3149 = vrcp.f32 %v868_v54  ;;  %v3153_v55 = vld [vmem:[%s3294_s26] sm:$0xff]  }
 0x15b   : > { %v3128_v0 = vpop.eup %3127  ;;  %v2555_v1 = vcombine.high %v1292_v59, %v1294_v61  ;;  %v2554_v3 = vcombine.low %v1292_v59, %v1294_v61  ;;  %v2642_v4 = vpack.c.bf16 %v3126_v62, %v3122_v52  ;;  %3151 = vrcp.f32 %v981_v58  ;;  %v2203_v58 = vld [vmem:[%s348_s10 + $0x10] sm:$0xff]  ;;  %v2201_v59 = vld [vmem:[%s348_s10] sm:$0xff]  ;;  %v2204_v61 = vld [vmem:[%s348_s10 + $0x18] sm:$0xff] }
 0x15c   : > { %v3130_v5 = vpop.eup %3129  ;;  %v2557_v10 = vcombine.high %v1293_v56, %v1295_v63  ;;  %v2556_v11 = vcombine.low %v1293_v56, %v1295_v63  ;;  %v2643_v12 = vpack.c.bf16 %v3128_v0, %v3124_v57  ;;  %v3024_v56 = vld [vmem:[%s3705_s6 + $0x38] sm:$0xff]   ;;  %v3162_v57 = vmov 0   ;;  %v2202_v62 = vld [vmem:[%s348_s10 + $0x8] sm:$0xff]  ;;  %v2205_v0 = vld [vmem:[%s348_s10 + $0x20] sm:$0xff] }
 0x15d   : > { %v3132_v13 = vpop.eup %3131  ;;  %1792 = vmatprep.mubr.bf16.mxu0 %v2555_v1  ;;  %v1296_v26 = vmul.bf16 %v2642_v4, %v1008_v16  ;;  %2944 = vset.pattern.permute.xlu1 %v3162_v57  ;;  %v2206_v63 = vld [vmem:[%s348_s10 + $0x28] sm:$0xff]  ;;  %v2208_v1 = vld [vmem:[%s348_s10 + $0x38] sm:$0xff] }
 0x15e   : > { %v3134_v15 = vpop.eup %3133  ;;  %1889 = vmatprep.mubr.bf16.mxu1 %v2557_v10  ;;  %1793 = vmatmul.mubr.bf16.gmra.mrb[52].mxu0 %v2554_v3  ;;  %v1297_v23 = vmul.bf16 %v2643_v12, %v1009_v14  ;;  %v2207_v3 = vld [vmem:[%s348_s10 + $0x30] sm:$0xff]  ;;  %v2210_v4 = vld [vmem:[%s348_s10 + $0x48] sm:$0xff]  ;;  %v2212_v10 = vld [vmem:[%s348_s10 + $0x58] sm:$0xff] }
 0x15f   : > { %v3136_v18 = vpop.eup %3135  ;;  %1890 = vmatmul.mubr.bf16.gmra.mrb[52].mxu1 %v2556_v11  ;;  %v2644_v19 = vpack.c.bf16 %v3134_v15, %v3130_v5  ;;  %2943 = vset.pattern.permute.xlu0 %v3162_v57  ;;  %v2209_v5 = vld [vmem:[%s348_s10 + $0x40] sm:$0xff]  ;;  %v2211_v11 = vld [vmem:[%s348_s10 + $0x50] sm:$0xff]  ;;  %v2214_v12 = vld [vmem:[%s348_s10 + $0x68] sm:$0xff] }
 0x160   : > { %v3138_v21 = vpop.eup %3137  ;;  %v2645_v22 = vpack.c.bf16 %v3136_v18, %v3132_v13  ;;  %2229 = vperm.xlu1 %2944, %v2203_v58   ;;  %2219 = vperm.xlu0 %2943, %v2201_v59   ;;  %v2213_v13 = vld [vmem:[%s348_s10 + $0x60] sm:$0xff]  ;;  %v2216_v14 = vld [vmem:[%s348_s10 + $0x78] sm:$0xff]  ;;  %v2215_v15 = vld [vmem:[%s348_s10 + $0x70] sm:$0xff] }
 0x161   : > { %v3140_v24 = vpop.eup %3139  ;;  %v1298_v27 = vmul.bf16 %v2644_v19, %v1010_v17 }
 0x162   : > { %v3142_v28 = vpop.eup %3141  ;;  %v1299_v29 = vmul.bf16 %v2645_v22, %v1011_v20 }
 0x163   : > { %v3144_v30 = vpop.eup %3143  ;;  %v2559_v31 = vcombine.high %v1296_v26, %v1298_v27  ;;  %v2558_v32 = vcombine.low %v1296_v26, %v1298_v27  ;;  %v2646_v33 = vpack.c.bf16 %v3142_v28, %v3138_v21 }
 0x164   : > { %v3146_v34 = vpop.eup %3145  ;;  %v2561_v35 = vcombine.high %v1297_v23, %v1299_v29  ;;  %v2560_v36 = vcombine.low %v1297_v23, %v1299_v29  ;;  %v2647_v37 = vpack.c.bf16 %v3144_v30, %v3140_v24  ;;  %2234 = vperm.xlu1 %2944, %v2204_v61   ;;  %2224 = vperm.xlu0 %2943, %v2202_v62  }
 0x165   : > { %v3148_v38 = vpop.eup %3147  ;;  %1800 = vmatprep.mubr.bf16.mxu0 %v2559_v31  ;;  %v1300_v25 = vmul.bf16 %v2646_v33, %v1012_v41 }
 0x166   : > { %v3150_v40 = vpop.eup %3149  ;;  %1897 = vmatprep.mubr.bf16.mxu1 %v2561_v35  ;;  %1801 = vmatmul.mubr.bf16.gmra.mrb[56].mxu0 %v2558_v32  ;;  %v1301_v47 = vmul.bf16 %v2647_v37, %v1013_v39 }
 0x167   : > { %v3152_v43 = vpop.eup %3151  ;;  %1898 = vmatmul.mubr.bf16.gmra.mrb[56].mxu1 %v2560_v36  ;;  %v2648_v44 = vpack.c.bf16 %v3150_v40, %v3146_v34 }
 0x168   : > { %v2649_v46 = vpack.c.bf16 %v3152_v43, %v3148_v38  ;;  %2244 = vperm.xlu1 %2944, %v2206_v63   ;;  %2239 = vperm.xlu0 %2943, %v2205_v0  }
 0x169   : > { %v1302_v48 = vmul.bf16 %v2648_v44, %v1014_v42 }
 0x16a   : > { %v1303_v49 = vmul.bf16 %v2649_v46, %v1015_v45 }
 0x16b   : > { %v2563_v50 = vcombine.high %v1300_v25, %v1302_v48  ;;  %v2562_v52 = vcombine.low %v1300_v25, %v1302_v48 }
 0x16c   : > { %v2565_v53 = vcombine.high %v1301_v47, %v1303_v49  ;;  %v2564_v54 = vcombine.low %v1301_v47, %v1303_v49  ;;  %2254 = vperm.xlu1 %2944, %v2208_v1   ;;  %2249 = vperm.xlu0 %2943, %v2207_v3  }
 0x16d   : > { %1808 = vmatprep.mubr.bf16.mxu0 %v2563_v50 }
 0x16e   : > { %1905 = vmatprep.mubr.bf16.mxu1 %v2565_v53  ;;  %1809 = vmatmul.mubr.bf16.gmra.mrb[60].mxu0 %v2562_v52 }
 0x16f   : > { %1906 = vmatmul.mubr.bf16.gmra.mrb[60].mxu1 %v2564_v54  ;;  %2869 = vmatprep.mubr.msk.bf16.mxu0 %vm637_vm0, %v3153_v55 }
 0x170   : > { %2264 = vperm.xlu1 %2944, %v2210_v4   ;;  %2259 = vperm.xlu0 %2943, %v2209_v5  }
 0x174   : > { %2274 = vperm.xlu1 %2944, %v2212_v10   ;;  %2269 = vperm.xlu0 %2943, %v2211_v11  }
 0x176   : > { %2870 = vmatmul.mubr.msk.bf16.vlgmr.msra.gmra.mrb[64].mxu0 %vm637_vm0, %v3364_v51  ;;  %v3017_v51 = vld [vmem:[%s3705_s6] sm:$0xff]  }
 0x177   : > { %2873 = vmatprep.mubr.msk.bf16.mxu0 %vm637_vm0, %v3397_v60  ;;  %2885 = vmatprep.subr.bf16.mxu1 %v3017_v51  ;;  %v3018_v60 = vld [vmem:[%s3705_s6 + $0x8] sm:$0xff]  }
 0x178   : > { %2886 = vmatpush3.bf16.msra.mxu1 %v3017_v51  ;;  %2284 = vperm.xlu1 %2944, %v2214_v12  }
 0x179   : > { %2887 = vmatprep.subr.bf16.mxu1 %v3018_v60  ;;  %2279 = vperm.xlu0 %2943, %v2213_v13  }
 0x17c   : > { %2888 = vmatpush3.bf16.msra.mxu1 %v3018_v60  ;;  %2294 = vperm.xlu1 %2944, %v2216_v14  }
 0x17d   : > { %2289 = vperm.xlu0 %2943, %v2215_v15  }
 0x17e   : > { %2874 = vmatmul.mubr.msk.bf16.gmra.mrb[68].mxu0 %vm637_vm0, %v3423_v2  ;;  %v3019_v2 = vld [vmem:[%s3705_s6 + $0x10] sm:$0xff]  }
 0x17f   : > { %2877 = vmatprep.mubr.msk.bf16.mxu0 %vm637_vm0, %v3443_v6  ;;  %2889 = vmatprep.subr.bf16.mxu1 %v3019_v2  ;;  %v3020_v6 = vld [vmem:[%s3705_s6 + $0x18] sm:$0xff]  }
 0x180   : > { %2890 = vmatpush3.bf16.msra.mxu1 %v3019_v2 }
 0x181   : > { %2891 = vmatprep.subr.bf16.mxu1 %v3020_v6 }
 0x184   : > { %2892 = vmatpush3.bf16.msra.mxu1 %v3020_v6 }
 0x186   : > { %2878 = vmatmul.mubr.msk.bf16.gmra.mrb[72].mxu0 %vm637_vm0, %v3454_v7  ;;  %v3021_v7 = vld [vmem:[%s3705_s6 + $0x20] sm:$0xff]  }
 0x187   : > { %2881 = vmatprep.mubr.msk.bf16.mxu0 %vm637_vm0, %v3465_v8  ;;  %2893 = vmatprep.subr.bf16.mxu1 %v3021_v7  ;;  %v3022_v8 = vld [vmem:[%s3705_s6 + $0x28] sm:$0xff]  }
 0x188   : > { %2894 = vmatpush3.bf16.msra.mxu1 %v3021_v7 }
 0x189   : > { %2895 = vmatprep.subr.bf16.mxu1 %v3022_v8 }
 0x18c   : > { %2896 = vmatpush3.bf16.msra.mxu1 %v3022_v8 }
 0x18e   : > { %2882 = vmatmul.mubr.msk.bf16.gmra.mrb[76].mxu0 %vm637_vm0, %v3476_v9  ;;  %v3023_v9 = vld [vmem:[%s3705_s6 + $0x30] sm:$0xff]  }
 0x18f   : > { %2897 = vmatprep.subr.bf16.mxu1 %v3023_v9 }
 0x190   : > { %2898 = vmatpush3.bf16.msra.mxu1 %v3023_v9 }
 0x191   : > { %2899 = vmatprep.subr.bf16.mxu1 %v3024_v56 }
 0x194   : > { %2900 = vmatpush3.bf16.msra.mxu1 %v3024_v56 }
 0x207   : > { %v2730_v16 = vpop.f32.mrb[32].mxu0 }
 0x208   : > { %v2794_v17 = vpop.f32.mrb[32].mxu1  ;;  %v2731_v18 = vpop.f32.mrb[33].mxu0 }
 0x209   : > { %v2732_v19 = vadd.f32 %v2731_v18, %v2730_v16  ;;  %v2795_v20 = vpop.f32.mrb[33].mxu1  ;;  %v2733_v21 = vpop.f32.mrb[34].mxu0 }
 0x20a   : > { %v2796_v22 = vadd.f32 %v2795_v20, %v2794_v17  ;;  %v2797_v23 = vpop.f32.mrb[34].mxu1  ;;  %v2734_v24 = vpop.f32.mrb[35].mxu0 }
 0x20b   : > { %v2735_v26 = vadd.f32 %v2734_v24, %v2733_v21  ;;  %v2798_v27 = vpop.f32.mrb[35].mxu1 }
 0x20c   : > { %v2799_v28 = vadd.f32 %v2798_v27, %v2797_v23  ;;  %v3622_v29 = vadd.f32 %v2796_v22, %v2732_v19 }
 0x20e   : > { %v3624_v30 = vadd.f32 %v2799_v28, %v2735_v26 }
 0x210   : > { %v2736_v31 = vpop.f32.mrb[36].mxu0 }
 0x211   : > { %v2800_v32 = vpop.f32.mrb[36].mxu1  ;;  %v2737_v33 = vpop.f32.mrb[37].mxu0 }
 0x212   : > { %v2738_v34 = vadd.f32 %v2737_v33, %v2736_v31  ;;  %v2801_v35 = vpop.f32.mrb[37].mxu1  ;;  %v2739_v36 = vpop.f32.mrb[38].mxu0 }
 0x213   : > { %v2802_v37 = vadd.f32 %v2801_v35, %v2800_v32  ;;  %v2803_v38 = vpop.f32.mrb[38].mxu1  ;;  %v2740_v39 = vpop.f32.mrb[39].mxu0 }
 0x214   : > { %v2741_v40 = vadd.f32 %v2740_v39, %v2739_v36  ;;  %v2804_v41 = vpop.f32.mrb[39].mxu1 }
 0x215   : > { %v2805_v42 = vadd.f32 %v2804_v41, %v2803_v38  ;;  %v3626_v43 = vadd.f32 %v2802_v37, %v2738_v34 }
 0x217   : > { %v3628_v44 = vadd.f32 %v2805_v42, %v2741_v40 }
 0x219   : > { %v2742_v45 = vpop.f32.mrb[40].mxu0 }
 0x21a   : > { %v2806_v46 = vpop.f32.mrb[40].mxu1  ;;  %v2743_v47 = vpop.f32.mrb[41].mxu0 }
 0x21b   : > { %v2744_v25 = vadd.f32 %v2743_v47, %v2742_v45  ;;  %v2807_v48 = vpop.f32.mrb[41].mxu1  ;;  %v2745_v49 = vpop.f32.mrb[42].mxu0 }
 0x21c   : > { %v2808_v50 = vadd.f32 %v2807_v48, %v2806_v46  ;;  %v2809_v52 = vpop.f32.mrb[42].mxu1  ;;  %v2746_v53 = vpop.f32.mrb[43].mxu0 }
 0x21d   : > { %v2747_v54 = vadd.f32 %v2746_v53, %v2745_v49  ;;  %v2810_v55 = vpop.f32.mrb[43].mxu1 }
 0x21e   : > { %v2811_v51 = vadd.f32 %v2810_v55, %v2809_v52  ;;  %v3630_v60 = vadd.f32 %v2808_v50, %v2744_v25 }
 0x220   : > { %v3632_v2 = vadd.f32 %v2811_v51, %v2747_v54 }
 0x221   : > { %v2748_v6 = vpop.f32.mrb[44].mxu0 }
 0x222   : > { %v2812_v7 = vpop.f32.mrb[44].mxu1  ;;  %v2749_v8 = vpop.f32.mrb[45].mxu0 }
 0x223   : > { %v2750_v9 = vadd.f32 %v2749_v8, %v2748_v6  ;;  %v2813_v56 = vpop.f32.mrb[45].mxu1  ;;  %v2751_v57 = vpop.f32.mrb[46].mxu0 }
 0x224   : > { %v2814_v58 = vadd.f32 %v2813_v56, %v2812_v7  ;;  %v2815_v59 = vpop.f32.mrb[46].mxu1  ;;  %v2752_v61 = vpop.f32.mrb[47].mxu0 }
 0x225   : > { %v2753_v62 = vadd.f32 %v2752_v61, %v2751_v57  ;;  %v2816_v63 = vpop.f32.mrb[47].mxu1 }
 0x226   : > { %v2817_v0 = vadd.f32 %v2816_v63, %v2815_v59  ;;  %v3634_v1 = vadd.f32 %v2814_v58, %v2750_v9 }
 0x228   : > { %v3636_v3 = vadd.f32 %v2817_v0, %v2753_v62 }
 0x229   : > { %v2754_v4 = vpop.f32.mrb[48].mxu0 }
 0x22a   : > { %v2818_v5 = vpop.f32.mrb[48].mxu1  ;;  %v2755_v10 = vpop.f32.mrb[49].mxu0 }
 0x22b   : > { %v2756_v11 = vadd.f32 %v2755_v10, %v2754_v4  ;;  %v2819_v12 = vpop.f32.mrb[49].mxu1  ;;  %v2757_v13 = vpop.f32.mrb[50].mxu0 }
 0x22c   : > { %v2820_v14 = vadd.f32 %v2819_v12, %v2818_v5  ;;  %v2821_v15 = vpop.f32.mrb[50].mxu1  ;;  %v2758_v16 = vpop.f32.mrb[51].mxu0 }
 0x22d   : > { %v2759_v17 = vadd.f32 %v2758_v16, %v2757_v13  ;;  %v2822_v18 = vpop.f32.mrb[51].mxu1 }
 0x22e   : > { %v2823_v19 = vadd.f32 %v2822_v18, %v2821_v15  ;;  %v3638_v20 = vadd.f32 %v2820_v14, %v2756_v11 }
 0x230   : > { %v3640_v21 = vadd.f32 %v2823_v19, %v2759_v17 }
 0x231   : > { %v2760_v22 = vpop.f32.mrb[52].mxu0 }
 0x232   : > { %v2824_v23 = vpop.f32.mrb[52].mxu1  ;;  %v2761_v24 = vpop.f32.mrb[53].mxu0 }
 0x233   : > { %v2762_v26 = vadd.f32 %v2761_v24, %v2760_v22  ;;  %v2825_v27 = vpop.f32.mrb[53].mxu1  ;;  %v2763_v28 = vpop.f32.mrb[54].mxu0 }
 0x234   : > { %v2826_v31 = vadd.f32 %v2825_v27, %v2824_v23  ;;  %v2827_v32 = vpop.f32.mrb[54].mxu1  ;;  %v2764_v33 = vpop.f32.mrb[55].mxu0 }
 0x235   : > { %v2765_v34 = vadd.f32 %v2764_v33, %v2763_v28  ;;  %v2828_v35 = vpop.f32.mrb[55].mxu1 }
 0x236   : > { %v2829_v36 = vadd.f32 %v2828_v35, %v2827_v32  ;;  %v1892_v37 = vadd.f32 %v2826_v31, %v2762_v26 }
 0x238   : > { %v1895_v38 = vadd.f32 %v2829_v36, %v2765_v34 }
 0x239   : > { %v2766_v39 = vpop.f32.mrb[56].mxu0 }
 0x23a   : > { %v2830_v40 = vpop.f32.mrb[56].mxu1  ;;  %v2767_v41 = vpop.f32.mrb[57].mxu0 }
 0x23b   : > { %v2768_v42 = vadd.f32 %v2767_v41, %v2766_v39  ;;  %v2831_v45 = vpop.f32.mrb[57].mxu1  ;;  %v2769_v46 = vpop.f32.mrb[58].mxu0 }
 0x23c   : > { %v2832_v47 = vadd.f32 %v2831_v45, %v2830_v40  ;;  %v2833_v25 = vpop.f32.mrb[58].mxu1  ;;  %v2770_v48 = vpop.f32.mrb[59].mxu0 }
 0x23d   : > { %v2771_v49 = vadd.f32 %v2770_v48, %v2769_v46  ;;  %v2834_v50 = vpop.f32.mrb[59].mxu1 }
 0x23e   : > { %v2835_v52 = vadd.f32 %v2834_v50, %v2833_v25  ;;  %v1900_v53 = vadd.f32 %v2832_v47, %v2768_v42  ;;  %v2230_v47 = vpop.permute.xlu1 %2229 }
 0x240   : > { %v1903_v54 = vadd.f32 %v2835_v52, %v2771_v49 }
 0x241   : > { %v2772_v55 = vpop.f32.mrb[60].mxu0 }
 0x242   : > { %v2836_v51 = vpop.f32.mrb[60].mxu1  ;;  %v2773_v6 = vpop.f32.mrb[61].mxu0 }
 0x243   : > { %v2774_v7 = vadd.f32 %v2773_v6, %v2772_v55  ;;  %v2837_v8 = vpop.f32.mrb[61].mxu1  ;;  %v2775_v9 = vpop.f32.mrb[62].mxu0 }
 0x244   : > { %v2838_v56 = vadd.f32 %v2837_v8, %v2836_v51  ;;  %v2839_v57 = vpop.f32.mrb[62].mxu1  ;;  %v2776_v58 = vpop.f32.mrb[63].mxu0 }
 0x245   : > { %v2777_v59 = vadd.f32 %v2776_v58, %v2775_v9  ;;  %v2840_v61 = vpop.f32.mrb[63].mxu1  ;;  %v2235_v25 = vpop.permute.xlu1 %2234 }
 0x246   : > { %v2841_v62 = vadd.f32 %v2840_v61, %v2839_v57  ;;  %v1908_v63 = vadd.f32 %v2838_v56, %v2774_v7 }
 0x248   : > { %v1911_v0 = vadd.f32 %v2841_v62, %v2777_v59 }
 0x249   : > { %v2871_v4 = vpop.f32.mrb[64].mxu0  ;;  %v2245_v49 = vpop.permute.xlu1 %2244 }
 0x24a   : > { %v2018_v5 = vmul.f32 %v2871_v4, %v3626_v43  ;;  %v1953_v10 = vpop.f32.mrb[65].mxu0 }
 0x24b   : > { %v2016_v11 = vmul.f32 %v1953_v10, %v3622_v29  ;;  %v2872_v12 = vpop.f32.mrb[66].mxu0 }
 0x24c   : > { %v2019_v13 = vmul.f32 %v2872_v12, %v3628_v44  ;;  %v1956_v14 = vpop.f32.mrb[67].mxu0 }
 0x24d   : > { %v2017_v15 = vmul.f32 %v1956_v14, %v3624_v30  ;;  %v2255_v51 = vpop.permute.xlu1 %2254 }
 0x24e   : > { %v2033_v16 = vpack.c.bf16 %v2019_v13, %v2018_v5 }
 0x24f   : > { %v2032_v17 = vpack.c.bf16 %v2017_v15, %v2016_v11 }
 0x251   : > { %v2875_v18 = vpop.f32.mrb[68].mxu0  ;;  %2901 = vmatprep.mubr.bf16.mxu1 %v2032_v17 }
 0x252   : > { %v2022_v19 = vmul.f32 %v2875_v18, %v3634_v1  ;;  %v1969_v22 = vpop.f32.mrb[69].mxu0  ;;  %2902 = vmatmul.mubr.bf16.vlgmr.msra.gmra.mrb[64].mxu1 %v2033_v16 }
 0x253   : > { %v2020_v23 = vmul.f32 %v1969_v22, %v3630_v60  ;;  %v2876_v43 = vpop.f32.mrb[70].mxu0 }
 0x254   : > { %v2023_v24 = vmul.f32 %v2876_v43, %v3636_v3  ;;  %v1972_v29 = vpop.f32.mrb[71].mxu0 }
 0x255   : > { %v2021_v26 = vmul.f32 %v1972_v29, %v3632_v2 }
 0x256   : > { %v2035_v44 = vpack.c.bf16 %v2023_v24, %v2022_v19 }
 0x257   : > { %v2034_v27 = vpack.c.bf16 %v2021_v26, %v2020_v23 }
 0x259   : > { %v2879_v28 = vpop.f32.mrb[72].mxu0  ;;  %2905 = vmatprep.mubr.bf16.mxu1 %v2034_v27 }
 0x25a   : > { %v2026_v30 = vmul.f32 %v2879_v28, %v1892_v37  ;;  %v1985_v31 = vpop.f32.mrb[73].mxu0  ;;  %2906 = vmatmul.mubr.bf16.gmra.mrb[68].mxu1 %v2035_v44 }
 0x25b   : > { %v2024_v32 = vmul.f32 %v1985_v31, %v3638_v20  ;;  %v2880_v1 = vpop.f32.mrb[74].mxu0 }
 0x25c   : > { %v2027_v33 = vmul.f32 %v2880_v1, %v1895_v38  ;;  %v1988_v34 = vpop.f32.mrb[75].mxu0  ;;  %v2220_v38 = vpop.permute.xlu0 %2219 }
 0x25d   : > { %v2025_v60 = vmul.f32 %v1988_v34, %v3640_v21 }
 0x25e   : > { %v2037_v35 = vpack.c.bf16 %v2027_v33, %v2026_v30 }
 0x25f   : > { %v2036_v36 = vpack.c.bf16 %v2025_v60, %v2024_v32 }
 0x260   : > { %v2225_v21 = vpop.permute.xlu0 %2224 }
 0x261   : > { %v2883_v3 = vpop.f32.mrb[76].mxu0  ;;  %2909 = vmatprep.mubr.bf16.mxu1 %v2036_v36 }
 0x262   : > { %v2030_v39 = vmul.f32 %v2883_v3, %v1908_v63  ;;  %v2001_v2 = vpop.f32.mrb[77].mxu0  ;;  %2910 = vmatmul.mubr.bf16.gmra.mrb[72].mxu1 %v2037_v35  ;;  %v2265_v63 = vpop.permute.xlu1 %2264 }
 0x263   : > { %v2028_v40 = vmul.f32 %v2001_v2, %v1900_v53  ;;  %v2884_v41 = vpop.f32.mrb[78].mxu0  ;;  %v3655_v53 = vld [vmem:[%s3706_s7] ss:$0 sm:$0xff] }
 0x264   : > { %v2031_v42 = vmul.f32 %v2884_v41, %v1911_v0  ;;  %v2004_v37 = vpop.f32.mrb[79].mxu0  ;;  %v2240_v48 = vpop.permute.xlu0 %2239 }
 0x265   : > { %v2029_v45 = vmul.f32 %v2004_v37, %v1903_v54 }
 0x266   : > { %v2039_v46 = vpack.c.bf16 %v2031_v42, %v2030_v39  ;;  %v2275_v19 = vpop.permute.xlu1 %2274 }
 0x267   : > { %v2038_v20 = vpack.c.bf16 %v2029_v45, %v2028_v40 }
 0x268   : > { %v2250_v50 = vpop.permute.xlu0 %2249 }
 0x269   : > { %2913 = vmatprep.mubr.bf16.mxu1 %v2038_v20 }
 0x26a   : > { %2914 = vmatmul.mubr.bf16.gmra.mrb[76].mxu1 %v2039_v46  ;;  %v2285_v31 = vpop.permute.xlu1 %2284 }
 0x26c   : > { %v2260_v61 = vpop.permute.xlu0 %2259 }
 0x26e   : > { %v2295_v39 = vpop.permute.xlu1 %2294 }
 0x270   : > { %v2270_v15 = vpop.permute.xlu0 %2269 }
 0x274   : > { %v2280_v29 = vpop.permute.xlu0 %2279 }
 0x278   : > { %v2290_v60 = vpop.permute.xlu0 %2289 }
 0x325   : > { %v2903_v52 = vpop.f32.mrb[64].mxu1 }
 0x326   : > { %v2299_v55 = vmul.f32 %v2903_v52, %v2230_v47  ;;  %v2138_v54 = vpop.f32.mrb[65].mxu1 }
 0x327   : > { %v2297_v6 = vmul.f32 %v2220_v38, %v2138_v54  ;;  %v2904_v7 = vpop.f32.mrb[66].mxu1 }
 0x328   : > { %v2322_v8 = vadd.f32 %v3655_v53, %v2299_v55  ;;  %v2300_v9 = vmul.f32 %v2904_v7, %v2235_v25  ;;  %v2141_v56 = vpop.f32.mrb[67].mxu1 }
 0x329   : > { %v2320_v57 = vadd.f32 %v3655_v53, %v2297_v6  ;;  %v2298_v58 = vmul.f32 %v2225_v21, %v2141_v56 }
 0x32a   : > { %2338 = vst [vmem:[%s3662_s14 + $0x10] sm:$0xff] %v2322_v8  ;;  %v2323_v59 = vadd.f32 %v3655_v53, %v2300_v9 }
 0x32b   : > { %2336 = vst [vmem:[%s3662_s14] sm:$0xff] %v2320_v57  ;;  %v2321_v62 = vadd.f32 %v3655_v53, %v2298_v58 }
 0x32c   : > { %2339 = vst [vmem:[%s3662_s14 + $0x18] sm:$0xff] %v2323_v59 }
 0x32d   : > { %2337 = vst [vmem:[%s3662_s14 + $0x8] sm:$0xff] %v2321_v62  ;;  %v2907_v0 = vpop.f32.mrb[68].mxu1 }
 0x32e   : > { %v2303_v4 = vmul.f32 %v2907_v0, %v2250_v50  ;;  %v2154_v5 = vpop.f32.mrb[69].mxu1 }
 0x32f   : > { %v2301_v10 = vmul.f32 %v2240_v48, %v2154_v5  ;;  %v2908_v11 = vpop.f32.mrb[70].mxu1 }
 0x330   : > { %v2326_v12 = vadd.f32 %v3655_v53, %v2303_v4  ;;  %v2304_v13 = vmul.f32 %v2908_v11, %v2255_v51  ;;  %v2157_v14 = vpop.f32.mrb[71].mxu1 }
 0x331   : > { %v2324_v16 = vadd.f32 %v3655_v53, %v2301_v10  ;;  %v2302_v17 = vmul.f32 %v2245_v49, %v2157_v14 }
 0x332   : > { %2342 = vst [vmem:[%s3662_s14 + $0x30] sm:$0xff] %v2326_v12  ;;  %v2327_v18 = vadd.f32 %v3655_v53, %v2304_v13 }
 0x333   : > { %2340 = vst [vmem:[%s3662_s14 + $0x20] sm:$0xff] %v2324_v16  ;;  %v2325_v22 = vadd.f32 %v3655_v53, %v2302_v17 }
 0x334   : > { %2343 = vst [vmem:[%s3662_s14 + $0x38] sm:$0xff] %v2327_v18 }
 0x335   : > { %2341 = vst [vmem:[%s3662_s14 + $0x28] sm:$0xff] %v2325_v22  ;;  %v2911_v23 = vpop.f32.mrb[72].mxu1 }
 0x336   : > { %v2307_v43 = vmul.f32 %v2911_v23, %v2270_v15  ;;  %v2170_v24 = vpop.f32.mrb[73].mxu1 }
 0x337   : > { %v2305_v26 = vmul.f32 %v2260_v61, %v2170_v24  ;;  %v2912_v44 = vpop.f32.mrb[74].mxu1 }
 0x338   : > { %v2330_v27 = vadd.f32 %v3655_v53, %v2307_v43  ;;  %v2308_v28 = vmul.f32 %v2912_v44, %v2275_v19  ;;  %v2173_v30 = vpop.f32.mrb[75].mxu1 }
 0x339   : > { %v2328_v32 = vadd.f32 %v3655_v53, %v2305_v26  ;;  %v2306_v1 = vmul.f32 %v2265_v63, %v2173_v30 }
 0x33a   : > { %2346 = vst [vmem:[%s3662_s14 + $0x50] sm:$0xff] %v2330_v27  ;;  %v2331_v33 = vadd.f32 %v3655_v53, %v2308_v28 }
 0x33b   : > { %2344 = vst [vmem:[%s3662_s14 + $0x40] sm:$0xff] %v2328_v32  ;;  %v2329_v34 = vadd.f32 %v3655_v53, %v2306_v1 }
 0x33c   : > { %2347 = vst [vmem:[%s3662_s14 + $0x58] sm:$0xff] %v2331_v33 }
 0x33d   : > { %2345 = vst [vmem:[%s3662_s14 + $0x48] sm:$0xff] %v2329_v34  ;;  %v2915_v35 = vpop.f32.mrb[76].mxu1 }
 0x33e   : > { %v2311_v36 = vmul.f32 %v2915_v35, %v2290_v60  ;;  %v2186_v3 = vpop.f32.mrb[77].mxu1 }
 0x33f   : > { %v2309_v2 = vmul.f32 %v2280_v29, %v2186_v3  ;;  %v2916_v40 = vpop.f32.mrb[78].mxu1 }
 0x340   : > { %v2334_v41 = vadd.f32 %v3655_v53, %v2311_v36  ;;  %v2312_v42 = vmul.f32 %v2916_v40, %v2295_v39  ;;  %v2189_v37 = vpop.f32.mrb[79].mxu1 }
 0x341   : > { %v2332_v45 = vadd.f32 %v3655_v53, %v2309_v2  ;;  %v2310_v46 = vmul.f32 %v2285_v31, %v2189_v37 }
 0x342   : > { %2350 = vst [vmem:[%s3662_s14 + $0x70] sm:$0xff] %v2334_v41  ;;  %v2335_v20 = vadd.f32 %v3655_v53, %v2312_v42 }
 0x343   : > { %2348 = vst [vmem:[%s3662_s14 + $0x60] sm:$0xff] %v2332_v45  ;;  %v2333_v38 = vadd.f32 %v3655_v53, %v2310_v46 }
 0x344   : > { %2351 = vst [vmem:[%s3662_s14 + $0x78] sm:$0xff] %v2335_v20 }
 0x345   : > { %2349 = vst [vmem:[%s3662_s14 + $0x68] sm:$0xff] %v2333_v38 }
 0x346 PF: > { %s18_s27 = sadd.s32 1, %s3160_s27  }
 0x347   : > { %p15_p4 = scmp.ge.s32.totalorder %s18_s27, 6  }
 0x349   :  { %17 = sbr.rel (!%p15_p4) target bundleno = 1 (0x1), region = 88 }

// kernel: mesh_seg_forward.6
= control target key start
LH: loop header
LB: loop body
LE: loop exit
PB: predicated region body
PF: predicated region fallthrough
CT: control target
= control target key end

     0   :  { %vm94_vm0 = vcmask 261120   ;;  %vm3080_vm1 = vcmask 1041408   ;;  %vm1510_vm2 = vcmask 31744   ;;  %vm2599_vm3 = vcmask 27648   ;;  %s8258_s3 = inlined_call_operand.vmem [shape: bf16[32,4], index: 3, kind: input, shape index: {}]   ;;  %s8259_s0 = inlined_call_operand.vmem [shape: f32[512,32], index: 0, kind: input, shape index: {}]   ;;  %s8260_s1 = inlined_call_operand.vmem [shape: f32[1,32], index: 1, kind: input, shape index: {}]   ;;  %s8261_s2 = inlined_call_operand.vmem [shape: f32[1,32], index: 2, kind: input, shape index: {}]   ;;  %s8262_s4 = inlined_call_operand.vmem [shape: bf16[32,128], index: 4, kind: input, shape index: {}]   ;;  %s8263_s6 = inlined_call_operand.vmem [shape: bf16[4,128], index: 6, kind: input, shape index: {}]   ;;  %s8264_s5 = inlined_call_operand.vmem [shape: f32[1,4], index: 5, kind: input, shape index: {}]   ;;  %s8265_s8 = inlined_call_operand.vmem [shape: bf16[512,4], index: 8, kind: output, shape index: {1}]   ;;  %s8266_s7 = inlined_call_operand.vmem [shape: bf16[512,4], index: 7, kind: output, shape index: {0}]   ;;  %s8267_s9 = inlined_call_operand.vmem [shape: bf16[512,128], index: 9, kind: output, shape index: {2}]  }
   0x1   :  { %v4755_v0 = vld [vmem:[%s8258_s3] sm:$0xff]   ;;  %v4756_v1 = vld [vmem:[%s8258_s3 + $0x8] sm:$0xff]   ;;  %v5087_v4 = vld [vmem:[%s8259_s0 + $0x10] sm:$0xff] }
   0x2   :  { %4548 = vmatprep.subr.bf16.mxu0 %v4755_v0  ;;  %v5077_v2 = vld [vmem:[%s8259_s0] sm:$0xff]  ;;  %v5082_v3 = vld [vmem:[%s8259_s0 + $0x8] sm:$0xff]  ;;  %4750 = vmatprep.subr.bf16.mxu1 %v4755_v0  ;;  %v5092_v5 = vld [vmem:[%s8259_s0 + $0x18] sm:$0xff]  ;;  %v98_v8 = vsel %vm94_vm0, %v5087_v4, 0.0 }
   0x3   :  { %4549 = vmatpush3.bf16.msra.mxu0 %v4755_v0  ;;  %v95_v6 = vsel %vm94_vm0, %v5077_v2, 0.0  ;;  %v96_v7 = vsel %vm94_vm0, %v5082_v3, 0.0  ;;  %4752 = vmatpush3.bf16.msra.mxu1 %v4755_v0  ;;  %v5103_v9 = vld [vmem:[%s8259_s0 + $0x20] sm:$0xff]  ;;  %v100_v11 = vsel %vm94_vm0, %v5092_v5, 0.0  ;;  %v5110_v12 = vld [vmem:[%s8259_s0 + $0x28] sm:$0xff]  ;;  %v5117_v15 = vld [vmem:[%s8259_s0 + $0x30] sm:$0xff] }
   0x4   :  { %4550 = vmatprep.subr.bf16.mxu0 %v4756_v1  ;;  %v97_v10 = vadd.f32 %v96_v7, %v95_v6  ;;  %4751 = vmatprep.subr.bf16.mxu1 %v4756_v1  ;;  %v102_v14 = vsel %vm94_vm0, %v5103_v9, 0.0  ;;  %v104_v17 = vsel %vm94_vm0, %v5110_v12, 0.0  ;;  %v5124_v18 = vld [vmem:[%s8259_s0 + $0x38] sm:$0xff]  ;;  %v106_v20 = vsel %vm94_vm0, %v5117_v15, 0.0  ;;  %v5131_v21 = vld [vmem:[%s8259_s0 + $0x40] sm:$0xff]  ;;  %v5138_v24 = vld [vmem:[%s8259_s0 + $0x48] sm:$0xff] }
   0x5   :  { %v108_v23 = vsel %vm94_vm0, %v5124_v18, 0.0  ;;  %v110_v26 = vsel %vm94_vm0, %v5131_v21, 0.0  ;;  %v5145_v27 = vld [vmem:[%s8259_s0 + $0x50] sm:$0xff]  ;;  %v112_v29 = vsel %vm94_vm0, %v5138_v24, 0.0  ;;  %v5152_v30 = vld [vmem:[%s8259_s0 + $0x58] sm:$0xff]  ;;  %v5159_v33 = vld [vmem:[%s8259_s0 + $0x60] sm:$0xff] }
   0x6   :  { %v99_v13 = vadd.f32 %v98_v8, %v97_v10  ;;  %v114_v32 = vsel %vm94_vm0, %v5145_v27, 0.0  ;;  %v116_v35 = vsel %vm94_vm0, %v5152_v30, 0.0  ;;  %v5166_v36 = vld [vmem:[%s8259_s0 + $0x68] sm:$0xff]  ;;  %v118_v38 = vsel %vm94_vm0, %v5159_v33, 0.0  ;;  %v5173_v39 = vld [vmem:[%s8259_s0 + $0x70] sm:$0xff]  ;;  %v5180_v42 = vld [vmem:[%s8259_s0 + $0x78] sm:$0xff] }
   0x7   :  { %4551 = vmatpush3.bf16.msra.mxu0 %v4756_v1  ;;  %4753 = vmatpush3.bf16.msra.mxu1 %v4756_v1  ;;  %v120_v41 = vsel %vm94_vm0, %v5166_v36, 0.0  ;;  %v122_v44 = vsel %vm94_vm0, %v5173_v39, 0.0  ;;  %v5187_v45 = vld [vmem:[%s8259_s0 + $0x80] sm:$0xff]  ;;  %v124_v47 = vsel %vm94_vm0, %v5180_v42, 0.0  ;;  %v5194_v48 = vld [vmem:[%s8259_s0 + $0x88] sm:$0xff]  ;;  %v5201_v51 = vld [vmem:[%s8259_s0 + $0x90] sm:$0xff] }
   0x8   :  { %v101_v16 = vadd.f32 %v100_v11, %v99_v13  ;;  %v126_v50 = vsel %vm94_vm0, %v5187_v45, 0.0  ;;  %v128_v53 = vsel %vm94_vm0, %v5194_v48, 0.0  ;;  %v5208_v54 = vld [vmem:[%s8259_s0 + $0x98] sm:$0xff]  ;;  %v130_v56 = vsel %vm94_vm0, %v5201_v51, 0.0  ;;  %v5215_v57 = vld [vmem:[%s8259_s0 + $0xa0] sm:$0xff]  ;;  %v5222_v60 = vld [vmem:[%s8259_s0 + $0xa8] sm:$0xff] }
   0x9   :  { %v132_v59 = vsel %vm94_vm0, %v5208_v54, 0.0  ;;  %v134_v62 = vsel %vm94_vm0, %v5215_v57, 0.0  ;;  %v5229_v63 = vld [vmem:[%s8259_s0 + $0xb0] sm:$0xff]  ;;  %v136_v1 = vsel %vm94_vm0, %v5222_v60, 0.0  ;;  %v5236_v6 = vld [vmem:[%s8259_s0 + $0xb8] sm:$0xff]  ;;  %v5243_v10 = vld [vmem:[%s8259_s0 + $0xc0] sm:$0xff] }
   0xa   :  { %v103_v19 = vadd.f32 %v102_v14, %v101_v16  ;;  %v138_v8 = vsel %vm94_vm0, %v5229_v63, 0.0  ;;  %v140_v13 = vsel %vm94_vm0, %v5236_v6, 0.0  ;;  %v5250_v14 = vld [vmem:[%s8259_s0 + $0xc8] sm:$0xff] }
   0xc   :  { %v105_v22 = vadd.f32 %v104_v17, %v103_v19  ;;  %v142_v17 = vsel %vm94_vm0, %v5243_v10, 0.0  ;;  %v5257_v19 = vld [vmem:[%s8259_s0 + $0xd0] sm:$0xff] }
   0xe   :  { %v107_v25 = vadd.f32 %v106_v20, %v105_v22  ;;  %v144_v22 = vsel %vm94_vm0, %v5250_v14, 0.0 }
  0x10   :  { %v109_v28 = vadd.f32 %v108_v23, %v107_v25  ;;  %v5264_v23 = vld [vmem:[%s8259_s0 + $0xd8] sm:$0xff] }
  0x12   :  { %v111_v31 = vadd.f32 %v110_v26, %v109_v28  ;;  %v146_v26 = vsel %vm94_vm0, %v5257_v19, 0.0  ;;  %v5271_v28 = vld [vmem:[%s8259_s0 + $0xe0] sm:$0xff] }
  0x14   :  { %v113_v34 = vadd.f32 %v112_v29, %v111_v31  ;;  %v148_v31 = vsel %vm94_vm0, %v5264_v23, 0.0 }
  0x16   :  { %v115_v37 = vadd.f32 %v114_v32, %v113_v34  ;;  %v5278_v32 = vld [vmem:[%s8259_s0 + $0xe8] sm:$0xff] }
  0x18   :  { %v117_v40 = vadd.f32 %v116_v35, %v115_v37  ;;  %v150_v35 = vsel %vm94_vm0, %v5271_v28, 0.0  ;;  %v5285_v37 = vld [vmem:[%s8259_s0 + $0xf0] sm:$0xff] }
  0x1a   :  { %v119_v43 = vadd.f32 %v118_v38, %v117_v40  ;;  %v152_v40 = vsel %vm94_vm0, %v5278_v32, 0.0 }
  0x1c   :  { %v121_v46 = vadd.f32 %v120_v41, %v119_v43  ;;  %v5292_v41 = vld [vmem:[%s8259_s0 + $0xf8] sm:$0xff] }
  0x1e   :  { %v123_v49 = vadd.f32 %v122_v44, %v121_v46  ;;  %v154_v44 = vsel %vm94_vm0, %v5285_v37, 0.0  ;;  %v5299_v46 = vld [vmem:[%s8259_s0 + $0x100] sm:$0xff] }
  0x20   :  { %v125_v52 = vadd.f32 %v124_v47, %v123_v49  ;;  %v156_v49 = vsel %vm94_vm0, %v5292_v41, 0.0 }
  0x22   :  { %v127_v55 = vadd.f32 %v126_v50, %v125_v52  ;;  %v5306_v50 = vld [vmem:[%s8259_s0 + $0x108] sm:$0xff] }
  0x24   :  { %v129_v58 = vadd.f32 %v128_v53, %v127_v55  ;;  %v158_v53 = vsel %vm94_vm0, %v5299_v46, 0.0  ;;  %v5313_v55 = vld [vmem:[%s8259_s0 + $0x110] sm:$0xff] }
  0x26   :  { %v131_v61 = vadd.f32 %v130_v56, %v129_v58  ;;  %v160_v58 = vsel %vm94_vm0, %v5306_v50, 0.0 }
  0x28   :  { %v133_v0 = vadd.f32 %v132_v59, %v131_v61  ;;  %v5320_v59 = vld [vmem:[%s8259_s0 + $0x118] sm:$0xff] }
  0x2a   :  { %v135_v7 = vadd.f32 %v134_v62, %v133_v0  ;;  %v162_v62 = vsel %vm94_vm0, %v5313_v55, 0.0  ;;  %v5327_v0 = vld [vmem:[%s8259_s0 + $0x120] sm:$0xff] }
  0x2c   :  { %v137_v11 = vadd.f32 %v136_v1, %v135_v7  ;;  %v164_v7 = vsel %vm94_vm0, %v5320_v59, 0.0 }
  0x2e   :  { %v139_v16 = vadd.f32 %v138_v8, %v137_v11  ;;  %v5334_v8 = vld [vmem:[%s8259_s0 + $0x128] sm:$0xff] }
  0x30   :  { %v141_v20 = vadd.f32 %v140_v13, %v139_v16  ;;  %v166_v13 = vsel %vm94_vm0, %v5327_v0, 0.0  ;;  %v5341_v16 = vld [vmem:[%s8259_s0 + $0x130] sm:$0xff] }
  0x32   :  { %v143_v25 = vadd.f32 %v142_v17, %v141_v20  ;;  %v168_v20 = vsel %vm94_vm0, %v5334_v8, 0.0 }
  0x34   :  { %v145_v29 = vadd.f32 %v144_v22, %v143_v25  ;;  %v5348_v22 = vld [vmem:[%s8259_s0 + $0x138] sm:$0xff] }
  0x36   :  { %v147_v34 = vadd.f32 %v146_v26, %v145_v29  ;;  %v170_v26 = vsel %vm94_vm0, %v5341_v16, 0.0  ;;  %v5355_v29 = vld [vmem:[%s8259_s0 + $0x140] sm:$0xff] }
  0x38   :  { %v149_v38 = vadd.f32 %v148_v31, %v147_v34  ;;  %v172_v34 = vsel %vm94_vm0, %v5348_v22, 0.0 }
  0x3a   :  { %v151_v43 = vadd.f32 %v150_v35, %v149_v38  ;;  %v5362_v35 = vld [vmem:[%s8259_s0 + $0x148] sm:$0xff] }
  0x3c   :  { %v153_v47 = vadd.f32 %v152_v40, %v151_v43  ;;  %v174_v40 = vsel %vm94_vm0, %v5355_v29, 0.0  ;;  %v5369_v43 = vld [vmem:[%s8259_s0 + $0x150] sm:$0xff] }
  0x3e   :  { %v155_v52 = vadd.f32 %v154_v44, %v153_v47  ;;  %v176_v47 = vsel %vm94_vm0, %v5362_v35, 0.0 }
  0x40   :  { %v157_v56 = vadd.f32 %v156_v49, %v155_v52  ;;  %v5376_v49 = vld [vmem:[%s8259_s0 + $0x158] sm:$0xff] }
  0x42   :  { %v159_v61 = vadd.f32 %v158_v53, %v157_v56  ;;  %v178_v53 = vsel %vm94_vm0, %v5369_v43, 0.0  ;;  %v5383_v56 = vld [vmem:[%s8259_s0 + $0x160] sm:$0xff] }
  0x44   :  { %v161_v1 = vadd.f32 %v160_v58, %v159_v61  ;;  %v180_v61 = vsel %vm94_vm0, %v5376_v49, 0.0 }
  0x46   :  { %v163_v11 = vadd.f32 %v162_v62, %v161_v1  ;;  %v5390_v62 = vld [vmem:[%s8259_s0 + $0x168] sm:$0xff] }
  0x48   :  { %v165_v17 = vadd.f32 %v164_v7, %v163_v11  ;;  %v182_v7 = vsel %vm94_vm0, %v5383_v56, 0.0  ;;  %v5397_v11 = vld [vmem:[%s8259_s0 + $0x170] sm:$0xff] }
  0x4a   :  { %v167_v25 = vadd.f32 %v166_v13, %v165_v17  ;;  %v184_v17 = vsel %vm94_vm0, %v5390_v62, 0.0 }
  0x4c   :  { %v169_v31 = vadd.f32 %v168_v20, %v167_v25  ;;  %v5404_v20 = vld [vmem:[%s8259_s0 + $0x178] sm:$0xff] }
  0x4e   :  { %v171_v38 = vadd.f32 %v170_v26, %v169_v31  ;;  %v186_v26 = vsel %vm94_vm0, %v5397_v11, 0.0  ;;  %v5411_v31 = vld [vmem:[%s8259_s0 + $0x180] sm:$0xff] }
  0x50   :  { %v173_v44 = vadd.f32 %v172_v34, %v171_v38  ;;  %v188_v38 = vsel %vm94_vm0, %v5404_v20, 0.0 }
  0x52   :  { %v175_v52 = vadd.f32 %v174_v40, %v173_v44  ;;  %v5418_v40 = vld [vmem:[%s8259_s0 + $0x188] sm:$0xff] }
  0x53   :  { %8429 = vst [vmem:[#allocation2_spill] sm:$0xff] %v5418_v40 }
  0x54   :  { %v177_v58 = vadd.f32 %v176_v47, %v175_v52  ;;  %v190_v47 = vsel %vm94_vm0, %v5411_v31, 0.0  ;;  %v5425_v52 = vld [vmem:[%s8259_s0 + $0x190] sm:$0xff] }
  0x55   :  { %8430 = vst [vmem:[#allocation3_spill] sm:$0xff] %v5425_v52 }
  0x56   :  { %v179_v1 = vadd.f32 %v178_v53, %v177_v58  ;;  %v192_v58 = vsel %vm94_vm0, %v5418_v40, 0.0 }
  0x58   :  { %v181_v13 = vadd.f32 %v180_v61, %v179_v1  ;;  %v5432_v61 = vld [vmem:[%s8259_s0 + $0x198] sm:$0xff] }
  0x59   :  { %8431 = vst [vmem:[#allocation4_spill] sm:$0xff] %v5432_v61 }
  0x5a   :  { %v183_v25 = vadd.f32 %v182_v7, %v181_v13  ;;  %v194_v7 = vsel %vm94_vm0, %v5425_v52, 0.0  ;;  %v5439_v13 = vld [vmem:[%s8259_s0 + $0x1a0] sm:$0xff] }
  0x5b   :  { %8432 = vst [vmem:[#allocation5_spill] sm:$0xff] %v5439_v13 }
  0x5c   :  { %v185_v34 = vadd.f32 %v184_v17, %v183_v25  ;;  %v196_v25 = vsel %vm94_vm0, %v5432_v61, 0.0 }
  0x5e   :  { %v187_v44 = vadd.f32 %v186_v26, %v185_v34  ;;  %v5446_v26 = vld [vmem:[%s8259_s0 + $0x1a8] sm:$0xff] }
  0x5f   :  { %8433 = vst [vmem:[#allocation6_spill] sm:$0xff] %v5446_v26 }
  0x60   :  { %v189_v53 = vadd.f32 %v188_v38, %v187_v44  ;;  %v198_v38 = vsel %vm94_vm0, %v5439_v13, 0.0  ;;  %v5453_v44 = vld [vmem:[%s8259_s0 + $0x1b0] sm:$0xff] }
  0x61   :  { %8434 = vst [vmem:[#allocation7_spill] sm:$0xff] %v5453_v44 }
  0x62   :  { %v191_v1 = vadd.f32 %v190_v47, %v189_v53  ;;  %v200_v53 = vsel %vm94_vm0, %v5446_v26, 0.0 }
  0x64   :  { %v193_v17 = vadd.f32 %v192_v58, %v191_v1  ;;  %v5460_v58 = vld [vmem:[%s8259_s0 + $0x1b8] sm:$0xff] }
  0x65   :  { %8435 = vst [vmem:[#allocation8_spill] sm:$0xff] %v5460_v58 }
  0x66   :  { %v195_v34 = vadd.f32 %v194_v7, %v193_v17  ;;  %v202_v7 = vsel %vm94_vm0, %v5453_v44, 0.0  ;;  %v5467_v17 = vld [vmem:[%s8259_s0 + $0x1c0] sm:$0xff] }
  0x67   :  { %8436 = vst [vmem:[#allocation9_spill] sm:$0xff] %v5467_v17 }
  0x68   :  { %v197_v47 = vadd.f32 %v196_v25, %v195_v34  ;;  %v204_v25 = vsel %vm94_vm0, %v5460_v58, 0.0  ;;  %v5474_v34 = vld [vmem:[%s8259_s0 + $0x1c8] sm:$0xff] }
  0x69   :  { %8437 = vst [vmem:[#allocation10_spill] sm:$0xff] %v5474_v34 }
  0x6a   :  { %v199_v1 = vadd.f32 %v198_v38, %v197_v47  ;;  %v206_v38 = vsel %vm94_vm0, %v5467_v17, 0.0  ;;  %v5481_v47 = vld [vmem:[%s8259_s0 + $0x1d0] sm:$0xff] }
  0x6b   :  { %8438 = vst [vmem:[#allocation11_spill] sm:$0xff] %v5481_v47 }
  0x6c   :  { %v201_v13 = vadd.f32 %v200_v53, %v199_v1  ;;  %v208_v53 = vsel %vm94_vm0, %v5474_v34, 0.0  ;;  %v5488_v1 = vld [vmem:[%s8259_s0 + $0x1d8] sm:$0xff] }
  0x6d   :  { %8439 = vst [vmem:[#allocation12_spill] sm:$0xff] %v5488_v1  ;;  %v212_v17 = vsel %vm94_vm0, %v5488_v1, 0.0 }
  0x6e   :  { %v203_v26 = vadd.f32 %v202_v7, %v201_v13  ;;  %v210_v13 = vsel %vm94_vm0, %v5481_v47, 0.0 }
  0x70   :  { %v205_v44 = vadd.f32 %v204_v25, %v203_v26  ;;  %v5497_v26 = vld [vmem:[%s8259_s0 + $0x1e0] sm:$0xff] }
  0x71   :  { %8440 = vst [vmem:[#allocation13_spill] sm:$0xff] %v5497_v26  ;;  %v214_v61 = vsel %vm94_vm0, %v5497_v26, 0.0 }
  0x72   :  { %v207_v58 = vadd.f32 %v206_v38, %v205_v44  ;;  %v5504_v44 = vld [vmem:[%s8259_s0 + $0x1e8] sm:$0xff] }
  0x73   :  { %8441 = vst [vmem:[#allocation14_spill] sm:$0xff] %v5504_v44 }
  0x74   :  { %v209_v7 = vadd.f32 %v208_v53, %v207_v58  ;;  %v216_v58 = vsel %vm94_vm0, %v5504_v44, 0.0  ;;  %v5511_v53 = vld [vmem:[%s8259_s0 + $0x1f0] sm:$0xff] }
  0x75   :  { %8442 = vst [vmem:[#allocation15_spill] sm:$0xff] %v5511_v53 }
  0x76   :  { %v211_v25 = vadd.f32 %v210_v13, %v209_v7  ;;  %v5518_v13 = vld [vmem:[%s8259_s0 + $0x1f8] sm:$0xff] }
  0x78   :  { %v213_v34 = vadd.f32 %v212_v17, %v211_v25  ;;  %v218_v17 = vsel %vm94_vm0, %v5511_v53, 0.0 }
  0x7a   :  { %v215_v38 = vadd.f32 %v214_v61, %v213_v34  ;;  %v220_v61 = vsel %vm94_vm0, %v5518_v13, 0.0 }
  0x7c   :  { %v217_v1 = vadd.f32 %v216_v58, %v215_v38 }
  0x7e   :  { %v219_v7 = vadd.f32 %v218_v17, %v217_v1 }
  0x80   :  { %v221_v34 = vadd.f32 %v220_v61, %v219_v7 }
  0x82   :  { %v222_v25 = vrot.slane %v221_v34, 4 }
  0x84   :  { %v223_v44 = vadd.f32 %v222_v25, %v221_v34 }
  0x86   :  { %v224_v26 = vrot.slane %v223_v44, 2 }
  0x88   :  { %v225_v47 = vadd.f32 %v224_v26, %v223_v44 }
  0x8a   :  { %v226_v52 = vrot.slane %v225_v47, 1 }
  0x8c   :  { %v227_v40 = vadd.f32 %v226_v52, %v225_v47 }
  0x8e   :  { %v5522_v38 = vmul.f32 0.001953125, %v227_v40 }
  0x90   :  { %v5526_v58 = vsub.f32 %v5077_v2, %v5522_v38  ;;  %v5530_v53 = vsub.f32 %v5082_v3, %v5522_v38  ;;  %v5534_v1 = vsub.f32 %v5087_v4, %v5522_v38  ;;  %v5538_v17 = vsub.f32 %v5092_v5, %v5522_v38 }
  0x91   :  { %v5542_v40 = vsub.f32 %v5103_v9, %v5522_v38  ;;  %v5552_v4 = vsub.f32 %v5110_v12, %v5522_v38  ;;  %v5558_v9 = vsub.f32 %v5117_v15, %v5522_v38  ;;  %v5567_v12 = vsub.f32 %v5124_v18, %v5522_v38 }
  0x92   :  { %v294_v2 = vmul.f32 %v5526_v58, %v5526_v58  ;;  %v295_v52 = vmul.f32 %v5530_v53, %v5530_v53  ;;  %v296_v3 = vmul.f32 %v5534_v1, %v5534_v1  ;;  %v297_v5 = vmul.f32 %v5538_v17, %v5538_v17 }
  0x93   :  { %8443 = vst [vmem:[#allocation16_spill] sm:$0xff] %v5542_v40  ;;  %v298_v47 = vmul.f32 %v5542_v40, %v5542_v40  ;;  %v299_v34 = vmul.f32 %v5552_v4, %v5552_v4  ;;  %v5574_v40 = vsub.f32 %v5131_v21, %v5522_v38  ;;  %v5581_v18 = vsub.f32 %v5138_v24, %v5522_v38 }
  0x94   :  { %v358_v26 = vsel %vm94_vm0, %v294_v2, 0.0  ;;  %v359_v44 = vsel %vm94_vm0, %v295_v52, 0.0  ;;  %v361_v7 = vsel %vm94_vm0, %v296_v3, 0.0  ;;  %v363_v15 = vsel %vm94_vm0, %v297_v5, 0.0 }
  0x95   :  { %v360_v61 = vadd.f32 %v359_v44, %v358_v26  ;;  %v300_v2 = vmul.f32 %v5558_v9, %v5558_v9  ;;  %v365_v52 = vsel %vm94_vm0, %v298_v47, 0.0  ;;  %v301_v26 = vmul.f32 %v5567_v12, %v5567_v12 }
  0x96   :  { %v367_v5 = vsel %vm94_vm0, %v299_v34, 0.0  ;;  %v5588_v21 = vsub.f32 %v5145_v27, %v5522_v38  ;;  %v5595_v24 = vsub.f32 %v5152_v30, %v5522_v38  ;;  %v5602_v27 = vsub.f32 %v5159_v33, %v5522_v38 }
  0x97   :  { %v362_v25 = vadd.f32 %v361_v7, %v360_v61  ;;  %v302_v7 = vmul.f32 %v5574_v40, %v5574_v40  ;;  %v369_v47 = vsel %vm94_vm0, %v300_v2, 0.0  ;;  %v371_v34 = vsel %vm94_vm0, %v301_v26, 0.0 }
  0x98   :  { %v5609_v30 = vsub.f32 %v5166_v36, %v5522_v38  ;;  %v5616_v33 = vsub.f32 %v5173_v39, %v5522_v38  ;;  %v5623_v36 = vsub.f32 %v5180_v42, %v5522_v38  ;;  %v5630_v39 = vsub.f32 %v5187_v45, %v5522_v38 }
  0x99   :  { %v364_v3 = vadd.f32 %v363_v15, %v362_v25  ;;  %v303_v15 = vmul.f32 %v5581_v18, %v5581_v18  ;;  %v373_v2 = vsel %vm94_vm0, %v302_v7, 0.0  ;;  %v5637_v42 = vsub.f32 %v5194_v48, %v5522_v38 }
  0x9a   :  { %v5644_v45 = vsub.f32 %v5201_v51, %v5522_v38  ;;  %v5651_v48 = vsub.f32 %v5208_v54, %v5522_v38  ;;  %v5658_v51 = vsub.f32 %v5215_v57, %v5522_v38  ;;  %v5665_v54 = vsub.f32 %v5222_v60, %v5522_v38 }
  0x9b   :  { %v366_v44 = vadd.f32 %v365_v52, %v364_v3  ;;  %v304_v52 = vmul.f32 %v5588_v21, %v5588_v21  ;;  %v375_v26 = vsel %vm94_vm0, %v303_v15, 0.0  ;;  %v5672_v57 = vsub.f32 %v5229_v63, %v5522_v38 }
  0x9c   :  { %v5679_v60 = vsub.f32 %v5236_v6, %v5522_v38  ;;  %v5686_v63 = vsub.f32 %v5243_v10, %v5522_v38  ;;  %v5693_v6 = vsub.f32 %v5250_v14, %v5522_v38  ;;  %v5700_v10 = vsub.f32 %v5257_v19, %v5522_v38 }
  0x9d   :  { %v368_v61 = vadd.f32 %v367_v5, %v366_v44  ;;  %v305_v5 = vmul.f32 %v5595_v24, %v5595_v24  ;;  %v377_v7 = vsel %vm94_vm0, %v304_v52, 0.0  ;;  %v5707_v14 = vsub.f32 %v5264_v23, %v5522_v38 }
  0x9e   :  { %v5714_v19 = vsub.f32 %v5271_v28, %v5522_v38  ;;  %v5721_v23 = vsub.f32 %v5278_v32, %v5522_v38  ;;  %v5728_v28 = vsub.f32 %v5285_v37, %v5522_v38  ;;  %v5735_v32 = vsub.f32 %v5292_v41, %v5522_v38 }
  0x9f   :  { %v370_v25 = vadd.f32 %v369_v47, %v368_v61  ;;  %v306_v47 = vmul.f32 %v5602_v27, %v5602_v27  ;;  %v379_v15 = vsel %vm94_vm0, %v305_v5, 0.0  ;;  %v5742_v37 = vsub.f32 %v5299_v46, %v5522_v38 }
  0xa0   :  { %v5749_v41 = vsub.f32 %v5306_v50, %v5522_v38  ;;  %v5756_v46 = vsub.f32 %v5313_v55, %v5522_v38  ;;  %v5763_v50 = vsub.f32 %v5320_v59, %v5522_v38  ;;  %v5770_v55 = vsub.f32 %v5327_v0, %v5522_v38 }
  0xa1   :  { %v372_v3 = vadd.f32 %v371_v34, %v370_v25  ;;  %v307_v34 = vmul.f32 %v5609_v30, %v5609_v30  ;;  %v381_v52 = vsel %vm94_vm0, %v306_v47, 0.0  ;;  %v5777_v59 = vsub.f32 %v5334_v8, %v5522_v38 }
  0xa2   :  { %v5784_v0 = vsub.f32 %v5341_v16, %v5522_v38  ;;  %v5791_v8 = vsub.f32 %v5348_v22, %v5522_v38  ;;  %v5798_v16 = vsub.f32 %v5355_v29, %v5522_v38  ;;  %v5805_v22 = vsub.f32 %v5362_v35, %v5522_v38 }
  0xa3   :  { %v374_v44 = vadd.f32 %v373_v2, %v372_v3  ;;  %v308_v2 = vmul.f32 %v5616_v33, %v5616_v33  ;;  %v383_v5 = vsel %vm94_vm0, %v307_v34, 0.0  ;;  %v5812_v29 = vsub.f32 %v5369_v43, %v5522_v38 }
  0xa4   :  { %v5819_v35 = vsub.f32 %v5376_v49, %v5522_v38  ;;  %v5826_v43 = vsub.f32 %v5383_v56, %v5522_v38  ;;  %v5833_v49 = vsub.f32 %v5390_v62, %v5522_v38  ;;  %v5840_v56 = vsub.f32 %v5397_v11, %v5522_v38 }
  0xa5   :  { %v376_v61 = vadd.f32 %v375_v26, %v374_v44  ;;  %v309_v26 = vmul.f32 %v5623_v36, %v5623_v36  ;;  %v385_v47 = vsel %vm94_vm0, %v308_v2, 0.0  ;;  %v5847_v62 = vsub.f32 %v5404_v20, %v5522_v38 }
  0xa6   :  { %8444 = vst [vmem:[#allocation17_spill] sm:$0xff] %v5826_v43  ;;  %8445 = vst [vmem:[#allocation18_spill] sm:$0xff] %v5833_v49  ;;  %v5854_v11 = vsub.f32 %v5411_v31, %v5522_v38 }
  0xa7   :  { %v378_v25 = vadd.f32 %v377_v7, %v376_v61  ;;  %v310_v7 = vmul.f32 %v5630_v39, %v5630_v39  ;;  %v387_v34 = vsel %vm94_vm0, %v309_v26, 0.0  ;;  %8446 = vst [vmem:[#allocation19_spill] sm:$0xff] %v5840_v56  ;;  %8447 = vst [vmem:[#allocation20_spill] sm:$0xff] %v5847_v62 }
  0xa8   :  { %8448 = vst [vmem:[#allocation21_spill] sm:$0xff] %v5854_v11 }
  0xa9   :  { %v380_v3 = vadd.f32 %v379_v15, %v378_v25  ;;  %v311_v15 = vmul.f32 %v5637_v42, %v5637_v42  ;;  %v389_v2 = vsel %vm94_vm0, %v310_v7, 0.0 }
  0xab   :  { %v382_v44 = vadd.f32 %v381_v52, %v380_v3  ;;  %v312_v52 = vmul.f32 %v5644_v45, %v5644_v45  ;;  %v391_v26 = vsel %vm94_vm0, %v311_v15, 0.0 }
  0xad   :  { %v384_v61 = vadd.f32 %v383_v5, %v382_v44  ;;  %v313_v5 = vmul.f32 %v5651_v48, %v5651_v48  ;;  %v393_v7 = vsel %vm94_vm0, %v312_v52, 0.0 }
  0xaf   :  { %v386_v25 = vadd.f32 %v385_v47, %v384_v61  ;;  %v314_v47 = vmul.f32 %v5658_v51, %v5658_v51  ;;  %v395_v15 = vsel %vm94_vm0, %v313_v5, 0.0 }
  0xb1   :  { %v388_v3 = vadd.f32 %v387_v34, %v386_v25  ;;  %v315_v34 = vmul.f32 %v5665_v54, %v5665_v54  ;;  %v397_v52 = vsel %vm94_vm0, %v314_v47, 0.0 }
  0xb3   :  { %v390_v44 = vadd.f32 %v389_v2, %v388_v3  ;;  %v316_v2 = vmul.f32 %v5672_v57, %v5672_v57  ;;  %v399_v5 = vsel %vm94_vm0, %v315_v34, 0.0 }
  0xb5   :  { %v392_v61 = vadd.f32 %v391_v26, %v390_v44  ;;  %v317_v26 = vmul.f32 %v5679_v60, %v5679_v60  ;;  %v401_v47 = vsel %vm94_vm0, %v316_v2, 0.0 }
  0xb7   :  { %v394_v25 = vadd.f32 %v393_v7, %v392_v61  ;;  %v318_v7 = vmul.f32 %v5686_v63, %v5686_v63  ;;  %v403_v34 = vsel %vm94_vm0, %v317_v26, 0.0 }
  0xb9   :  { %v396_v3 = vadd.f32 %v395_v15, %v394_v25  ;;  %v319_v15 = vmul.f32 %v5693_v6, %v5693_v6  ;;  %v405_v2 = vsel %vm94_vm0, %v318_v7, 0.0 }
  0xbb   :  { %v398_v44 = vadd.f32 %v397_v52, %v396_v3  ;;  %v320_v52 = vmul.f32 %v5700_v10, %v5700_v10  ;;  %v407_v26 = vsel %vm94_vm0, %v319_v15, 0.0 }
  0xbd   :  { %v400_v61 = vadd.f32 %v399_v5, %v398_v44  ;;  %v321_v5 = vmul.f32 %v5707_v14, %v5707_v14  ;;  %v409_v7 = vsel %vm94_vm0, %v320_v52, 0.0 }
  0xbf   :  { %v402_v25 = vadd.f32 %v401_v47, %v400_v61  ;;  %v322_v47 = vmul.f32 %v5714_v19, %v5714_v19  ;;  %v411_v15 = vsel %vm94_vm0, %v321_v5, 0.0 }
  0xc1   :  { %v404_v3 = vadd.f32 %v403_v34, %v402_v25  ;;  %v323_v34 = vmul.f32 %v5721_v23, %v5721_v23  ;;  %v413_v52 = vsel %vm94_vm0, %v322_v47, 0.0 }
  0xc3   :  { %v406_v44 = vadd.f32 %v405_v2, %v404_v3  ;;  %v324_v2 = vmul.f32 %v5728_v28, %v5728_v28  ;;  %v415_v5 = vsel %vm94_vm0, %v323_v34, 0.0 }
  0xc5   :  { %v408_v61 = vadd.f32 %v407_v26, %v406_v44  ;;  %v325_v26 = vmul.f32 %v5735_v32, %v5735_v32  ;;  %v417_v47 = vsel %vm94_vm0, %v324_v2, 0.0 }
  0xc7   :  { %v410_v25 = vadd.f32 %v409_v7, %v408_v61  ;;  %v326_v7 = vmul.f32 %v5742_v37, %v5742_v37  ;;  %v419_v34 = vsel %vm94_vm0, %v325_v26, 0.0 }
  0xc9   :  { %v412_v3 = vadd.f32 %v411_v15, %v410_v25  ;;  %v327_v15 = vmul.f32 %v5749_v41, %v5749_v41  ;;  %v421_v2 = vsel %vm94_vm0, %v326_v7, 0.0 }
  0xcb   :  { %v414_v44 = vadd.f32 %v413_v52, %v412_v3  ;;  %v328_v52 = vmul.f32 %v5756_v46, %v5756_v46  ;;  %v423_v26 = vsel %vm94_vm0, %v327_v15, 0.0 }
  0xcd   :  { %v416_v61 = vadd.f32 %v415_v5, %v414_v44  ;;  %v329_v5 = vmul.f32 %v5763_v50, %v5763_v50  ;;  %v425_v7 = vsel %vm94_vm0, %v328_v52, 0.0 }
  0xcf   :  { %v418_v25 = vadd.f32 %v417_v47, %v416_v61  ;;  %v330_v47 = vmul.f32 %v5770_v55, %v5770_v55  ;;  %v427_v15 = vsel %vm94_vm0, %v329_v5, 0.0 }
  0xd1   :  { %v420_v3 = vadd.f32 %v419_v34, %v418_v25  ;;  %v331_v34 = vmul.f32 %v5777_v59, %v5777_v59  ;;  %v429_v52 = vsel %vm94_vm0, %v330_v47, 0.0 }
  0xd3   :  { %v422_v44 = vadd.f32 %v421_v2, %v420_v3  ;;  %v332_v2 = vmul.f32 %v5784_v0, %v5784_v0  ;;  %v431_v5 = vsel %vm94_vm0, %v331_v34, 0.0 }
  0xd5   :  { %v424_v61 = vadd.f32 %v423_v26, %v422_v44  ;;  %v333_v26 = vmul.f32 %v5791_v8, %v5791_v8  ;;  %v433_v47 = vsel %vm94_vm0, %v332_v2, 0.0 }
  0xd7   :  { %v426_v25 = vadd.f32 %v425_v7, %v424_v61  ;;  %v334_v7 = vmul.f32 %v5798_v16, %v5798_v16  ;;  %v435_v34 = vsel %vm94_vm0, %v333_v26, 0.0 }
  0xd9   :  { %v428_v3 = vadd.f32 %v427_v15, %v426_v25  ;;  %v335_v15 = vmul.f32 %v5805_v22, %v5805_v22  ;;  %v437_v2 = vsel %vm94_vm0, %v334_v7, 0.0 }
  0xdb   :  { %v430_v44 = vadd.f32 %v429_v52, %v428_v3  ;;  %v336_v52 = vmul.f32 %v5812_v29, %v5812_v29  ;;  %v439_v26 = vsel %vm94_vm0, %v335_v15, 0.0 }
  0xdd   :  { %v432_v61 = vadd.f32 %v431_v5, %v430_v44  ;;  %v337_v5 = vmul.f32 %v5819_v35, %v5819_v35  ;;  %v441_v7 = vsel %vm94_vm0, %v336_v52, 0.0 }
  0xdf   :  { %v434_v25 = vadd.f32 %v433_v47, %v432_v61  ;;  %v338_v47 = vmul.f32 %v5826_v43, %v5826_v43  ;;  %v443_v15 = vsel %vm94_vm0, %v337_v5, 0.0 }
  0xe1   :  { %v436_v3 = vadd.f32 %v435_v34, %v434_v25  ;;  %v339_v34 = vmul.f32 %v5833_v49, %v5833_v49  ;;  %v445_v52 = vsel %vm94_vm0, %v338_v47, 0.0 }
  0xe3   :  { %v438_v44 = vadd.f32 %v437_v2, %v436_v3  ;;  %v340_v2 = vmul.f32 %v5840_v56, %v5840_v56  ;;  %v447_v5 = vsel %vm94_vm0, %v339_v34, 0.0  ;;  %v342_v56 = vmul.f32 %v5854_v11, %v5854_v11 }
  0xe5   :  { %v440_v61 = vadd.f32 %v439_v26, %v438_v44  ;;  %v8449_v26 = vld [vmem:[#allocation2_spill] sm:$0xff]  ;;  %v341_v44 = vmul.f32 %v5847_v62, %v5847_v62  ;;  %v449_v47 = vsel %vm94_vm0, %v340_v2, 0.0  ;;  %v453_v2 = vsel %vm94_vm0, %v342_v56, 0.0 }
  0xe6   :  { %v5861_v20 = vsub.f32 %v8449_v26, %v5522_v38 }
  0xe7   :  { %v442_v25 = vadd.f32 %v441_v7, %v440_v61  ;;  %v8451_v61 = vld [vmem:[#allocation3_spill] sm:$0xff]  ;;  %v451_v34 = vsel %vm94_vm0, %v341_v44, 0.0 }
  0xe8   :  { %8450 = vst [vmem:[#allocation2_spill] sm:$0xff] %v5861_v20  ;;  %v5868_v31 = vsub.f32 %v8451_v61, %v5522_v38  ;;  %v343_v62 = vmul.f32 %v5861_v20, %v5861_v20 }
  0xe9   :  { %v444_v3 = vadd.f32 %v443_v15, %v442_v25  ;;  %v8453_v25 = vld [vmem:[#allocation4_spill] sm:$0xff] }
  0xea   :  { %8452 = vst [vmem:[#allocation3_spill] sm:$0xff] %v5868_v31  ;;  %v5875_v26 = vsub.f32 %v8453_v25, %v5522_v38  ;;  %v344_v11 = vmul.f32 %v5868_v31, %v5868_v31  ;;  %v455_v44 = vsel %vm94_vm0, %v343_v62, 0.0 }
  0xeb   :  { %v446_v7 = vadd.f32 %v445_v52, %v444_v3  ;;  %v8455_v3 = vld [vmem:[#allocation5_spill] sm:$0xff] }
  0xec   :  { %8454 = vst [vmem:[#allocation4_spill] sm:$0xff] %v5875_v26  ;;  %v5882_v61 = vsub.f32 %v8455_v3, %v5522_v38  ;;  %v345_v20 = vmul.f32 %v5875_v26, %v5875_v26  ;;  %v457_v56 = vsel %vm94_vm0, %v344_v11, 0.0 }
  0xed   :  { %v448_v15 = vadd.f32 %v447_v5, %v446_v7  ;;  %v8457_v7 = vld [vmem:[#allocation6_spill] sm:$0xff] }
  0xee   :  { %8456 = vst [vmem:[#allocation5_spill] sm:$0xff] %v5882_v61  ;;  %v5889_v25 = vsub.f32 %v8457_v7, %v5522_v38  ;;  %v346_v31 = vmul.f32 %v5882_v61, %v5882_v61  ;;  %v459_v62 = vsel %vm94_vm0, %v345_v20, 0.0 }
  0xef   :  { %v450_v52 = vadd.f32 %v449_v47, %v448_v15  ;;  %v8459_v15 = vld [vmem:[#allocation7_spill] sm:$0xff] }
  0xf0   :  { %8458 = vst [vmem:[#allocation6_spill] sm:$0xff] %v5889_v25  ;;  %v5896_v3 = vsub.f32 %v8459_v15, %v5522_v38  ;;  %v347_v26 = vmul.f32 %v5889_v25, %v5889_v25  ;;  %v461_v11 = vsel %vm94_vm0, %v346_v31, 0.0 }
  0xf1   :  { %v452_v5 = vadd.f32 %v451_v34, %v450_v52  ;;  %v8461_v52 = vld [vmem:[#allocation8_spill] sm:$0xff] }
  0xf2   :  { %8460 = vst [vmem:[#allocation7_spill] sm:$0xff] %v5896_v3  ;;  %v5903_v7 = vsub.f32 %v8461_v52, %v5522_v38  ;;  %v348_v61 = vmul.f32 %v5896_v3, %v5896_v3  ;;  %v463_v20 = vsel %vm94_vm0, %v347_v26, 0.0 }
  0xf3   :  { %v454_v47 = vadd.f32 %v453_v2, %v452_v5  ;;  %v8463_v5 = vld [vmem:[#allocation9_spill] sm:$0xff] }
  0xf4   :  { %8462 = vst [vmem:[#allocation8_spill] sm:$0xff] %v5903_v7  ;;  %v5910_v15 = vsub.f32 %v8463_v5, %v5522_v38  ;;  %v349_v25 = vmul.f32 %v5903_v7, %v5903_v7  ;;  %v465_v31 = vsel %vm94_vm0, %v348_v61, 0.0 }
  0xf5   :  { %v456_v34 = vadd.f32 %v455_v44, %v454_v47  ;;  %v8465_v47 = vld [vmem:[#allocation10_spill] sm:$0xff] }
  0xf6   :  { %8464 = vst [vmem:[#allocation9_spill] sm:$0xff] %v5910_v15  ;;  %v5917_v52 = vsub.f32 %v8465_v47, %v5522_v38  ;;  %v350_v3 = vmul.f32 %v5910_v15, %v5910_v15  ;;  %v467_v26 = vsel %vm94_vm0, %v349_v25, 0.0 }
  0xf7   :  { %v458_v2 = vadd.f32 %v457_v56, %v456_v34  ;;  %v8467_v34 = vld [vmem:[#allocation11_spill] sm:$0xff] }
  0xf8   :  { %8466 = vst [vmem:[#allocation10_spill] sm:$0xff] %v5917_v52  ;;  %v5924_v5 = vsub.f32 %v8467_v34, %v5522_v38  ;;  %v351_v7 = vmul.f32 %v5917_v52, %v5917_v52  ;;  %v469_v61 = vsel %vm94_vm0, %v350_v3, 0.0 }
  0xf9   :  { %v460_v44 = vadd.f32 %v459_v62, %v458_v2  ;;  %v8469_v2 = vld [vmem:[#allocation12_spill] sm:$0xff] }
  0xfa   :  { %8468 = vst [vmem:[#allocation11_spill] sm:$0xff] %v5924_v5  ;;  %v5931_v47 = vsub.f32 %v8469_v2, %v5522_v38  ;;  %v352_v15 = vmul.f32 %v5924_v5, %v5924_v5  ;;  %v471_v25 = vsel %vm94_vm0, %v351_v7, 0.0 }
  0xfb   :  { %v462_v56 = vadd.f32 %v461_v11, %v460_v44  ;;  %v8471_v44 = vld [vmem:[#allocation13_spill] sm:$0xff] }
  0xfc   :  { %8470 = vst [vmem:[#allocation12_spill] sm:$0xff] %v5931_v47  ;;  %v5938_v34 = vsub.f32 %v8471_v44, %v5522_v38  ;;  %v353_v52 = vmul.f32 %v5931_v47, %v5931_v47  ;;  %v473_v3 = vsel %vm94_vm0, %v352_v15, 0.0 }
  0xfd   :  { %v464_v62 = vadd.f32 %v463_v20, %v462_v56  ;;  %v8473_v56 = vld [vmem:[#allocation14_spill] sm:$0xff] }
  0xfe   :  { %8472 = vst [vmem:[#allocation13_spill] sm:$0xff] %v5938_v34  ;;  %v5945_v2 = vsub.f32 %v8473_v56, %v5522_v38  ;;  %v354_v5 = vmul.f32 %v5938_v34, %v5938_v34  ;;  %v475_v7 = vsel %vm94_vm0, %v353_v52, 0.0 }
  0xff   :  { %v466_v11 = vadd.f32 %v465_v31, %v464_v62  ;;  %v8475_v62 = vld [vmem:[#allocation15_spill] sm:$0xff] }
 0x100   :  { %8474 = vst [vmem:[#allocation14_spill] sm:$0xff] %v5945_v2  ;;  %v5952_v44 = vsub.f32 %v8475_v62, %v5522_v38  ;;  %v355_v56 = vmul.f32 %v5945_v2, %v5945_v2  ;;  %v477_v62 = vsel %vm94_vm0, %v354_v5, 0.0 }
 0x101   :  { %v468_v20 = vadd.f32 %v467_v26, %v466_v11  ;;  %v5959_v11 = vsub.f32 %v5518_v13, %v5522_v38 }
 0x102   :  { %8476 = vst [vmem:[#allocation15_spill] sm:$0xff] %v5952_v44 }
 0x103   :  { %v470_v31 = vadd.f32 %v469_v61, %v468_v20  ;;  %8477 = vst [vmem:[#allocation22_spill] sm:$0xff] %v5959_v11  ;;  %v356_v20 = vmul.f32 %v5952_v44, %v5952_v44  ;;  %v357_v15 = vmul.f32 %v5959_v11, %v5959_v11 }
 0x105   :  { %v472_v26 = vadd.f32 %v471_v25, %v470_v31  ;;  %v479_v25 = vsel %vm94_vm0, %v355_v56, 0.0  ;;  %v481_v13 = vsel %vm94_vm0, %v356_v20, 0.0  ;;  %v483_v2 = vsel %vm94_vm0, %v357_v15, 0.0 }
 0x107   :  { %v474_v61 = vadd.f32 %v473_v3, %v472_v26 }
 0x109   :  { %v476_v47 = vadd.f32 %v475_v7, %v474_v61 }
 0x10b   :  { %v478_v31 = vadd.f32 %v477_v62, %v476_v47  ;;  %v5977_v47 = vld [vmem:[%s8260_s1] ss:$0 sm:$0xff] }
 0x10d   :  { %v480_v38 = vadd.f32 %v479_v25, %v478_v31 }
 0x10f   :  { %v482_v34 = vadd.f32 %v481_v13, %v480_v38 }
 0x111   :  { %v484_v52 = vadd.f32 %v483_v2, %v482_v34  ;;  %v5990_v2 = vld [vmem:[%s8261_s2] ss:$0 sm:$0xff] }
 0x113   :  { %v485_v3 = vrot.slane %v484_v52, 4 }
 0x115   :  { %v486_v26 = vadd.f32 %v485_v3, %v484_v52 }
 0x117   :  { %v487_v49 = vrot.slane %v486_v26, 2 }
 0x119   :  { %v488_v44 = vadd.f32 %v487_v49, %v486_v26 }
 0x11b   :  { %v489_v43 = vrot.slane %v488_v44, 1 }
 0x11d   :  { %v490_v5 = vadd.f32 %v489_v43, %v488_v44  ;;  %v8478_v44 = vld [vmem:[#allocation16_spill] sm:$0xff] }
 0x11f   :  { %v491_v7 = vmul.f32 0.001953125, %v490_v5 }
 0x121   :  { %v492_v61 = vadd.f32 1e-05, %v491_v7 }
 0x123   :  { %4759 = vrsqrt.f32 %v492_v61 }
 0x12d   :  { %v5972_v11 = vpop.eup %4759 }
 0x12e   :  { %v494_v56 = vmul.f32 %v5972_v11, %v5526_v58  ;;  %v495_v34 = vmul.f32 %v5972_v11, %v5530_v53  ;;  %v496_v49 = vmul.f32 %v5972_v11, %v5534_v1  ;;  %v497_v43 = vmul.f32 %v5972_v11, %v5538_v17 }
 0x12f   :  { %v498_v20 = vmul.f32 %v5972_v11, %v8478_v44  ;;  %v499_v58 = vmul.f32 %v5972_v11, %v5552_v4  ;;  %v500_v53 = vmul.f32 %v5972_v11, %v5558_v9  ;;  %v501_v1 = vmul.f32 %v5972_v11, %v5567_v12 }
 0x130   :  { %v565_v62 = vmul.f32 %v5977_v47, %v494_v56  ;;  %v566_v17 = vmul.f32 %v5977_v47, %v495_v34  ;;  %v567_v15 = vmul.f32 %v5977_v47, %v496_v49  ;;  %v568_v25 = vmul.f32 %v5977_v47, %v497_v43 }
 0x131   :  { %v569_v31 = vmul.f32 %v5977_v47, %v498_v20  ;;  %v570_v13 = vmul.f32 %v5977_v47, %v499_v58  ;;  %v571_v4 = vmul.f32 %v5977_v47, %v500_v53  ;;  %v572_v38 = vmul.f32 %v5977_v47, %v501_v1 }
 0x132   :  { %v636_v9 = vadd.f32 %v5990_v2, %v565_v62  ;;  %v637_v12 = vadd.f32 %v5990_v2, %v566_v17  ;;  %v638_v52 = vadd.f32 %v5990_v2, %v567_v15  ;;  %v639_v3 = vadd.f32 %v5990_v2, %v568_v25 }
 0x133   :  { %v640_v26 = vadd.f32 %v5990_v2, %v569_v31  ;;  %v641_v5 = vadd.f32 %v5990_v2, %v570_v13  ;;  %v502_v56 = vmul.f32 %v5972_v11, %v5574_v40  ;;  %v503_v34 = vmul.f32 %v5972_v11, %v5581_v18 }
 0x134   :  { %v6014_v7 = vpack.c.bf16 %v637_v12, %v636_v9  ;;  %v6016_v61 = vpack.c.bf16 %v639_v3, %v638_v52  ;;  %v504_v43 = vmul.f32 %v5972_v11, %v5588_v21  ;;  %v505_v44 = vmul.f32 %v5972_v11, %v5595_v24 }
 0x135   :  { %v6022_v49 = vpack.c.bf16 %v641_v5, %v640_v26  ;;  %v642_v20 = vadd.f32 %v5990_v2, %v571_v4  ;;  %v643_v58 = vadd.f32 %v5990_v2, %v572_v38  ;;  %v573_v40 = vmul.f32 %v5977_v47, %v502_v56 }
 0x136   :  { %4552 = vmatprep.mubr.msk.bf16.mxu0 %vm94_vm0, %v6014_v7  ;;  %v574_v53 = vmul.f32 %v5977_v47, %v503_v34  ;;  %v575_v18 = vmul.f32 %v5977_v47, %v504_v43  ;;  %v506_v21 = vmul.f32 %v5972_v11, %v5602_v27  ;;  %v507_v24 = vmul.f32 %v5972_v11, %v5609_v30 }
 0x137   :  { %4553 = vmatmul.mubr.msk.bf16.vlgmr.msra.gmra.mrb[0].mxu0 %vm94_vm0, %v6016_v61  ;;  %v644_v1 = vadd.f32 %v5990_v2, %v573_v40  ;;  %v576_v17 = vmul.f32 %v5977_v47, %v505_v44  ;;  %v508_v15 = vmul.f32 %v5972_v11, %v5616_v33  ;;  %v509_v25 = vmul.f32 %v5972_v11, %v5623_v36 }
 0x138   :  { %4556 = vmatprep.mubr.msk.bf16.mxu0 %vm94_vm0, %v6022_v49  ;;  %v645_v62 = vadd.f32 %v5990_v2, %v574_v53  ;;  %v6050_v31 = vpack.c.bf16 %v643_v58, %v642_v20  ;;  %v510_v27 = vmul.f32 %v5972_v11, %v5630_v39  ;;  %v646_v30 = vadd.f32 %v5990_v2, %v575_v18 }
 0x139   :  { %v577_v13 = vmul.f32 %v5977_v47, %v506_v21  ;;  %v578_v4 = vmul.f32 %v5977_v47, %v507_v24  ;;  %v511_v38 = vmul.f32 %v5972_v11, %v5637_v42  ;;  %v647_v33 = vadd.f32 %v5990_v2, %v576_v17 }
 0x13a   :  { %v6059_v9 = vpack.c.bf16 %v645_v62, %v644_v1  ;;  %v512_v36 = vmul.f32 %v5972_v11, %v5644_v45  ;;  %v513_v12 = vmul.f32 %v5972_v11, %v5651_v48  ;;  %v579_v39 = vmul.f32 %v5977_v47, %v508_v15 }
 0x13b   :  { %v580_v52 = vmul.f32 %v5977_v47, %v509_v25  ;;  %v514_v3 = vmul.f32 %v5972_v11, %v5658_v51  ;;  %v515_v42 = vmul.f32 %v5972_v11, %v5665_v54  ;;  %v581_v26 = vmul.f32 %v5977_v47, %v510_v27 }
 0x13c   :  { %v582_v5 = vmul.f32 %v5977_v47, %v511_v38  ;;  %v583_v56 = vmul.f32 %v5977_v47, %v512_v36  ;;  %v584_v45 = vmul.f32 %v5977_v47, %v513_v12  ;;  %v516_v51 = vmul.f32 %v5972_v11, %v5672_v57 }
 0x13d   :  { %v585_v48 = vmul.f32 %v5977_v47, %v514_v3  ;;  %v586_v34 = vmul.f32 %v5977_v47, %v515_v42  ;;  %v648_v54 = vadd.f32 %v5990_v2, %v577_v13  ;;  %v649_v43 = vadd.f32 %v5990_v2, %v578_v4 }
 0x13e   :  { %v517_v44 = vmul.f32 %v5972_v11, %v5679_v60  ;;  %v518_v20 = vmul.f32 %v5972_v11, %v5686_v63  ;;  %v6090_v58 = vpack.c.bf16 %v647_v33, %v646_v30  ;;  %v650_v40 = vadd.f32 %v5990_v2, %v579_v39 }
 0x13f   :  { %4557 = vmatmul.mubr.msk.bf16.gmra.mrb[4].mxu0 %vm94_vm0, %v6050_v31  ;;  %v651_v53 = vadd.f32 %v5990_v2, %v580_v52  ;;  %v652_v57 = vadd.f32 %v5990_v2, %v581_v26  ;;  %v653_v18 = vadd.f32 %v5990_v2, %v582_v5  ;;  %v654_v21 = vadd.f32 %v5990_v2, %v583_v56 }
 0x140   :  { %4560 = vmatprep.mubr.msk.bf16.mxu0 %vm94_vm0, %v6059_v9  ;;  %v519_v24 = vmul.f32 %v5972_v11, %v5693_v6  ;;  %v655_v60 = vadd.f32 %v5990_v2, %v584_v45  ;;  %v656_v1 = vadd.f32 %v5990_v2, %v585_v48  ;;  %v657_v63 = vadd.f32 %v5990_v2, %v586_v34 }
 0x141   :  { %v587_v62 = vmul.f32 %v5977_v47, %v516_v51  ;;  %v6103_v17 = vpack.c.bf16 %v649_v43, %v648_v54  ;;  %v588_v15 = vmul.f32 %v5977_v47, %v517_v44  ;;  %v589_v25 = vmul.f32 %v5977_v47, %v518_v20 }
 0x142   :  { %v520_v27 = vmul.f32 %v5972_v11, %v5700_v10  ;;  %v521_v6 = vmul.f32 %v5972_v11, %v5707_v14  ;;  %v6111_v30 = vpack.c.bf16 %v651_v53, %v650_v40  ;;  %v6113_v13 = vpack.c.bf16 %v653_v18, %v652_v57 }
 0x143   :  { %v590_v4 = vmul.f32 %v5977_v47, %v519_v24  ;;  %v522_v38 = vmul.f32 %v5972_v11, %v5714_v19  ;;  %v6120_v33 = vpack.c.bf16 %v655_v60, %v654_v21  ;;  %v6122_v36 = vpack.c.bf16 %v657_v63, %v656_v1 }
 0x144   :  { %v6125_v10 = vadd.f32 %v5990_v2, %v587_v62  ;;  %v526_v14 = vmul.f32 %v5972_v11, %v5742_v37  ;;  %v6132_v12 = vadd.f32 %v5990_v2, %v588_v15  ;;  %v6135_v19 = vadd.f32 %v5990_v2, %v589_v25 }
 0x145   :  { %v591_v39 = vmul.f32 %v5977_v47, %v520_v27  ;;  %v523_v52 = vmul.f32 %v5972_v11, %v5721_v23  ;;  %v592_v3 = vmul.f32 %v5977_v47, %v521_v6  ;;  %v6143_v42 = vmul.f32 %v5972_v11, %v5728_v28  ;;  %v8479_v27 = vld [vmem:[#allocation17_spill] sm:$0xff] }
 0x146   :  { %v527_v37 = vmul.f32 %v5972_v11, %v5749_v41  ;;  %v597_v26 = vmul.f32 %v5977_v47, %v526_v14  ;;  %v6149_v5 = vadd.f32 %v5990_v2, %v590_v4  ;;  %v593_v56 = vmul.f32 %v5977_v47, %v522_v38  ;;  %v8480_v4 = vld [vmem:[#allocation18_spill] sm:$0xff] }
 0x147   :  { %4561 = vmatmul.mubr.msk.bf16.gmra.mrb[8].mxu0 %vm94_vm0, %v6090_v58  ;;  %v528_v45 = vmul.f32 %v5972_v11, %v5756_v46  ;;  %v529_v23 = vmul.f32 %v5972_v11, %v5763_v50  ;;  %v530_v41 = vmul.f32 %v5972_v11, %v5770_v55  ;;  %v531_v34 = vmul.f32 %v5972_v11, %v5777_v59 }
 0x148   :  { %4564 = vmatprep.mubr.msk.bf16.mxu0 %vm94_vm0, %v6103_v17  ;;  %v598_v48 = vmul.f32 %v5977_v47, %v527_v37  ;;  %v668_v28 = vadd.f32 %v5990_v2, %v597_v26  ;;  %v594_v51 = vmul.f32 %v5977_v47, %v523_v52  ;;  %v532_v46 = vmul.f32 %v5972_v11, %v5784_v0  ;;  %v8481_v52 = vld [vmem:[#allocation19_spill] sm:$0xff] }
 0x149   :  { %v599_v54 = vmul.f32 %v5977_v47, %v528_v45  ;;  %v600_v43 = vmul.f32 %v5977_v47, %v529_v23  ;;  %v601_v44 = vmul.f32 %v5977_v47, %v530_v41  ;;  %v602_v20 = vmul.f32 %v5977_v47, %v531_v34 }
 0x14a   :  { %v669_v50 = vadd.f32 %v5990_v2, %v598_v48  ;;  %v533_v55 = vmul.f32 %v5972_v11, %v5791_v8  ;;  %v603_v53 = vmul.f32 %v5977_v47, %v532_v46  ;;  %v534_v57 = vmul.f32 %v5972_v11, %v5798_v16  ;;  %v8482_v48 = vld [vmem:[#allocation20_spill] sm:$0xff] }
 0x14b   :  { %v670_v59 = vadd.f32 %v5990_v2, %v599_v54  ;;  %v671_v40 = vadd.f32 %v5990_v2, %v600_v43  ;;  %v672_v18 = vadd.f32 %v5990_v2, %v601_v44  ;;  %v673_v21 = vadd.f32 %v5990_v2, %v602_v20  ;;  %v8483_v43 = vld [vmem:[#allocation21_spill] sm:$0xff] }
 0x14c   :  { %v6179_v0 = vpack.c.bf16 %v669_v50, %v668_v28  ;;  %v604_v8 = vmul.f32 %v5977_v47, %v533_v55  ;;  %v525_v24 = vmul.f32 %v5972_v11, %v5735_v32  ;;  %v535_v16 = vmul.f32 %v5972_v11, %v5805_v22 }
 0x14d   :  { %v6188_v60 = vpack.c.bf16 %v671_v40, %v670_v59  ;;  %v605_v1 = vmul.f32 %v5977_v47, %v534_v57  ;;  %v6195_v63 = vpack.c.bf16 %v673_v21, %v672_v18  ;;  %v674_v62 = vadd.f32 %v5990_v2, %v603_v53  ;;  %v8484_v18 = vld [vmem:[#allocation2_spill] sm:$0xff] }
 0x14e   :  { %4584 = vmatprep.mubr.msk.bf16.mxu1 %vm94_vm0, %v6179_v0  ;;  %v536_v15 = vmul.f32 %v5972_v11, %v5812_v29  ;;  %v537_v32 = vmul.f32 %v5972_v11, %v5819_v35  ;;  %v675_v22 = vadd.f32 %v5990_v2, %v604_v8  ;;  %v606_v25 = vmul.f32 %v5977_v47, %v535_v16 }
 0x14f   :  { %4565 = vmatmul.mubr.msk.bf16.gmra.mrb[12].mxu0 %vm94_vm0, %v6111_v30  ;;  %4585 = vmatmul.mubr.msk.bf16.vlgmr.msra.gmra.mrb[0].mxu1 %vm94_vm0, %v6188_v60  ;;  %v538_v6 = vmul.f32 %v5972_v11, %v8479_v27  ;;  %v539_v38 = vmul.f32 %v5972_v11, %v8480_v4  ;;  %v676_v29 = vadd.f32 %v5990_v2, %v605_v1 }
 0x150   :  { %4568 = vmatprep.mubr.msk.bf16.mxu0 %vm94_vm0, %v6113_v13  ;;  %4588 = vmatprep.mubr.msk.bf16.mxu1 %vm94_vm0, %v6195_v63  ;;  %v607_v35 = vmul.f32 %v5977_v47, %v536_v15  ;;  %v608_v14 = vmul.f32 %v5977_v47, %v537_v32  ;;  %v540_v37 = vmul.f32 %v5972_v11, %v8481_v52  ;;  %v8486_v15 = vld [vmem:[#allocation8_spill] sm:$0xff] }
 0x151   :  { %v677_v26 = vadd.f32 %v5990_v2, %v606_v25  ;;  %v609_v45 = vmul.f32 %v5977_v47, %v538_v6  ;;  %v610_v23 = vmul.f32 %v5977_v47, %v539_v38  ;;  %v541_v28 = vmul.f32 %v5972_v11, %v8482_v48  ;;  %v8488_v6 = vld [vmem:[#allocation9_spill] sm:$0xff] }
 0x152   :  { %v662_v41 = vadd.f32 %v5990_v2, %v591_v39  ;;  %v663_v34 = vadd.f32 %v5990_v2, %v592_v3  ;;  %v664_v54 = vadd.f32 %v5990_v2, %v593_v56  ;;  %v542_v46 = vmul.f32 %v5972_v11, %v8483_v43  ;;  %v8493_v43 = vld [vmem:[#allocation11_spill] sm:$0xff] }
 0x153   :  { %v665_v50 = vadd.f32 %v5990_v2, %v594_v51  ;;  %v6228_v44 = vpack.c.bf16 %v675_v22, %v674_v62  ;;  %v678_v20 = vadd.f32 %v5990_v2, %v607_v35  ;;  %v679_v55 = vadd.f32 %v5990_v2, %v608_v14  ;;  %v8487_v22 = vld [vmem:[#allocation3_spill] sm:$0xff]  ;;  %v8489_v35 = vld [vmem:[#allocation4_spill] sm:$0xff] }
 0x154   :  { %v6234_v59 = vpack.c.bf16 %v677_v26, %v676_v29  ;;  %v680_v39 = vadd.f32 %v5990_v2, %v609_v45  ;;  %v681_v3 = vadd.f32 %v5990_v2, %v610_v23  ;;  %v611_v56 = vmul.f32 %v5977_v47, %v540_v37  ;;  %v8490_v37 = vld [vmem:[#allocation5_spill] sm:$0xff]  ;;  %v8491_v23 = vld [vmem:[#allocation10_spill] sm:$0xff] }
 0x155   :  { %v6243_v51 = vpack.c.bf16 %v6132_v12, %v6125_v10  ;;  %v612_v40 = vmul.f32 %v5977_v47, %v541_v28  ;;  %v6248_v53 = vpack.c.bf16 %v6149_v5, %v6135_v19  ;;  %v595_v57 = vmul.f32 %v5977_v47, %v6143_v42  ;;  %v8485_v12 = vld [vmem:[#allocation7_spill] sm:$0xff] }
 0x156   :  { %v543_v21 = vmul.f32 %v5972_v11, %v8484_v18  ;;  %v613_v8 = vmul.f32 %v5977_v47, %v542_v46  ;;  %v6255_v16 = vpack.c.bf16 %v663_v34, %v662_v41  ;;  %v6257_v1 = vpack.c.bf16 %v665_v50, %v664_v54  ;;  %v8492_v41 = vld [vmem:[#allocation6_spill] sm:$0xff]  ;;  %v8494_v50 = vld [vmem:[#allocation12_spill] sm:$0xff] }
 0x157   :  { %4569 = vmatmul.mubr.msk.bf16.gmra.mrb[16].mxu0 %vm94_vm0, %v6120_v33  ;;  %v596_v10 = vmul.f32 %v5977_v47, %v525_v24  ;;  %4589 = vmatmul.mubr.msk.bf16.gmra.mrb[4].mxu1 %vm94_vm0, %v6228_v44  ;;  %v548_v19 = vmul.f32 %v5972_v11, %v8485_v12  ;;  %v6266_v42 = vpack.c.bf16 %v679_v55, %v678_v20 }
 0x158   :  { %4572 = vmatprep.mubr.msk.bf16.mxu0 %vm94_vm0, %v6122_v36  ;;  %4592 = vmatprep.mubr.msk.bf16.mxu1 %vm94_vm0, %v6234_v59  ;;  %v6268_v5 = vpack.c.bf16 %v681_v3, %v680_v39  ;;  %v682_v62 = vadd.f32 %v5990_v2, %v611_v56  ;;  %v549_v32 = vmul.f32 %v5972_v11, %v8486_v15  ;;  %v8495_v3 = vld [vmem:[#allocation13_spill] sm:$0xff] }
 0x159   :  { %v683_v24 = vadd.f32 %v5990_v2, %v612_v40  ;;  %v544_v25 = vmul.f32 %v5972_v11, %v8487_v22  ;;  %v619_v27 = vmul.f32 %v5977_v47, %v548_v19  ;;  %v550_v4 = vmul.f32 %v5972_v11, %v8488_v6  ;;  %v8496_v40 = vld [vmem:[#allocation14_spill] sm:$0xff]  ;;  %v8497_v19 = vld [vmem:[#allocation15_spill] sm:$0xff] }
 0x15a   :  { %v614_v38 = vmul.f32 %v5977_v47, %v543_v21  ;;  %v684_v29 = vadd.f32 %v5990_v2, %v613_v8  ;;  %v545_v14 = vmul.f32 %v5972_v11, %v8489_v35  ;;  %v620_v52 = vmul.f32 %v5977_v47, %v549_v32  ;;  %v8498_v6 = vld [vmem:[#allocation22_spill] sm:$0xff] }
 0x15b   :  { %v546_v26 = vmul.f32 %v5972_v11, %v8490_v37  ;;  %v690_v45 = vadd.f32 %v5990_v2, %v619_v27  ;;  %v551_v48 = vmul.f32 %v5972_v11, %v8491_v23  ;;  %v621_v28 = vmul.f32 %v5977_v47, %v550_v4 }
 0x15c   :  { %v547_v34 = vmul.f32 %v5972_v11, %v8492_v41  ;;  %v691_v54 = vadd.f32 %v5990_v2, %v620_v52  ;;  %v552_v46 = vmul.f32 %v5972_v11, %v8493_v43  ;;  %v553_v20 = vmul.f32 %v5972_v11, %v8494_v50 }
 0x15d   :  { %v622_v55 = vmul.f32 %v5977_v47, %v551_v48  ;;  %v692_v39 = vadd.f32 %v5990_v2, %v621_v28  ;;  %v554_v56 = vmul.f32 %v5972_v11, %v8495_v3  ;;  %v555_v18 = vmul.f32 %v5972_v11, %v8496_v40 }
 0x15e   :  { %v6307_v21 = vpack.c.bf16 %v691_v54, %v690_v45  ;;  %v623_v8 = vmul.f32 %v5977_v47, %v552_v46  ;;  %v624_v12 = vmul.f32 %v5977_v47, %v553_v20  ;;  %v556_v15 = vmul.f32 %v5972_v11, %v8497_v19 }
 0x15f   :  { %4573 = vmatmul.mubr.msk.bf16.gmra.mrb[20].mxu0 %vm94_vm0, %v6243_v51  ;;  %4593 = vmatmul.mubr.msk.bf16.gmra.mrb[8].mxu1 %vm94_vm0, %v6266_v42  ;;  %v693_v32 = vadd.f32 %v5990_v2, %v622_v55  ;;  %v625_v22 = vmul.f32 %v5977_v47, %v554_v56  ;;  %v626_v27 = vmul.f32 %v5977_v47, %v555_v18 }
 0x160   :  { %4576 = vmatprep.mubr.msk.bf16.mxu0 %vm94_vm0, %v6248_v53  ;;  %v557_v4 = vmul.f32 %v5972_v11, %v8498_v6  ;;  %4596 = vmatprep.mubr.msk.bf16.mxu1 %vm94_vm0, %v6268_v5  ;;  %v685_v35 = vadd.f32 %v5990_v2, %v614_v38  ;;  %v694_v52 = vadd.f32 %v5990_v2, %v623_v8 }
 0x161   :  { %v695_v37 = vadd.f32 %v5990_v2, %v624_v12  ;;  %v627_v45 = vmul.f32 %v5977_v47, %v556_v15  ;;  %v6326_v23 = vpack.c.bf16 %v693_v32, %v692_v39  ;;  %v696_v48 = vadd.f32 %v5990_v2, %v625_v22 }
 0x162   :  { %v697_v28 = vadd.f32 %v5990_v2, %v626_v27  ;;  %v628_v41 = vmul.f32 %v5977_v47, %v557_v4  ;;  %v666_v11 = vadd.f32 %v5990_v2, %v595_v57  ;;  %v6332_v54 = vpack.c.bf16 %v683_v24, %v682_v62 }
 0x163   :  { %v6334_v43 = vpack.c.bf16 %v695_v37, %v694_v52  ;;  %v698_v38 = vadd.f32 %v5990_v2, %v627_v45  ;;  %v615_v46 = vmul.f32 %v5977_v47, %v544_v25  ;;  %v616_v50 = vmul.f32 %v5977_v47, %v545_v14 }
 0x164   :  { %v6339_v20 = vpack.c.bf16 %v697_v28, %v696_v48  ;;  %v699_v55 = vadd.f32 %v5990_v2, %v628_v41  ;;  %v667_v39 = vadd.f32 %v5990_v2, %v596_v10  ;;  %v6345_v57 = vpack.c.bf16 %v685_v35, %v684_v29  ;;  %v4758_v35 = vld [vmem:[%s8262_s4 + $0x8] sm:$0xff]  }
 0x165   :  { %v617_v62 = vmul.f32 %v5977_v47, %v546_v26  ;;  %v618_v24 = vmul.f32 %v5977_v47, %v547_v34  ;;  %v686_v14 = vadd.f32 %v5990_v2, %v615_v46  ;;  %v687_v3 = vadd.f32 %v5990_v2, %v616_v50  ;;  %v1439_v34 = vld [vmem:[%s8263_s6] sm:$0x3] }
 0x166   :  { %v6351_v25 = vpack.c.bf16 %v699_v55, %v698_v38  ;;  %v6357_v56 = vpack.c.bf16 %v667_v39, %v666_v11  ;;  %4754 = vmatprep.subr.msk.bf16.mxu0 %vm3080_vm1, %v1439_v34  ;;  %v3082_v40 = vsel %vm3080_vm1, %v1439_v34, 0 }
 0x167   :  { %4577 = vmatmul.mubr.msk.bf16.gmra.mrb[24].mxu0 %vm94_vm0, %v6255_v16  ;;  %4597 = vmatmul.mubr.msk.bf16.gmra.mrb[12].mxu1 %vm94_vm0, %v6332_v54  ;;  %v688_v10 = vadd.f32 %v5990_v2, %v617_v62  ;;  %v689_v47 = vadd.f32 %v5990_v2, %v618_v24  ;;  %v6363_v29 = vpack.c.bf16 %v687_v3, %v686_v14  ;;  %v4757_v2 = vld [vmem:[%s8262_s4] sm:$0xff]  }
 0x168   :  { %4580 = vmatprep.mubr.msk.bf16.mxu0 %vm94_vm0, %v6257_v1  ;;  %4600 = vmatprep.mubr.msk.bf16.mxu1 %vm94_vm0, %v6345_v57 }
 0x169   :  { %v6367_v26 = vpack.c.bf16 %v689_v47, %v688_v10  ;;  %4616 = vmatprep.subr.bf16.mxu1 %v4757_v2  ;;  %4685 = vmatpush3.bf16.msra.mxu0 %v3082_v40 }
 0x16a   :  { %4617 = vmatpush3.bf16.msra.mxu1 %v4757_v2 }
 0x16b   :  { %4618 = vmatprep.subr.bf16.mxu1 %v4758_v35 }
 0x16e   :  { %4619 = vmatpush3.bf16.msra.mxu1 %v4758_v35 }
 0x16f   :  { %4581 = vmatmul.mubr.msk.bf16.gmra.mrb[28].mxu0 %vm94_vm0, %v6357_v56  ;;  %4601 = vmatmul.mubr.msk.bf16.gmra.mrb[16].mxu1 %vm94_vm0, %v6363_v29 }
 0x170   :  { %4604 = vmatprep.mubr.msk.bf16.mxu1 %vm94_vm0, %v6367_v26 }
 0x177   :  { %4605 = vmatmul.mubr.msk.bf16.gmra.mrb[20].mxu1 %vm94_vm0, %v6307_v21 }
 0x178   :  { %4608 = vmatprep.mubr.msk.bf16.mxu1 %vm94_vm0, %v6326_v23 }
 0x17f   :  { %4609 = vmatmul.mubr.msk.bf16.gmra.mrb[24].mxu1 %vm94_vm0, %v6334_v43 }
 0x180   :  { %4612 = vmatprep.mubr.msk.bf16.mxu1 %vm94_vm0, %v6339_v20 }
 0x187   :  { %4613 = vmatmul.mubr.msk.bf16.gmra.mrb[28].mxu1 %vm94_vm0, %v6351_v25 }
 0x188   :  { %4620 = vmatprep.mubr.msk.bf16.mxu1 %vm94_vm0, %v6014_v7 }
 0x18f   :  { %4621 = vmatmul.mubr.msk.bf16.vlgmr.msra.gmra.mrb[32].mxu1 %vm94_vm0, %v6016_v61 }
 0x190   :  { %4624 = vmatprep.mubr.msk.bf16.mxu1 %vm94_vm0, %v6022_v49 }
 0x197   :  { %4625 = vmatmul.mubr.msk.bf16.gmra.mrb[36].mxu1 %vm94_vm0, %v6050_v31 }
 0x198   :  { %4628 = vmatprep.mubr.msk.bf16.mxu1 %vm94_vm0, %v6059_v9 }
 0x19f   :  { %4629 = vmatmul.mubr.msk.bf16.gmra.mrb[40].mxu1 %vm94_vm0, %v6090_v58 }
 0x1a0   :  { %4632 = vmatprep.mubr.msk.bf16.mxu1 %vm94_vm0, %v6103_v17 }
 0x1a7   :  { %4633 = vmatmul.mubr.msk.bf16.gmra.mrb[44].mxu1 %vm94_vm0, %v6111_v30 }
 0x1a8   :  { %4636 = vmatprep.mubr.msk.bf16.mxu1 %vm94_vm0, %v6113_v13 }
 0x1af   :  { %4637 = vmatmul.mubr.msk.bf16.gmra.mrb[48].mxu1 %vm94_vm0, %v6120_v33 }
 0x1b0   :  { %4640 = vmatprep.mubr.msk.bf16.mxu1 %vm94_vm0, %v6122_v36 }
 0x1b7   :  { %4641 = vmatmul.mubr.msk.bf16.gmra.mrb[52].mxu1 %vm94_vm0, %v6243_v51 }
 0x1b8   :  { %4644 = vmatprep.mubr.msk.bf16.mxu1 %vm94_vm0, %v6248_v53 }
 0x1bf   :  { %4645 = vmatmul.mubr.msk.bf16.gmra.mrb[56].mxu1 %vm94_vm0, %v6255_v16 }
 0x1c0   :  { %4648 = vmatprep.mubr.msk.bf16.mxu1 %vm94_vm0, %v6257_v1 }
 0x1c7   :  { %4649 = vmatmul.mubr.msk.bf16.gmra.mrb[60].mxu1 %vm94_vm0, %v6357_v56 }
 0x1c8   :  { %4652 = vmatprep.mubr.msk.bf16.mxu1 %vm94_vm0, %v6179_v0 }
 0x1cf   :  { %4653 = vmatmul.mubr.msk.bf16.gmra.mrb[64].mxu1 %vm94_vm0, %v6188_v60 }
 0x1d0   :  { %4656 = vmatprep.mubr.msk.bf16.mxu1 %vm94_vm0, %v6195_v63 }
 0x1d7   :  { %4657 = vmatmul.mubr.msk.bf16.gmra.mrb[68].mxu1 %vm94_vm0, %v6228_v44 }
 0x1d8   :  { %4660 = vmatprep.mubr.msk.bf16.mxu1 %vm94_vm0, %v6234_v59 }
 0x1df   :  { %4661 = vmatmul.mubr.msk.bf16.gmra.mrb[72].mxu1 %vm94_vm0, %v6266_v42 }
 0x1e0   :  { %4664 = vmatprep.mubr.msk.bf16.mxu1 %vm94_vm0, %v6268_v5 }
 0x1e7   :  { %4665 = vmatmul.mubr.msk.bf16.gmra.mrb[76].mxu1 %vm94_vm0, %v6332_v54 }
 0x1e8   :  { %4668 = vmatprep.mubr.msk.bf16.mxu1 %vm94_vm0, %v6345_v57 }
 0x1ef   :  { %4669 = vmatmul.mubr.msk.bf16.gmra.mrb[80].mxu1 %vm94_vm0, %v6363_v29 }
 0x1f0   :  { %4672 = vmatprep.mubr.msk.bf16.mxu1 %vm94_vm0, %v6367_v26 }
 0x1f7   :  { %4673 = vmatmul.mubr.msk.bf16.gmra.mrb[84].mxu1 %vm94_vm0, %v6307_v21 }
 0x1f8   :  { %4676 = vmatprep.mubr.msk.bf16.mxu1 %vm94_vm0, %v6326_v23  ;;  %v6827_v23 = vld [vmem:[%s8264_s5] ss:$0 sm:$0xff] }
 0x1ff   :  { %4677 = vmatmul.mubr.msk.bf16.gmra.mrb[88].mxu1 %vm94_vm0, %v6334_v43 }
 0x200   :  { %4680 = vmatprep.mubr.msk.bf16.mxu1 %vm94_vm0, %v6339_v20 }
 0x207   :  { %4681 = vmatmul.mubr.msk.bf16.gmra.mrb[92].mxu1 %vm94_vm0, %v6351_v25 }
 0x20a   :  { %v6391_v18 = vpop.f32.mrb[0].mxu0 }
 0x20b   :  { %v6393_v8 = vpop.f32.mrb[1].mxu0  ;;  %v8321_v7 = vsub.f32 0.0, %v6391_v18  ;;  %v6853_v20 = vadd.f32 %v6391_v18, %v6827_v23 }
 0x20c   :  { %v6396_v12 = vpop.f32.mrb[2].mxu0  ;;  %v8320_v19 = vsub.f32 0.0, %v6393_v8 }
 0x20d   :  { %v8318_v15 = vsub.f32 0.0, %v6396_v12  ;;  %v6400_v32 = vpop.f32.mrb[3].mxu0  ;;  %v1965_v22 = vsel %vm1510_vm2, %v8321_v7, -inf }
 0x20e   :  { %v8316_v27 = vsub.f32 0.0, %v6400_v32  ;;  %1966 = vmax.xlane.f32.xlu1 %v1965_v22  ;;  %v1959_v6 = vsel %vm1510_vm2, %v8320_v19, -inf  ;;  %v6846_v43 = vadd.f32 %v6827_v23, %v6400_v32 }
 0x20f   :  { %1960 = vmax.xlane.f32.xlu0 %v1959_v6  ;;  %v1968_v4 = vsel %vm1510_vm2, %v8318_v15, -inf }
 0x210   :  { %v1962_v37 = vsel %vm1510_vm2, %v8316_v27, -inf }
 0x212   :  { %1969 = vmax.xlane.f32.xlu1 %v1968_v4  ;;  %v6415_v52 = vpop.f32.mrb[4].mxu0 }
 0x213   :  { %1963 = vmax.xlane.f32.xlu0 %v1962_v37  ;;  %v6420_v45 = vpop.f32.mrb[5].mxu0  ;;  %v8311_v11 = vsub.f32 0.0, %v6415_v52 }
 0x214   :  { %v8315_v48 = vsub.f32 0.0, %v6420_v45  ;;  %v6423_v28 = vpop.f32.mrb[6].mxu0 }
 0x215   :  { %v6425_v41 = vpop.f32.mrb[7].mxu0  ;;  %v8310_v50 = vsub.f32 0.0, %v6423_v28  ;;  %v1977_v62 = vsel %vm1510_vm2, %v8311_v11, -inf }
 0x216   :  { %v8313_v38 = vsub.f32 0.0, %v6425_v41  ;;  %v1971_v46 = vsel %vm1510_vm2, %v8315_v48, -inf }
 0x217   :  { %1972 = vmax.xlane.f32.xlu0 %v1971_v46  ;;  %v1980_v3 = vsel %vm1510_vm2, %v8310_v50, -inf }
 0x218   :  { %v1974_v55 = vsel %vm1510_vm2, %v8313_v38, -inf }
 0x219   :  { %1975 = vmax.xlane.f32.xlu1 %v1974_v55 }
 0x21a   :  { %v6440_v39 = vpop.f32.mrb[8].mxu0 }
 0x21b   :  { %1978 = vmax.xlane.f32.xlu0 %v1977_v62  ;;  %v6445_v24 = vpop.f32.mrb[9].mxu0  ;;  %v8305_v10 = vsub.f32 0.0, %v6440_v39 }
 0x21c   :  { %v8308_v61 = vsub.f32 0.0, %v6445_v24  ;;  %v6448_v14 = vpop.f32.mrb[10].mxu0 }
 0x21d   :  { %1981 = vmax.xlane.f32.xlu1 %v1980_v3  ;;  %v6453_v49 = vpop.f32.mrb[11].mxu0  ;;  %v8303_v34 = vsub.f32 0.0, %v6448_v14  ;;  %v1989_v6 = vsel %vm1510_vm2, %v8305_v10, -inf }
 0x21e   :  { %v8306_v47 = vsub.f32 0.0, %v6453_v49  ;;  %v1983_v2 = vsel %vm1510_vm2, %v8308_v61, -inf }
 0x21f   :  { %1984 = vmax.xlane.f32.xlu0 %v1983_v2  ;;  %v1992_v37 = vsel %vm1510_vm2, %v8303_v34, -inf }
 0x220   :  { %v1986_v40 = vsel %vm1510_vm2, %v8306_v47, -inf }
 0x221   :  { %1987 = vmax.xlane.f32.xlu1 %v1986_v40 }
 0x222   :  { %v6468_v22 = vpop.f32.mrb[12].mxu0  ;;  %v6483_v46 = vpop.f32.mrb[0].mxu1 }
 0x223   :  { %1990 = vmax.xlane.f32.xlu0 %v1989_v6  ;;  %v6473_v4 = vpop.f32.mrb[13].mxu0  ;;  %v8309_v55 = vsub.f32 0.0, %v6468_v22  ;;  %v6490_v2 = vpop.f32.mrb[1].mxu1  ;;  %v8365_v1 = vsub.f32 0.0, %v6483_v46 }
 0x224   :  { %v8304_v31 = vsub.f32 0.0, %v6473_v4  ;;  %v6476_v35 = vpop.f32.mrb[14].mxu0  ;;  %8500 = vst [vmem:[#allocation17_spill] sm:$0xff] %v6490_v2  ;;  %v6492_v40 = vpop.f32.mrb[2].mxu1 }
 0x225   :  { %8499 = vst [vmem:[#allocation16_spill] sm:$0xff] %v6476_v35  ;;  %1993 = vmax.xlane.f32.xlu1 %v1992_v37  ;;  %v6481_v9 = vpop.f32.mrb[15].mxu0  ;;  %v8312_v6 = vsub.f32 0.0, %v6476_v35  ;;  %v6500_v34 = vpop.f32.mrb[3].mxu1 }
 0x226   :  { %v8307_v62 = vsub.f32 0.0, %v6481_v9  ;;  %v1995_v3 = vsel %vm1510_vm2, %v8304_v31, -inf  ;;  %8501 = vst [vmem:[#allocation18_spill] sm:$0xff] %v6500_v34  ;;  %v8362_v16 = vsub.f32 0.0, %v6500_v34 }
 0x227   :  { %1996 = vmax.xlane.f32.xlu0 %v1995_v3  ;;  %v2001_v3 = vsel %vm1510_vm2, %v8309_v55, -inf }
 0x228   :  { %v1998_v37 = vsel %vm1510_vm2, %v8307_v62, -inf  ;;  %v2004_v62 = vsel %vm1510_vm2, %v8312_v6, -inf }
 0x229   :  { %1999 = vmax.xlane.f32.xlu1 %v1998_v37 }
 0x22a   :  { %v6504_v31 = vpop.f32.mrb[16].mxu0  ;;  %v6519_v37 = vpop.f32.mrb[4].mxu1 }
 0x22b   :  { %8502 = vst [vmem:[#allocation19_spill] sm:$0xff] %v6504_v31  ;;  %2002 = vmax.xlane.f32.xlu0 %v2001_v3  ;;  %v6509_v58 = vpop.f32.mrb[17].mxu0  ;;  %v8319_v61 = vsub.f32 0.0, %v6504_v31  ;;  %v6526_v50 = vpop.f32.mrb[5].mxu1  ;;  %v8372_v0 = vsub.f32 0.0, %v6519_v37 }
 0x22c   :  { %8503 = vst [vmem:[#allocation20_spill] sm:$0xff] %v6509_v58  ;;  %v8314_v10 = vsub.f32 0.0, %v6509_v58  ;;  %v6512_v47 = vpop.f32.mrb[18].mxu0  ;;  %8506 = vst [vmem:[#allocation7_spill] sm:$0xff] %v6526_v50  ;;  %v6528_v11 = vpop.f32.mrb[6].mxu1 }
 0x22d   :  { %8504 = vst [vmem:[#allocation21_spill] sm:$0xff] %v6512_v47  ;;  %2005 = vmax.xlane.f32.xlu1 %v2004_v62  ;;  %v6517_v17 = vpop.f32.mrb[19].mxu0  ;;  %v8322_v62 = vsub.f32 0.0, %v6512_v47  ;;  %v6536_v38 = vpop.f32.mrb[7].mxu1 }
 0x22e   :  { %8505 = vst [vmem:[#allocation2_spill] sm:$0xff] %v6517_v17  ;;  %v8317_v55 = vsub.f32 0.0, %v6517_v17  ;;  %v2007_v3 = vsel %vm1510_vm2, %v8314_v10, -inf  ;;  %8507 = vst [vmem:[#allocation8_spill] sm:$0xff] %v6536_v38  ;;  %v8369_v56 = vsub.f32 0.0, %v6536_v38 }
 0x22f   :  { %2008 = vmax.xlane.f32.xlu0 %v2007_v3  ;;  %v2013_v3 = vsel %vm1510_vm2, %v8319_v61, -inf }
 0x230   :  { %v2010_v6 = vsel %vm1510_vm2, %v8317_v55, -inf  ;;  %v2016_v55 = vsel %vm1510_vm2, %v8322_v62, -inf }
 0x231   :  { %2011 = vmax.xlane.f32.xlu1 %v2010_v6 }
 0x232   :  { %v6540_v10 = vpop.f32.mrb[20].mxu0  ;;  %v6555_v6 = vpop.f32.mrb[8].mxu1 }
 0x233   :  { %8508 = vst [vmem:[#allocation3_spill] sm:$0xff] %v6540_v10  ;;  %2014 = vmax.xlane.f32.xlu0 %v2013_v3  ;;  %v6545_v30 = vpop.f32.mrb[21].mxu0  ;;  %v6562_v19 = vpop.f32.mrb[9].mxu1  ;;  %v8399_v63 = vsub.f32 0.0, %v6555_v6 }
 0x234   :  { %8509 = vst [vmem:[#allocation9_spill] sm:$0xff] %v6545_v30  ;;  %v8323_v48 = vsub.f32 0.0, %v6545_v30  ;;  %v6548_v27 = vpop.f32.mrb[22].mxu0  ;;  %8512 = vst [vmem:[#allocation10_spill] sm:$0xff] %v6562_v19  ;;  %v6564_v7 = vpop.f32.mrb[10].mxu1 }
 0x235   :  { %8510 = vst [vmem:[#allocation4_spill] sm:$0xff] %v6548_v27  ;;  %2017 = vmax.xlane.f32.xlu1 %v2016_v55  ;;  %v6553_v13 = vpop.f32.mrb[23].mxu0  ;;  %v6572_v15 = vpop.f32.mrb[11].mxu1 }
 0x236   :  { %8511 = vst [vmem:[#allocation5_spill] sm:$0xff] %v6553_v13  ;;  %v8328_v61 = vsub.f32 0.0, %v6553_v13  ;;  %v2019_v3 = vsel %vm1510_vm2, %v8323_v48, -inf  ;;  %8513 = vst [vmem:[#allocation6_spill] sm:$0xff] %v6572_v15  ;;  %v8376_v60 = vsub.f32 0.0, %v6572_v15 }
 0x237   :  { %2020 = vmax.xlane.f32.xlu0 %v2019_v3  ;;  %v8515_v3 = vsub.f32 0.0, %v6540_v10 }
 0x238   :  { %v2022_v62 = vsel %vm1510_vm2, %v8328_v61, -inf  ;;  %v8518_v61 = vsub.f32 0.0, %v6548_v27 }
 0x239   :  { %2023 = vmax.xlane.f32.xlu1 %v2022_v62  ;;  %v2025_v30 = vsel %vm1510_vm2, %v8515_v3, -inf }
 0x23a   :  { %v6576_v48 = vpop.f32.mrb[24].mxu0  ;;  %v2028_v47 = vsel %vm1510_vm2, %v8518_v61, -inf  ;;  %v6591_v62 = vpop.f32.mrb[12].mxu1 }
 0x23b   :  { %8514 = vst [vmem:[#allocation11_spill] sm:$0xff] %v6576_v48  ;;  %2026 = vmax.xlane.f32.xlu0 %v2025_v30  ;;  %v6581_v33 = vpop.f32.mrb[25].mxu0  ;;  %v6598_v31 = vpop.f32.mrb[13].mxu1  ;;  %v8397_v15 = vsub.f32 0.0, %v6591_v62 }
 0x23c   :  { %8516 = vst [vmem:[#allocation12_spill] sm:$0xff] %v6581_v33  ;;  %v8337_v55 = vsub.f32 0.0, %v6581_v33  ;;  %v6584_v13 = vpop.f32.mrb[26].mxu0  ;;  %v6600_v17 = vpop.f32.mrb[14].mxu1 }
 0x23d   :  { %8517 = vst [vmem:[#allocation13_spill] sm:$0xff] %v6584_v13  ;;  %2029 = vmax.xlane.f32.xlu1 %v2028_v47  ;;  %v6589_v36 = vpop.f32.mrb[27].mxu0  ;;  %v6608_v10 = vpop.f32.mrb[15].mxu1  ;;  %v8396_v59 = vsub.f32 0.0, %v6600_v17 }
 0x23e   :  { %8519 = vst [vmem:[#allocation14_spill] sm:$0xff] %v6589_v36  ;;  %v8342_v3 = vsub.f32 0.0, %v6589_v36  ;;  %v2031_v30 = vsel %vm1510_vm2, %v8337_v55, -inf  ;;  %v8379_v44 = vsub.f32 0.0, %v6608_v10 }
 0x23f   :  { %2032 = vmax.xlane.f32.xlu0 %v2031_v30  ;;  %v8520_v30 = vsub.f32 0.0, %v6576_v48  ;;  %v2100_v42 = vsel %vm1510_vm2, %v8396_v59, -inf  ;;  %v8537_v59 = vsub.f32 0.0, %v6393_v8 }
 0x240   :  { %v2034_v47 = vsel %vm1510_vm2, %v8342_v3, -inf  ;;  %v8522_v3 = vsub.f32 0.0, %v6584_v13 }
 0x241   :  { %2035 = vmax.xlane.f32.xlu1 %v2034_v47  ;;  %v2037_v33 = vsel %vm1510_vm2, %v8520_v30, -inf }
 0x242   :  { %v6612_v55 = vpop.f32.mrb[28].mxu0  ;;  %v2040_v27 = vsel %vm1510_vm2, %v8522_v3, -inf  ;;  %v6627_v47 = vpop.f32.mrb[16].mxu1 }
 0x243   :  { %2038 = vmax.xlane.f32.xlu0 %v2037_v33  ;;  %v6617_v51 = vpop.f32.mrb[29].mxu0  ;;  %v6634_v58 = vpop.f32.mrb[17].mxu1 }
 0x244   :  { %8521 = vst [vmem:[#allocation15_spill] sm:$0xff] %v6617_v51  ;;  %v8353_v61 = vsub.f32 0.0, %v6617_v51  ;;  %v6620_v36 = vpop.f32.mrb[30].mxu0  ;;  %v6636_v35 = vpop.f32.mrb[18].mxu1 }
 0x245   :  { %2041 = vmax.xlane.f32.xlu1 %v2040_v27  ;;  %v6625_v53 = vpop.f32.mrb[31].mxu0  ;;  %v8359_v27 = vsub.f32 0.0, %v6620_v36  ;;  %v6645_v13 = vpop.f32.mrb[19].mxu1  ;;  %v8394_v5 = vsub.f32 0.0, %v6636_v35 }
 0x246   :  { %8523 = vst [vmem:[#allocation22_spill] sm:$0xff] %v6625_v53  ;;  %v8356_v30 = vsub.f32 0.0, %v6625_v53  ;;  %v2043_v33 = vsel %vm1510_vm2, %v8353_v61, -inf  ;;  %v8525_v53 = vsub.f32 0.0, %v6490_v2  ;;  %v8526_v2 = vsub.f32 0.0, %v6526_v50 }
 0x247   :  { %2044 = vmax.xlane.f32.xlu0 %v2043_v33  ;;  %v8524_v33 = vsub.f32 0.0, %v6612_v55  ;;  %v2052_v3 = vsel %vm1510_vm2, %v8359_v27, -inf  ;;  %v8527_v50 = vsub.f32 0.0, %v6562_v19  ;;  %v8528_v19 = vsub.f32 0.0, %v6598_v31 }
 0x248   :  { %v2046_v48 = vsel %vm1510_vm2, %v8356_v30, -inf  ;;  %v2055_v30 = vsel %vm1510_vm2, %v8525_v53, -inf  ;;  %v2058_v53 = vsel %vm1510_vm2, %v8362_v16, -inf  ;;  %v2067_v16 = vsel %vm1510_vm2, %v8526_v2, -inf }
 0x249   :  { %2047 = vmax.xlane.f32.xlu1 %v2046_v48  ;;  %v2049_v61 = vsel %vm1510_vm2, %v8524_v33, -inf  ;;  %v2070_v2 = vsel %vm1510_vm2, %v8369_v56, -inf  ;;  %v2079_v56 = vsel %vm1510_vm2, %v8527_v50, -inf  ;;  %v2082_v50 = vsel %vm1510_vm2, %v8376_v60, -inf }
 0x24a   :  { %v6659_v51 = vpop.f32.mrb[20].mxu1  ;;  %v2091_v60 = vsel %vm1510_vm2, %v8528_v19, -inf  ;;  %v2097_v19 = vsel %vm1510_vm2, %v8397_v15, -inf  ;;  %v2112_v54 = vsel %vm1510_vm2, %v8394_v5, -inf }
 0x24b   :  { %2050 = vmax.xlane.f32.xlu0 %v2049_v61  ;;  %v6662_v48 = vpop.f32.mrb[21].mxu1  ;;  %v8366_v61 = vsub.f32 0.0, %v6492_v40 }
 0x24c   :  { %v6664_v33 = vpop.f32.mrb[22].mxu1 }
 0x24d   :  { %2053 = vmax.xlane.f32.xlu1 %v2052_v3  ;;  %v6673_v3 = vpop.f32.mrb[23].mxu1  ;;  %v2064_v27 = vsel %vm1510_vm2, %v8366_v61, -inf  ;;  %v8392_v57 = vsub.f32 0.0, %v6664_v33 }
 0x24f   :  { %2056 = vmax.xlane.f32.xlu0 %v2055_v30  ;;  %v2061_v30 = vsel %vm1510_vm2, %v8365_v1, -inf  ;;  %v2124_v29 = vsel %vm1510_vm2, %v8392_v57, -inf }
 0x251   :  { %2059 = vmax.xlane.f32.xlu1 %v2058_v53 }
 0x252   :  { %v6687_v34 = vpop.f32.mrb[24].mxu1 }
 0x253   :  { %2062 = vmax.xlane.f32.xlu0 %v2061_v30  ;;  %v6690_v53 = vpop.f32.mrb[25].mxu1  ;;  %v8373_v30 = vsub.f32 0.0, %v6528_v11 }
 0x254   :  { %v6692_v1 = vpop.f32.mrb[26].mxu1 }
 0x255   :  { %2065 = vmax.xlane.f32.xlu1 %v2064_v27  ;;  %v6701_v27 = vpop.f32.mrb[27].mxu1  ;;  %v2076_v61 = vsel %vm1510_vm2, %v8373_v30, -inf  ;;  %v8390_v26 = vsub.f32 0.0, %v6692_v1 }
 0x257   :  { %2068 = vmax.xlane.f32.xlu0 %v2067_v16  ;;  %v2073_v16 = vsel %vm1510_vm2, %v8372_v0, -inf  ;;  %v2136_v21 = vsel %vm1510_vm2, %v8390_v26, -inf  ;;  %v6885_v26 = vadd.f32 %v6423_v28, %v6827_v23 }
 0x259   :  { %2071 = vmax.xlane.f32.xlu1 %v2070_v2  ;;  %8533 = vst [vmem:[#allocation27_spill] sm:$0xff] %v6885_v26 }
 0x25a   :  { %v6715_v38 = vpop.f32.mrb[28].mxu1 }
 0x25b   :  { %2074 = vmax.xlane.f32.xlu0 %v2073_v16  ;;  %v6718_v2 = vpop.f32.mrb[29].mxu1  ;;  %v8398_v16 = vsub.f32 0.0, %v6564_v7 }
 0x25c   :  { %v6720_v0 = vpop.f32.mrb[30].mxu1 }
 0x25d   :  { %2077 = vmax.xlane.f32.xlu1 %v2076_v61  ;;  %v6729_v61 = vpop.f32.mrb[31].mxu1  ;;  %v2088_v30 = vsel %vm1510_vm2, %v8398_v16, -inf  ;;  %v6907_v16 = vadd.f32 %v6440_v39, %v6827_v23 }
 0x25f   :  { %2080 = vmax.xlane.f32.xlu0 %v2079_v56  ;;  %v2085_v56 = vsel %vm1510_vm2, %v8399_v63, -inf  ;;  %8538 = vst [vmem:[#allocation30_spill] sm:$0xff] %v6907_v16 }
 0x261   :  { %2083 = vmax.xlane.f32.xlu1 %v2082_v50  ;;  %v8380_v50 = vsub.f32 0.0, %v6634_v58 }
 0x263   :  { %2086 = vmax.xlane.f32.xlu0 %v2085_v56  ;;  %v2094_v56 = vsel %vm1510_vm2, %v8379_v44, -inf  ;;  %v8395_v44 = vsub.f32 0.0, %v6627_v47 }
 0x265   :  { %2089 = vmax.xlane.f32.xlu1 %v2088_v30  ;;  %v8381_v30 = vsub.f32 0.0, %v6645_v13 }
 0x267   :  { %2092 = vmax.xlane.f32.xlu0 %v2091_v60  ;;  %v2103_v60 = vsel %vm1510_vm2, %v8380_v50, -inf }
 0x269   :  { %2095 = vmax.xlane.f32.xlu1 %v2094_v56  ;;  %v8382_v56 = vsub.f32 0.0, %v6662_v48 }
 0x26b   :  { %2098 = vmax.xlane.f32.xlu0 %v2097_v19  ;;  %v2106_v19 = vsel %vm1510_vm2, %v8381_v30, -inf  ;;  %v2115_v50 = vsel %vm1510_vm2, %v8382_v56, -inf  ;;  %v8393_v30 = vsub.f32 0.0, %v6659_v51 }
 0x26d   :  { %2101 = vmax.xlane.f32.xlu1 %v2100_v42  ;;  %v2109_v42 = vsel %vm1510_vm2, %v8395_v44, -inf }
 0x26f   :  { %2104 = vmax.xlane.f32.xlu0 %v2103_v60  ;;  %v8383_v60 = vsub.f32 0.0, %v6673_v3 }
 0x271   :  { %2107 = vmax.xlane.f32.xlu1 %v2106_v19  ;;  %v8384_v19 = vsub.f32 0.0, %v6690_v53 }
 0x273   :  { %2110 = vmax.xlane.f32.xlu0 %v2109_v42  ;;  %v2118_v42 = vsel %vm1510_vm2, %v8383_v60, -inf  ;;  %v2127_v56 = vsel %vm1510_vm2, %v8384_v19, -inf  ;;  %v8391_v60 = vsub.f32 0.0, %v6687_v34 }
 0x275   :  { %2113 = vmax.xlane.f32.xlu1 %v2112_v54  ;;  %v2121_v54 = vsel %vm1510_vm2, %v8393_v30, -inf  ;;  %v8536_v30 = vsub.f32 0.0, %v6391_v18  ;;  %v6913_v18 = vadd.f32 %v6448_v14, %v6827_v23 }
 0x277   :  { %2116 = vmax.xlane.f32.xlu0 %v2115_v50  ;;  %v8385_v50 = vsub.f32 0.0, %v6701_v27  ;;  %8539 = vst [vmem:[#allocation31_spill] sm:$0xff] %v6913_v18 }
 0x279   :  { %2119 = vmax.xlane.f32.xlu1 %v2118_v42  ;;  %v8389_v42 = vsub.f32 0.0, %v6718_v2 }
 0x27b   :  { %2122 = vmax.xlane.f32.xlu0 %v2121_v54  ;;  %v2130_v54 = vsel %vm1510_vm2, %v8385_v50, -inf  ;;  %v2139_v19 = vsel %vm1510_vm2, %v8389_v42, -inf  ;;  %v8387_v50 = vsub.f32 0.0, %v6715_v38  ;;  %v6879_v42 = vadd.f32 %v6415_v52, %v6827_v23 }
 0x27d   :  { %2125 = vmax.xlane.f32.xlu1 %v2124_v29  ;;  %v2133_v29 = vsel %vm1510_vm2, %v8391_v60, -inf  ;;  %8532 = vst [vmem:[#allocation26_spill] sm:$0xff] %v6879_v42  ;;  %v6891_v60 = vadd.f32 %v6827_v23, %v6445_v24 }
 0x27f   :  { %2128 = vmax.xlane.f32.xlu0 %v2127_v56  ;;  %v8386_v56 = vsub.f32 0.0, %v6729_v61  ;;  %8534 = vst [vmem:[#allocation28_spill] sm:$0xff] %v6891_v60  ;;  %v1535_v63 = vsel %vm1510_vm2, %v6891_v60, -inf }
 0x281   :  { %2131 = vmax.xlane.f32.xlu1 %v2130_v54  ;;  %v8388_v54 = vsub.f32 0.0, %v6720_v0 }
 0x283   :  { %2134 = vmax.xlane.f32.xlu0 %v2133_v29  ;;  %v2142_v29 = vsel %vm1510_vm2, %v8386_v56, -inf  ;;  %v2148_v56 = vsel %vm1510_vm2, %v8388_v54, -inf  ;;  %v1517_v54 = vsel %vm1510_vm2, %v6853_v20, -inf }
 0x285   :  { %2137 = vmax.xlane.f32.xlu1 %v2136_v21  ;;  %v6839_v21 = vadd.f32 %v6827_v23, %v6393_v8  ;;  %v8540_v8 = vsub.f32 0.0, %v6396_v12 }
 0x287   :  { %2140 = vmax.xlane.f32.xlu0 %v2139_v19  ;;  %v2145_v19 = vsel %vm1510_vm2, %v8387_v50, -inf  ;;  %v1514_v50 = vsel %vm1510_vm2, %v6846_v43, -inf }
 0x289   :  { %2143 = vmax.xlane.f32.xlu1 %v2142_v29  ;;  %v1511_v29 = vsel %vm1510_vm2, %v6839_v21, -inf }
 0x28b   :  { %2146 = vmax.xlane.f32.xlu0 %v2145_v19  ;;  %v6861_v19 = vadd.f32 %v6396_v12, %v6827_v23  ;;  %v6929_v12 = vadd.f32 %v6827_v23, %v6481_v9 }
 0x28d   :  { %2149 = vmax.xlane.f32.xlu1 %v2148_v56  ;;  %8529 = vst [vmem:[#allocation23_spill] sm:$0xff] %v6861_v19  ;;  %v6867_v56 = vadd.f32 %v6827_v23, %v6420_v45  ;;  %v1520_v25 = vsel %vm1510_vm2, %v6861_v19, -inf  ;;  %8543 = vst [vmem:[#allocation33_spill] sm:$0xff] %v6929_v12 }
 0x28f   :  { %1512 = vmax.xlane.f32.xlu0 %v1511_v29  ;;  %8530 = vst [vmem:[#allocation24_spill] sm:$0xff] %v6867_v56  ;;  %v6873_v29 = vadd.f32 %v6827_v23, %v6425_v41 }
 0x291   :  { %1515 = vmax.xlane.f32.xlu1 %v1514_v50  ;;  %8531 = vst [vmem:[#allocation25_spill] sm:$0xff] %v6873_v29  ;;  %v1523_v50 = vsel %vm1510_vm2, %v6867_v56, -inf }
 0x293   :  { %1518 = vmax.xlane.f32.xlu0 %v1517_v54  ;;  %v1526_v54 = vsel %vm1510_vm2, %v6873_v29, -inf }
 0x295   :  { %1521 = vmax.xlane.f32.xlu1 %v1520_v25  ;;  %v1529_v25 = vsel %vm1510_vm2, %v6879_v42, -inf }
 0x297   :  { %1524 = vmax.xlane.f32.xlu0 %v1523_v50  ;;  %v6897_v50 = vadd.f32 %v6827_v23, %v6453_v49 }
 0x299   :  { %1527 = vmax.xlane.f32.xlu1 %v1526_v54  ;;  %8535 = vst [vmem:[#allocation29_spill] sm:$0xff] %v6897_v50  ;;  %v1532_v54 = vsel %vm1510_vm2, %v6885_v26, -inf }
 0x29b   :  { %v1967_v57 = vpop.xlane.xlu1 %1966  ;;  %1530 = vmax.xlane.f32.xlu0 %v1529_v25 }
 0x29c   :  { %v2153_v5 = vsub.f32 %v8536_v30, %v1967_v57  ;;  %v1961_v44 = vpop.xlane.xlu0 %1960  ;;  %v1538_v30 = vsel %vm1510_vm2, %v6897_v50, -inf }
 0x29d   :  { %v2151_v15 = vsub.f32 %v8537_v59, %v1961_v44  ;;  %1533 = vmax.xlane.f32.xlu1 %v1532_v54  ;;  %v1541_v54 = vsel %vm1510_vm2, %v6907_v16, -inf }
 0x29e   :  { %v2219_v25 = vmul.f32 1.442695, %v2153_v5  ;;  %v8541_v5 = vsub.f32 0.0, %v6400_v32  ;;  %v1544_v32 = vsel %vm1510_vm2, %v6913_v18, -inf }
 0x29f   :  { %v2215_v42 = vmul.f32 1.442695, %v2151_v15  ;;  %v1970_v29 = vpop.xlane.xlu1 %1969  ;;  %1536 = vmax.xlane.f32.xlu0 %v1535_v63  ;;  %v6923_v15 = vadd.f32 %v6827_v23, %v6473_v4 }
 0x2a0   :  { %4761 = vpow2.f32 %v2219_v25  ;;  %v2154_v44 = vsub.f32 %v8540_v8, %v1970_v29  ;;  %v1964_v59 = vpop.xlane.xlu0 %1963  ;;  %v8544_v29 = vsub.f32 0.0, %v6420_v45 }
 0x2a1   :  { %4763 = vpow2.f32 %v2215_v42  ;;  %v2152_v57 = vsub.f32 %v8541_v5, %v1964_v59  ;;  %1539 = vmax.xlane.f32.xlu1 %v1538_v30  ;;  %8542 = vst [vmem:[#allocation32_spill] sm:$0xff] %v6923_v15  ;;  %v1547_v30 = vsel %vm1510_vm2, %v6923_v15, -inf }
 0x2a2   :  { %v2221_v63 = vmul.f32 1.442695, %v2154_v44  ;;  %v6937_v44 = vadd.f32 %v6468_v22, %v6827_v23 }
 0x2a3   :  { %v2217_v25 = vmul.f32 1.442695, %v2152_v57  ;;  %1542 = vmax.xlane.f32.xlu0 %v1541_v54  ;;  %v8546_v57 = vsub.f32 0.0, %v6425_v41  ;;  %v8547_v54 = vld [vmem:[#allocation16_spill] sm:$0xff] }
 0x2a4   :  { %4765 = vpow2.f32 %v2221_v63  ;;  %v1973_v42 = vpop.xlane.xlu0 %1972  ;;  %8545 = vst [vmem:[#allocation34_spill] sm:$0xff] %v6937_v44 }
 0x2a5   :  { %4767 = vpow2.f32 %v2217_v25  ;;  %v2155_v8 = vsub.f32 %v8544_v29, %v1973_v42  ;;  %1545 = vmax.xlane.f32.xlu1 %v1544_v32  ;;  %v6945_v25 = vadd.f32 %v8547_v54, %v6827_v23  ;;  %v1550_v42 = vsel %vm1510_vm2, %v6929_v12, -inf }
 0x2a6   :  { %v1976_v59 = vpop.xlane.xlu1 %1975  ;;  %v8549_v29 = vsub.f32 0.0, %v6415_v52  ;;  %v8552_v52 = vld [vmem:[#allocation2_spill] sm:$0xff] }
 0x2a7   :  { %v2223_v5 = vmul.f32 1.442695, %v2155_v8  ;;  %v2156_v63 = vsub.f32 %v8546_v57, %v1976_v59  ;;  %1548 = vmax.xlane.f32.xlu0 %v1547_v30  ;;  %8548 = vst [vmem:[#allocation16_spill] sm:$0xff] %v6945_v25  ;;  %v8550_v8 = vld [vmem:[#allocation20_spill] sm:$0xff]  ;;  %v1553_v30 = vsel %vm1510_vm2, %v6937_v44, -inf  ;;  %v1556_v50 = vsel %vm1510_vm2, %v6945_v25, -inf }
 0x2a8   :  { %v1979_v45 = vpop.xlane.xlu0 %1978  ;;  %v6953_v41 = vadd.f32 %v6827_v23, %v8550_v8  ;;  %v8559_v44 = vsub.f32 0.0, %v6453_v49 }
 0x2a9   :  { %4769 = vpow2.f32 %v2223_v5  ;;  %v2225_v32 = vmul.f32 1.442695, %v2156_v63  ;;  %v2157_v18 = vsub.f32 %v8549_v29, %v1979_v45  ;;  %1551 = vmax.xlane.f32.xlu1 %v1550_v42  ;;  %v8551_v5 = vsub.f32 0.0, %v6423_v28 }
 0x2aa   :  { %v4762_v15 = vpop.eup %4761  ;;  %v1982_v59 = vpop.xlane.xlu1 %1981  ;;  %v6961_v45 = vadd.f32 %v6827_v23, %v8552_v52  ;;  %v8554_v28 = vsub.f32 0.0, %v6445_v24 }
 0x2ab   :  { %v4764_v57 = vpop.eup %4763  ;;  %v4130_v16 = vpack.c.bf16 %v4762_v15, %v4762_v15  ;;  %4771 = vpow2.f32 %v2225_v32  ;;  %v2227_v12 = vmul.f32 1.442695, %v2157_v18  ;;  %v2158_v63 = vsub.f32 %v8551_v5, %v1982_v59  ;;  %1554 = vmax.xlane.f32.xlu0 %v1553_v30  ;;  %v8555_v30 = vld [vmem:[#allocation19_spill] sm:$0xff] }
 0x2ac   :  { %8553 = vst [vmem:[#allocation20_spill] sm:$0xff] %v6961_v45  ;;  %v4128_v42 = vpack.c.bf16 %v4764_v57, %v4764_v57  ;;  %v1985_v29 = vpop.xlane.xlu0 %1984  ;;  %v6973_v5 = vadd.f32 %v8555_v30, %v6827_v23 }
 0x2ad   :  { %2922 = vst.msk [vmem:[%s8265_s8 + $0x8] sm:$0xf] %vm2599_vm3, %v4130_v16  ;;  %4773 = vpow2.f32 %v2227_v12  ;;  %v2229_v18 = vmul.f32 1.442695, %v2158_v63  ;;  %v2159_v32 = vsub.f32 %v8554_v28, %v1985_v29  ;;  %1557 = vmax.xlane.f32.xlu1 %v1556_v50  ;;  %v1559_v16 = vsel %vm1510_vm2, %v6953_v41, -inf  ;;  %v8557_v63 = vld [vmem:[#allocation21_spill] sm:$0xff] }
 0x2ae   :  { %v4766_v59 = vpop.eup %4765  ;;  %8556 = vst [vmem:[#allocation2_spill] sm:$0xff] %v6973_v5  ;;  %2920 = vst.msk [vmem:[%s8265_s8] sm:$0xf] %vm2599_vm3, %v4128_v42  ;;  %v1988_v25 = vpop.xlane.xlu1 %1987  ;;  %v6983_v24 = vadd.f32 %v8557_v63, %v6827_v23  ;;  %v1562_v42 = vsel %vm1510_vm2, %v6961_v45, -inf }
 0x2af   :  { %v4768_v12 = vpop.eup %4767  ;;  %v4131_v50 = vpack.c.bf16 %v4766_v59, %v4766_v59  ;;  %4775 = vpow2.f32 %v2229_v18  ;;  %v2231_v29 = vmul.f32 1.442695, %v2159_v32  ;;  %1560 = vmax.xlane.f32.xlu0 %v1559_v16  ;;  %v2160_v60 = vsub.f32 %v8559_v44, %v1988_v25  ;;  %v8561_v16 = vld [vmem:[#allocation9_spill] sm:$0xff] }
 0x2b0   :  { %8558 = vst [vmem:[#allocation19_spill] sm:$0xff] %v6983_v24  ;;  %v4129_v28 = vpack.c.bf16 %v4768_v12, %v4768_v12  ;;  %v1991_v26 = vpop.xlane.xlu0 %1990  ;;  %v2664_v56 = vpack.c.bf16 %v4768_v12, %v4764_v57  ;;  %v2665_v19 = vpack.c.bf16 %v4766_v59, %v4762_v15  ;;  %v8560_v18 = vsub.f32 0.0, %v6440_v39  ;;  %v8564_v12 = vld [vmem:[#allocation5_spill] sm:$0xff] }
 0x2b1   :  { %2923 = vst.msk [vmem:[%s8265_s8 + $0xc] sm:$0xf] %vm2599_vm3, %v4131_v50  ;;  %4777 = vpow2.f32 %v2231_v29  ;;  %1563 = vmax.xlane.f32.xlu1 %v1562_v42  ;;  %v6997_v49 = vadd.f32 %v6827_v23, %v8561_v16  ;;  %v2233_v15 = vmul.f32 1.442695, %v2160_v60  ;;  %v1565_v25 = vsel %vm1510_vm2, %v6973_v5, -inf }
 0x2b2   :  { %v2161_v32 = vsub.f32 %v8560_v18, %v1991_v26  ;;  %2921 = vst.msk [vmem:[%s8265_s8 + $0x4] sm:$0xf] %vm2599_vm3, %v4129_v28  ;;  %4686 = vmatprep.mubr.msk.bf16.mxu0 %vm1510_vm2, %v2664_v56  ;;  %v1994_v44 = vpop.xlane.xlu1 %1993  ;;  %v8563_v26 = vsub.f32 0.0, %v6448_v14  ;;  %v7011_v50 = vadd.f32 %v6827_v23, %v8564_v12  ;;  %v1568_v56 = vsel %vm1510_vm2, %v6983_v24, -inf }
 0x2b3   :  { %8562 = vst [vmem:[#allocation21_spill] sm:$0xff] %v6997_v49  ;;  %v4770_v57 = vpop.eup %4769  ;;  %4687 = vmatmul.mubr.msk.bf16.vlgmr.msra.gmra.mrb[32].mxu0 %vm1510_vm2, %v2665_v19  ;;  %1566 = vmax.xlane.f32.xlu0 %v1565_v25  ;;  %4779 = vpow2.f32 %v2233_v15  ;;  %v8566_v18 = vsub.f32 0.0, %v6473_v4  ;;  %v8567_v19 = vld [vmem:[#allocation3_spill] sm:$0xff]  ;;  %v1571_v25 = vsel %vm1510_vm2, %v6997_v49, -inf }
 0x2b4   :  { %v2235_v39 = vmul.f32 1.442695, %v2161_v32  ;;  %v2162_v59 = vsub.f32 %v8563_v26, %v1994_v44  ;;  %8565 = vst [vmem:[#allocation9_spill] sm:$0xff] %v7011_v50  ;;  %v4132_v29 = vpack.c.bf16 %v4770_v57, %v4770_v57  ;;  %v1997_v60 = vpop.xlane.xlu0 %1996  ;;  %v7019_v32 = vadd.f32 %v8567_v19, %v6827_v23 }
 0x2b5   :  { %v4772_v28 = vpop.eup %4771  ;;  %v2163_v14 = vsub.f32 %v8566_v18, %v1997_v60  ;;  %1569 = vmax.xlane.f32.xlu1 %v1568_v56  ;;  %v8570_v56 = vld [vmem:[#allocation4_spill] sm:$0xff] }
 0x2b6   :  { %4781 = vpow2.f32 %v2235_v39  ;;  %v2237_v42 = vmul.f32 1.442695, %v2162_v59  ;;  %8568 = vst [vmem:[#allocation5_spill] sm:$0xff] %v7019_v32  ;;  %2924 = vst.msk [vmem:[%s8265_s8 + $0x10] sm:$0xf] %vm2599_vm3, %v4132_v29  ;;  %v4133_v15 = vpack.c.bf16 %v4772_v28, %v4772_v28  ;;  %v2000_v44 = vpop.xlane.xlu1 %1999  ;;  %v2666_v39 = vpack.c.bf16 %v4772_v28, %v4770_v57 }
 0x2b7   :  { %v4774_v26 = vpop.eup %4773  ;;  %v2239_v4 = vmul.f32 1.442695, %v2163_v14  ;;  %v8569_v59 = vsub.f32 0.0, %v6481_v9  ;;  %1572 = vmax.xlane.f32.xlu0 %v1571_v25  ;;  %v7031_v18 = vadd.f32 %v8570_v56, %v6827_v23  ;;  %v1574_v28 = vsel %vm1510_vm2, %v7011_v50, -inf  ;;  %v8573_v25 = vld [vmem:[#allocation12_spill] sm:$0xff] }
 0x2b8   :  { %4783 = vpow2.f32 %v2237_v42  ;;  %2925 = vst.msk [vmem:[%s8265_s8 + $0x14] sm:$0xf] %vm2599_vm3, %v4133_v15  ;;  %v4134_v29 = vpack.c.bf16 %v4774_v26, %v4774_v26  ;;  %4690 = vmatprep.mubr.msk.bf16.mxu0 %vm1510_vm2, %v2666_v39  ;;  %v2003_v57 = vpop.xlane.xlu0 %2002  ;;  %v8572_v14 = vsub.f32 0.0, %v6468_v22  ;;  %v1577_v50 = vsel %vm1510_vm2, %v7019_v32, -inf }
 0x2b9   :  { %v2164_v60 = vsub.f32 %v8569_v59, %v2000_v44  ;;  %8571 = vst [vmem:[#allocation3_spill] sm:$0xff] %v7031_v18  ;;  %v4776_v42 = vpop.eup %4775  ;;  %4785 = vpow2.f32 %v2239_v4  ;;  %1575 = vmax.xlane.f32.xlu1 %v1574_v28  ;;  %v7044_v59 = vadd.f32 %v6827_v23, %v8573_v25 }
 0x2ba   :  { %v2165_v44 = vsub.f32 %v8572_v14, %v2003_v57  ;;  %2926 = vst.msk [vmem:[%s8265_s8 + $0x18] sm:$0xf] %vm2599_vm3, %v4134_v29  ;;  %v4135_v15 = vpack.c.bf16 %v4776_v42, %v4776_v42  ;;  %v2006_v39 = vpop.xlane.xlu1 %2005  ;;  %v2667_v4 = vpack.c.bf16 %v4776_v42, %v4774_v26  ;;  %v8574_v57 = vsub.f32 0.0, %v8547_v54  ;;  %v8575_v14 = vld [vmem:[#allocation14_spill] sm:$0xff] }
 0x2bb   :  { %v2241_v9 = vmul.f32 1.442695, %v2164_v60  ;;  %v4778_v60 = vpop.eup %4777  ;;  %1578 = vmax.xlane.f32.xlu0 %v1577_v50  ;;  %v7056_v49 = vadd.f32 %v6827_v23, %v8575_v14  ;;  %v1580_v42 = vsel %vm1510_vm2, %v7031_v18, -inf  ;;  %v8576_v50 = vsub.f32 0.0, %v8550_v8 }
 0x2bc   :  { %v2243_v22 = vmul.f32 1.442695, %v2165_v44  ;;  %v2166_v28 = vsub.f32 %v8574_v57, %v2006_v39  ;;  %2927 = vst.msk [vmem:[%s8265_s8 + $0x1c] sm:$0xf] %vm2599_vm3, %v4135_v15  ;;  %v4136_v29 = vpack.c.bf16 %v4778_v60, %v4778_v60  ;;  %4691 = vmatmul.mubr.msk.bf16.gmra.mrb[36].mxu0 %vm1510_vm2, %v2667_v4  ;;  %v2009_v26 = vpop.xlane.xlu0 %2008  ;;  %v8577_v39 = vld [vmem:[#allocation11_spill] sm:$0xff]  ;;  %v1583_v4 = vsel %vm1510_vm2, %v7044_v59, -inf }
 0x2bd   :  { %4787 = vpow2.f32 %v2241_v9  ;;  %v2167_v9 = vsub.f32 %v8576_v50, %v2009_v26  ;;  %1581 = vmax.xlane.f32.xlu1 %v1580_v42  ;;  %v4780_v44 = vpop.eup %4779  ;;  %v7069_v57 = vadd.f32 %v8577_v39, %v6827_v23  ;;  %v8578_v26 = vsub.f32 0.0, %v8552_v52  ;;  %v8579_v50 = vld [vmem:[#allocation13_spill] sm:$0xff] }
 0x2be   :  { %4789 = vpow2.f32 %v2243_v22  ;;  %v2245_v54 = vmul.f32 1.442695, %v2166_v28  ;;  %2928 = vst.msk [vmem:[%s8265_s8 + $0x20] sm:$0xf] %vm2599_vm3, %v4136_v29  ;;  %v2012_v15 = vpop.xlane.xlu1 %2011  ;;  %v4137_v28 = vpack.c.bf16 %v4780_v44, %v4780_v44  ;;  %v7081_v18 = vadd.f32 %v8579_v50, %v6827_v23 }
 0x2bf   :  { %v2247_v8 = vmul.f32 1.442695, %v2167_v9  ;;  %v2168_v42 = vsub.f32 %v8578_v26, %v2012_v15  ;;  %1584 = vmax.xlane.f32.xlu0 %v1583_v4  ;;  %v2668_v24 = vpack.c.bf16 %v4780_v44, %v4778_v60  ;;  %v1586_v29 = vsel %vm1510_vm2, %v7056_v49, -inf  ;;  %v8581_v15 = vld [vmem:[#allocation15_spill] sm:$0xff] }
 0x2c0   :  { %v4782_v22 = vpop.eup %4781  ;;  %4791 = vpow2.f32 %v2245_v54  ;;  %v2015_v5 = vpop.xlane.xlu0 %2014  ;;  %2929 = vst.msk [vmem:[%s8265_s8 + $0x24] sm:$0xf] %vm2599_vm3, %v4137_v28  ;;  %v8580_v54 = vsub.f32 0.0, %v8555_v30  ;;  %v7093_v4 = vadd.f32 %v6827_v23, %v8581_v15  ;;  %v1589_v28 = vsel %vm1510_vm2, %v7069_v57, -inf }
 0x2c1   :  { %v4138_v32 = vpack.c.bf16 %v4782_v22, %v4782_v22  ;;  %4793 = vpow2.f32 %v2247_v8  ;;  %v2249_v52 = vmul.f32 1.442695, %v2168_v42  ;;  %1587 = vmax.xlane.f32.xlu1 %v1586_v29  ;;  %4694 = vmatprep.mubr.msk.bf16.mxu0 %vm1510_vm2, %v2668_v24  ;;  %v8582_v26 = vsub.f32 0.0, %v8557_v63 }
 0x2c2   :  { %v4784_v45 = vpop.eup %4783  ;;  %v2169_v9 = vsub.f32 %v8580_v54, %v2015_v5  ;;  %v2018_v44 = vpop.xlane.xlu1 %2017  ;;  %v7106_v29 = vadd.f32 %v6620_v36, %v6827_v23 }
 0x2c3   :  { %2930 = vst.msk [vmem:[%s8265_s8 + $0x28] sm:$0xf] %vm2599_vm3, %v4138_v32  ;;  %v4139_v60 = vpack.c.bf16 %v4784_v45, %v4784_v45  ;;  %v2669_v8 = vpack.c.bf16 %v4784_v45, %v4782_v22  ;;  %v4786_v30 = vpop.eup %4785  ;;  %4795 = vpow2.f32 %v2249_v52  ;;  %v2170_v42 = vsub.f32 %v8582_v26, %v2018_v44  ;;  %1590 = vmax.xlane.f32.xlu0 %v1589_v28 }
 0x2c4   :  { %v2251_v5 = vmul.f32 1.442695, %v2169_v9  ;;  %v4140_v24 = vpack.c.bf16 %v4786_v30, %v4786_v30  ;;  %v2021_v45 = vpop.xlane.xlu0 %2020  ;;  %v1592_v32 = vsel %vm1510_vm2, %v7081_v18, -inf  ;;  %v8583_v52 = vsub.f32 0.0, %v8561_v16 }
 0x2c5   :  { %2931 = vst.msk [vmem:[%s8265_s8 + $0x2c] sm:$0xf] %vm2599_vm3, %v4139_v60  ;;  %4695 = vmatmul.mubr.msk.bf16.gmra.mrb[40].mxu0 %vm1510_vm2, %v2669_v8  ;;  %v2253_v63 = vmul.f32 1.442695, %v2170_v42  ;;  %1593 = vmax.xlane.f32.xlu1 %v1592_v32  ;;  %v7119_v9 = vadd.f32 %v6612_v55, %v6827_v23  ;;  %v1595_v28 = vsel %vm1510_vm2, %v7093_v4, -inf  ;;  %v8584_v26 = vsub.f32 0.0, %v8564_v12 }
 0x2c6   :  { %4797 = vpow2.f32 %v2251_v5  ;;  %v2171_v54 = vsub.f32 %v8583_v52, %v2021_v45  ;;  %2932 = vst.msk [vmem:[%s8265_s8 + $0x30] sm:$0xf] %vm2599_vm3, %v4140_v24  ;;  %v2024_v44 = vpop.xlane.xlu1 %2023  ;;  %v8585_v45 = vld [vmem:[#allocation18_spill] sm:$0xff]  ;;  %v8587_v52 = vsub.f32 0.0, %v8567_v19 }
 0x2c7   :  { %v4788_v22 = vpop.eup %4787  ;;  %4799 = vpow2.f32 %v2253_v63  ;;  %v2172_v42 = vsub.f32 %v8584_v26, %v2024_v44  ;;  %1596 = vmax.xlane.f32.xlu0 %v1595_v28  ;;  %v7131_v32 = vadd.f32 %v6827_v23, %v8585_v45  ;;  %v8588_v44 = vld [vmem:[#allocation17_spill] sm:$0xff]  ;;  %v1601_v26 = vsel %vm1510_vm2, %v7119_v9, -inf }
 0x2c8   :  { %v4141_v60 = vpack.c.bf16 %v4788_v22, %v4788_v22  ;;  %v2670_v8 = vpack.c.bf16 %v4788_v22, %v4786_v30  ;;  %v4790_v5 = vpop.eup %4789  ;;  %v2255_v16 = vmul.f32 1.442695, %v2171_v54  ;;  %v2027_v30 = vpop.xlane.xlu0 %2026  ;;  %v1604_v22 = vsel %vm1510_vm2, %v7106_v29, -inf }
 0x2c9   :  { %8586 = vst [vmem:[#allocation4_spill] sm:$0xff] %v7131_v32  ;;  %v4142_v24 = vpack.c.bf16 %v4790_v5, %v4790_v5  ;;  %v2257_v12 = vmul.f32 1.442695, %v2172_v42  ;;  %v2173_v54 = vsub.f32 %v8587_v52, %v2027_v30  ;;  %1605 = vmax.xlane.f32.xlu1 %v1604_v22  ;;  %v7144_v28 = vadd.f32 %v6827_v23, %v8588_v44 }
 0x2ca   :  { %2933 = vst.msk [vmem:[%s8265_s8 + $0x34] sm:$0xf] %vm2599_vm3, %v4141_v60  ;;  %4698 = vmatprep.mubr.msk.bf16.mxu0 %vm1510_vm2, %v2670_v8  ;;  %v4792_v63 = vpop.eup %4791  ;;  %4801 = vpow2.f32 %v2255_v16  ;;  %v2030_v8 = vpop.xlane.xlu1 %2029  ;;  %v8589_v30 = vsub.f32 0.0, %v8570_v56  ;;  %v7156_v52 = vadd.f32 %v6492_v40, %v6827_v23 }
 0x2cb   :  { %2934 = vst.msk [vmem:[%s8265_s8 + $0x38] sm:$0xf] %vm2599_vm3, %v4142_v24  ;;  %v4143_v60 = vpack.c.bf16 %v4792_v63, %v4792_v63  ;;  %v2671_v16 = vpack.c.bf16 %v4792_v63, %v4790_v5  ;;  %v4794_v42 = vpop.eup %4793  ;;  %4803 = vpow2.f32 %v2257_v12  ;;  %v2259_v19 = vmul.f32 1.442695, %v2173_v54  ;;  %1602 = vmax.xlane.f32.xlu0 %v1601_v26 }
 0x2cc   :  { %v2174_v22 = vsub.f32 %v8589_v30, %v2030_v8  ;;  %8590 = vst [vmem:[#allocation12_spill] sm:$0xff] %v7156_v52  ;;  %v4144_v24 = vpack.c.bf16 %v4794_v42, %v4794_v42  ;;  %v2033_v5 = vpop.xlane.xlu0 %2032  ;;  %v1610_v63 = vsel %vm1510_vm2, %v7131_v32, -inf  ;;  %v8591_v54 = vsub.f32 0.0, %v8573_v25 }
 0x2cd   :  { %2935 = vst.msk [vmem:[%s8265_s8 + $0x3c] sm:$0xf] %vm2599_vm3, %v4143_v60  ;;  %4699 = vmatmul.mubr.msk.bf16.gmra.mrb[44].mxu0 %vm1510_vm2, %v2671_v16  ;;  %v4796_v12 = vpop.eup %4795  ;;  %4805 = vpow2.f32 %v2259_v19  ;;  %1611 = vmax.xlane.f32.xlu1 %v1610_v63  ;;  %v7169_v26 = vadd.f32 %v6483_v46, %v6827_v23  ;;  %v1607_v30 = vsel %vm1510_vm2, %v7144_v28, -inf }
 0x2ce   :  { %v2261_v56 = vmul.f32 1.442695, %v2174_v22  ;;  %v2175_v8 = vsub.f32 %v8591_v54, %v2033_v5  ;;  %2936 = vst.msk [vmem:[%s8265_s8 + $0x40] sm:$0xf] %vm2599_vm3, %v4144_v24  ;;  %v4145_v60 = vpack.c.bf16 %v4796_v12, %v4796_v12  ;;  %v2036_v16 = vpop.xlane.xlu1 %2035  ;;  %v2672_v19 = vpack.c.bf16 %v4796_v12, %v4794_v42  ;;  %v8594_v54 = vld [vmem:[#allocation8_spill] sm:$0xff] }
 0x2cf   :  { %8592 = vst [vmem:[#allocation14_spill] sm:$0xff] %v7169_v26  ;;  %v8593_v5 = vsub.f32 0.0, %v8575_v14  ;;  %1608 = vmax.xlane.f32.xlu0 %v1607_v30  ;;  %v7181_v32 = vadd.f32 %v6827_v23, %v8594_v54  ;;  %v1616_v12 = vsel %vm1510_vm2, %v7156_v52, -inf  ;;  %v8597_v30 = vld [vmem:[#allocation7_spill] sm:$0xff]  ;;  %v1613_v52 = vsel %vm1510_vm2, %v7169_v26, -inf }
 0x2d0   :  { %v4798_v22 = vpop.eup %4797  ;;  %4807 = vpow2.f32 %v2261_v56  ;;  %v2263_v25 = vmul.f32 1.442695, %v2175_v8  ;;  %2937 = vst.msk [vmem:[%s8265_s8 + $0x44] sm:$0xf] %vm2599_vm3, %v4145_v60  ;;  %4702 = vmatprep.mubr.msk.bf16.mxu0 %vm1510_vm2, %v2672_v19  ;;  %v2039_v42 = vpop.xlane.xlu0 %2038  ;;  %v8596_v8 = vsub.f32 0.0, %v8577_v39 }
 0x2d1   :  { %v2176_v63 = vsub.f32 %v8593_v5, %v2036_v16  ;;  %8595 = vst [vmem:[#allocation11_spill] sm:$0xff] %v7181_v32  ;;  %v4146_v24 = vpack.c.bf16 %v4798_v22, %v4798_v22  ;;  %v4800_v56 = vpop.eup %4799  ;;  %1617 = vmax.xlane.f32.xlu1 %v1616_v12  ;;  %v7194_v5 = vadd.f32 %v6827_v23, %v8597_v30 }
 0x2d2   :  { %4809 = vpow2.f32 %v2263_v25  ;;  %v2177_v16 = vsub.f32 %v8596_v8, %v2039_v42  ;;  %v4147_v60 = vpack.c.bf16 %v4800_v56, %v4800_v56  ;;  %v2042_v19 = vpop.xlane.xlu1 %2041  ;;  %v2673_v25 = vpack.c.bf16 %v4800_v56, %v4798_v22 }
 0x2d3   :  { %v2265_v14 = vmul.f32 1.442695, %v2176_v63  ;;  %8598 = vst [vmem:[#allocation13_spill] sm:$0xff] %v7194_v5  ;;  %2938 = vst.msk [vmem:[%s8265_s8 + $0x48] sm:$0xf] %vm2599_vm3, %v4146_v24  ;;  %v8599_v42 = vsub.f32 0.0, %v8579_v50  ;;  %1614 = vmax.xlane.f32.xlu0 %v1613_v52  ;;  %v7206_v8 = vadd.f32 %v6528_v11, %v6827_v23 }
 0x2d4   :  { %v4802_v63 = vpop.eup %4801  ;;  %v2267_v39 = vmul.f32 1.442695, %v2177_v16  ;;  %2939 = vst.msk [vmem:[%s8265_s8 + $0x4c] sm:$0xf] %vm2599_vm3, %v4147_v60  ;;  %v2045_v22 = vpop.xlane.xlu0 %2044  ;;  %v1622_v56 = vsel %vm1510_vm2, %v7181_v32, -inf  ;;  %v8601_v52 = vsub.f32 0.0, %v8581_v15 }
 0x2d5   :  { %4811 = vpow2.f32 %v2265_v14  ;;  %v2178_v12 = vsub.f32 %v8599_v42, %v2042_v19  ;;  %8600 = vst [vmem:[#allocation15_spill] sm:$0xff] %v7206_v8  ;;  %v4148_v24 = vpack.c.bf16 %v4802_v63, %v4802_v63  ;;  %4703 = vmatmul.mubr.msk.bf16.gmra.mrb[48].mxu0 %vm1510_vm2, %v2673_v25  ;;  %v4804_v14 = vpop.eup %4803  ;;  %1623 = vmax.xlane.f32.xlu1 %v1622_v56  ;;  %v1619_v42 = vsel %vm1510_vm2, %v7194_v5, -inf  ;;  %v8604_v32 = vld [vmem:[#allocation6_spill] sm:$0xff] }
 0x2d6   :  { %4813 = vpow2.f32 %v2267_v39  ;;  %v2179_v16 = vsub.f32 %v8601_v52, %v2045_v22  ;;  %v7219_v19 = vadd.f32 %v6519_v37, %v6827_v23  ;;  %v4149_v60 = vpack.c.bf16 %v4804_v14, %v4804_v14  ;;  %v2048_v25 = vpop.xlane.xlu1 %2047  ;;  %v8602_v22 = vld [vmem:[#allocation22_spill] sm:$0xff] }
 0x2d7   :  { %v2269_v50 = vmul.f32 1.442695, %v2178_v12  ;;  %2940 = vst.msk [vmem:[%s8265_s8 + $0x50] sm:$0xf] %vm2599_vm3, %v4148_v24  ;;  %v2674_v39 = vpack.c.bf16 %v4804_v14, %v4802_v63  ;;  %v4806_v12 = vpop.eup %4805  ;;  %v8603_v56 = vsub.f32 0.0, %v8602_v22  ;;  %1620 = vmax.xlane.f32.xlu0 %v1619_v42  ;;  %v7231_v26 = vadd.f32 %v6827_v23, %v8604_v32 }
 0x2d8   :  { %v2271_v15 = vmul.f32 1.442695, %v2179_v16  ;;  %2941 = vst.msk [vmem:[%s8265_s8 + $0x54] sm:$0xf] %vm2599_vm3, %v4149_v60  ;;  %v4150_v24 = vpack.c.bf16 %v4806_v12, %v4806_v12  ;;  %v2051_v63 = vpop.xlane.xlu0 %2050  ;;  %v1628_v14 = vsel %vm1510_vm2, %v7206_v8, -inf  ;;  %v1625_v8 = vsel %vm1510_vm2, %v7219_v19, -inf }
 0x2d9   :  { %4815 = vpow2.f32 %v2269_v50  ;;  %v2180_v52 = vsub.f32 %v8603_v56, %v2048_v25  ;;  %4706 = vmatprep.mubr.msk.bf16.mxu0 %vm1510_vm2, %v2674_v39  ;;  %v8605_v25 = vsub.f32 0.0, %v6612_v55  ;;  %1629 = vmax.xlane.f32.xlu1 %v1628_v14  ;;  %v8606_v56 = vld [vmem:[#allocation10_spill] sm:$0xff] }
 0x2da   :  { %v4808_v50 = vpop.eup %4807  ;;  %4817 = vpow2.f32 %v2271_v15  ;;  %v7244_v5 = vadd.f32 %v6827_v23, %v8606_v56  ;;  %2942 = vst.msk [vmem:[%s8265_s8 + $0x58] sm:$0xf] %vm2599_vm3, %v4150_v24  ;;  %v2054_v39 = vpop.xlane.xlu1 %2053 }
 0x2db   :  { %v2273_v16 = vmul.f32 1.442695, %v2180_v52  ;;  %v2181_v42 = vsub.f32 %v8605_v25, %v2051_v63  ;;  %v4151_v60 = vpack.c.bf16 %v4808_v50, %v4808_v50  ;;  %v2675_v15 = vpack.c.bf16 %v4808_v50, %v4806_v12  ;;  %1626 = vmax.xlane.f32.xlu0 %v1625_v8 }
 0x2dc   :  { %v4810_v52 = vpop.eup %4809  ;;  %v8607_v63 = vsub.f32 0.0, %v6620_v36  ;;  %v7256_v25 = vadd.f32 %v6564_v7, %v6827_v23  ;;  %v2057_v12 = vpop.xlane.xlu0 %2056  ;;  %v1634_v50 = vsel %vm1510_vm2, %v7231_v26, -inf  ;;  %v8608_v8 = vsub.f32 0.0, %v8588_v44 }
 0x2dd   :  { %4819 = vpow2.f32 %v2273_v16  ;;  %v2275_v55 = vmul.f32 1.442695, %v2181_v42  ;;  %2943 = vst.msk [vmem:[%s8265_s8 + $0x5c] sm:$0xf] %vm2599_vm3, %v4151_v60  ;;  %v4152_v24 = vpack.c.bf16 %v4810_v52, %v4810_v52  ;;  %4707 = vmatmul.mubr.msk.bf16.gmra.mrb[52].mxu0 %vm1510_vm2, %v2675_v15  ;;  %1635 = vmax.xlane.f32.xlu1 %v1634_v50 }
 0x2de   :  { %v2182_v14 = vsub.f32 %v8607_v63, %v2054_v39  ;;  %v2183_v42 = vsub.f32 %v8608_v8, %v2057_v12  ;;  %v7269_v39 = vadd.f32 %v6555_v6, %v6827_v23  ;;  %v2060_v15 = vpop.xlane.xlu1 %2059  ;;  %v1631_v63 = vsel %vm1510_vm2, %v7244_v5, -inf }
 0x2df   :  { %v4812_v16 = vpop.eup %4811  ;;  %4821 = vpow2.f32 %v2275_v55  ;;  %2944 = vst.msk [vmem:[%s8265_s8 + $0x60] sm:$0xf] %vm2599_vm3, %v4152_v24  ;;  %v8609_v12 = vsub.f32 0.0, %v8585_v45  ;;  %1632 = vmax.xlane.f32.xlu0 %v1631_v63  ;;  %v7281_v8 = vadd.f32 %v6827_v23, %v6608_v10  ;;  %v7294_v63 = vadd.f32 %v6827_v23, %v6598_v31 }
 0x2e0   :  { %v2277_v36 = vmul.f32 1.442695, %v2182_v14  ;;  %v4153_v60 = vpack.c.bf16 %v4812_v16, %v4812_v16  ;;  %v2676_v55 = vpack.c.bf16 %v4812_v16, %v4810_v52  ;;  %v4814_v14 = vpop.eup %4813  ;;  %v2279_v44 = vmul.f32 1.442695, %v2183_v42  ;;  %v2063_v52 = vpop.xlane.xlu0 %2062 }
 0x2e1   :  { %v2184_v50 = vsub.f32 %v8609_v12, %v2060_v15  ;;  %8610 = vst [vmem:[#allocation18_spill] sm:$0xff] %v7281_v8  ;;  %v4154_v24 = vpack.c.bf16 %v4814_v14, %v4814_v14  ;;  %v1640_v16 = vsel %vm1510_vm2, %v7256_v25, -inf  ;;  %v8611_v42 = vsub.f32 0.0, %v6483_v46 }
 0x2e2   :  { %4823 = vpow2.f32 %v2277_v36  ;;  %2945 = vst.msk [vmem:[%s8265_s8 + $0x64] sm:$0xf] %vm2599_vm3, %v4153_v60  ;;  %4710 = vmatprep.mubr.msk.bf16.mxu0 %vm1510_vm2, %v2676_v55  ;;  %1641 = vmax.xlane.f32.xlu1 %v1640_v16  ;;  %v2066_v55 = vpop.xlane.xlu1 %2065  ;;  %v1637_v12 = vsel %vm1510_vm2, %v7269_v39, -inf }
 0x2e3   :  { %v4816_v36 = vpop.eup %4815  ;;  %4825 = vpow2.f32 %v2279_v44  ;;  %v2281_v45 = vmul.f32 1.442695, %v2184_v50  ;;  %v2185_v15 = vsub.f32 %v8611_v42, %v2063_v52  ;;  %2946 = vst.msk [vmem:[%s8265_s8 + $0x68] sm:$0xf] %vm2599_vm3, %v4154_v24  ;;  %v8612_v52 = vsub.f32 0.0, %v6492_v40  ;;  %1638 = vmax.xlane.f32.xlu0 %v1637_v12 }
 0x2e4   :  { %v4155_v60 = vpack.c.bf16 %v4816_v36, %v4816_v36  ;;  %v2677_v44 = vpack.c.bf16 %v4816_v36, %v4814_v14  ;;  %v4818_v50 = vpop.eup %4817  ;;  %v7306_v42 = vadd.f32 %v6600_v17, %v6827_v23  ;;  %v2069_v14 = vpop.xlane.xlu0 %2068  ;;  %v1646_v36 = vsel %vm1510_vm2, %v7281_v8, -inf }
 0x2e5   :  { %4827 = vpow2.f32 %v2281_v45  ;;  %v2283_v46 = vmul.f32 1.442695, %v2185_v15  ;;  %v2186_v16 = vsub.f32 %v8612_v52, %v2066_v55  ;;  %v4156_v24 = vpack.c.bf16 %v4818_v50, %v4818_v50 }
 0x2e6   :  { %2947 = vst.msk [vmem:[%s8265_s8 + $0x6c] sm:$0xf] %vm2599_vm3, %v4155_v60  ;;  %4711 = vmatmul.mubr.msk.bf16.gmra.mrb[56].mxu0 %vm1510_vm2, %v2677_v44  ;;  %v8613_v15 = vsub.f32 0.0, %v8597_v30  ;;  %1647 = vmax.xlane.f32.xlu1 %v1646_v36  ;;  %v7319_v12 = vadd.f32 %v6591_v62, %v6827_v23  ;;  %v2072_v44 = vpop.xlane.xlu1 %2071  ;;  %v1643_v52 = vsel %vm1510_vm2, %v7294_v63, -inf }
 0x2e7   :  { %v4820_v45 = vpop.eup %4819  ;;  %4829 = vpow2.f32 %v2283_v46  ;;  %v2285_v40 = vmul.f32 1.442695, %v2186_v16  ;;  %2948 = vst.msk [vmem:[%s8265_s8 + $0x70] sm:$0xf] %vm2599_vm3, %v4156_v24  ;;  %1644 = vmax.xlane.f32.xlu0 %v1643_v52 }
 0x2e8   :  { %v2187_v55 = vsub.f32 %v8613_v15, %v2069_v14  ;;  %v4157_v60 = vpack.c.bf16 %v4820_v45, %v4820_v45  ;;  %v2678_v46 = vpack.c.bf16 %v4820_v45, %v4818_v50  ;;  %v8614_v14 = vsub.f32 0.0, %v8594_v54  ;;  %v2075_v8 = vpop.xlane.xlu0 %2074 }
 0x2e9   :  { %v4822_v16 = vpop.eup %4821  ;;  %4831 = vpow2.f32 %v2285_v40  ;;  %v7331_v15 = vadd.f32 %v6827_v23, %v6645_v13  ;;  %v1652_v50 = vsel %vm1510_vm2, %v7306_v42, -inf  ;;  %v8615_v40 = vsub.f32 0.0, %v6519_v37 }
 0x2ea   :  { %v2287_v30 = vmul.f32 1.442695, %v2187_v55  ;;  %v2188_v36 = vsub.f32 %v8614_v14, %v2072_v44  ;;  %2949 = vst.msk [vmem:[%s8265_s8 + $0x74] sm:$0xf] %vm2599_vm3, %v4157_v60  ;;  %v4158_v24 = vpack.c.bf16 %v4822_v16, %v4822_v16  ;;  %4714 = vmatprep.mubr.msk.bf16.mxu0 %vm1510_vm2, %v2678_v46  ;;  %1653 = vmax.xlane.f32.xlu1 %v1652_v50  ;;  %v2078_v52 = vpop.xlane.xlu1 %2077  ;;  %v1649_v46 = vsel %vm1510_vm2, %v7319_v12, -inf }
 0x2eb   :  { %v2189_v55 = vsub.f32 %v8615_v40, %v2075_v8  ;;  %v7344_v44 = vadd.f32 %v6827_v23, %v6634_v58  ;;  %v8616_v8 = vsub.f32 0.0, %v6528_v11  ;;  %1650 = vmax.xlane.f32.xlu0 %v1649_v46  ;;  %v7356_v50 = vadd.f32 %v6636_v35, %v6827_v23 }
 0x2ec   :  { %v4824_v45 = vpop.eup %4823  ;;  %4833 = vpow2.f32 %v2287_v30  ;;  %v2289_v54 = vmul.f32 1.442695, %v2188_v36  ;;  %2950 = vst.msk [vmem:[%s8265_s8 + $0x78] sm:$0xf] %vm2599_vm3, %v4158_v24  ;;  %v2081_v40 = vpop.xlane.xlu0 %2080 }
 0x2ed   :  { %v4159_v60 = vpack.c.bf16 %v4824_v45, %v4824_v45  ;;  %v2679_v30 = vpack.c.bf16 %v4824_v45, %v4822_v16  ;;  %v4826_v14 = vpop.eup %4825  ;;  %v2291_v37 = vmul.f32 1.442695, %v2189_v55  ;;  %v2190_v36 = vsub.f32 %v8616_v8, %v2078_v52 }
 0x2ee   :  { %4835 = vpow2.f32 %v2289_v54  ;;  %v4160_v24 = vpack.c.bf16 %v4826_v14, %v4826_v14  ;;  %v1658_v16 = vsel %vm1510_vm2, %v7331_v15, -inf  ;;  %v8617_v54 = vsub.f32 0.0, %v8606_v56  ;;  %v2084_v46 = vpop.xlane.xlu1 %2083 }
 0x2ef   :  { %2951 = vst.msk [vmem:[%s8265_s8 + $0x7c] sm:$0xf] %vm2599_vm3, %v4159_v60  ;;  %4715 = vmatmul.mubr.msk.bf16.gmra.mrb[60].mxu0 %vm1510_vm2, %v2679_v30  ;;  %v4828_v45 = vpop.eup %4827  ;;  %4837 = vpow2.f32 %v2291_v37  ;;  %v2293_v11 = vmul.f32 1.442695, %v2190_v36  ;;  %1659 = vmax.xlane.f32.xlu1 %v1658_v16  ;;  %v7369_v52 = vadd.f32 %v6627_v47, %v6827_v23  ;;  %v1655_v30 = vsel %vm1510_vm2, %v7344_v44, -inf }
 0x2f0   :  { %v2191_v55 = vsub.f32 %v8617_v54, %v2081_v40  ;;  %2952 = vst.msk [vmem:[%s8265_s8 + $0x80] sm:$0xf] %vm2599_vm3, %v4160_v24  ;;  %v4161_v60 = vpack.c.bf16 %v4828_v45, %v4828_v45  ;;  %v2680_v37 = vpack.c.bf16 %v4828_v45, %v4826_v14  ;;  %v8618_v36 = vsub.f32 0.0, %v8604_v32  ;;  %1656 = vmax.xlane.f32.xlu0 %v1655_v30  ;;  %v2087_v54 = vpop.xlane.xlu0 %2086 }
 0x2f1   :  { %v4830_v8 = vpop.eup %4829  ;;  %4839 = vpow2.f32 %v2293_v11  ;;  %v7381_v16 = vadd.f32 %v6827_v23, %v6673_v3  ;;  %v1664_v14 = vsel %vm1510_vm2, %v7356_v50, -inf  ;;  %v8619_v11 = vsub.f32 0.0, %v6555_v6 }
 0x2f2   :  { %v2295_v56 = vmul.f32 1.442695, %v2191_v55  ;;  %v2192_v40 = vsub.f32 %v8618_v36, %v2084_v46  ;;  %2953 = vst.msk [vmem:[%s8265_s8 + $0x84] sm:$0xf] %vm2599_vm3, %v4161_v60  ;;  %v4162_v24 = vpack.c.bf16 %v4830_v8, %v4830_v8  ;;  %4718 = vmatprep.mubr.msk.bf16.mxu0 %vm1510_vm2, %v2680_v37  ;;  %v7394_v46 = vadd.f32 %v6827_v23, %v6662_v48  ;;  %v2090_v30 = vpop.xlane.xlu1 %2089 }
 0x2f3   :  { %v4832_v45 = vpop.eup %4831  ;;  %v2193_v55 = vsub.f32 %v8619_v11, %v2087_v54  ;;  %1665 = vmax.xlane.f32.xlu1 %v1664_v14  ;;  %v1661_v37 = vsel %vm1510_vm2, %v7369_v52, -inf  ;;  %v7406_v14 = vadd.f32 %v6664_v33, %v6827_v23 }
 0x2f4   :  { %4841 = vpow2.f32 %v2295_v56  ;;  %v2297_v32 = vmul.f32 1.442695, %v2192_v40  ;;  %2954 = vst.msk [vmem:[%s8265_s8 + $0x88] sm:$0xf] %vm2599_vm3, %v4162_v24  ;;  %v4163_v60 = vpack.c.bf16 %v4832_v45, %v4832_v45  ;;  %v2681_v56 = vpack.c.bf16 %v4832_v45, %v4830_v8  ;;  %1662 = vmax.xlane.f32.xlu0 %v1661_v37  ;;  %v2093_v11 = vpop.xlane.xlu0 %2092 }
 0x2f5   :  { %v2299_v6 = vmul.f32 1.442695, %v2193_v55  ;;  %v8620_v40 = vsub.f32 0.0, %v6564_v7  ;;  %v1670_v8 = vsel %vm1510_vm2, %v7381_v16, -inf }
 0x2f6   :  { %v4834_v36 = vpop.eup %4833  ;;  %4843 = vpow2.f32 %v2297_v32  ;;  %2955 = vst.msk [vmem:[%s8265_s8 + $0x8c] sm:$0xf] %vm2599_vm3, %v4163_v60  ;;  %v8621_v32 = vsub.f32 0.0, %v6598_v31  ;;  %v2096_v37 = vpop.xlane.xlu1 %2095 }
 0x2f7   :  { %v2194_v54 = vsub.f32 %v8620_v40, %v2090_v30  ;;  %v4164_v24 = vpack.c.bf16 %v4834_v36, %v4834_v36  ;;  %4719 = vmatmul.mubr.msk.bf16.gmra.mrb[64].mxu0 %vm1510_vm2, %v2681_v56  ;;  %4845 = vpow2.f32 %v2299_v6  ;;  %1671 = vmax.xlane.f32.xlu1 %v1670_v8  ;;  %v7419_v30 = vadd.f32 %v6659_v51, %v6827_v23 }
 0x2f8   :  { %v4836_v45 = vpop.eup %4835  ;;  %v2195_v55 = vsub.f32 %v8621_v32, %v2093_v11  ;;  %v1667_v56 = vsel %vm1510_vm2, %v7394_v46, -inf  ;;  %v7431_v8 = vadd.f32 %v6827_v23, %v6701_v27  ;;  %v2099_v32 = vpop.xlane.xlu0 %2098  ;;  %v7445_v23 = vld [vmem:[%s8264_s5] ss:$0 sm:$0xff] }
 0x2f9   :  { %v2301_v7 = vmul.f32 1.442695, %v2194_v54  ;;  %2956 = vst.msk [vmem:[%s8265_s8 + $0x90] sm:$0xf] %vm2599_vm3, %v4164_v24  ;;  %v4165_v60 = vpack.c.bf16 %v4836_v45, %v4836_v45  ;;  %v2682_v6 = vpack.c.bf16 %v4836_v45, %v4834_v36  ;;  %v4838_v40 = vpop.eup %4837  ;;  %v8622_v54 = vsub.f32 0.0, %v6608_v10  ;;  %1668 = vmax.xlane.f32.xlu0 %v1667_v56 }
 0x2fa   :  { %v2303_v31 = vmul.f32 1.442695, %v2195_v55  ;;  %v4166_v24 = vpack.c.bf16 %v4838_v40, %v4838_v40  ;;  %v1676_v36 = vsel %vm1510_vm2, %v7406_v14, -inf  ;;  %v2102_v56 = vpop.xlane.xlu1 %2101 }
 0x2fb   :  { %4847 = vpow2.f32 %v2301_v7  ;;  %v2196_v11 = vsub.f32 %v8622_v54, %v2096_v37  ;;  %2957 = vst.msk [vmem:[%s8265_s8 + $0x94] sm:$0xf] %vm2599_vm3, %v4165_v60  ;;  %4722 = vmatprep.mubr.msk.bf16.mxu0 %vm1510_vm2, %v2682_v6  ;;  %v4840_v45 = vpop.eup %4839  ;;  %v8623_v7 = vsub.f32 0.0, %v6591_v62  ;;  %1677 = vmax.xlane.f32.xlu1 %v1676_v36  ;;  %v7449_v60 = vadd.f32 %v7445_v23, %v6690_v53 }
 0x2fc   :  { %4849 = vpow2.f32 %v2303_v31  ;;  %2958 = vst.msk [vmem:[%s8265_s8 + $0x98] sm:$0xf] %vm2599_vm3, %v4166_v24  ;;  %v4167_v37 = vpack.c.bf16 %v4840_v45, %v4840_v45  ;;  %v1673_v62 = vsel %vm1510_vm2, %v7419_v30, -inf  ;;  %v2683_v6 = vpack.c.bf16 %v4840_v45, %v4838_v40 }
 0x2fd   :  { %v2305_v10 = vmul.f32 1.442695, %v2196_v11  ;;  %v2197_v55 = vsub.f32 %v8623_v7, %v2099_v32  ;;  %v8624_v11 = vsub.f32 0.0, %v6600_v17  ;;  %1674 = vmax.xlane.f32.xlu0 %v1673_v62  ;;  %v7461_v36 = vadd.f32 %v7445_v23, %v6692_v1  ;;  %v2105_v7 = vpop.xlane.xlu0 %2104 }
 0x2fe   :  { %v4842_v31 = vpop.eup %4841  ;;  %2959 = vst.msk [vmem:[%s8265_s8 + $0x9c] sm:$0xf] %vm2599_vm3, %v4167_v37  ;;  %v1682_v40 = vsel %vm1510_vm2, %v7431_v8, -inf  ;;  %v2108_v62 = vpop.xlane.xlu1 %2107 }
 0x2ff   :  { %4851 = vpow2.f32 %v2305_v10  ;;  %v2307_v54 = vmul.f32 1.442695, %v2197_v55  ;;  %v2198_v32 = vsub.f32 %v8624_v11, %v2102_v56  ;;  %v4168_v24 = vpack.c.bf16 %v4842_v31, %v4842_v31  ;;  %4723 = vmatmul.mubr.msk.bf16.gmra.mrb[68].mxu0 %vm1510_vm2, %v2683_v6  ;;  %1683 = vmax.xlane.f32.xlu1 %v1682_v40 }
 0x300   :  { %v4844_v45 = vpop.eup %4843  ;;  %v8625_v10 = vsub.f32 0.0, %v6634_v58  ;;  %v7474_v56 = vadd.f32 %v7445_v23, %v6687_v34  ;;  %v1679_v6 = vsel %vm1510_vm2, %v7449_v60, -inf  ;;  %v7486_v40 = vadd.f32 %v7445_v23, %v8602_v22 }
 0x301   :  { %4853 = vpow2.f32 %v2307_v54  ;;  %v2309_v17 = vmul.f32 1.442695, %v2198_v32  ;;  %2960 = vst.msk [vmem:[%s8265_s8 + $0xa0] sm:$0xf] %vm2599_vm3, %v4168_v24  ;;  %v4169_v37 = vpack.c.bf16 %v4844_v45, %v4844_v45  ;;  %v2684_v54 = vpack.c.bf16 %v4844_v45, %v4842_v31  ;;  %v4846_v11 = vpop.eup %4845  ;;  %1680 = vmax.xlane.f32.xlu0 %v1679_v6 }
 0x302   :  { %v2199_v55 = vsub.f32 %v8625_v10, %v2105_v7  ;;  %v8626_v32 = vsub.f32 0.0, %v6645_v13  ;;  %v4170_v24 = vpack.c.bf16 %v4846_v11, %v4846_v11  ;;  %v2111_v10 = vpop.xlane.xlu0 %2110  ;;  %v1688_v31 = vsel %vm1510_vm2, %v7461_v36, -inf }
 0x303   :  { %4855 = vpow2.f32 %v2309_v17  ;;  %2961 = vst.msk [vmem:[%s8265_s8 + $0xa4] sm:$0xf] %vm2599_vm3, %v4169_v37  ;;  %4726 = vmatprep.mubr.msk.bf16.mxu0 %vm1510_vm2, %v2684_v54  ;;  %v8627_v17 = vsub.f32 0.0, %v6627_v47  ;;  %1689 = vmax.xlane.f32.xlu1 %v1688_v31  ;;  %v7499_v22 = vadd.f32 %v7445_v23, %v6718_v2  ;;  %v1685_v6 = vsel %vm1510_vm2, %v7474_v56, -inf }
 0x304   :  { %v2311_v58 = vmul.f32 1.442695, %v2199_v55  ;;  %v2200_v7 = vsub.f32 %v8626_v32, %v2108_v62  ;;  %2962 = vst.msk [vmem:[%s8265_s8 + $0xa8] sm:$0xf] %vm2599_vm3, %v4170_v24  ;;  %v2114_v62 = vpop.xlane.xlu1 %2113  ;;  %v8628_v32 = vsub.f32 0.0, %v6636_v35 }
 0x305   :  { %v4848_v45 = vpop.eup %4847  ;;  %v2201_v55 = vsub.f32 %v8627_v17, %v2111_v10  ;;  %1686 = vmax.xlane.f32.xlu0 %v1685_v6  ;;  %v7511_v10 = vadd.f32 %v7445_v23, %v6729_v61  ;;  %v1691_v6 = vsel %vm1510_vm2, %v7499_v22, -inf }
 0x306   :  { %4857 = vpow2.f32 %v2311_v58  ;;  %v2313_v13 = vmul.f32 1.442695, %v2200_v7  ;;  %v4171_v37 = vpack.c.bf16 %v4848_v45, %v4848_v45  ;;  %v2685_v54 = vpack.c.bf16 %v4848_v45, %v4846_v11  ;;  %v4850_v58 = vpop.eup %4849  ;;  %v2117_v31 = vpop.xlane.xlu0 %2116 }
 0x307   :  { %v2315_v47 = vmul.f32 1.442695, %v2201_v55  ;;  %v2202_v7 = vsub.f32 %v8628_v32, %v2114_v62  ;;  %8629 = vst [vmem:[#allocation17_spill] sm:$0xff] %v7511_v10  ;;  %v4172_v24 = vpack.c.bf16 %v4850_v58, %v4850_v58  ;;  %v1598_v11 = vsel %vm1510_vm2, %v7486_v40, -inf }
 0x308   :  { %4859 = vpow2.f32 %v2313_v13  ;;  %2963 = vst.msk [vmem:[%s8265_s8 + $0xac] sm:$0xf] %vm2599_vm3, %v4171_v37  ;;  %4727 = vmatmul.mubr.msk.bf16.gmra.mrb[72].mxu0 %vm1510_vm2, %v2685_v54  ;;  %v8630_v13 = vsub.f32 0.0, %v6662_v48  ;;  %1599 = vmax.xlane.f32.xlu1 %v1598_v11  ;;  %v7524_v55 = vadd.f32 %v7445_v23, %v6715_v38  ;;  %v2120_v62 = vpop.xlane.xlu1 %2119  ;;  %v8631_v32 = vsub.f32 0.0, %v6673_v3 }
 0x309   :  { %v4852_v45 = vpop.eup %4851  ;;  %4861 = vpow2.f32 %v2315_v47  ;;  %v2317_v35 = vmul.f32 1.442695, %v2202_v7  ;;  %2964 = vst.msk [vmem:[%s8265_s8 + $0xb0] sm:$0xf] %vm2599_vm3, %v4172_v24  ;;  %1692 = vmax.xlane.f32.xlu0 %v1691_v6  ;;  %v7538_v11 = vadd.f32 %v7445_v23, %v6720_v0  ;;  %v1694_v3 = vsel %vm1510_vm2, %v7511_v10, -inf }
 0x30a   :  { %v2203_v17 = vsub.f32 %v8630_v13, %v2117_v31  ;;  %v4173_v37 = vpack.c.bf16 %v4852_v45, %v4852_v45  ;;  %v2686_v54 = vpack.c.bf16 %v4852_v45, %v4850_v58  ;;  %v2204_v7 = vsub.f32 %v8631_v32, %v2120_v62  ;;  %v7534_v31 = vpop.f32.mrb[32].mxu1  ;;  %v2123_v58 = vpop.xlane.xlu0 %2122 }
 0x30b   :  { %v4854_v47 = vpop.eup %4853  ;;  %4863 = vpow2.f32 %v2317_v35  ;;  %8632 = vst [vmem:[#allocation8_spill] sm:$0xff] %v7538_v11  ;;  %v7547_v45 = vpop.f32.mrb[33].mxu1  ;;  %v8633_v23 = vsub.f32 0.0, %v6659_v51 }
 0x30c   :  { %v2319_v48 = vmul.f32 1.442695, %v2203_v17  ;;  %2965 = vst.msk [vmem:[%s8265_s8 + $0xb4] sm:$0xf] %vm2599_vm3, %v4173_v37  ;;  %v4174_v24 = vpack.c.bf16 %v4854_v47, %v4854_v47  ;;  %4730 = vmatprep.mubr.msk.bf16.mxu0 %vm1510_vm2, %v2686_v54  ;;  %v2321_v13 = vmul.f32 1.442695, %v2204_v7  ;;  %1695 = vmax.xlane.f32.xlu1 %v1694_v3  ;;  %v2126_v6 = vpop.xlane.xlu1 %2125 }
 0x30d   :  { %v4856_v35 = vpop.eup %4855  ;;  %v2205_v17 = vsub.f32 %v8633_v23, %v2123_v58  ;;  %v7551_v62 = vpop.f32.mrb[34].mxu1  ;;  %v1697_v54 = vsel %vm1510_vm2, %v7524_v55, -inf  ;;  %v8634_v7 = vsub.f32 0.0, %v6664_v33  ;;  %v8635_v23 = vsub.f32 0.0, %v6690_v53 }
 0x30e   :  { %4865 = vpow2.f32 %v2319_v48  ;;  %2966 = vst.msk [vmem:[%s8265_s8 + $0xb8] sm:$0xf] %vm2599_vm3, %v4174_v24  ;;  %v4175_v37 = vpack.c.bf16 %v4856_v35, %v4856_v35  ;;  %v2687_v32 = vpack.c.bf16 %v4856_v35, %v4854_v47  ;;  %v7559_v10 = vpop.f32.mrb[35].mxu1  ;;  %1698 = vmax.xlane.f32.xlu0 %v1697_v54  ;;  %v2129_v3 = vpop.xlane.xlu0 %2128  ;;  %v1700_v47 = vsel %vm1510_vm2, %v7538_v11, -inf }
 0x30f   :  { %4867 = vpow2.f32 %v2321_v13  ;;  %v2323_v51 = vmul.f32 1.442695, %v2205_v17  ;;  %v2206_v58 = vsub.f32 %v8634_v7, %v2126_v6  ;;  %v2207_v33 = vsub.f32 %v8635_v23, %v2129_v3 }
 0x310   :  { %v4858_v48 = vpop.eup %4857  ;;  %2967 = vst.msk [vmem:[%s8265_s8 + $0xbc] sm:$0xf] %vm2599_vm3, %v4175_v37  ;;  %4731 = vmatmul.mubr.msk.bf16.gmra.mrb[76].mxu0 %vm1510_vm2, %v2687_v32  ;;  %1701 = vmax.xlane.f32.xlu1 %v1700_v47  ;;  %v2132_v37 = vpop.xlane.xlu1 %2131  ;;  %v8636_v7 = vsub.f32 0.0, %v6701_v27  ;;  %v8637_v47 = vsub.f32 0.0, %v6687_v34 }
 0x311   :  { %v4176_v24 = vpack.c.bf16 %v4858_v48, %v4858_v48  ;;  %4869 = vpow2.f32 %v2323_v51  ;;  %v2325_v13 = vmul.f32 1.442695, %v2206_v58  ;;  %v2327_v32 = vmul.f32 1.442695, %v2207_v33  ;;  %v7578_v51 = vpop.f32.mrb[36].mxu1 }
 0x312   :  { %v4860_v35 = vpop.eup %4859  ;;  %v2208_v11 = vsub.f32 %v8636_v7, %v2132_v37  ;;  %v2135_v58 = vpop.xlane.xlu0 %2134 }
 0x313   :  { %2968 = vst.msk [vmem:[%s8265_s8 + $0xc0] sm:$0xf] %vm2599_vm3, %v4176_v24  ;;  %v4177_v17 = vpack.c.bf16 %v4860_v35, %v4860_v35  ;;  %v2688_v6 = vpack.c.bf16 %v4860_v35, %v4858_v48  ;;  %v4862_v54 = vpop.eup %4861  ;;  %4871 = vpow2.f32 %v2325_v13  ;;  %v7585_v24 = vpop.f32.mrb[37].mxu1  ;;  %v2209_v27 = vsub.f32 %v8637_v47, %v2135_v58 }
 0x314   :  { %v4178_v53 = vpack.c.bf16 %v4862_v54, %v4862_v54  ;;  %4873 = vpow2.f32 %v2327_v32  ;;  %v2329_v3 = vmul.f32 1.442695, %v2208_v11  ;;  %v7589_v35 = vpop.f32.mrb[38].mxu1  ;;  %v2138_v23 = vpop.xlane.xlu1 %2137  ;;  %v8638_v11 = vsub.f32 0.0, %v6692_v1 }
 0x315   :  { %2969 = vst.msk [vmem:[%s8265_s8 + $0xc4] sm:$0xf] %vm2599_vm3, %v4177_v17  ;;  %4734 = vmatprep.mubr.msk.bf16.mxu0 %vm1510_vm2, %v2688_v6  ;;  %v4864_v48 = vpop.eup %4863  ;;  %v7595_v17 = vpop.f32.mrb[39].mxu1  ;;  %v2331_v6 = vmul.f32 1.442695, %v2209_v27  ;;  %v8639_v58 = vsub.f32 0.0, %v6718_v2 }
 0x316   :  { %2970 = vst.msk [vmem:[%s8265_s8 + $0xc8] sm:$0xf] %vm2599_vm3, %v4178_v53  ;;  %v4179_v13 = vpack.c.bf16 %v4864_v48, %v4864_v48  ;;  %v2689_v33 = vpack.c.bf16 %v4864_v48, %v4862_v54  ;;  %4875 = vpow2.f32 %v2329_v3  ;;  %v2210_v32 = vsub.f32 %v8638_v11, %v2138_v23  ;;  %v2141_v7 = vpop.xlane.xlu0 %2140  ;;  %v7612_v11 = vpop.f32.mrb[40].mxu1 }
 0x317   :  { %4877 = vpow2.f32 %v2331_v6  ;;  %v2211_v48 = vsub.f32 %v8639_v58, %v2141_v7  ;;  %v8640_v23 = vsub.f32 0.0, %v6729_v61  ;;  %v8641_v7 = vsub.f32 0.0, %v6715_v38 }
 0x318   :  { %v4866_v37 = vpop.eup %4865  ;;  %2971 = vst.msk [vmem:[%s8265_s8 + $0xcc] sm:$0xf] %vm2599_vm3, %v4179_v13  ;;  %4735 = vmatmul.mubr.msk.bf16.gmra.mrb[80].mxu0 %vm1510_vm2, %v2689_v33  ;;  %v2333_v54 = vmul.f32 1.442695, %v2210_v32  ;;  %v2144_v3 = vpop.xlane.xlu1 %2143 }
 0x319   :  { %v4180_v34 = vpack.c.bf16 %v4866_v37, %v4866_v37  ;;  %v4868_v53 = vpop.eup %4867  ;;  %v2335_v13 = vmul.f32 1.442695, %v2211_v48  ;;  %v2212_v33 = vsub.f32 %v8640_v23, %v2144_v3  ;;  %v7619_v32 = vpop.f32.mrb[41].mxu1 }
 0x31a   :  { %v4181_v1 = vpack.c.bf16 %v4868_v53, %v4868_v53  ;;  %v2690_v47 = vpack.c.bf16 %v4868_v53, %v4866_v37  ;;  %4879 = vpow2.f32 %v2333_v54  ;;  %v2147_v6 = vpop.xlane.xlu0 %2146  ;;  %v7623_v53 = vpop.f32.mrb[42].mxu1 }
 0x31b   :  { %2972 = vst.msk [vmem:[%s8265_s8 + $0xd0] sm:$0xf] %vm2599_vm3, %v4180_v34  ;;  %v4870_v27 = vpop.eup %4869  ;;  %4881 = vpow2.f32 %v2335_v13  ;;  %v2337_v34 = vmul.f32 1.442695, %v2212_v33  ;;  %v2213_v61 = vsub.f32 %v8641_v7, %v2147_v6  ;;  %v8642_v13 = vsub.f32 0.0, %v6720_v0 }
 0x31c   :  { %2973 = vst.msk [vmem:[%s8265_s8 + $0xd4] sm:$0xf] %vm2599_vm3, %v4181_v1  ;;  %v4182_v2 = vpack.c.bf16 %v4870_v27, %v4870_v27  ;;  %4738 = vmatprep.mubr.msk.bf16.mxu0 %vm1510_vm2, %v2690_v47  ;;  %v2150_v58 = vpop.xlane.xlu1 %2149  ;;  %v7629_v1 = vpop.f32.mrb[43].mxu1 }
 0x31d   :  { %v4872_v37 = vpop.eup %4871  ;;  %4883 = vpow2.f32 %v2337_v34  ;;  %v2339_v47 = vmul.f32 1.442695, %v2213_v61  ;;  %v2214_v23 = vsub.f32 %v8642_v13, %v2150_v58  ;;  %v7644_v58 = vpop.f32.mrb[44].mxu1 }
 0x31e   :  { %2974 = vst.msk [vmem:[%s8265_s8 + $0xd8] sm:$0xf] %vm2599_vm3, %v4182_v2  ;;  %v4183_v54 = vpack.c.bf16 %v4872_v37, %v4872_v37  ;;  %v2691_v48 = vpack.c.bf16 %v4872_v37, %v4870_v27  ;;  %v4874_v3 = vpop.eup %4873  ;;  %v1513_v33 = vpop.xlane.xlu0 %1512 }
 0x31f   :  { %v4184_v38 = vpack.c.bf16 %v4874_v3, %v4874_v3  ;;  %4885 = vpow2.f32 %v2339_v47  ;;  %v2341_v27 = vmul.f32 1.442695, %v2214_v23  ;;  %v1703_v6 = vsub.f32 %v6839_v21, %v1513_v33  ;;  %v7651_v47 = vpop.f32.mrb[45].mxu1 }
 0x320   :  { %2975 = vst.msk [vmem:[%s8265_s8 + $0xdc] sm:$0xf] %vm2599_vm3, %v4183_v54  ;;  %4739 = vmatmul.mubr.msk.bf16.gmra.mrb[84].mxu0 %vm1510_vm2, %v2691_v48  ;;  %v4876_v2 = vpop.eup %4875  ;;  %v1516_v37 = vpop.xlane.xlu1 %1515 }
 0x321   :  { %2976 = vst.msk [vmem:[%s8265_s8 + $0xe0] sm:$0xf] %vm2599_vm3, %v4184_v38  ;;  %v4185_v0 = vpack.c.bf16 %v4876_v2, %v4876_v2  ;;  %v2692_v34 = vpack.c.bf16 %v4876_v2, %v4874_v3  ;;  %v4878_v7 = vpop.eup %4877  ;;  %4887 = vpow2.f32 %v2341_v27  ;;  %v1767_v61 = vmul.f32 1.442695, %v1703_v6  ;;  %v7654_v38 = vpop.f32.mrb[46].mxu1 }
 0x322   :  { %v1704_v54 = vsub.f32 %v6846_v43, %v1516_v37  ;;  %v4186_v21 = vpack.c.bf16 %v4878_v7, %v4878_v7  ;;  %v1519_v48 = vpop.xlane.xlu0 %1518  ;;  %8643 = vst [vmem:[#allocation7_spill] sm:$0xff] %v7654_v38  ;;  %v7660_v27 = vpop.f32.mrb[47].mxu1  ;;  %v8645_v37 = vld [vmem:[#allocation23_spill] sm:$0xff] }
 0x323   :  { %2977 = vst.msk [vmem:[%s8265_s8 + $0xe4] sm:$0xf] %vm2599_vm3, %v4185_v0  ;;  %4742 = vmatprep.mubr.msk.bf16.mxu0 %vm1510_vm2, %v2692_v34  ;;  %4889 = vpow2.f32 %v1767_v61  ;;  %v1705_v23 = vsub.f32 %v6853_v20, %v1519_v48  ;;  %8644 = vst [vmem:[#allocation22_spill] sm:$0xff] %v7660_v27  ;;  %v7674_v38 = vpop.f32.mrb[48].mxu1 }
 0x324   :  { %v4880_v13 = vpop.eup %4879  ;;  %v1769_v3 = vmul.f32 1.442695, %v1704_v54  ;;  %2978 = vst.msk [vmem:[%s8265_s8 + $0xe8] sm:$0xf] %vm2599_vm3, %v4186_v21  ;;  %v1522_v33 = vpop.xlane.xlu1 %1521 }
 0x325   :  { %v4187_v43 = vpack.c.bf16 %v4880_v13, %v4880_v13  ;;  %v2693_v2 = vpack.c.bf16 %v4880_v13, %v4878_v7  ;;  %v4882_v6 = vpop.eup %4881  ;;  %v1771_v0 = vmul.f32 1.442695, %v1705_v23  ;;  %v1706_v34 = vsub.f32 %v8645_v37, %v1522_v33  ;;  %v8646_v7 = vld [vmem:[#allocation24_spill] sm:$0xff]  ;;  %v8647_v37 = vld [vmem:[#allocation25_spill] sm:$0xff] }
 0x326   :  { %4891 = vpow2.f32 %v1769_v3  ;;  %v4188_v20 = vpack.c.bf16 %v4882_v6, %v4882_v6  ;;  %v1525_v61 = vpop.xlane.xlu0 %1524 }
 0x327   :  { %2979 = vst.msk [vmem:[%s8265_s8 + $0xec] sm:$0xf] %vm2599_vm3, %v4187_v43  ;;  %v4884_v54 = vpop.eup %4883  ;;  %4893 = vpow2.f32 %v1771_v0  ;;  %v1773_v21 = vmul.f32 1.442695, %v1706_v34  ;;  %v1707_v48 = vsub.f32 %v8646_v7, %v1525_v61  ;;  %v7681_v34 = vpop.f32.mrb[49].mxu1  ;;  %v8649_v61 = vld [vmem:[#allocation26_spill] sm:$0xff] }
 0x328   :  { %4743 = vmatmul.mubr.msk.bf16.gmra.mrb[88].mxu0 %vm1510_vm2, %v2693_v2  ;;  %2980 = vst.msk [vmem:[%s8265_s8 + $0xf0] sm:$0xf] %vm2599_vm3, %v4188_v20  ;;  %v4189_v13 = vpack.c.bf16 %v4884_v54, %v4884_v54  ;;  %v1528_v3 = vpop.xlane.xlu1 %1527  ;;  %v2694_v23 = vpack.c.bf16 %v4884_v54, %v4882_v6  ;;  %8648 = vst [vmem:[#allocation6_spill] sm:$0xff] %v7681_v34  ;;  %v8651_v34 = vld [vmem:[#allocation27_spill] sm:$0xff] }
 0x329   :  { %v4886_v33 = vpop.eup %4885  ;;  %4895 = vpow2.f32 %v1773_v21  ;;  %v1775_v43 = vmul.f32 1.442695, %v1707_v48  ;;  %v1708_v27 = vsub.f32 %v8647_v37, %v1528_v3  ;;  %v7684_v21 = vpop.f32.mrb[50].mxu1 }
 0x32a   :  { %2981 = vst.msk [vmem:[%s8265_s8 + $0xf4] sm:$0xf] %vm2599_vm3, %v4189_v13  ;;  %v4190_v2 = vpack.c.bf16 %v4886_v33, %v4886_v33  ;;  %v1531_v0 = vpop.xlane.xlu0 %1530  ;;  %4746 = vmatprep.mubr.msk.bf16.mxu0 %vm1510_vm2, %v2694_v23  ;;  %v7690_v3 = vpop.f32.mrb[51].mxu1 }
 0x32b   :  { %v4888_v20 = vpop.eup %4887  ;;  %4897 = vpow2.f32 %v1775_v43  ;;  %v1777_v6 = vmul.f32 1.442695, %v1708_v27  ;;  %v1709_v54 = vsub.f32 %v8649_v61, %v1531_v0  ;;  %8650 = vst [vmem:[#allocation10_spill] sm:$0xff] %v7690_v3  ;;  %v7704_v3 = vpop.f32.mrb[52].mxu1 }
 0x32c   :  { %2982 = vst.msk [vmem:[%s8265_s8 + $0xf8] sm:$0xf] %vm2599_vm3, %v4190_v2  ;;  %v4191_v7 = vpack.c.bf16 %v4888_v20, %v4888_v20  ;;  %v1534_v48 = vpop.xlane.xlu1 %1533  ;;  %v2695_v13 = vpack.c.bf16 %v4888_v20, %v4886_v33  ;;  %v8652_v33 = vld [vmem:[#allocation28_spill] sm:$0xff]  ;;  %8654 = vst [vmem:[#allocation23_spill] sm:$0xff] %v7704_v3 }
 0x32d   :  { %v4890_v23 = vpop.eup %4889  ;;  %4899 = vpow2.f32 %v1777_v6  ;;  %v1779_v37 = vmul.f32 1.442695, %v1709_v54  ;;  %v1710_v43 = vsub.f32 %v8651_v34, %v1534_v48 }
 0x32e   :  { %2983 = vst.msk [vmem:[%s8265_s8 + $0xfc] sm:$0xf] %vm2599_vm3, %v4191_v7  ;;  %v4064_v27 = vpack.c.bf16 %v4890_v23, %v4890_v23  ;;  %v1537_v0 = vpop.xlane.xlu0 %1536  ;;  %v8653_v7 = vld [vmem:[#allocation29_spill] sm:$0xff] }
 0x32f   :  { %4901 = vpow2.f32 %v1779_v37  ;;  %v1781_v61 = vmul.f32 1.442695, %v1710_v43  ;;  %v1711_v20 = vsub.f32 %v8652_v33, %v1537_v0  ;;  %v7710_v43 = vpop.f32.mrb[53].mxu1 }
 0x330   :  { %4747 = vmatmul.mubr.msk.bf16.gmra.mrb[92].mxu0 %vm1510_vm2, %v2695_v13  ;;  %v4892_v2 = vpop.eup %4891  ;;  %2600 = vst.msk [vmem:[%s8266_s7] sm:$0xf] %vm2599_vm3, %v4064_v27  ;;  %v1540_v6 = vpop.xlane.xlu1 %1539  ;;  %8655 = vst [vmem:[#allocation24_spill] sm:$0xff] %v7710_v43  ;;  %v8659_v43 = vld [vmem:[#allocation31_spill] sm:$0xff] }
 0x331   :  { %v4065_v34 = vpack.c.bf16 %v4892_v2, %v4892_v2  ;;  %v4894_v54 = vpop.eup %4893  ;;  %4903 = vpow2.f32 %v1781_v61  ;;  %v1783_v48 = vmul.f32 1.442695, %v1711_v20  ;;  %v1712_v23 = vsub.f32 %v8653_v7, %v1540_v6  ;;  %v8656_v2 = vld [vmem:[#allocation30_spill] sm:$0xff]  ;;  %v7713_v61 = vpop.f32.mrb[54].mxu1 }
 0x332   :  { %v4066_v13 = vpack.c.bf16 %v4894_v54, %v4894_v54  ;;  %v1543_v37 = vpop.xlane.xlu0 %1542  ;;  %8657 = vst [vmem:[#allocation25_spill] sm:$0xff] %v7713_v61  ;;  %v7719_v7 = vpop.f32.mrb[55].mxu1 }
 0x333   :  { %2601 = vst.msk [vmem:[%s8266_s7 + $0x4] sm:$0xf] %vm2599_vm3, %v4065_v34  ;;  %v4896_v0 = vpop.eup %4895  ;;  %4905 = vpow2.f32 %v1783_v48  ;;  %v1785_v27 = vmul.f32 1.442695, %v1712_v23  ;;  %v1713_v33 = vsub.f32 %v8656_v2, %v1543_v37  ;;  %8658 = vst [vmem:[#allocation26_spill] sm:$0xff] %v7719_v7  ;;  %v8661_v7 = vld [vmem:[#allocation33_spill] sm:$0xff] }
 0x334   :  { %2602 = vst.msk [vmem:[%s8266_s7 + $0x8] sm:$0xf] %vm2599_vm3, %v4066_v13  ;;  %v4067_v20 = vpack.c.bf16 %v4896_v0, %v4896_v0  ;;  %v1546_v6 = vpop.xlane.xlu1 %1545  ;;  %v8660_v13 = vld [vmem:[#allocation32_spill] sm:$0xff] }
 0x335   :  { %v4898_v34 = vpop.eup %4897  ;;  %4907 = vpow2.f32 %v1785_v27  ;;  %v1787_v54 = vmul.f32 1.442695, %v1713_v33  ;;  %v1714_v3 = vsub.f32 %v8659_v43, %v1546_v6 }
 0x336   :  { %2603 = vst.msk [vmem:[%s8266_s7 + $0xc] sm:$0xf] %vm2599_vm3, %v4067_v20  ;;  %v4068_v48 = vpack.c.bf16 %v4898_v34, %v4898_v34  ;;  %v1549_v23 = vpop.xlane.xlu0 %1548  ;;  %v7732_v20 = vpop.f32.mrb[56].mxu1 }
 0x337   :  { %v4900_v37 = vpop.eup %4899  ;;  %4909 = vpow2.f32 %v1787_v54  ;;  %v1789_v2 = vmul.f32 1.442695, %v1714_v3  ;;  %v1715_v0 = vsub.f32 %v8660_v13, %v1549_v23  ;;  %8662 = vst [vmem:[#allocation27_spill] sm:$0xff] %v7732_v20  ;;  %v7738_v54 = vpop.f32.mrb[57].mxu1 }
 0x338   :  { %2604 = vst.msk [vmem:[%s8266_s7 + $0x10] sm:$0xf] %vm2599_vm3, %v4068_v48  ;;  %v4069_v27 = vpack.c.bf16 %v4900_v37, %v4900_v37  ;;  %v1552_v33 = vpop.xlane.xlu1 %1551  ;;  %8663 = vst [vmem:[#allocation28_spill] sm:$0xff] %v7738_v54  ;;  %v8664_v37 = vld [vmem:[#allocation34_spill] sm:$0xff]  ;;  %v8666_v54 = vld [vmem:[#allocation16_spill] sm:$0xff] }
 0x339   :  { %v4902_v43 = vpop.eup %4901  ;;  %4911 = vpow2.f32 %v1789_v2  ;;  %v1791_v6 = vmul.f32 1.442695, %v1715_v0  ;;  %v1716_v61 = vsub.f32 %v8661_v7, %v1552_v33  ;;  %v7741_v2 = vpop.f32.mrb[58].mxu1 }
 0x33a   :  { %2605 = vst.msk [vmem:[%s8266_s7 + $0x14] sm:$0xf] %vm2599_vm3, %v4069_v27  ;;  %v4070_v3 = vpack.c.bf16 %v4902_v43, %v4902_v43  ;;  %v1555_v34 = vpop.xlane.xlu0 %1554  ;;  %v7747_v33 = vpop.f32.mrb[59].mxu1 }
 0x33b   :  { %v4904_v23 = vpop.eup %4903  ;;  %4913 = vpow2.f32 %v1791_v6  ;;  %v1793_v48 = vmul.f32 1.442695, %v1716_v61  ;;  %v1717_v13 = vsub.f32 %v8664_v37, %v1555_v34  ;;  %8665 = vst [vmem:[#allocation29_spill] sm:$0xff] %v7747_v33 }
 0x33c   :  { %2606 = vst.msk [vmem:[%s8266_s7 + $0x18] sm:$0xf] %vm2599_vm3, %v4070_v3  ;;  %v4071_v7 = vpack.c.bf16 %v4904_v23, %v4904_v23  ;;  %v1558_v0 = vpop.xlane.xlu1 %1557 }
 0x33d   :  { %v4906_v27 = vpop.eup %4905  ;;  %4915 = vpow2.f32 %v1793_v48  ;;  %v1795_v43 = vmul.f32 1.442695, %v1717_v13  ;;  %v1718_v20 = vsub.f32 %v8666_v54, %v1558_v0  ;;  %v8667_v0 = vld [vmem:[#allocation20_spill] sm:$0xff] }
 0x33e   :  { %2607 = vst.msk [vmem:[%s8266_s7 + $0x1c] sm:$0xf] %vm2599_vm3, %v4071_v7  ;;  %v4072_v61 = vpack.c.bf16 %v4906_v27, %v4906_v27  ;;  %v1561_v6 = vpop.xlane.xlu0 %1560  ;;  %v7760_v7 = vpop.f32.mrb[60].mxu1 }
 0x33f   :  { %v4908_v34 = vpop.eup %4907  ;;  %4917 = vpow2.f32 %v1795_v43  ;;  %v1797_v37 = vmul.f32 1.442695, %v1718_v20  ;;  %v1719_v3 = vsub.f32 %v6953_v41, %v1561_v6  ;;  %8668 = vst [vmem:[#allocation30_spill] sm:$0xff] %v7760_v7  ;;  %v7766_v27 = vpop.f32.mrb[61].mxu1  ;;  %v8670_v6 = vld [vmem:[#allocation2_spill] sm:$0xff] }
 0x340   :  { %2608 = vst.msk [vmem:[%s8266_s7 + $0x20] sm:$0xf] %vm2599_vm3, %v4072_v61  ;;  %v4073_v23 = vpack.c.bf16 %v4908_v34, %v4908_v34  ;;  %v1564_v48 = vpop.xlane.xlu1 %1563  ;;  %8669 = vst [vmem:[#allocation31_spill] sm:$0xff] %v7766_v27  ;;  %v8673_v27 = vld [vmem:[#allocation19_spill] sm:$0xff] }
 0x341   :  { %v4910_v54 = vpop.eup %4909  ;;  %4919 = vpow2.f32 %v1797_v37  ;;  %v1799_v13 = vmul.f32 1.442695, %v1719_v3  ;;  %v1720_v33 = vsub.f32 %v8667_v0, %v1564_v48  ;;  %v7769_v37 = vpop.f32.mrb[62].mxu1 }
 0x342   :  { %2609 = vst.msk [vmem:[%s8266_s7 + $0x24] sm:$0xf] %vm2599_vm3, %v4073_v23  ;;  %v4074_v41 = vpack.c.bf16 %v4910_v54, %v4910_v54  ;;  %v1567_v20 = vpop.xlane.xlu0 %1566  ;;  %8671 = vst [vmem:[#allocation32_spill] sm:$0xff] %v7769_v37  ;;  %v7775_v0 = vpop.f32.mrb[63].mxu1 }
 0x343   :  { %v4912_v43 = vpop.eup %4911  ;;  %4921 = vpow2.f32 %v1799_v13  ;;  %v1801_v61 = vmul.f32 1.442695, %v1720_v33  ;;  %v1721_v34 = vsub.f32 %v8670_v6, %v1567_v20  ;;  %8672 = vst [vmem:[#allocation33_spill] sm:$0xff] %v7775_v0  ;;  %v8675_v0 = vld [vmem:[#allocation9_spill] sm:$0xff] }
 0x344   :  { %2610 = vst.msk [vmem:[%s8266_s7 + $0x28] sm:$0xf] %vm2599_vm3, %v4074_v41  ;;  %v4075_v3 = vpack.c.bf16 %v4912_v43, %v4912_v43  ;;  %v1570_v48 = vpop.xlane.xlu1 %1569  ;;  %v8674_v41 = vld [vmem:[#allocation21_spill] sm:$0xff] }
 0x345   :  { %v4914_v23 = vpop.eup %4913  ;;  %4923 = vpow2.f32 %v1801_v61  ;;  %v1803_v54 = vmul.f32 1.442695, %v1721_v34  ;;  %v1722_v7 = vsub.f32 %v8673_v27, %v1570_v48 }
 0x346   :  { %2611 = vst.msk [vmem:[%s8266_s7 + $0x2c] sm:$0xf] %vm2599_vm3, %v4075_v3  ;;  %v4076_v33 = vpack.c.bf16 %v4914_v23, %v4914_v23  ;;  %v1573_v13 = vpop.xlane.xlu0 %1572  ;;  %v7788_v3 = vpop.f32.mrb[64].mxu1 }
 0x347   :  { %v4916_v20 = vpop.eup %4915  ;;  %4925 = vpow2.f32 %v1803_v54  ;;  %v1805_v6 = vmul.f32 1.442695, %v1722_v7  ;;  %v1723_v43 = vsub.f32 %v8674_v41, %v1573_v13  ;;  %8676 = vst [vmem:[#allocation34_spill] sm:$0xff] %v7788_v3  ;;  %v7794_v54 = vpop.f32.mrb[65].mxu1 }
 0x348   :  { %2612 = vst.msk [vmem:[%s8266_s7 + $0x30] sm:$0xf] %vm2599_vm3, %v4076_v33  ;;  %v4077_v61 = vpack.c.bf16 %v4916_v20, %v4916_v20  ;;  %v1576_v34 = vpop.xlane.xlu1 %1575  ;;  %8677 = vst [vmem:[#allocation16_spill] sm:$0xff] %v7794_v54  ;;  %v8678_v20 = vld [vmem:[#allocation5_spill] sm:$0xff]  ;;  %v8679_v54 = vld [vmem:[#allocation3_spill] sm:$0xff] }
 0x349   :  { %v4918_v27 = vpop.eup %4917  ;;  %4927 = vpow2.f32 %v1805_v6  ;;  %v1807_v48 = vmul.f32 1.442695, %v1723_v43  ;;  %v1724_v37 = vsub.f32 %v8675_v0, %v1576_v34  ;;  %v7797_v6 = vpop.f32.mrb[66].mxu1 }
 0x34a   :  { %2613 = vst.msk [vmem:[%s8266_s7 + $0x34] sm:$0xf] %vm2599_vm3, %v4077_v61  ;;  %v4078_v7 = vpack.c.bf16 %v4918_v27, %v4918_v27  ;;  %v1579_v23 = vpop.xlane.xlu0 %1578  ;;  %v7803_v34 = vpop.f32.mrb[67].mxu1 }
 0x34b   :  { %v4920_v13 = vpop.eup %4919  ;;  %4929 = vpow2.f32 %v1807_v48  ;;  %v1809_v33 = vmul.f32 1.442695, %v1724_v37  ;;  %v1725_v41 = vsub.f32 %v8678_v20, %v1579_v23 }
 0x34c   :  { %2614 = vst.msk [vmem:[%s8266_s7 + $0x38] sm:$0xf] %vm2599_vm3, %v4078_v7  ;;  %v4079_v0 = vpack.c.bf16 %v4920_v13, %v4920_v13  ;;  %v1582_v43 = vpop.xlane.xlu1 %1581 }
 0x34d   :  { %v4922_v61 = vpop.eup %4921  ;;  %4931 = vpow2.f32 %v1809_v33  ;;  %v1811_v27 = vmul.f32 1.442695, %v1725_v41  ;;  %v1726_v3 = vsub.f32 %v8679_v54, %v1582_v43 }
 0x34e   :  { %2615 = vst.msk [vmem:[%s8266_s7 + $0x3c] sm:$0xf] %vm2599_vm3, %v4079_v0  ;;  %v4080_v37 = vpack.c.bf16 %v4922_v61, %v4922_v61  ;;  %v1585_v48 = vpop.xlane.xlu0 %1584  ;;  %v7816_v0 = vpop.f32.mrb[68].mxu1 }
 0x34f   :  { %v4924_v23 = vpop.eup %4923  ;;  %4933 = vpow2.f32 %v1811_v27  ;;  %v1813_v20 = vmul.f32 1.442695, %v1726_v3  ;;  %v1727_v7 = vsub.f32 %v7044_v59, %v1585_v48  ;;  %v7822_v61 = vpop.f32.mrb[69].mxu1 }
 0x350   :  { %2616 = vst.msk [vmem:[%s8266_s7 + $0x40] sm:$0xf] %vm2599_vm3, %v4080_v37  ;;  %v4081_v13 = vpack.c.bf16 %v4924_v23, %v4924_v23  ;;  %v1588_v33 = vpop.xlane.xlu1 %1587  ;;  %v7825_v23 = vpop.f32.mrb[70].mxu1 }
 0x351   :  { %v4926_v54 = vpop.eup %4925  ;;  %4935 = vpow2.f32 %v1813_v20  ;;  %v1815_v41 = vmul.f32 1.442695, %v1727_v7  ;;  %v1728_v43 = vsub.f32 %v7056_v49, %v1588_v33  ;;  %v7831_v7 = vpop.f32.mrb[71].mxu1 }
 0x352   :  { %2617 = vst.msk [vmem:[%s8266_s7 + $0x44] sm:$0xf] %vm2599_vm3, %v4081_v13  ;;  %v4082_v59 = vpack.c.bf16 %v4926_v54, %v4926_v54  ;;  %v1591_v3 = vpop.xlane.xlu0 %1590 }
 0x353   :  { %v4928_v27 = vpop.eup %4927  ;;  %4937 = vpow2.f32 %v1815_v41  ;;  %v1817_v37 = vmul.f32 1.442695, %v1728_v43  ;;  %v1729_v48 = vsub.f32 %v7069_v57, %v1591_v3 }
 0x354   :  { %2618 = vst.msk [vmem:[%s8266_s7 + $0x48] sm:$0xf] %vm2599_vm3, %v4082_v59  ;;  %v4083_v49 = vpack.c.bf16 %v4928_v27, %v4928_v27  ;;  %v1594_v20 = vpop.xlane.xlu1 %1593 }
 0x355   :  { %v4930_v13 = vpop.eup %4929  ;;  %4939 = vpow2.f32 %v1817_v37  ;;  %v1819_v33 = vmul.f32 1.442695, %v1729_v48  ;;  %v1730_v54 = vsub.f32 %v7081_v18, %v1594_v20 }
 0x356   :  { %2619 = vst.msk [vmem:[%s8266_s7 + $0x4c] sm:$0xf] %vm2599_vm3, %v4083_v49  ;;  %v4084_v57 = vpack.c.bf16 %v4930_v13, %v4930_v13  ;;  %v1597_v41 = vpop.xlane.xlu0 %1596  ;;  %v7844_v49 = vpop.f32.mrb[72].mxu1 }
 0x357   :  { %v4932_v43 = vpop.eup %4931  ;;  %4941 = vpow2.f32 %v1819_v33  ;;  %v1821_v3 = vmul.f32 1.442695, %v1730_v54  ;;  %v1731_v59 = vsub.f32 %v7093_v4, %v1597_v41  ;;  %v7850_v33 = vpop.f32.mrb[73].mxu1 }
 0x358   :  { %2620 = vst.msk [vmem:[%s8266_s7 + $0x50] sm:$0xf] %vm2599_vm3, %v4084_v57  ;;  %v4085_v27 = vpack.c.bf16 %v4932_v43, %v4932_v43  ;;  %v1606_v37 = vpop.xlane.xlu1 %1605  ;;  %8680 = vst [vmem:[#allocation20_spill] sm:$0xff] %v7850_v33  ;;  %v7853_v43 = vpop.f32.mrb[74].mxu1 }
 0x359   :  { %v4934_v18 = vpop.eup %4933  ;;  %4943 = vpow2.f32 %v1821_v3  ;;  %v1823_v48 = vmul.f32 1.442695, %v1731_v59  ;;  %v1734_v20 = vsub.f32 %v7106_v29, %v1606_v37  ;;  %v7859_v59 = vpop.f32.mrb[75].mxu1 }
 0x35a   :  { %2621 = vst.msk [vmem:[%s8266_s7 + $0x54] sm:$0xf] %vm2599_vm3, %v4085_v27  ;;  %v4086_v4 = vpack.c.bf16 %v4934_v18, %v4934_v18  ;;  %v1603_v13 = vpop.xlane.xlu0 %1602  ;;  %8681 = vst [vmem:[#allocation2_spill] sm:$0xff] %v7859_v59  ;;  %v8682_v18 = vld [vmem:[#allocation4_spill] sm:$0xff] }
 0x35b   :  { %v4936_v54 = vpop.eup %4935  ;;  %4945 = vpow2.f32 %v1823_v48  ;;  %v1829_v57 = vmul.f32 1.442695, %v1734_v20  ;;  %v1733_v41 = vsub.f32 %v7119_v9, %v1603_v13 }
 0x35c   :  { %2622 = vst.msk [vmem:[%s8266_s7 + $0x58] sm:$0xf] %vm2599_vm3, %v4086_v4  ;;  %v4087_v29 = vpack.c.bf16 %v4936_v54, %v4936_v54  ;;  %v1612_v3 = vpop.xlane.xlu1 %1611 }
 0x35d   :  { %v4938_v27 = vpop.eup %4937  ;;  %4947 = vpow2.f32 %v1829_v57  ;;  %v1827_v37 = vmul.f32 1.442695, %v1733_v41  ;;  %v1736_v33 = vsub.f32 %v8682_v18, %v1612_v3  ;;  %v8683_v18 = vld [vmem:[#allocation12_spill] sm:$0xff] }
 0x35e   :  { %2623 = vst.msk [vmem:[%s8266_s7 + $0x5c] sm:$0xf] %vm2599_vm3, %v4087_v29  ;;  %v4088_v9 = vpack.c.bf16 %v4938_v27, %v4938_v27  ;;  %v1609_v48 = vpop.xlane.xlu0 %1608  ;;  %v7872_v29 = vpop.f32.mrb[76].mxu1 }
 0x35f   :  { %v4940_v20 = vpop.eup %4939  ;;  %4949 = vpow2.f32 %v1827_v37  ;;  %v1833_v13 = vmul.f32 1.442695, %v1736_v33  ;;  %v1735_v4 = vsub.f32 %v7144_v28, %v1609_v48  ;;  %8684 = vst [vmem:[#allocation19_spill] sm:$0xff] %v7872_v29  ;;  %v7878_v27 = vpop.f32.mrb[77].mxu1  ;;  %v8686_v48 = vld [vmem:[#allocation14_spill] sm:$0xff] }
 0x360   :  { %2624 = vst.msk [vmem:[%s8266_s7 + $0x60] sm:$0xf] %vm2599_vm3, %v4088_v9  ;;  %v4089_v54 = vpack.c.bf16 %v4940_v20, %v4940_v20  ;;  %v1618_v57 = vpop.xlane.xlu1 %1617  ;;  %8685 = vst [vmem:[#allocation21_spill] sm:$0xff] %v7878_v27  ;;  %v8689_v27 = vld [vmem:[#allocation11_spill] sm:$0xff] }
 0x361   :  { %v4942_v41 = vpop.eup %4941  ;;  %4951 = vpow2.f32 %v1833_v13  ;;  %v1831_v3 = vmul.f32 1.442695, %v1735_v4  ;;  %v1738_v59 = vsub.f32 %v8683_v18, %v1618_v57  ;;  %v7881_v13 = vpop.f32.mrb[78].mxu1 }
 0x362   :  { %2625 = vst.msk [vmem:[%s8266_s7 + $0x64] sm:$0xf] %vm2599_vm3, %v4089_v54  ;;  %v4090_v28 = vpack.c.bf16 %v4942_v41, %v4942_v41  ;;  %v1615_v33 = vpop.xlane.xlu0 %1614  ;;  %8687 = vst [vmem:[#allocation9_spill] sm:$0xff] %v7881_v13  ;;  %v7887_v18 = vpop.f32.mrb[79].mxu1 }
 0x363   :  { %v4944_v37 = vpop.eup %4943  ;;  %4953 = vpow2.f32 %v1831_v3  ;;  %v1837_v9 = vmul.f32 1.442695, %v1738_v59  ;;  %v1737_v20 = vsub.f32 %v8686_v48, %v1615_v33  ;;  %8688 = vst [vmem:[#allocation5_spill] sm:$0xff] %v7887_v18  ;;  %v8691_v18 = vld [vmem:[#allocation15_spill] sm:$0xff] }
 0x364   :  { %2626 = vst.msk [vmem:[%s8266_s7 + $0x68] sm:$0xf] %vm2599_vm3, %v4090_v28  ;;  %v4091_v4 = vpack.c.bf16 %v4944_v37, %v4944_v37  ;;  %v1624_v57 = vpop.xlane.xlu1 %1623  ;;  %v8690_v28 = vld [vmem:[#allocation13_spill] sm:$0xff] }
 0x365   :  { %v4946_v54 = vpop.eup %4945  ;;  %4955 = vpow2.f32 %v1837_v9  ;;  %v1835_v41 = vmul.f32 1.442695, %v1737_v20  ;;  %v1740_v29 = vsub.f32 %v8689_v27, %v1624_v57 }
 0x366   :  { %2627 = vst.msk [vmem:[%s8266_s7 + $0x6c] sm:$0xf] %vm2599_vm3, %v4091_v4  ;;  %v4092_v59 = vpack.c.bf16 %v4946_v54, %v4946_v54  ;;  %v1621_v3 = vpop.xlane.xlu0 %1620  ;;  %v7900_v4 = vpop.f32.mrb[80].mxu1 }
 0x367   :  { %v4948_v33 = vpop.eup %4947  ;;  %4957 = vpow2.f32 %v1835_v41  ;;  %v1841_v48 = vmul.f32 1.442695, %v1740_v29  ;;  %v1739_v37 = vsub.f32 %v8690_v28, %v1621_v3  ;;  %v7906_v41 = vpop.f32.mrb[81].mxu1 }
 0x368   :  { %2628 = vst.msk [vmem:[%s8266_s7 + $0x70] sm:$0xf] %vm2599_vm3, %v4092_v59  ;;  %v4095_v9 = vpack.c.bf16 %v4948_v33, %v4948_v33  ;;  %v1630_v20 = vpop.xlane.xlu1 %1629 }
 0x369   :  { %v4950_v27 = vpop.eup %4949  ;;  %4959 = vpow2.f32 %v1841_v48  ;;  %v1839_v57 = vmul.f32 1.442695, %v1739_v37  ;;  %v1742_v13 = vsub.f32 %v8691_v18, %v1630_v20  ;;  %v7909_v48 = vpop.f32.mrb[82].mxu1 }
 0x36a   :  { %2631 = vst.msk [vmem:[%s8266_s7 + $0x7c] sm:$0xf] %vm2599_vm3, %v4095_v9  ;;  %v4094_v29 = vpack.c.bf16 %v4950_v27, %v4950_v27  ;;  %v1627_v54 = vpop.xlane.xlu0 %1626  ;;  %v7915_v37 = vpop.f32.mrb[83].mxu1 }
 0x36b   :  { %v4952_v3 = vpop.eup %4951  ;;  %4961 = vpow2.f32 %v1839_v57  ;;  %v1845_v59 = vmul.f32 1.442695, %v1742_v13  ;;  %v1741_v33 = vsub.f32 %v7219_v19, %v1627_v54 }
 0x36c   :  { %2630 = vst.msk [vmem:[%s8266_s7 + $0x78] sm:$0xf] %vm2599_vm3, %v4094_v29  ;;  %v4097_v18 = vpack.c.bf16 %v4952_v3, %v4952_v3  ;;  %v1636_v28 = vpop.xlane.xlu1 %1635 }
 0x36d   :  { %v4954_v9 = vpop.eup %4953  ;;  %4963 = vpow2.f32 %v1845_v59  ;;  %v1843_v20 = vmul.f32 1.442695, %v1741_v33  ;;  %v1744_v27 = vsub.f32 %v7231_v26, %v1636_v28 }
 0x36e   :  { %2633 = vst.msk [vmem:[%s8266_s7 + $0x84] sm:$0xf] %vm2599_vm3, %v4097_v18  ;;  %v4096_v19 = vpack.c.bf16 %v4954_v9, %v4954_v9  ;;  %v1633_v13 = vpop.xlane.xlu0 %1632  ;;  %v7928_v18 = vpop.f32.mrb[84].mxu1 }
 0x36f   :  { %v4956_v57 = vpop.eup %4955  ;;  %4965 = vpow2.f32 %v1843_v20  ;;  %v1849_v54 = vmul.f32 1.442695, %v1744_v27  ;;  %v1743_v29 = vsub.f32 %v7244_v5, %v1633_v13  ;;  %v7934_v20 = vpop.f32.mrb[85].mxu1 }
 0x370   :  { %2632 = vst.msk [vmem:[%s8266_s7 + $0x80] sm:$0xf] %vm2599_vm3, %v4096_v19  ;;  %v4099_v3 = vpack.c.bf16 %v4956_v57, %v4956_v57  ;;  %v1642_v59 = vpop.xlane.xlu1 %1641  ;;  %8692 = vst [vmem:[#allocation3_spill] sm:$0xff] %v7934_v20  ;;  %v7937_v57 = vpop.f32.mrb[86].mxu1 }
 0x371   :  { %v4958_v26 = vpop.eup %4957  ;;  %4967 = vpow2.f32 %v1849_v54  ;;  %v1847_v33 = vmul.f32 1.442695, %v1743_v29  ;;  %v1746_v28 = vsub.f32 %v7256_v25, %v1642_v59  ;;  %v7943_v29 = vpop.f32.mrb[87].mxu1 }
 0x372   :  { %2635 = vst.msk [vmem:[%s8266_s7 + $0x8c] sm:$0xf] %vm2599_vm3, %v4099_v3  ;;  %v4098_v5 = vpack.c.bf16 %v4958_v26, %v4958_v26  ;;  %v1639_v9 = vpop.xlane.xlu0 %1638  ;;  %v8693_v26 = vld [vmem:[#allocation18_spill] sm:$0xff] }
 0x373   :  { %v4960_v27 = vpop.eup %4959  ;;  %4969 = vpow2.f32 %v1847_v33  ;;  %v1853_v19 = vmul.f32 1.442695, %v1746_v28  ;;  %v1745_v13 = vsub.f32 %v7269_v39, %v1639_v9 }
 0x374   :  { %2634 = vst.msk [vmem:[%s8266_s7 + $0x88] sm:$0xf] %vm2599_vm3, %v4098_v5  ;;  %v4101_v25 = vpack.c.bf16 %v4960_v27, %v4960_v27  ;;  %v1648_v54 = vpop.xlane.xlu1 %1647 }
 0x375   :  { %v4962_v3 = vpop.eup %4961  ;;  %4971 = vpow2.f32 %v1853_v19  ;;  %v1851_v59 = vmul.f32 1.442695, %v1745_v13  ;;  %v1748_v20 = vsub.f32 %v8693_v26, %v1648_v54 }
 0x376   :  { %2637 = vst.msk [vmem:[%s8266_s7 + $0x94] sm:$0xf] %vm2599_vm3, %v4101_v25  ;;  %v4100_v39 = vpack.c.bf16 %v4962_v3, %v4962_v3  ;;  %v1645_v33 = vpop.xlane.xlu0 %1644  ;;  %v7956_v25 = vpop.f32.mrb[88].mxu1 }
 0x377   :  { %v4964_v28 = vpop.eup %4963  ;;  %4973 = vpow2.f32 %v1851_v59  ;;  %v1857_v9 = vmul.f32 1.442695, %v1748_v20  ;;  %v1747_v5 = vsub.f32 %v7294_v63, %v1645_v33  ;;  %v7962_v3 = vpop.f32.mrb[89].mxu1 }
 0x378   :  { %2636 = vst.msk [vmem:[%s8266_s7 + $0x90] sm:$0xf] %vm2599_vm3, %v4100_v39  ;;  %v4103_v27 = vpack.c.bf16 %v4964_v28, %v4964_v28  ;;  %v1654_v19 = vpop.xlane.xlu1 %1653  ;;  %v7965_v28 = vpop.f32.mrb[90].mxu1 }
 0x379   :  { %v4966_v13 = vpop.eup %4965  ;;  %4975 = vpow2.f32 %v1857_v9  ;;  %v1855_v54 = vmul.f32 1.442695, %v1747_v5  ;;  %v1750_v26 = vsub.f32 %v7306_v42, %v1654_v19  ;;  %v7971_v5 = vpop.f32.mrb[91].mxu1 }
 0x37a   :  { %2639 = vst.msk [vmem:[%s8266_s7 + $0x9c] sm:$0xf] %vm2599_vm3, %v4103_v27  ;;  %v4102_v63 = vpack.c.bf16 %v4966_v13, %v4966_v13  ;;  %v1651_v20 = vpop.xlane.xlu0 %1650 }
 0x37b   :  { %v4968_v59 = vpop.eup %4967  ;;  %4977 = vpow2.f32 %v1855_v54  ;;  %v1861_v39 = vmul.f32 1.442695, %v1750_v26  ;;  %v1749_v33 = vsub.f32 %v7319_v12, %v1651_v20 }
 0x37c   :  { %2638 = vst.msk [vmem:[%s8266_s7 + $0x98] sm:$0xf] %vm2599_vm3, %v4102_v63  ;;  %v4105_v42 = vpack.c.bf16 %v4968_v59, %v4968_v59  ;;  %v1660_v9 = vpop.xlane.xlu1 %1659 }
 0x37d   :  { %v4970_v27 = vpop.eup %4969  ;;  %4979 = vpow2.f32 %v1861_v39  ;;  %v1859_v19 = vmul.f32 1.442695, %v1749_v33  ;;  %v1752_v13 = vsub.f32 %v7331_v15, %v1660_v9 }
 0x37e   :  { %2641 = vst.msk [vmem:[%s8266_s7 + $0xa4] sm:$0xf] %vm2599_vm3, %v4105_v42  ;;  %v4104_v12 = vpack.c.bf16 %v4970_v27, %v4970_v27  ;;  %v1657_v54 = vpop.xlane.xlu0 %1656  ;;  %v7984_v42 = vpop.f32.mrb[92].mxu1 }
 0x37f   :  { %v4972_v26 = vpop.eup %4971  ;;  %4981 = vpow2.f32 %v1859_v19  ;;  %v1865_v20 = vmul.f32 1.442695, %v1752_v13  ;;  %v1751_v63 = vsub.f32 %v7344_v44, %v1657_v54  ;;  %v7990_v19 = vpop.f32.mrb[93].mxu1 }
 0x380   :  { %2640 = vst.msk [vmem:[%s8266_s7 + $0xa0] sm:$0xf] %vm2599_vm3, %v4104_v12  ;;  %v4107_v59 = vpack.c.bf16 %v4972_v26, %v4972_v26  ;;  %v1666_v39 = vpop.xlane.xlu1 %1665  ;;  %v7993_v26 = vpop.f32.mrb[94].mxu1 }
 0x381   :  { %v4974_v15 = vpop.eup %4973  ;;  %4983 = vpow2.f32 %v1865_v20  ;;  %v1863_v33 = vmul.f32 1.442695, %v1751_v63  ;;  %v1754_v9 = vsub.f32 %v7356_v50, %v1666_v39  ;;  %v7999_v63 = vpop.f32.mrb[95].mxu1 }
 0x382   :  { %2643 = vst.msk [vmem:[%s8266_s7 + $0xac] sm:$0xf] %vm2599_vm3, %v4107_v59  ;;  %v4106_v44 = vpack.c.bf16 %v4974_v15, %v4974_v15  ;;  %v1663_v27 = vpop.xlane.xlu0 %1662  ;;  %8694 = vst [vmem:[#allocation4_spill] sm:$0xff] %v7999_v63 }
 0x383   :  { %v4976_v13 = vpop.eup %4975  ;;  %4985 = vpow2.f32 %v1863_v33  ;;  %v1869_v12 = vmul.f32 1.442695, %v1754_v9  ;;  %v1753_v54 = vsub.f32 %v7369_v52, %v1663_v27 }
 0x384   :  { %2642 = vst.msk [vmem:[%s8266_s7 + $0xa8] sm:$0xf] %vm2599_vm3, %v4106_v44  ;;  %v4109_v50 = vpack.c.bf16 %v4976_v13, %v4976_v13  ;;  %v1672_v20 = vpop.xlane.xlu1 %1671 }
 0x385   :  { %v4978_v59 = vpop.eup %4977  ;;  %4987 = vpow2.f32 %v1869_v12  ;;  %v1867_v39 = vmul.f32 1.442695, %v1753_v54  ;;  %v1756_v15 = vsub.f32 %v7381_v16, %v1672_v20 }
 0x386   :  { %2645 = vst.msk [vmem:[%s8266_s7 + $0xb4] sm:$0xf] %vm2599_vm3, %v4109_v50  ;;  %v4108_v52 = vpack.c.bf16 %v4978_v59, %v4978_v59  ;;  %v1669_v33 = vpop.xlane.xlu0 %1668  ;;  %v4688_v12 = vpop.f32.mrb[32].mxu0 }
 0x387   :  { %v4980_v9 = vpop.eup %4979  ;;  %4989 = vpow2.f32 %v1867_v39  ;;  %v1873_v27 = vmul.f32 1.442695, %v1756_v15  ;;  %v1755_v44 = vsub.f32 %v7394_v46, %v1669_v33  ;;  %v3375_v50 = vmul.f32 %v4688_v12, %v7534_v31  ;;  %v3118_v63 = vpop.f32.mrb[33].mxu0 }
 0x388   :  { %2644 = vst.msk [vmem:[%s8266_s7 + $0xb0] sm:$0xf] %vm2599_vm3, %v4108_v52  ;;  %v4111_v13 = vpack.c.bf16 %v4980_v9, %v4980_v9  ;;  %v1678_v16 = vpop.xlane.xlu1 %1677  ;;  %v3373_v39 = vmul.f32 %v3118_v63, %v7547_v45  ;;  %v4689_v52 = vpop.f32.mrb[34].mxu0 }
 0x389   :  { %v4982_v54 = vpop.eup %4981  ;;  %4991 = vpow2.f32 %v1873_v27  ;;  %v1871_v20 = vmul.f32 1.442695, %v1755_v44  ;;  %v1758_v59 = vsub.f32 %v7406_v14, %v1678_v16  ;;  %v3376_v31 = vmul.f32 %v4689_v52, %v7551_v62  ;;  %v3121_v44 = vpop.f32.mrb[35].mxu0 }
 0x38a   :  { %2647 = vst.msk [vmem:[%s8266_s7 + $0xbc] sm:$0xf] %vm2599_vm3, %v4111_v13  ;;  %v4110_v46 = vpack.c.bf16 %v4982_v54, %v4982_v54  ;;  %v1675_v15 = vpop.xlane.xlu0 %1674  ;;  %v3374_v13 = vmul.f32 %v3121_v44, %v7559_v10 }
 0x38b   :  { %v4984_v33 = vpop.eup %4983  ;;  %4993 = vpow2.f32 %v1871_v20  ;;  %v1877_v9 = vmul.f32 1.442695, %v1758_v59  ;;  %v1757_v27 = vsub.f32 %v7419_v30, %v1675_v15  ;;  %v4264_v16 = vpack.c.bf16 %v3376_v31, %v3375_v50 }
 0x38c   :  { %2646 = vst.msk [vmem:[%s8266_s7 + $0xb8] sm:$0xf] %vm2599_vm3, %v4110_v46  ;;  %v4113_v14 = vpack.c.bf16 %v4984_v33, %v4984_v33  ;;  %v1684_v12 = vpop.xlane.xlu1 %1683  ;;  %v4259_v62 = vpack.c.bf16 %v3374_v13, %v3373_v39 }
 0x38d   :  { %v4986_v45 = vpop.eup %4985  ;;  %4995 = vpow2.f32 %v1877_v9  ;;  %v1875_v63 = vmul.f32 1.442695, %v1757_v27  ;;  %v1760_v54 = vsub.f32 %v7431_v8, %v1684_v12  ;;  %4416 = vst [vmem:[%s8267_s9 + $0x8] sm:$0xff] %v4264_v16  }
 0x38e   :  { %2649 = vst.msk [vmem:[%s8266_s7 + $0xc4] sm:$0xf] %vm2599_vm3, %v4113_v14  ;;  %v4112_v30 = vpack.c.bf16 %v4986_v45, %v4986_v45  ;;  %v1681_v20 = vpop.xlane.xlu0 %1680  ;;  %4260 = vst [vmem:[%s8267_s9] sm:$0xff] %v4259_v62  }
 0x38f   :  { %v4988_v59 = vpop.eup %4987  ;;  %4997 = vpow2.f32 %v1875_v63  ;;  %v1881_v10 = vmul.f32 1.442695, %v1760_v54  ;;  %v1759_v46 = vsub.f32 %v7449_v60, %v1681_v20  ;;  %v4692_v33 = vpop.f32.mrb[36].mxu0 }
 0x390   :  { %2648 = vst.msk [vmem:[%s8266_s7 + $0xc0] sm:$0xf] %vm2599_vm3, %v4112_v30  ;;  %v4115_v8 = vpack.c.bf16 %v4988_v59, %v4988_v59  ;;  %v1690_v50 = vpop.xlane.xlu1 %1689  ;;  %v3379_v9 = vmul.f32 %v4692_v33, %v7578_v51  ;;  %v3134_v31 = vpop.f32.mrb[37].mxu0 }
 0x391   :  { %v4990_v39 = vpop.eup %4989  ;;  %4999 = vpow2.f32 %v1881_v10  ;;  %v1879_v15 = vmul.f32 1.442695, %v1759_v46  ;;  %v1762_v52 = vsub.f32 %v7461_v36, %v1690_v50  ;;  %v3377_v12 = vmul.f32 %v3134_v31, %v7585_v24  ;;  %v4693_v45 = vpop.f32.mrb[38].mxu0 }
 0x392   :  { %2651 = vst.msk [vmem:[%s8266_s7 + $0xcc] sm:$0xf] %vm2599_vm3, %v4115_v8  ;;  %v4114_v60 = vpack.c.bf16 %v4990_v39, %v4990_v39  ;;  %v1687_v27 = vpop.xlane.xlu0 %1686  ;;  %v3380_v63 = vmul.f32 %v4693_v45, %v7589_v35  ;;  %v3137_v16 = vpop.f32.mrb[39].mxu0 }
 0x393   :  { %v4992_v44 = vpop.eup %4991  ;;  %5001 = vpow2.f32 %v1879_v15  ;;  %v1885_v14 = vmul.f32 1.442695, %v1762_v52  ;;  %v1761_v13 = vsub.f32 %v7474_v56, %v1687_v27  ;;  %v3378_v62 = vmul.f32 %v3137_v16, %v7595_v17  ;;  %v8695_v15 = vld [vmem:[#allocation17_spill] sm:$0xff] }
 0x394   :  { %2650 = vst.msk [vmem:[%s8266_s7 + $0xc8] sm:$0xf] %vm2599_vm3, %v4114_v60  ;;  %v4117_v36 = vpack.c.bf16 %v4992_v44, %v4992_v44  ;;  %v4274_v20 = vpack.c.bf16 %v3380_v63, %v3379_v9 }
 0x395   :  { %v1600_v51 = vpop.xlane.xlu1 %1599  ;;  %v4994_v54 = vpop.eup %4993  ;;  %5003 = vpow2.f32 %v1885_v14  ;;  %v1883_v30 = vmul.f32 1.442695, %v1761_v13  ;;  %v4269_v35 = vpack.c.bf16 %v3378_v62, %v3377_v12 }
 0x396   :  { %v1732_v56 = vsub.f32 %v7486_v40, %v1600_v51  ;;  %2653 = vst.msk [vmem:[%s8266_s7 + $0xd4] sm:$0xf] %vm2599_vm3, %v4117_v36  ;;  %v4116_v24 = vpack.c.bf16 %v4994_v54, %v4994_v54  ;;  %v1693_v59 = vpop.xlane.xlu0 %1692  ;;  %4418 = vst [vmem:[%s8267_s9 + $0x18] sm:$0xff] %v4274_v20  }
 0x397   :  { %v4996_v10 = vpop.eup %4995  ;;  %5005 = vpow2.f32 %v1883_v30  ;;  %v1763_v8 = vsub.f32 %v7499_v22, %v1693_v59  ;;  %4417 = vst [vmem:[%s8267_s9 + $0x10] sm:$0xff] %v4269_v35   ;;  %v8696_v30 = vld [vmem:[#allocation8_spill] sm:$0xff] }
 0x398   :  { %v1825_v46 = vmul.f32 1.442695, %v1732_v56  ;;  %2652 = vst.msk [vmem:[%s8266_s7 + $0xd0] sm:$0xf] %vm2599_vm3, %v4116_v24  ;;  %v4119_v40 = vpack.c.bf16 %v4996_v10, %v4996_v10  ;;  %v4696_v52 = vpop.f32.mrb[40].mxu0 }
 0x399   :  { %v1696_v17 = vpop.xlane.xlu1 %1695  ;;  %v4998_v50 = vpop.eup %4997  ;;  %v1887_v39 = vmul.f32 1.442695, %v1763_v8  ;;  %v3383_v60 = vmul.f32 %v4696_v52, %v7612_v11 }
 0x39a   :  { %5007 = vpow2.f32 %v1825_v46  ;;  %v1764_v22 = vsub.f32 %v8695_v15, %v1696_v17  ;;  %2655 = vst.msk [vmem:[%s8266_s7 + $0xdc] sm:$0xf] %vm2599_vm3, %v4119_v40  ;;  %v4118_v33 = vpack.c.bf16 %v4998_v50, %v4998_v50  ;;  %v3150_v27 = vpop.f32.mrb[41].mxu0 }
 0x39b   :  { %v1699_v9 = vpop.xlane.xlu0 %1698  ;;  %v5000_v31 = vpop.eup %4999  ;;  %5009 = vpow2.f32 %v1887_v39  ;;  %v3381_v13 = vmul.f32 %v3150_v27, %v7619_v32  ;;  %v8697_v39 = vld [vmem:[#allocation7_spill] sm:$0xff] }
 0x39c   :  { %v1889_v44 = vmul.f32 1.442695, %v1764_v22  ;;  %v1765_v14 = vsub.f32 %v7524_v55, %v1699_v9  ;;  %v4697_v12 = vpop.f32.mrb[42].mxu0  ;;  %2654 = vst.msk [vmem:[%s8266_s7 + $0xd8] sm:$0xf] %vm2599_vm3, %v4118_v33  ;;  %v4121_v45 = vpack.c.bf16 %v5000_v31, %v5000_v31  ;;  %v8698_v33 = vld [vmem:[#allocation22_spill] sm:$0xff] }
 0x39d   :  { %v3384_v36 = vmul.f32 %v4697_v12, %v7623_v53  ;;  %v3153_v63 = vpop.f32.mrb[43].mxu0  ;;  %v1702_v11 = vpop.xlane.xlu1 %1701 }
 0x39e   :  { %v5002_v16 = vpop.eup %5001  ;;  %5011 = vpow2.f32 %v1889_v44  ;;  %v1891_v51 = vmul.f32 1.442695, %v1765_v14  ;;  %v3382_v54 = vmul.f32 %v3153_v63, %v7629_v1  ;;  %v1766_v55 = vsub.f32 %v8696_v30, %v1702_v11  ;;  %2657 = vst.msk [vmem:[%s8266_s7 + $0xe4] sm:$0xf] %vm2599_vm3, %v4121_v45  ;;  %v8699_v63 = vld [vmem:[#allocation6_spill] sm:$0xff] }
 0x39f   :  { %v4120_v32 = vpack.c.bf16 %v5002_v16, %v5002_v16  ;;  %v4284_v62 = vpack.c.bf16 %v3384_v36, %v3383_v60  ;;  %v5004_v56 = vpop.eup %5003 }
 0x3a0   :  { %5013 = vpow2.f32 %v1891_v51  ;;  %v4279_v24 = vpack.c.bf16 %v3382_v54, %v3381_v13  ;;  %v1893_v53 = vmul.f32 1.442695, %v1766_v55  ;;  %v4123_v20 = vpack.c.bf16 %v5004_v56, %v5004_v56  ;;  %v4700_v59 = vpop.f32.mrb[44].mxu0  ;;  %v8700_v55 = vld [vmem:[#allocation10_spill] sm:$0xff] }
 0x3a1   :  { %2656 = vst.msk [vmem:[%s8266_s7 + $0xe0] sm:$0xf] %vm2599_vm3, %v4120_v32  ;;  %4420 = vst [vmem:[%s8267_s9 + $0x28] sm:$0xff] %v4284_v62   ;;  %v5006_v1 = vpop.eup %5005  ;;  %v3387_v35 = vmul.f32 %v4700_v59, %v7644_v58  ;;  %v3166_v46 = vpop.f32.mrb[45].mxu0 }
 0x3a2   :  { %4419 = vst [vmem:[%s8267_s9 + $0x20] sm:$0xff] %v4279_v24   ;;  %5015 = vpow2.f32 %v1893_v53  ;;  %2659 = vst.msk [vmem:[%s8266_s7 + $0xec] sm:$0xf] %vm2599_vm3, %v4123_v20  ;;  %v4122_v10 = vpack.c.bf16 %v5006_v1, %v5006_v1  ;;  %v3385_v40 = vmul.f32 %v3166_v46, %v7651_v47  ;;  %v4701_v17 = vpop.f32.mrb[46].mxu0  ;;  %v8702_v20 = vld [vmem:[#allocation24_spill] sm:$0xff] }
 0x3a3   :  { %v3388_v15 = vmul.f32 %v4701_v17, %v8697_v39  ;;  %v3169_v22 = vpop.f32.mrb[47].mxu0 }
 0x3a4   :  { %v5008_v8 = vpop.eup %5007  ;;  %2658 = vst.msk [vmem:[%s8266_s7 + $0xe8] sm:$0xf] %vm2599_vm3, %v4122_v10  ;;  %v3386_v60 = vmul.f32 %v3169_v22, %v8698_v33  ;;  %v8703_v10 = vld [vmem:[#allocation25_spill] sm:$0xff]  ;;  %v8706_v33 = vld [vmem:[#allocation28_spill] sm:$0xff] }
 0x3a5   :  { %v4093_v50 = vpack.c.bf16 %v5008_v8, %v5008_v8  ;;  %v5010_v52 = vpop.eup %5009  ;;  %v4294_v47 = vpack.c.bf16 %v3388_v15, %v3387_v35  ;;  %v8704_v8 = vld [vmem:[#allocation26_spill] sm:$0xff]  ;;  %v8705_v15 = vld [vmem:[#allocation27_spill] sm:$0xff] }
 0x3a6   :  { %v4124_v58 = vpack.c.bf16 %v5010_v52, %v5010_v52  ;;  %v4289_v27 = vpack.c.bf16 %v3386_v60, %v3385_v40 }
 0x3a7   :  { %2629 = vst.msk [vmem:[%s8266_s7 + $0x74] sm:$0xf] %vm2599_vm3, %v4093_v50  ;;  %4422 = vst [vmem:[%s8267_s9 + $0x38] sm:$0xff] %v4294_v47  }
 0x3a8   :  { %v5012_v9 = vpop.eup %5011  ;;  %2660 = vst.msk [vmem:[%s8266_s7 + $0xf0] sm:$0xf] %vm2599_vm3, %v4124_v58  ;;  %4421 = vst [vmem:[%s8267_s9 + $0x30] sm:$0xff] %v4289_v27   ;;  %v4704_v14 = vpop.f32.mrb[48].mxu0  ;;  %v8707_v27 = vld [vmem:[#allocation29_spill] sm:$0xff] }
 0x3a9   :  { %v4125_v31 = vpack.c.bf16 %v5012_v9, %v5012_v9  ;;  %v3391_v12 = vmul.f32 %v4704_v14, %v7674_v38  ;;  %v3182_v45 = vpop.f32.mrb[49].mxu0 }
 0x3aa   :  { %v5014_v44 = vpop.eup %5013  ;;  %v3389_v11 = vmul.f32 %v3182_v45, %v8699_v63  ;;  %v4705_v16 = vpop.f32.mrb[50].mxu0  ;;  %v8709_v63 = vld [vmem:[#allocation31_spill] sm:$0xff] }
 0x3ab   :  { %2661 = vst.msk [vmem:[%s8266_s7 + $0xf4] sm:$0xf] %vm2599_vm3, %v4125_v31  ;;  %v4126_v13 = vpack.c.bf16 %v5014_v44, %v5014_v44  ;;  %v3392_v54 = vmul.f32 %v4705_v16, %v7684_v21  ;;  %v3185_v30 = vpop.f32.mrb[51].mxu0  ;;  %v8701_v21 = vld [vmem:[#allocation23_spill] sm:$0xff]  ;;  %v8710_v16 = vld [vmem:[#allocation32_spill] sm:$0xff] }
 0x3ac   :  { %v5016_v36 = vpop.eup %5015  ;;  %v3390_v32 = vmul.f32 %v3185_v30, %v8700_v55  ;;  %v8711_v30 = vld [vmem:[#allocation33_spill] sm:$0xff] }
 0x3ad   :  { %2662 = vst.msk [vmem:[%s8266_s7 + $0xf8] sm:$0xf] %vm2599_vm3, %v4126_v13  ;;  %v4127_v51 = vpack.c.bf16 %v5016_v36, %v5016_v36  ;;  %v4304_v38 = vpack.c.bf16 %v3392_v54, %v3391_v12  ;;  %v8708_v12 = vld [vmem:[#allocation30_spill] sm:$0xff] }
 0x3ae   :  { %v4299_v62 = vpack.c.bf16 %v3390_v32, %v3389_v11 }
 0x3af   :  { %2663 = vst.msk [vmem:[%s8266_s7 + $0xfc] sm:$0xf] %vm2599_vm3, %v4127_v51  ;;  %4424 = vst [vmem:[%s8267_s9 + $0x48] sm:$0xff] %v4304_v38  }
 0x3b0   :  { %4423 = vst [vmem:[%s8267_s9 + $0x40] sm:$0xff] %v4299_v62   ;;  %v4708_v56 = vpop.f32.mrb[52].mxu0 }
 0x3b1   :  { %v3395_v24 = vmul.f32 %v4708_v56, %v8701_v21  ;;  %v3198_v53 = vpop.f32.mrb[53].mxu0  ;;  %v8712_v56 = vld [vmem:[#allocation34_spill] sm:$0xff] }
 0x3b2   :  { %v3393_v1 = vmul.f32 %v3198_v53, %v8702_v20  ;;  %v4709_v59 = vpop.f32.mrb[54].mxu0  ;;  %v8713_v53 = vld [vmem:[#allocation16_spill] sm:$0xff] }
 0x3b3   :  { %v3396_v35 = vmul.f32 %v4709_v59, %v8703_v10  ;;  %v3201_v46 = vpop.f32.mrb[55].mxu0 }
 0x3b4   :  { %v3394_v40 = vmul.f32 %v3201_v46, %v8704_v8 }
 0x3b5   :  { %v4314_v17 = vpack.c.bf16 %v3396_v35, %v3395_v24 }
 0x3b6   :  { %v4309_v50 = vpack.c.bf16 %v3394_v40, %v3393_v1 }
 0x3b7   :  { %4426 = vst [vmem:[%s8267_s9 + $0x58] sm:$0xff] %v4314_v17  }
 0x3b8   :  { %4425 = vst [vmem:[%s8267_s9 + $0x50] sm:$0xff] %v4309_v50  }
 0x3b9   :  { %v4712_v39 = vpop.f32.mrb[56].mxu0 }
 0x3ba   :  { %v3399_v22 = vmul.f32 %v4712_v39, %v8705_v15  ;;  %v3214_v52 = vpop.f32.mrb[57].mxu0 }
 0x3bb   :  { %v3397_v60 = vmul.f32 %v3214_v52, %v8706_v33  ;;  %v4713_v58 = vpop.f32.mrb[58].mxu0 }
 0x3bc   :  { %v3400_v47 = vmul.f32 %v4713_v58, %v7741_v2  ;;  %v3217_v9 = vpop.f32.mrb[59].mxu0  ;;  %v8714_v58 = vld [vmem:[#allocation20_spill] sm:$0xff] }
 0x3bd   :  { %v3398_v31 = vmul.f32 %v3217_v9, %v8707_v27  ;;  %v8715_v27 = vld [vmem:[#allocation2_spill] sm:$0xff] }
 0x3be   :  { %v4324_v44 = vpack.c.bf16 %v3400_v47, %v3399_v22 }
 0x3bf   :  { %v4319_v14 = vpack.c.bf16 %v3398_v31, %v3397_v60 }
 0x3c0   :  { %4428 = vst [vmem:[%s8267_s9 + $0x68] sm:$0xff] %v4324_v44  }
 0x3c1   :  { %4427 = vst [vmem:[%s8267_s9 + $0x60] sm:$0xff] %v4319_v14  }
 0x3c2   :  { %v4716_v13 = vpop.f32.mrb[60].mxu0 }
 0x3c3   :  { %v3403_v45 = vmul.f32 %v4716_v13, %v8708_v12  ;;  %v3230_v36 = vpop.f32.mrb[61].mxu0  ;;  %v8716_v13 = vld [vmem:[#allocation19_spill] sm:$0xff] }
 0x3c4   :  { %v3401_v11 = vmul.f32 %v3230_v36, %v8709_v63  ;;  %v4717_v2 = vpop.f32.mrb[62].mxu0  ;;  %v8717_v36 = vld [vmem:[#allocation21_spill] sm:$0xff] }
 0x3c5   :  { %v3404_v51 = vmul.f32 %v4717_v2, %v8710_v16  ;;  %v3233_v54 = vpop.f32.mrb[63].mxu0 }
 0x3c6   :  { %v3402_v55 = vmul.f32 %v3233_v54, %v8711_v30 }
 0x3c7   :  { %v4334_v32 = vpack.c.bf16 %v3404_v51, %v3403_v45  ;;  %v8719_v51 = vld [vmem:[#allocation5_spill] sm:$0xff] }
 0x3c8   :  { %v4329_v38 = vpack.c.bf16 %v3402_v55, %v3401_v11  ;;  %v8718_v11 = vld [vmem:[#allocation9_spill] sm:$0xff] }
 0x3c9   :  { %4430 = vst [vmem:[%s8267_s9 + $0x78] sm:$0xff] %v4334_v32  }
 0x3ca   :  { %4429 = vst [vmem:[%s8267_s9 + $0x70] sm:$0xff] %v4329_v38   ;;  %v4720_v62 = vpop.f32.mrb[64].mxu0 }
 0x3cb   :  { %v3407_v21 = vmul.f32 %v4720_v62, %v8712_v56  ;;  %v3246_v24 = vpop.f32.mrb[65].mxu0 }
 0x3cc   :  { %v3405_v20 = vmul.f32 %v3246_v24, %v8713_v53  ;;  %v4721_v1 = vpop.f32.mrb[66].mxu0 }
 0x3cd   :  { %v3408_v59 = vmul.f32 %v4721_v1, %v7797_v6  ;;  %v3249_v10 = vpop.f32.mrb[67].mxu0 }
 0x3ce   :  { %v3406_v35 = vmul.f32 %v3249_v10, %v7803_v34 }
 0x3cf   :  { %v4344_v46 = vpack.c.bf16 %v3408_v59, %v3407_v21 }
 0x3d0   :  { %v4339_v8 = vpack.c.bf16 %v3406_v35, %v3405_v20  ;;  %v8720_v35 = vld [vmem:[#allocation3_spill] sm:$0xff] }
 0x3d1   :  { %4432 = vst [vmem:[%s8267_s9 + $0x88] sm:$0xff] %v4344_v46  }
 0x3d2   :  { %4431 = vst [vmem:[%s8267_s9 + $0x80] sm:$0xff] %v4339_v8   ;;  %v4724_v40 = vpop.f32.mrb[68].mxu0 }
 0x3d3   :  { %v3411_v17 = vmul.f32 %v4724_v40, %v7816_v0  ;;  %v3262_v50 = vpop.f32.mrb[69].mxu0 }
 0x3d4   :  { %v3409_v39 = vmul.f32 %v3262_v50, %v7822_v61  ;;  %v4725_v6 = vpop.f32.mrb[70].mxu0 }
 0x3d5   :  { %v3412_v15 = vmul.f32 %v4725_v6, %v7825_v23  ;;  %v3265_v34 = vpop.f32.mrb[71].mxu0 }
 0x3d6   :  { %v3410_v22 = vmul.f32 %v3265_v34, %v7831_v7 }
 0x3d7   :  { %v4354_v52 = vpack.c.bf16 %v3412_v15, %v3411_v17 }
 0x3d8   :  { %v4349_v33 = vpack.c.bf16 %v3410_v22, %v3409_v39 }
 0x3d9   :  { %4434 = vst [vmem:[%s8267_s9 + $0x98] sm:$0xff] %v4354_v52  }
 0x3da   :  { %4433 = vst [vmem:[%s8267_s9 + $0x90] sm:$0xff] %v4349_v33  }
 0x3db   :  { %v4728_v0 = vpop.f32.mrb[72].mxu0 }
 0x3dc   :  { %v3415_v60 = vmul.f32 %v4728_v0, %v7844_v49  ;;  %v3278_v61 = vpop.f32.mrb[73].mxu0 }
 0x3dd   :  { %v3413_v47 = vmul.f32 %v3278_v61, %v8714_v58  ;;  %v4729_v23 = vpop.f32.mrb[74].mxu0  ;;  %v8721_v58 = vld [vmem:[#allocation4_spill] sm:$0xff] }
 0x3de   :  { %v3416_v9 = vmul.f32 %v4729_v23, %v7853_v43  ;;  %v3281_v7 = vpop.f32.mrb[75].mxu0 }
 0x3df   :  { %v3414_v31 = vmul.f32 %v3281_v7, %v8715_v27 }
 0x3e0   :  { %v4364_v44 = vpack.c.bf16 %v3416_v9, %v3415_v60 }
 0x3e1   :  { %v4359_v14 = vpack.c.bf16 %v3414_v31, %v3413_v47 }
 0x3e2   :  { %4436 = vst [vmem:[%s8267_s9 + $0xa8] sm:$0xff] %v4364_v44  }
 0x3e3   :  { %4435 = vst [vmem:[%s8267_s9 + $0xa0] sm:$0xff] %v4359_v14   ;;  %v4732_v49 = vpop.f32.mrb[76].mxu0 }
 0x3e4   :  { %v3419_v12 = vmul.f32 %v4732_v49, %v8716_v13  ;;  %v3294_v45 = vpop.f32.mrb[77].mxu0 }
 0x3e5   :  { %v3417_v63 = vmul.f32 %v3294_v45, %v8717_v36  ;;  %v4733_v43 = vpop.f32.mrb[78].mxu0 }
 0x3e6   :  { %v3420_v2 = vmul.f32 %v4733_v43, %v8718_v11  ;;  %v3297_v16 = vpop.f32.mrb[79].mxu0 }
 0x3e7   :  { %v3418_v54 = vmul.f32 %v3297_v16, %v8719_v51 }
 0x3e8   :  { %v4374_v30 = vpack.c.bf16 %v3420_v2, %v3419_v12 }
 0x3e9   :  { %v4369_v55 = vpack.c.bf16 %v3418_v54, %v3417_v63 }
 0x3ea   :  { %4438 = vst [vmem:[%s8267_s9 + $0xb8] sm:$0xff] %v4374_v30  }
 0x3eb   :  { %4437 = vst [vmem:[%s8267_s9 + $0xb0] sm:$0xff] %v4369_v55   ;;  %v4736_v32 = vpop.f32.mrb[80].mxu0 }
 0x3ec   :  { %v3423_v38 = vmul.f32 %v4736_v32, %v7900_v4  ;;  %v3310_v62 = vpop.f32.mrb[81].mxu0 }
 0x3ed   :  { %v3421_v56 = vmul.f32 %v3310_v62, %v7906_v41  ;;  %v4737_v21 = vpop.f32.mrb[82].mxu0 }
 0x3ee   :  { %v3424_v24 = vmul.f32 %v4737_v21, %v7909_v48  ;;  %v3313_v53 = vpop.f32.mrb[83].mxu0 }
 0x3ef   :  { %v3422_v20 = vmul.f32 %v3313_v53, %v7915_v37 }
 0x3f0   :  { %v4384_v1 = vpack.c.bf16 %v3424_v24, %v3423_v38 }
 0x3f1   :  { %v4379_v59 = vpack.c.bf16 %v3422_v20, %v3421_v56 }
 0x3f2   :  { %4440 = vst [vmem:[%s8267_s9 + $0xc8] sm:$0xff] %v4384_v1  }
 0x3f3   :  { %4439 = vst [vmem:[%s8267_s9 + $0xc0] sm:$0xff] %v4379_v59   ;;  %v4740_v4 = vpop.f32.mrb[84].mxu0 }
 0x3f4   :  { %v3427_v10 = vmul.f32 %v4740_v4, %v7928_v18  ;;  %v3326_v41 = vpop.f32.mrb[85].mxu0 }
 0x3f5   :  { %v3425_v46 = vmul.f32 %v3326_v41, %v8720_v35  ;;  %v4741_v48 = vpop.f32.mrb[86].mxu0 }
 0x3f6   :  { %v3428_v8 = vmul.f32 %v4741_v48, %v7937_v57  ;;  %v3329_v37 = vpop.f32.mrb[87].mxu0 }
 0x3f7   :  { %v3426_v40 = vmul.f32 %v3329_v37, %v7943_v29 }
 0x3f8   :  { %v4394_v17 = vpack.c.bf16 %v3428_v8, %v3427_v10 }
 0x3f9   :  { %v4389_v50 = vpack.c.bf16 %v3426_v40, %v3425_v46 }
 0x3fa   :  { %4442 = vst [vmem:[%s8267_s9 + $0xd8] sm:$0xff] %v4394_v17  }
 0x3fb   :  { %4441 = vst [vmem:[%s8267_s9 + $0xd0] sm:$0xff] %v4389_v50   ;;  %v4744_v18 = vpop.f32.mrb[88].mxu0 }
 0x3fc   :  { %v3431_v39 = vmul.f32 %v4744_v18, %v7956_v25  ;;  %v3342_v6 = vpop.f32.mrb[89].mxu0 }
 0x3fd   :  { %v3429_v15 = vmul.f32 %v3342_v6, %v7962_v3  ;;  %v4745_v57 = vpop.f32.mrb[90].mxu0 }
 0x3fe   :  { %v3432_v34 = vmul.f32 %v4745_v57, %v7965_v28  ;;  %v3345_v29 = vpop.f32.mrb[91].mxu0 }
 0x3ff   :  { %v3430_v22 = vmul.f32 %v3345_v29, %v7971_v5 }
 0x400   :  { %v4404_v52 = vpack.c.bf16 %v3432_v34, %v3431_v39 }
 0x401   :  { %v4399_v33 = vpack.c.bf16 %v3430_v22, %v3429_v15 }
 0x402   :  { %4444 = vst [vmem:[%s8267_s9 + $0xe8] sm:$0xff] %v4404_v52  }
 0x403   :  { %4443 = vst [vmem:[%s8267_s9 + $0xe0] sm:$0xff] %v4399_v33   ;;  %v4748_v25 = vpop.f32.mrb[92].mxu0 }
 0x404   :  { %v3435_v0 = vmul.f32 %v4748_v25, %v7984_v42  ;;  %v3358_v3 = vpop.f32.mrb[93].mxu0 }
 0x405   :  { %v3433_v60 = vmul.f32 %v3358_v3, %v7990_v19  ;;  %v4749_v28 = vpop.f32.mrb[94].mxu0 }
 0x406   :  { %v3436_v61 = vmul.f32 %v4749_v28, %v7993_v26  ;;  %v3361_v5 = vpop.f32.mrb[95].mxu0 }
 0x407   :  { %v3434_v47 = vmul.f32 %v3361_v5, %v8721_v58 }
 0x408   :  { %v4414_v23 = vpack.c.bf16 %v3436_v61, %v3435_v0 }
 0x409   :  { %v4409_v9 = vpack.c.bf16 %v3434_v47, %v3433_v60 }
 0x40a   :  { %4446 = vst [vmem:[%s8267_s9 + $0xf8] sm:$0xff] %v4414_v23  }
 0x40b   :  { %4445 = vst [vmem:[%s8267_s9 + $0xf0] sm:$0xff] %v4409_v9  }

</bundles_post_ra>
